<compile_context>
chip_gen: v7x
topology: tpu7x:2x2x1
jax: 0.10.0
libtpu: 0.0.40
codegen_flags: <defaults>
</compile_context>

<pallas_src>
import functools

import jax
import jax.numpy as jnp
from jax.experimental import pallas as pl
from jax.experimental.pallas import tpu as pltpu


# ------------------------------ Pallas kernel -------------------------------

def _deepse_conv2_kernel(xp_ref, wd_ref, bd_ref, g_ref, b_ref, ws_ref, bs_ref,
                         o_ref, *, n, h, w, c):
    """Fused depthwise3x3 -> BN(batch stats) -> ReLU6 -> 1x1 conv -> +x.

    xp_ref : (N, H+2, W+2, C) zero-padded NHWC input (pad=1 for the 3x3 dw conv)
    wd_ref : (9, C)  depthwise weights, tap-major (index = kh*3 + kw)
    bd_ref, g_ref, b_ref, bs_ref : (1, C)
    ws_ref : (C, C)  pointwise 1x1 weight laid out (cin, cout)
    o_ref  : (N*H*W, C)
    """
    xp = xp_ref[...]                      # single VMEM-resident load
    wd = wd_ref[...]                      # (9, C)
    m = n * h * w

    # ---- depthwise 3x3, padding=1: shift-and-accumulate over 9 taps (VPU) ----
    acc = None
    for kh in range(3):
        for kw in range(3):
            tap = xp[:, kh:kh + h, kw:kw + w, :]          # (N, H, W, C)
            k = kh * 3 + kw
            term = tap * wd[k:k + 1, :]                   # per-channel scale
            acc = term if acc is None else acc + term
    y = (acc + bd_ref[...]).reshape(m, c)                 # (M, C)

    # ---- BatchNorm2d, training mode: per-channel batch stats, biased var ----
    # Two-pass centered variance (numerically safer than E[x^2]-E[x]^2).
    inv_m = 1.0 / float(m)
    mean = jnp.sum(y, axis=0, keepdims=True) * inv_m
    yc = y - mean
    var = jnp.sum(yc * yc, axis=0, keepdims=True) * inv_m
    yn = yc * jax.lax.rsqrt(var + 1e-5) * g_ref[...] + b_ref[...]

    # ---- ReLU6 ----
    a = jnp.clip(yn, 0.0, 6.0)

    # ---- pointwise 1x1 conv (MXU) + bias + residual add with original x ----
    x_res = xp[:, 1:1 + h, 1:1 + w, :].reshape(m, c)      # un-padded input
    z = jnp.dot(a, ws_ref[...], preferred_element_type=jnp.float32) + bs_ref[...]
    o_ref[...] = x_res + z


# -------------------------------- wrapper ------------------------------------

@jax.jit
def deepse_conv2_forward(x_nchw, params):
    n, c, h, w = x_nchw.shape
    x_nhwc = jnp.transpose(x_nchw, (0, 2, 3, 1))                  # NCHW -> NHWC
    xp = jnp.pad(x_nhwc, ((0, 0), (1, 1), (1, 1), (0, 0)))

    kernel = functools.partial(_deepse_conv2_kernel, n=n, h=h, w=w, c=c)
    out_flat = pl.pallas_call(
        kernel,
        out_shape=jax.ShapeDtypeStruct((n * h * w, c), jnp.float32),
        # Whole-array VMEM residency: at M = N*H*W = 512, C = 4 everything
        # (padded input ~10 KiB, params < 1 KiB, output 8 KiB) fits trivially,
        # so a single un-gridded fused call beats any multi-launch pipeline.
        in_specs=[pl.BlockSpec(memory_space=pltpu.MemorySpace.VMEM)] * 7,
        out_specs=pl.BlockSpec(memory_space=pltpu.MemorySpace.VMEM),
    )(
        xp,
        params["wd"],
        params["bd"].reshape(1, c),
        params["gamma"].reshape(1, c),
        params["beta"].reshape(1, c),
        params["ws"],
        params["bs"].reshape(1, c),
    )
    return jnp.transpose(out_flat.reshape(n, h, w, c), (0, 3, 1, 2))   # -> NCHW


# --------------------------- reference (pure JAX) -----------------------------

def _reference_forward(x_nchw, params):
    n, c, h, w = x_nchw.shape
    # depthwise 3x3, padding=1, groups=c   (OIHW weight: (C, 1, 3, 3))
    wd = params["wd"].T.reshape(c, 1, 3, 3)
    y = jax.lax.conv_general_dilated(
        x_nchw, wd, window_strides=(1, 1), padding=((1, 1), (1, 1)),
        dimension_numbers=("NCHW", "OIHW", "NCHW"), feature_group_count=c,
    ) + params["bd"].reshape(1, c, 1, 1)
    mean = jnp.mean(y, axis=(0, 2, 3), keepdims=True)
    var = jnp.mean((y - mean) ** 2, axis=(0, 2, 3), keepdims=True)
    yn = (y - mean) * jax.lax.rsqrt(var + 1e-5)
    yn = yn * params["gamma"].reshape(1, c, 1, 1) + params["beta"].reshape(1, c, 1, 1)
    a = jnp.clip(yn, 0.0, 6.0)
    ws = params["ws"].T.reshape(c, c, 1, 1)                # (Cout, Cin, 1, 1)
    z = jax.lax.conv_general_dilated(
        a, ws, window_strides=(1, 1), padding="VALID",
        dimension_numbers=("NCHW", "OIHW", "NCHW"),
    ) + params["bs"].reshape(1, c, 1, 1)
    return x_nchw + z


# --------------------------------- params ------------------------------------

def init_params(key, c):
    k1, k2, k3, k4 = jax.random.split(key, 4)
    return dict(
        wd=jax.random.normal(k1, (9, c), jnp.float32) * (1.0 / 3.0),
        bd=jax.random.normal(k2, (c,), jnp.float32) * 0.05,
        gamma=jnp.ones((c,), jnp.float32),
        beta=jnp.zeros((c,), jnp.float32),
        ws=jax.random.normal(k3, (c, c), jnp.float32) * (1.0 / jnp.sqrt(float(c))),
        bs=jax.random.normal(k4, (c,), jnp.float32) * 0.05,
    )


# ---------------------------------- main --------------------------------------

if __name__ == "__main__":
    in_c = 4
    N, H, W = 2, 16, 16

    key = jax.random.PRNGKey(0)
    k_x, k_p = jax.random.split(key)
    x = jax.random.normal(k_x, (N, in_c, H, W), jnp.float32)
    params = init_params(k_p, in_c)

    out = deepse_conv2_forward(x, params)
    out = jax.block_until_ready(out)

    assert out.shape == (N, in_c, H, W), out.shape
    assert bool(jnp.all(jnp.isfinite(out)))

    ref = _reference_forward(x, params)
    max_err = float(jnp.max(jnp.abs(out - ref)))
    assert max_err < 1e-3, f"max abs error vs reference: {max_err}"

    print("KERNEL_OK")
</pallas_src>

<mosaic_0001>
module attributes {stable_mosaic.version = 11 : i64} {
  func.func @_deepse_conv2_kernel(%arg0: memref<2x18x18x4xf32, #tpu.memory_space<vmem>>, %arg1: memref<9x4xf32, #tpu.memory_space<vmem>>, %arg2: memref<1x4xf32, #tpu.memory_space<vmem>>, %arg3: memref<1x4xf32, #tpu.memory_space<vmem>>, %arg4: memref<1x4xf32, #tpu.memory_space<vmem>>, %arg5: memref<4x4xf32, #tpu.memory_space<vmem>>, %arg6: memref<1x4xf32, #tpu.memory_space<vmem>>, %arg7: memref<512x4xf32, #tpu.memory_space<vmem>>) attributes {dimension_semantics = [], scalar_prefetch = 0 : i64, scratch_operands = 0 : i64, tpu.core_type = #tpu.core_type<tc>} {
    %c0 = arith.constant 0 : index
    %c0_0 = arith.constant 0 : index
    %c0_1 = arith.constant 0 : index
    %c0_2 = arith.constant 0 : index
    %0 = vector.load %arg0[%c0, %c0_0, %c0_1, %c0_2] : memref<2x18x18x4xf32, #tpu.memory_space<vmem>>, vector<2x18x18x4xf32>
    %c0_3 = arith.constant 0 : index
    %c0_4 = arith.constant 0 : index
    %1 = vector.load %arg1[%c0_3, %c0_4] : memref<9x4xf32, #tpu.memory_space<vmem>>, vector<9x4xf32>
    %2 = vector.extract_strided_slice %0 {offsets = [0, 0, 0, 0], sizes = [2, 16, 16, 4], strides = [1, 1, 1, 1]} : vector<2x18x18x4xf32> to vector<2x16x16x4xf32>
    %3 = vector.extract_strided_slice %1 {offsets = [0, 0], sizes = [1, 4], strides = [1, 1]} : vector<9x4xf32> to vector<1x4xf32>
    %4 = vector.shape_cast %3 : vector<1x4xf32> to vector<1x1x1x4xf32>
    %5 = vector.broadcast %4 : vector<1x1x1x4xf32> to vector<2x16x16x4xf32>
    %6 = arith.mulf %2, %5 : vector<2x16x16x4xf32>
    %7 = vector.extract_strided_slice %0 {offsets = [0, 0, 1, 0], sizes = [2, 16, 16, 4], strides = [1, 1, 1, 1]} : vector<2x18x18x4xf32> to vector<2x16x16x4xf32>
    %8 = vector.extract_strided_slice %1 {offsets = [1, 0], sizes = [1, 4], strides = [1, 1]} : vector<9x4xf32> to vector<1x4xf32>
    %9 = vector.shape_cast %8 : vector<1x4xf32> to vector<1x1x1x4xf32>
    %10 = vector.broadcast %9 : vector<1x1x1x4xf32> to vector<2x16x16x4xf32>
    %11 = arith.mulf %7, %10 : vector<2x16x16x4xf32>
    %12 = arith.addf %6, %11 : vector<2x16x16x4xf32>
    %13 = vector.extract_strided_slice %0 {offsets = [0, 0, 2, 0], sizes = [2, 16, 16, 4], strides = [1, 1, 1, 1]} : vector<2x18x18x4xf32> to vector<2x16x16x4xf32>
    %14 = vector.extract_strided_slice %1 {offsets = [2, 0], sizes = [1, 4], strides = [1, 1]} : vector<9x4xf32> to vector<1x4xf32>
    %15 = vector.shape_cast %14 : vector<1x4xf32> to vector<1x1x1x4xf32>
    %16 = vector.broadcast %15 : vector<1x1x1x4xf32> to vector<2x16x16x4xf32>
    %17 = arith.mulf %13, %16 : vector<2x16x16x4xf32>
    %18 = arith.addf %12, %17 : vector<2x16x16x4xf32>
    %19 = vector.extract_strided_slice %0 {offsets = [0, 1, 0, 0], sizes = [2, 16, 16, 4], strides = [1, 1, 1, 1]} : vector<2x18x18x4xf32> to vector<2x16x16x4xf32>
    %20 = vector.extract_strided_slice %1 {offsets = [3, 0], sizes = [1, 4], strides = [1, 1]} : vector<9x4xf32> to vector<1x4xf32>
    %21 = vector.shape_cast %20 : vector<1x4xf32> to vector<1x1x1x4xf32>
    %22 = vector.broadcast %21 : vector<1x1x1x4xf32> to vector<2x16x16x4xf32>
    %23 = arith.mulf %19, %22 : vector<2x16x16x4xf32>
    %24 = arith.addf %18, %23 : vector<2x16x16x4xf32>
    %25 = vector.extract_strided_slice %0 {offsets = [0, 1, 1, 0], sizes = [2, 16, 16, 4], strides = [1, 1, 1, 1]} : vector<2x18x18x4xf32> to vector<2x16x16x4xf32>
    %26 = vector.extract_strided_slice %1 {offsets = [4, 0], sizes = [1, 4], strides = [1, 1]} : vector<9x4xf32> to vector<1x4xf32>
    %27 = vector.shape_cast %26 : vector<1x4xf32> to vector<1x1x1x4xf32>
    %28 = vector.broadcast %27 : vector<1x1x1x4xf32> to vector<2x16x16x4xf32>
    %29 = arith.mulf %25, %28 : vector<2x16x16x4xf32>
    %30 = arith.addf %24, %29 : vector<2x16x16x4xf32>
    %31 = vector.extract_strided_slice %0 {offsets = [0, 1, 2, 0], sizes = [2, 16, 16, 4], strides = [1, 1, 1, 1]} : vector<2x18x18x4xf32> to vector<2x16x16x4xf32>
    %32 = vector.extract_strided_slice %1 {offsets = [5, 0], sizes = [1, 4], strides = [1, 1]} : vector<9x4xf32> to vector<1x4xf32>
    %33 = vector.shape_cast %32 : vector<1x4xf32> to vector<1x1x1x4xf32>
    %34 = vector.broadcast %33 : vector<1x1x1x4xf32> to vector<2x16x16x4xf32>
    %35 = arith.mulf %31, %34 : vector<2x16x16x4xf32>
    %36 = arith.addf %30, %35 : vector<2x16x16x4xf32>
    %37 = vector.extract_strided_slice %0 {offsets = [0, 2, 0, 0], sizes = [2, 16, 16, 4], strides = [1, 1, 1, 1]} : vector<2x18x18x4xf32> to vector<2x16x16x4xf32>
    %38 = vector.extract_strided_slice %1 {offsets = [6, 0], sizes = [1, 4], strides = [1, 1]} : vector<9x4xf32> to vector<1x4xf32>
    %39 = vector.shape_cast %38 : vector<1x4xf32> to vector<1x1x1x4xf32>
    %40 = vector.broadcast %39 : vector<1x1x1x4xf32> to vector<2x16x16x4xf32>
    %41 = arith.mulf %37, %40 : vector<2x16x16x4xf32>
    %42 = arith.addf %36, %41 : vector<2x16x16x4xf32>
    %43 = vector.extract_strided_slice %0 {offsets = [0, 2, 1, 0], sizes = [2, 16, 16, 4], strides = [1, 1, 1, 1]} : vector<2x18x18x4xf32> to vector<2x16x16x4xf32>
    %44 = vector.extract_strided_slice %1 {offsets = [7, 0], sizes = [1, 4], strides = [1, 1]} : vector<9x4xf32> to vector<1x4xf32>
    %45 = vector.shape_cast %44 : vector<1x4xf32> to vector<1x1x1x4xf32>
    %46 = vector.broadcast %45 : vector<1x1x1x4xf32> to vector<2x16x16x4xf32>
    %47 = arith.mulf %43, %46 : vector<2x16x16x4xf32>
    %48 = arith.addf %42, %47 : vector<2x16x16x4xf32>
    %49 = vector.extract_strided_slice %0 {offsets = [0, 2, 2, 0], sizes = [2, 16, 16, 4], strides = [1, 1, 1, 1]} : vector<2x18x18x4xf32> to vector<2x16x16x4xf32>
    %50 = vector.extract_strided_slice %1 {offsets = [8, 0], sizes = [1, 4], strides = [1, 1]} : vector<9x4xf32> to vector<1x4xf32>
    %51 = vector.shape_cast %50 : vector<1x4xf32> to vector<1x1x1x4xf32>
    %52 = vector.broadcast %51 : vector<1x1x1x4xf32> to vector<2x16x16x4xf32>
    %53 = arith.mulf %49, %52 : vector<2x16x16x4xf32>
    %54 = arith.addf %48, %53 : vector<2x16x16x4xf32>
    %c0_5 = arith.constant 0 : index
    %c0_6 = arith.constant 0 : index
    %55 = vector.load %arg2[%c0_5, %c0_6] : memref<1x4xf32, #tpu.memory_space<vmem>>, vector<1x4xf32>
    %56 = vector.shape_cast %55 : vector<1x4xf32> to vector<1x1x1x4xf32>
    %57 = vector.broadcast %56 : vector<1x1x1x4xf32> to vector<2x16x16x4xf32>
    %58 = arith.addf %54, %57 : vector<2x16x16x4xf32>
    %59 = vector.shape_cast %58 : vector<2x16x16x4xf32> to vector<512x4xf32>
    %cst = arith.constant dense<0.000000e+00> : vector<4xf32>
    %60 = vector.multi_reduction <add>, %59, %cst [0] : vector<512x4xf32> to vector<4xf32>
    %61 = vector.shape_cast %60 : vector<4xf32> to vector<1x4xf32>
    %cst_7 = arith.constant 0.001953125 : f32
    %62 = vector.broadcast %cst_7 : f32 to vector<1x4xf32>
    %63 = arith.mulf %61, %62 : vector<1x4xf32>
    %64 = vector.broadcast %63 : vector<1x4xf32> to vector<512x4xf32>
    %65 = arith.subf %59, %64 : vector<512x4xf32>
    %66 = arith.mulf %65, %65 : vector<512x4xf32>
    %cst_8 = arith.constant dense<0.000000e+00> : vector<4xf32>
    %67 = vector.multi_reduction <add>, %66, %cst_8 [0] : vector<512x4xf32> to vector<4xf32>
    %68 = vector.shape_cast %67 : vector<4xf32> to vector<1x4xf32>
    %cst_9 = arith.constant 0.001953125 : f32
    %69 = vector.broadcast %cst_9 : f32 to vector<1x4xf32>
    %70 = arith.mulf %68, %69 : vector<1x4xf32>
    %cst_10 = arith.constant 9.99999974E-6 : f32
    %71 = vector.broadcast %cst_10 : f32 to vector<1x4xf32>
    %72 = arith.addf %70, %71 : vector<1x4xf32>
    %73 = math.rsqrt %72 : vector<1x4xf32>
    %74 = vector.broadcast %73 : vector<1x4xf32> to vector<512x4xf32>
    %75 = arith.mulf %65, %74 : vector<512x4xf32>
    %c0_11 = arith.constant 0 : index
    %c0_12 = arith.constant 0 : index
    %76 = vector.load %arg3[%c0_11, %c0_12] : memref<1x4xf32, #tpu.memory_space<vmem>>, vector<1x4xf32>
    %77 = vector.broadcast %76 : vector<1x4xf32> to vector<512x4xf32>
    %78 = arith.mulf %75, %77 : vector<512x4xf32>
    %c0_13 = arith.constant 0 : index
    %c0_14 = arith.constant 0 : index
    %79 = vector.load %arg4[%c0_13, %c0_14] : memref<1x4xf32, #tpu.memory_space<vmem>>, vector<1x4xf32>
    %80 = vector.broadcast %79 : vector<1x4xf32> to vector<512x4xf32>
    %81 = arith.addf %78, %80 : vector<512x4xf32>
    %cst_15 = arith.constant 0.000000e+00 : f32
    %cst_16 = arith.constant 6.000000e+00 : f32
    %82 = vector.broadcast %cst_15 : f32 to vector<512x4xf32>
    %83 = arith.maximumf %82, %81 : vector<512x4xf32>
    %84 = vector.broadcast %cst_16 : f32 to vector<512x4xf32>
    %85 = arith.minimumf %84, %83 : vector<512x4xf32>
    %86 = vector.extract_strided_slice %0 {offsets = [0, 1, 1, 0], sizes = [2, 16, 16, 4], strides = [1, 1, 1, 1]} : vector<2x18x18x4xf32> to vector<2x16x16x4xf32>
    %87 = vector.shape_cast %86 : vector<2x16x16x4xf32> to vector<512x4xf32>
    %c0_17 = arith.constant 0 : index
    %c0_18 = arith.constant 0 : index
    %88 = vector.load %arg5[%c0_17, %c0_18] : memref<4x4xf32, #tpu.memory_space<vmem>>, vector<4x4xf32>
    %cst_19 = arith.constant dense<0.000000e+00> : vector<512x4xf32>
    %89 = tpu.matmul %85, %88, %cst_19 {dimension_numbers = #tpu.dot_dimension_numbers<[1], [0], [0], [1], [0, 0, 1, 1], [], []>} : vector<512x4xf32>, vector<4x4xf32>, vector<512x4xf32> -> vector<512x4xf32>
    %c0_20 = arith.constant 0 : index
    %c0_21 = arith.constant 0 : index
    %90 = vector.load %arg6[%c0_20, %c0_21] : memref<1x4xf32, #tpu.memory_space<vmem>>, vector<1x4xf32>
    %91 = vector.broadcast %90 : vector<1x4xf32> to vector<512x4xf32>
    %92 = arith.addf %89, %91 : vector<512x4xf32>
    %93 = arith.addf %87, %92 : vector<512x4xf32>
    %c0_22 = arith.constant 0 : index
    %c0_23 = arith.constant 0 : index
    %94 = vector.load %arg7[%c0_22, %c0_23] : memref<512x4xf32, #tpu.memory_space<vmem>>, vector<512x4xf32>
    tpu.vector_store %arg7[%c0_22, %c0_23], %93 {strides = array<i32>} : memref<512x4xf32, #tpu.memory_space<vmem>>, vector<512x4xf32>,
    return
  }
}

</mosaic_0001>

<bundles_post_ra>
// kernel: deepse_conv2_forward.1
= control target key start
LH: loop header
LB: loop body
LE: loop exit
PB: predicated region body
PF: predicated region fallthrough
CT: control target
= control target key end

     0   :  { %vm4698_vm0 = vcmask 1043456   ;;  %v136_v1 = vlaneseq  ;;  %vm400_vm1 = vcmask 1046528   ;;  %vm885_vm2 = vcmask 1045504   ;;  %s14609_s5 = inlined_call_operand.vmem [shape: f32[4,4], index: 5, kind: input, shape index: {}]   ;;  %s14610_s1 = inlined_call_operand.vmem [shape: f32[9,4], index: 1, kind: input, shape index: {}]   ;;  %s14611_s0 = inlined_call_operand.vmem [shape: f32[2,18,18,4], index: 0, kind: input, shape index: {}]   ;;  %s14612_s2 = inlined_call_operand.vmem [shape: f32[1,4], index: 2, kind: input, shape index: {}]   ;;  %s14613_s3 = inlined_call_operand.vmem [shape: f32[1,4], index: 3, kind: input, shape index: {}]   ;;  %s14614_s4 = inlined_call_operand.vmem [shape: f32[1,4], index: 4, kind: input, shape index: {}]   ;;  %s14615_s6 = inlined_call_operand.vmem [shape: f32[1,4], index: 6, kind: input, shape index: {}]   ;;  %s14616_s7 = inlined_call_operand.vmem [shape: f32[512,4], index: 7, kind: output, shape index: {}]  }
   0x1   :  { %v4498_v0 = vld [vmem:[%s14609_s5] sm:$0xf]  ;;  %v5869_v12 = vld [vmem:[%s14611_s0 + $0x8] sm:$0xff]  ;;  %v5874_v13 = vld [vmem:[%s14611_s0 + $0x18] sm:$0xff]  ;;  %vm3445_vm3 = vcmask 31744  }
   0x2   :  { %5354 = vmatprep.subr.msk.mxu0 %vm4698_vm0, %v4498_v0  ;;  %5452 = vmatprep.subr.msk.mxu1 %vm4698_vm0, %v4498_v0  ;;  %v5840_v2 = vshrl.u32 %v136_v1, 7  ;;  %v134_v4 = vld [vmem:[%s14610_s1] sm:$0xff]  ;;  %15107 = vst [vmem:[#allocation6_spill] sm:$0xff] %v5869_v12  ;;  %15108 = vst [vmem:[#allocation7_spill] sm:$0xff] %v5874_v13  ;;  %v5884_v15 = vld [vmem:[%s14611_s0 + $0x30] sm:$0xff] }
   0x3   :  { %5355 = vmatpush3.msk.msra.mxu0 %vm4698_vm0, %v4498_v0  ;;  %5453 = vmatpush3.msk.msra.mxu1 %vm4698_vm0, %v4498_v0  ;;  %v5849_v5 = vld [vmem:[%s14611_s0 + $0x1c0] sm:$0x3]  ;;  %15110 = vst [vmem:[#allocation9_spill] sm:$0xff] %v5884_v15  ;;  %v5889_v16 = vld [vmem:[%s14611_s0 + $0x38] sm:$0xff]  ;;  %v5894_v17 = vld [vmem:[%s14611_s0 + $0x48] sm:$0xff] }
   0x4   :  { %15103 = vst [vmem:[#allocation2_spill] sm:$0xff] %v5840_v2  ;;  %v206_v3 = vsub.s32 1, %v5840_v2  ;;  %15104 = vst [vmem:[#allocation3_spill] sm:$0xff] %v5849_v5  ;;  %v138_v8 = vsub.s32 0, %v5840_v2  ;;  %v691_v9 = vsub.s32 2, %v5840_v2  ;;  %v5864_v11 = vld [vmem:[%s14611_s0] sm:$0xff] }
   0x5   :  { %15106 = vst [vmem:[#allocation5_spill] sm:$0xff] %v5864_v11  ;;  %v5879_v14 = vld [vmem:[%s14611_s0 + $0x20] sm:$0xff]  ;;  %15111 = vst [vmem:[#allocation10_spill] sm:$0xff] %v5889_v16  ;;  %v5899_v18 = vld [vmem:[%s14611_s0 + $0x50] sm:$0xff] }
   0x6   :  { %v5851_v6 = vrot.slane %v134_v4, %v206_v3  ;;  %v5859_v10 = vrot.slane %v134_v4, %v138_v8  ;;  %15109 = vst [vmem:[#allocation8_spill] sm:$0xff] %v5879_v14  ;;  %15112 = vst [vmem:[#allocation11_spill] sm:$0xff] %v5894_v17  ;;  %v5904_v19 = vld [vmem:[%s14611_s0 + $0x60] sm:$0xff]  ;;  %v5909_v20 = vld [vmem:[%s14611_s0 + $0x68] sm:$0xff]  ;;  %v5921_v23 = vrot.slane %v134_v4, %v691_v9 }
   0x7   :  { %15113 = vst [vmem:[#allocation12_spill] sm:$0xff] %v5899_v18  ;;  %15114 = vst [vmem:[#allocation13_spill] sm:$0xff] %v5904_v19  ;;  %v5914_v21 = vld [vmem:[%s14611_s0 + $0x78] sm:$0xff]  ;;  %v5919_v22 = vld [vmem:[%s14611_s0 + $0x80] sm:$0xff] }
   0x8   :  { %15105 = vst [vmem:[#allocation4_spill] sm:$0xff] %v5851_v6  ;;  %v5855_v7 = vmul.f32 %v5851_v6, %v5849_v5  ;;  %15115 = vst [vmem:[#allocation14_spill] sm:$0xff] %v5909_v20  ;;  %v5926_v24 = vld [vmem:[%s14611_s0 + $0x90] sm:$0xff]  ;;  %v5931_v25 = vld [vmem:[%s14611_s0 + $0x98] sm:$0xff]  ;;  %v5945_v28 = vmul.f32 %v5859_v10, %v5864_v11  ;;  %v5949_v29 = vmul.f32 %v5859_v10, %v5869_v12 }
   0x9   :  { %15116 = vst [vmem:[#allocation15_spill] sm:$0xff] %v5914_v21  ;;  %15117 = vst [vmem:[#allocation16_spill] sm:$0xff] %v5919_v22  ;;  %v5936_v26 = vld [vmem:[%s14611_s0 + $0xa8] sm:$0xff]  ;;  %v5941_v27 = vld [vmem:[%s14611_s0 + $0xb0] sm:$0xff]  ;;  %v5953_v30 = vmul.f32 %v5859_v10, %v5874_v13  ;;  %v5957_v31 = vmul.f32 %v5859_v10, %v5879_v14  ;;  %v5981_v36 = vmul.f32 %v5859_v10, %v5884_v15 }
   0xa   :  { %15118 = vst [vmem:[#allocation17_spill] sm:$0xff] %v5921_v23  ;;  %15119 = vst [vmem:[#allocation18_spill] sm:$0xff] %v5926_v24  ;;  %v5962_v32 = vld [vmem:[%s14611_s0 + $0xc0] sm:$0xff]  ;;  %v5967_v33 = vld [vmem:[%s14611_s0 + $0xc8] sm:$0xff]  ;;  %v5985_v37 = vmul.f32 %v5859_v10, %v5889_v16  ;;  %v5989_v38 = vmul.f32 %v5859_v10, %v5894_v17  ;;  %v5993_v39 = vmul.f32 %v5859_v10, %v5899_v18 }
   0xb   :  { %15120 = vst [vmem:[#allocation19_spill] sm:$0xff] %v5931_v25  ;;  %15121 = vst [vmem:[#allocation20_spill] sm:$0xff] %v5936_v26  ;;  %v5972_v34 = vld [vmem:[%s14611_s0 + $0xd8] sm:$0xff]  ;;  %v5977_v35 = vld [vmem:[%s14611_s0 + $0xe0] sm:$0xff]  ;;  %v6017_v44 = vmul.f32 %v5859_v10, %v5904_v19  ;;  %v6021_v45 = vmul.f32 %v5859_v10, %v5909_v20  ;;  %v6025_v46 = vmul.f32 %v5859_v10, %v5914_v21 }
   0xc   :  { %15122 = vst [vmem:[#allocation21_spill] sm:$0xff] %v5941_v27  ;;  %15123 = vst [vmem:[#allocation22_spill] sm:$0xff] %v5945_v28  ;;  %v5998_v40 = vld [vmem:[%s14611_s0 + $0xf0] sm:$0xff]  ;;  %v6003_v41 = vld [vmem:[%s14611_s0 + $0xf8] sm:$0xff]  ;;  %v6029_v47 = vmul.f32 %v5859_v10, %v5919_v22  ;;  %v6053_v52 = vmul.f32 %v5859_v10, %v5926_v24  ;;  %v6057_v53 = vmul.f32 %v5859_v10, %v5931_v25 }
   0xd   :  { %15124 = vst [vmem:[#allocation23_spill] sm:$0xff] %v5949_v29  ;;  %15125 = vst [vmem:[#allocation24_spill] sm:$0xff] %v5953_v30  ;;  %v6008_v42 = vld [vmem:[%s14611_s0 + $0x108] sm:$0xff]  ;;  %v6013_v43 = vld [vmem:[%s14611_s0 + $0x110] sm:$0xff]  ;;  %v6061_v54 = vmul.f32 %v5859_v10, %v5936_v26  ;;  %v6065_v55 = vmul.f32 %v5859_v10, %v5941_v27  ;;  %v6089_v60 = vmul.f32 %v5859_v10, %v5962_v32 }
   0xe   :  { %15126 = vst [vmem:[#allocation25_spill] sm:$0xff] %v5957_v31  ;;  %15127 = vst [vmem:[#allocation26_spill] sm:$0xff] %v5962_v32  ;;  %v6034_v48 = vld [vmem:[%s14611_s0 + $0x120] sm:$0xff]  ;;  %v6039_v49 = vld [vmem:[%s14611_s0 + $0x128] sm:$0xff]  ;;  %v6093_v61 = vmul.f32 %v5859_v10, %v5967_v33  ;;  %v6097_v62 = vmul.f32 %v5859_v10, %v5972_v34  ;;  %v6101_v63 = vmul.f32 %v5859_v10, %v5977_v35 }
   0xf   :  { %15128 = vst [vmem:[#allocation27_spill] sm:$0xff] %v5967_v33  ;;  %15129 = vst [vmem:[#allocation28_spill] sm:$0xff] %v5972_v34  ;;  %v6044_v50 = vld [vmem:[%s14611_s0 + $0x138] sm:$0xff]  ;;  %v6049_v51 = vld [vmem:[%s14611_s0 + $0x140] sm:$0xff]  ;;  %v6125_v8 = vmul.f32 %v5859_v10, %v5998_v40  ;;  %v6129_v9 = vmul.f32 %v5859_v10, %v6003_v41  ;;  %v6133_v2 = vmul.f32 %v5859_v10, %v6008_v42 }
  0x10   :  { %15130 = vst [vmem:[#allocation29_spill] sm:$0xff] %v5977_v35  ;;  %15131 = vst [vmem:[#allocation30_spill] sm:$0xff] %v5981_v36  ;;  %v6070_v56 = vld [vmem:[%s14611_s0 + $0x150] sm:$0xff]  ;;  %v6075_v57 = vld [vmem:[%s14611_s0 + $0x158] sm:$0xff] }
  0x11   :  { %15132 = vst [vmem:[#allocation31_spill] sm:$0xff] %v5985_v37  ;;  %15133 = vst [vmem:[#allocation32_spill] sm:$0xff] %v5989_v38  ;;  %v6080_v58 = vld [vmem:[%s14611_s0 + $0x168] sm:$0xff]  ;;  %v6085_v59 = vld [vmem:[%s14611_s0 + $0x170] sm:$0xff] }
  0x12   :  { %15134 = vst [vmem:[#allocation33_spill] sm:$0xff] %v5993_v39  ;;  %15135 = vst [vmem:[#allocation34_spill] sm:$0xff] %v5998_v40  ;;  %v6106_v0 = vld [vmem:[%s14611_s0 + $0x1b0] sm:$0xff]  ;;  %v6111_v1 = vld [vmem:[%s14611_s0 + $0x1b8] sm:$0xff] }
  0x13   :  { %15136 = vst [vmem:[#allocation35_spill] sm:$0xff] %v6003_v41  ;;  %15137 = vst [vmem:[#allocation36_spill] sm:$0xff] %v6008_v42  ;;  %v6116_v3 = vld [vmem:[%s14611_s0 + $0x1c8] sm:$0xff]  ;;  %v6121_v4 = vld [vmem:[%s14611_s0 + $0x1d0] sm:$0xff] }
  0x14   :  { %15138 = vst [vmem:[#allocation37_spill] sm:$0xff] %v6013_v43  ;;  %15139 = vst [vmem:[#allocation38_spill] sm:$0xff] %v6017_v44  ;;  %v6240_v44 = vld [vmem:[%s14611_s0 + $0x258] sm:$0xff]  ;;  %v6250_v39 = vld [vmem:[%s14611_s0 + $0x270] sm:$0xff] }
  0x15   :  { %15140 = vst [vmem:[#allocation39_spill] sm:$0xff] %v6021_v45  ;;  %15141 = vst [vmem:[#allocation40_spill] sm:$0xff] %v6025_v46  ;;  %v6231_v46 = vmul.f32 %v5859_v10, %v6116_v3  ;;  %v6235_v45 = vmul.f32 %v5859_v10, %v6121_v4  ;;  %v6271_v30 = vld [vmem:[%s14611_s0 + $0x278] sm:$0xff]  ;;  %v6276_v29 = vld [vmem:[%s14611_s0 + $0x288] sm:$0xff]  ;;  %v6357_v34 = vmul.f32 %v5859_v10, %v6250_v39 }
  0x16   :  { %15142 = vst [vmem:[#allocation41_spill] sm:$0xff] %v6029_v47  ;;  %15143 = vst [vmem:[#allocation42_spill] sm:$0xff] %v6034_v48  ;;  %v6209_v47 = vld [vmem:[%s14611_s0 + $0x230] sm:$0xff]  ;;  %v6343_v41 = vld [vmem:[%s14611_s0 + $0x2c0] sm:$0xff]  ;;  %v6361_v33 = vmul.f32 %v5859_v10, %v6271_v30  ;;  %v6365_v32 = vmul.f32 %v5859_v10, %v6276_v29 }
  0x17   :  { %15144 = vst [vmem:[#allocation43_spill] sm:$0xff] %v6039_v49  ;;  %15145 = vst [vmem:[#allocation44_spill] sm:$0xff] %v6044_v50  ;;  %v6281_v28 = vld [vmem:[%s14611_s0 + $0x290] sm:$0xff]  ;;  %v6353_v35 = vld [vmem:[%s14611_s0 + $0x2d8] sm:$0xff]  ;;  %v6400_v19 = vmul.f32 %v5859_v10, %v6343_v41 }
  0x18   :  { %15146 = vst [vmem:[#allocation45_spill] sm:$0xff] %v6049_v51  ;;  %15147 = vst [vmem:[#allocation46_spill] sm:$0xff] %v6053_v52  ;;  %v6204_v52 = vmul.f32 %v5859_v10, %v6085_v59  ;;  %v6338_v42 = vld [vmem:[%s14611_s0 + $0x1f0] sm:$0x3]  ;;  %v6369_v27 = vmul.f32 %v5859_v10, %v6281_v28  ;;  %v6374_v26 = vld [vmem:[%s14611_s0 + $0x2e8] sm:$0xff]  ;;  %v6423_v14 = vmul.f32 %v5859_v10, %v6353_v35 }
  0x19   :  { %15148 = vst [vmem:[#allocation47_spill] sm:$0xff] %v6057_v53  ;;  %15149 = vst [vmem:[#allocation48_spill] sm:$0xff] %v6061_v54  ;;  %v6178_v54 = vld [vmem:[%s14611_s0 + $0x210] sm:$0xff]  ;;  %v6200_v53 = vmul.f32 %v5859_v10, %v6080_v58  ;;  %v6384_v24 = vld [vmem:[%s14611_s0 + $0x300] sm:$0xff]  ;;  %v6427_v13 = vmul.f32 %v5859_v10, %v6374_v26 }
  0x1a   :  { %15150 = vst [vmem:[#allocation49_spill] sm:$0xff] %v6065_v55  ;;  %15151 = vst [vmem:[#allocation50_spill] sm:$0xff] %v6070_v56  ;;  %v6173_v55 = vmul.f32 %v5859_v10, %v6049_v51  ;;  %v6348_v40 = vld [vmem:[%s14611_s0 + $0x2d0] sm:$0xff]  ;;  %v6405_v18 = vld [vmem:[%s14611_s0 + $0x308] sm:$0xff] }
  0x1b   :  { %15152 = vst [vmem:[#allocation51_spill] sm:$0xff] %v6075_v57  ;;  %15153 = vst [vmem:[#allocation52_spill] sm:$0xff] %v6080_v58  ;;  %v6302_v58 = vld [vmem:[%s14611_s0 + $0x2a0] sm:$0xff]  ;;  %v6379_v25 = vld [vmem:[%s14611_s0 + $0x2f0] sm:$0xff]  ;;  %v6419_v15 = vmul.f32 %v5859_v10, %v6348_v40 }
  0x1c   :  { %15154 = vst [vmem:[#allocation53_spill] sm:$0xff] %v6085_v59  ;;  %15155 = vst [vmem:[#allocation54_spill] sm:$0xff] %v6089_v60  ;;  %v6169_v60 = vmul.f32 %v5859_v10, %v6044_v50  ;;  %v6297_v59 = vmul.f32 %v5859_v10, %v6209_v47  ;;  %v6388_v22 = vmul.f32 %v5859_v10, %v6302_v58  ;;  %v6410_v17 = vld [vmem:[%s14611_s0 + $0x318] sm:$0xff]  ;;  %v6415_v16 = vld [vmem:[%s14611_s0 + $0x320] sm:$0xff] }
  0x1d   :  { %15156 = vst [vmem:[#allocation55_spill] sm:$0xff] %v6093_v61  ;;  %15157 = vst [vmem:[#allocation56_spill] sm:$0xff] %v6097_v62  ;;  %v6142_v62 = vld [vmem:[%s14611_s0 + $0x1e0] sm:$0xff]  ;;  %v6165_v61 = vmul.f32 %v5859_v10, %v6039_v49  ;;  %v6324_v49 = vmul.f32 %v5859_v10, %v6240_v44  ;;  %v6431_v12 = vmul.f32 %v5859_v10, %v6379_v25 }
  0x1e   :  { %15158 = vst [vmem:[#allocation57_spill] sm:$0xff] %v6101_v63  ;;  %15159 = vst [vmem:[#allocation58_spill] sm:$0xff] %v6106_v0  ;;  %v6137_v63 = vmul.f32 %v5859_v10, %v6013_v43  ;;  %v6254_v38 = vmul.f32 %v5859_v10, %v6142_v62  ;;  %v6333_v43 = vld [vmem:[%s14611_s0 + $0x1d8] sm:$0x3] }
  0x1f   :  { %15160 = vst [vmem:[#allocation59_spill] sm:$0xff] %v6111_v1  ;;  %15161 = vst [vmem:[#allocation60_spill] sm:$0xff] %v6116_v3 }
  0x20   :  { %15162 = vst [vmem:[#allocation61_spill] sm:$0xff] %v6121_v4  ;;  %15163 = vst [vmem:[#allocation62_spill] sm:$0xff] %v6125_v8  ;;  %v6147_v8 = vld [vmem:[%s14611_s0 + $0x1e8] sm:$0xff] }
  0x21   :  { %15164 = vst [vmem:[#allocation63_spill] sm:$0xff] %v6129_v9  ;;  %15165 = vst [vmem:[#allocation64_spill] sm:$0xff] %v6133_v2  ;;  %v6152_v9 = vld [vmem:[%s14611_s0 + $0x1f8] sm:$0xff]  ;;  %v6157_v2 = vld [vmem:[%s14611_s0 + $0x200] sm:$0xff]  ;;  %v6258_v37 = vmul.f32 %v5859_v10, %v6147_v8 }
  0x22   :  { %15166 = vst [vmem:[#allocation65_spill] sm:$0xff] %v6137_v63  ;;  %15167 = vst [vmem:[#allocation66_spill] sm:$0xff] %v6142_v62  ;;  %v6161_v63 = vmul.f32 %v5859_v10, %v6034_v48  ;;  %v6262_v36 = vmul.f32 %v5859_v10, %v6152_v9  ;;  %v6266_v31 = vmul.f32 %v5859_v10, %v6157_v2 }
  0x23   :  { %15168 = vst [vmem:[#allocation67_spill] sm:$0xff] %v6147_v8  ;;  %15169 = vst [vmem:[#allocation68_spill] sm:$0xff] %v6152_v9 }
  0x24   :  { %15170 = vst [vmem:[#allocation69_spill] sm:$0xff] %v6157_v2  ;;  %15171 = vst [vmem:[#allocation70_spill] sm:$0xff] %v6161_v63  ;;  %v6183_v63 = vld [vmem:[%s14611_s0 + $0x218] sm:$0xff] }
  0x25   :  { %15172 = vst [vmem:[#allocation71_spill] sm:$0xff] %v6165_v61  ;;  %15173 = vst [vmem:[#allocation72_spill] sm:$0xff] %v6169_v60  ;;  %v6188_v61 = vld [vmem:[%s14611_s0 + $0x228] sm:$0xff]  ;;  %v6192_v60 = vmul.f32 %v5859_v10, %v6070_v56  ;;  %v6289_v23 = vmul.f32 %v5859_v10, %v6183_v63  ;;  %v6312_v56 = vld [vmem:[%s14611_s0 + $0x2b8] sm:$0xff] }
  0x26   :  { %15174 = vst [vmem:[#allocation73_spill] sm:$0xff] %v6173_v55  ;;  %15175 = vst [vmem:[#allocation74_spill] sm:$0xff] %v6178_v54  ;;  %v6196_v55 = vmul.f32 %v5859_v10, %v6075_v57  ;;  %v6293_v5 = vmul.f32 %v5859_v10, %v6188_v61  ;;  %v6307_v57 = vld [vmem:[%s14611_s0 + $0x2a8] sm:$0xff]  ;;  %v6396_v20 = vmul.f32 %v5859_v10, %v6312_v56 }
  0x27   :  { %15176 = vst [vmem:[#allocation75_spill] sm:$0xff] %v6183_v63  ;;  %15177 = vst [vmem:[#allocation76_spill] sm:$0xff] %v6188_v61  ;;  %v6392_v21 = vmul.f32 %v5859_v10, %v6307_v57 }
  0x28   :  { %15178 = vst [vmem:[#allocation77_spill] sm:$0xff] %v6192_v60  ;;  %15179 = vst [vmem:[#allocation78_spill] sm:$0xff] %v6196_v55  ;;  %v6214_v60 = vld [vmem:[%s14611_s0 + $0x240] sm:$0xff]  ;;  %v6219_v55 = vld [vmem:[%s14611_s0 + $0x248] sm:$0xff] }
  0x29   :  { %15180 = vst [vmem:[#allocation79_spill] sm:$0xff] %v6200_v53  ;;  %15181 = vst [vmem:[#allocation80_spill] sm:$0xff] %v6204_v52  ;;  %v6223_v53 = vmul.f32 %v5859_v10, %v6106_v0  ;;  %v6227_v52 = vmul.f32 %v5859_v10, %v6111_v1  ;;  %v6285_v0 = vmul.f32 %v5859_v10, %v6178_v54 }
  0x2a   :  { %15182 = vst [vmem:[#allocation81_spill] sm:$0xff] %v6209_v47  ;;  %15183 = vst [vmem:[#allocation82_spill] sm:$0xff] %v6214_v60  ;;  %v6316_v51 = vmul.f32 %v5859_v10, %v6214_v60  ;;  %v6320_v50 = vmul.f32 %v5859_v10, %v6219_v55 }
  0x2b   :  { %15184 = vst [vmem:[#allocation83_spill] sm:$0xff] %v6219_v55  ;;  %15185 = vst [vmem:[#allocation84_spill] sm:$0xff] %v6223_v53  ;;  %v6245_v53 = vld [vmem:[%s14611_s0 + $0x260] sm:$0xff] }
  0x2c   :  { %15186 = vst [vmem:[#allocation85_spill] sm:$0xff] %v6240_v44  ;;  %15187 = vst [vmem:[#allocation86_spill] sm:$0xff] %v6245_v53  ;;  %v6328_v48 = vmul.f32 %v5859_v10, %v6245_v53 }
  0x2d   :  { %15188 = vst [vmem:[#allocation87_spill] sm:$0xff] %v6250_v39  ;;  %15189 = vst [vmem:[#allocation88_spill] sm:$0xff] %v6271_v30 }
  0x2e   :  { %15190 = vst [vmem:[#allocation89_spill] sm:$0xff] %v6276_v29  ;;  %15191 = vst [vmem:[#allocation90_spill] sm:$0xff] %v6281_v28 }
  0x2f   :  { %15192 = vst [vmem:[#allocation91_spill] sm:$0xff] %v6285_v0  ;;  %15193 = vst [vmem:[#allocation92_spill] sm:$0xff] %v6289_v23 }
  0x30   :  { %15194 = vst [vmem:[#allocation93_spill] sm:$0xff] %v6293_v5  ;;  %15195 = vst [vmem:[#allocation94_spill] sm:$0xff] %v6297_v59 }
  0x31   :  { %15196 = vst [vmem:[#allocation95_spill] sm:$0xff] %v6302_v58  ;;  %15197 = vst [vmem:[#allocation96_spill] sm:$0xff] %v6307_v57 }
  0x32   :  { %15198 = vst [vmem:[#allocation97_spill] sm:$0xff] %v6312_v56  ;;  %15199 = vst [vmem:[#allocation98_spill] sm:$0xff] %v6316_v51  ;;  %v6673_v51 = vmul.f32 %v5851_v6, %v6379_v25 }
  0x33   :  { %15200 = vst [vmem:[#allocation99_spill] sm:$0xff] %v6320_v50  ;;  %15201 = vst [vmem:[#allocation100_spill] sm:$0xff] %v6324_v49  ;;  %v6635_v49 = vld [vmem:[%s14611_s0 + $0x310] sm:$0x3]  ;;  %v6656_v50 = vld [vmem:[%s14611_s0 + $0x328] sm:$0x3] }
  0x34   :  { %15202 = vst [vmem:[#allocation101_spill] sm:$0xff] %v6328_v48  ;;  %15203 = vst [vmem:[#allocation102_spill] sm:$0xff] %v6333_v43  ;;  %v6614_v48 = vld [vmem:[%s14611_s0 + $0x2f8] sm:$0x3] }
  0x35   :  { %15204 = vst [vmem:[#allocation103_spill] sm:$0xff] %v6338_v42  ;;  %15205 = vst [vmem:[#allocation104_spill] sm:$0xff] %v6343_v41  ;;  %v6677_v59 = vmul.f32 %v5851_v6, %v6614_v48 }
  0x36   :  { %15206 = vst [vmem:[#allocation105_spill] sm:$0xff] %v6348_v40  ;;  %15207 = vst [vmem:[#allocation106_spill] sm:$0xff] %v6353_v35 }
  0x37   :  { %15208 = vst [vmem:[#allocation107_spill] sm:$0xff] %v6357_v34  ;;  %15209 = vst [vmem:[#allocation108_spill] sm:$0xff] %v6361_v33  ;;  %v6572_v33 = vld [vmem:[%s14611_s0 + $0x2c8] sm:$0x3]  ;;  %v6593_v34 = vld [vmem:[%s14611_s0 + $0x2e0] sm:$0x3] }
  0x38   :  { %15210 = vst [vmem:[#allocation109_spill] sm:$0xff] %v6365_v32  ;;  %15211 = vst [vmem:[#allocation110_spill] sm:$0xff] %v6369_v27  ;;  %v6546_v27 = vld [vmem:[%s14611_s0 + $0x298] sm:$0x3] }
  0x39   :  { %15212 = vst [vmem:[#allocation111_spill] sm:$0xff] %v6374_v26  ;;  %15213 = vst [vmem:[#allocation112_spill] sm:$0xff] %v6379_v25 }
  0x3a   :  { %15214 = vst [vmem:[#allocation113_spill] sm:$0xff] %v6384_v24  ;;  %15215 = vst [vmem:[#allocation114_spill] sm:$0xff] %v6388_v22  ;;  %v6525_v22 = vld [vmem:[%s14611_s0 + $0x280] sm:$0x3] }
  0x3b   :  { %15216 = vst [vmem:[#allocation115_spill] sm:$0xff] %v6392_v21  ;;  %15217 = vst [vmem:[#allocation116_spill] sm:$0xff] %v6396_v20  ;;  %v6457_v20 = vld [vmem:[%s14611_s0 + $0x220] sm:$0x3]  ;;  %v6504_v21 = vld [vmem:[%s14611_s0 + $0x268] sm:$0x3] }
  0x3c   :  { %15218 = vst [vmem:[#allocation117_spill] sm:$0xff] %v6400_v19  ;;  %15219 = vst [vmem:[#allocation118_spill] sm:$0xff] %v6405_v18  ;;  %v6436_v19 = vld [vmem:[%s14611_s0 + $0x208] sm:$0x3] }
  0x3d   :  { %15220 = vst [vmem:[#allocation119_spill] sm:$0xff] %v6410_v17  ;;  %15221 = vst [vmem:[#allocation120_spill] sm:$0xff] %v6415_v16 }
  0x3e   :  { %15222 = vst [vmem:[#allocation121_spill] sm:$0xff] %v6419_v15  ;;  %15223 = vst [vmem:[#allocation122_spill] sm:$0xff] %v6423_v14  ;;  %v6440_v15 = vmul.f32 %v5859_v10, %v6384_v24  ;;  %v6444_v14 = vmul.f32 %v5859_v10, %v6405_v18 }
  0x3f   :  { %15224 = vst [vmem:[#allocation123_spill] sm:$0xff] %v6427_v13  ;;  %15225 = vst [vmem:[#allocation124_spill] sm:$0xff] %v6431_v12  ;;  %v6448_v13 = vmul.f32 %v5859_v10, %v6410_v17  ;;  %v6452_v12 = vmul.f32 %v5859_v10, %v6415_v16  ;;  %v6473_v10 = vmul.f32 %v5851_v6, %v6121_v4 }
  0x40   :  { %15226 = vst [vmem:[#allocation125_spill] sm:$0xff] %v6436_v19  ;;  %15227 = vst [vmem:[#allocation126_spill] sm:$0xff] %v6440_v15  ;;  %v6461_v15 = vmul.f32 %v5851_v6, %v5864_v11  ;;  %v6483_v11 = vld [vmem:[%s14611_s0 + $0x250] sm:$0x3]  ;;  %v6495_v4 = vmul.f32 %v5851_v6, %v6147_v8  ;;  %v6516_v8 = vmul.f32 %v5851_v6, %v6436_v19 }
  0x41   :  { %15228 = vst [vmem:[#allocation127_spill] sm:$0xff] %v6444_v14  ;;  %15229 = vst [vmem:[#allocation128_spill] sm:$0xff] %v6448_v13  ;;  %v6465_v14 = vmul.f32 %v5851_v6, %v6111_v1  ;;  %v6469_v13 = vmul.f32 %v5851_v6, %v6116_v3  ;;  %v6487_v1 = vmul.f32 %v5851_v6, %v6333_v43  ;;  %v487_v5 = vrot.slane %v6473_v10, 1 }
  0x42   :  { %15230 = vst [vmem:[#allocation129_spill] sm:$0xff] %v6452_v12  ;;  %15231 = vst [vmem:[#allocation130_spill] sm:$0xff] %v6457_v20  ;;  %v6478_v12 = vld [vmem:[%s14611_s0 + $0x238] sm:$0x3]  ;;  %v6491_v3 = vmul.f32 %v5851_v6, %v6142_v62  ;;  %v6508_v43 = vmul.f32 %v5851_v6, %v6152_v9  ;;  %v6512_v62 = vmul.f32 %v5851_v6, %v6157_v2  ;;  %v492_v23 = vrot.slane %v6495_v4, 1 }
  0x43   :  { %15232 = vst [vmem:[#allocation131_spill] sm:$0xff] %v6461_v15  ;;  %15233 = vst [vmem:[#allocation132_spill] sm:$0xff] %v6465_v14  ;;  %v6499_v15 = vmul.f32 %v5851_v6, %v6338_v42  ;;  %v6520_v42 = vmul.f32 %v5851_v6, %v6178_v54  ;;  %v6529_v9 = vmul.f32 %v5851_v6, %v6183_v63  ;;  %v6551_v63 = vld [vmem:[%s14611_s0 + $0x2b0] sm:$0x3]  ;;  %v14703_v25 = vrot.slane %v6465_v14, 1 }
  0x44   :  { %15234 = vst [vmem:[#allocation133_spill] sm:$0xff] %v6478_v12  ;;  %15235 = vst [vmem:[#allocation134_spill] sm:$0xff] %v6483_v11  ;;  %v6533_v2 = vmul.f32 %v5851_v6, %v6457_v20  ;;  %v6537_v19 = vmul.f32 %v5851_v6, %v6188_v61  ;;  %v6541_v54 = vmul.f32 %v5851_v6, %v6209_v47 }
  0x45   :  { %15236 = vst [vmem:[#allocation135_spill] sm:$0xff] %v6504_v21  ;;  %15237 = vst [vmem:[#allocation136_spill] sm:$0xff] %v6525_v22  ;;  %v6555_v20 = vmul.f32 %v5851_v6, %v6478_v12  ;;  %v6559_v61 = vmul.f32 %v5851_v6, %v6214_v60  ;;  %v6563_v47 = vmul.f32 %v5851_v6, %v6219_v55  ;;  %v494_v0 = vrot.slane %v6499_v15, 1 }
  0x46   :  { %15238 = vst [vmem:[#allocation137_spill] sm:$0xff] %v6546_v27  ;;  %15239 = vst [vmem:[#allocation138_spill] sm:$0xff] %v6551_v63  ;;  %v6567_v32 = vmul.f32 %v5851_v6, %v6483_v11  ;;  %v6576_v12 = vmul.f32 %v5851_v6, %v6240_v44  ;;  %v6580_v60 = vmul.f32 %v5851_v6, %v6245_v53  ;;  %v501_v10 = vrot.slane %v6520_v42, 1 }
  0x47   :  { %15240 = vst [vmem:[#allocation139_spill] sm:$0xff] %v6572_v33  ;;  %v6584_v55 = vmul.f32 %v5851_v6, %v6504_v21  ;;  %v6588_v11 = vmul.f32 %v5851_v6, %v6250_v39  ;;  %15241 = vst [vmem:[#allocation140_spill] sm:$0xff] %v6593_v34  ;;  %v6597_v44 = vmul.f32 %v5851_v6, %v6271_v30  ;;  %v504_v14 = vrot.slane %v6533_v2, 1 }
  0x48   :  { %v6601_v53 = vmul.f32 %v5851_v6, %v6525_v22  ;;  %v6605_v21 = vmul.f32 %v5851_v6, %v6276_v29  ;;  %v6609_v39 = vmul.f32 %v5851_v6, %v6281_v28  ;;  %15242 = vst [vmem:[#allocation141_spill] sm:$0xff] %v6614_v48  ;;  %v6618_v30 = vmul.f32 %v5851_v6, %v6546_v27 }
  0x49   :  { %v6622_v22 = vmul.f32 %v5851_v6, %v6302_v58  ;;  %v6626_v29 = vmul.f32 %v5851_v6, %v6307_v57  ;;  %v6630_v28 = vmul.f32 %v5851_v6, %v6551_v63  ;;  %15243 = vst [vmem:[#allocation142_spill] sm:$0xff] %v6635_v49  ;;  %v6639_v27 = vmul.f32 %v5851_v6, %v6312_v56 }
  0x4a   :  { %v6643_v58 = vmul.f32 %v5851_v6, %v6343_v41  ;;  %v6647_v57 = vmul.f32 %v5851_v6, %v6572_v33  ;;  %v6651_v63 = vmul.f32 %v5851_v6, %v6348_v40  ;;  %15244 = vst [vmem:[#allocation143_spill] sm:$0xff] %v6656_v50  ;;  %v6660_v56 = vmul.f32 %v5851_v6, %v6353_v35 }
  0x4b   :  { %v6664_v41 = vmul.f32 %v5851_v6, %v6593_v34  ;;  %v6668_v33 = vmul.f32 %v5851_v6, %v6374_v26  ;;  %v484_v40 = vrot.slane %v5855_v7, 1  ;;  %v6681_v35 = vmul.f32 %v5851_v6, %v6384_v24 }
  0x4c   :  { %v6685_v34 = vmul.f32 %v5851_v6, %v6405_v18  ;;  %v6689_v26 = vmul.f32 %v5851_v6, %v6635_v49  ;;  %v6693_v7 = vmul.f32 %v5851_v6, %v6410_v17  ;;  %v6697_v48 = vmul.f32 %v5851_v6, %v6415_v16 }
  0x4d   :  { %v6702_v24 = vmul.f32 %v5851_v6, %v6656_v50  ;;  %v486_v18 = vrot.slane %v6469_v13, 1  ;;  %v489_v49 = vrot.slane %v6487_v1, 1  ;;  %v6710_v17 = vsel %vm400_vm1, %v14703_v25, %v484_v40 }
  0x4e   :  { %v491_v16 = vrot.slane %v6491_v3, 1  ;;  %v496_v50 = vrot.slane %v6508_v43, 1  ;;  %v497_v6 = vrot.slane %v6512_v62, 1  ;;  %v499_v13 = vrot.slane %v6516_v8, 1 }
  0x4f   :  { %v502_v1 = vrot.slane %v6529_v9, 1  ;;  %v506_v40 = vrot.slane %v6537_v19, 1  ;;  %v507_v3 = vrot.slane %v6541_v54, 1  ;;  %v509_v4 = vrot.slane %v6555_v20, 1 }
  0x50   :  { %v511_v15 = vrot.slane %v6559_v61, 1  ;;  %v512_v43 = vrot.slane %v6563_v47, 1  ;;  %v514_v62 = vrot.slane %v6567_v32, 1  ;;  %v488_v8 = vsel %vm400_vm1, %v486_v18, %v487_v5 }
  0x51   :  { %v516_v42 = vrot.slane %v6576_v12, 1  ;;  %v517_v9 = vrot.slane %v6580_v60, 1  ;;  %v519_v2 = vrot.slane %v6584_v55, 1  ;;  %v490_v19 = vsel %vm400_vm1, %v487_v5, %v489_v49 }
  0x52   :  { %v493_v54 = vsel %vm400_vm1, %v491_v16, %v492_v23  ;;  %v495_v20 = vsel %vm400_vm1, %v492_v23, %v494_v0  ;;  %v498_v61 = vsel %vm400_vm1, %v496_v50, %v497_v6  ;;  %v500_v47 = vsel %vm400_vm1, %v497_v6, %v499_v13 }
  0x53   :  { %v503_v32 = vsel %vm400_vm1, %v501_v10, %v502_v1  ;;  %v505_v18 = vsel %vm400_vm1, %v502_v1, %v504_v14  ;;  %v508_v12 = vsel %vm400_vm1, %v506_v40, %v507_v3  ;;  %v510_v60 = vsel %vm400_vm1, %v507_v3, %v509_v4 }
  0x54   :  { %v513_v55 = vsel %vm400_vm1, %v511_v15, %v512_v43  ;;  %v515_v5 = vsel %vm400_vm1, %v512_v43, %v514_v62  ;;  %v521_v16 = vrot.slane %v6588_v11, 1  ;;  %v518_v23 = vsel %vm400_vm1, %v516_v42, %v517_v9 }
  0x55   :  { %v520_v49 = vsel %vm400_vm1, %v517_v9, %v519_v2  ;;  %v522_v6 = vrot.slane %v6597_v44, 1  ;;  %v524_v50 = vrot.slane %v6601_v53, 1  ;;  %v526_v14 = vrot.slane %v6605_v21, 1 }
  0x56   :  { %v527_v0 = vrot.slane %v6609_v39, 1  ;;  %v529_v13 = vrot.slane %v6618_v30, 1  ;;  %v531_v10 = vrot.slane %v6622_v22, 1  ;;  %v532_v1 = vrot.slane %v6626_v29, 1 }
  0x57   :  { %v534_v11 = vrot.slane %v6630_v28, 1  ;;  %v536_v40 = vrot.slane %v6639_v27, 1  ;;  %v537_v3 = vrot.slane %v6643_v58, 1  ;;  %v539_v44 = vrot.slane %v6647_v57, 1 }
  0x58   :  { %v541_v53 = vrot.slane %v6651_v63, 1  ;;  %v542_v21 = vrot.slane %v6660_v56, 1  ;;  %v544_v39 = vrot.slane %v6664_v41, 1  ;;  %v546_v30 = vrot.slane %v6668_v33, 1 }
  0x59   :  { %v547_v22 = vrot.slane %v6673_v51, 1  ;;  %v549_v29 = vrot.slane %v6677_v59, 1  ;;  %v551_v28 = vrot.slane %v6681_v35, 1  ;;  %v552_v27 = vrot.slane %v6685_v34, 1 }
  0x5a   :  { %v554_v58 = vrot.slane %v6689_v26, 1  ;;  %v556_v57 = vrot.slane %v6693_v7, 1  ;;  %v557_v63 = vrot.slane %v6697_v48, 1  ;;  %v523_v56 = vsel %vm400_vm1, %v521_v16, %v522_v6 }
  0x5b   :  { %v525_v41 = vsel %vm400_vm1, %v522_v6, %v524_v50  ;;  %v528_v33 = vsel %vm400_vm1, %v526_v14, %v527_v0  ;;  %v559_v51 = vrot.slane %v6702_v24, 1  ;;  %v530_v59 = vsel %vm400_vm1, %v527_v0, %v529_v13 }
  0x5c   :  { %v533_v35 = vsel %vm400_vm1, %v531_v10, %v532_v1  ;;  %v535_v34 = vsel %vm400_vm1, %v532_v1, %v534_v11  ;;  %v538_v26 = vsel %vm400_vm1, %v536_v40, %v537_v3  ;;  %v540_v7 = vsel %vm400_vm1, %v537_v3, %v539_v44  ;;  %v15275_v44 = vld [vmem:[#allocation115_spill] sm:$0xff] }
  0x5d   :  { %v543_v48 = vsel %vm400_vm1, %v541_v53, %v542_v21  ;;  %v545_v4 = vsel %vm400_vm1, %v542_v21, %v544_v39  ;;  %v548_v15 = vsel %vm400_vm1, %v546_v30, %v547_v22  ;;  %v550_v43 = vsel %vm400_vm1, %v547_v22, %v549_v29  ;;  %v15277_v21 = vld [vmem:[#allocation116_spill] sm:$0xff]  ;;  %v15279_v30 = vld [vmem:[#allocation117_spill] sm:$0xff]  ;;  %v6862_v29 = vld [vmem:[%s14611_s0 + $0x28] sm:$0x3] }
  0x5e   :  { %v553_v24 = vsel %vm400_vm1, %v551_v28, %v552_v27  ;;  %v555_v62 = vsel %vm400_vm1, %v552_v27, %v554_v58  ;;  %v558_v42 = vsel %vm400_vm1, %v556_v57, %v557_v63  ;;  %v560_v9 = vsel %vm400_vm1, %v557_v63, %v559_v51  ;;  %15281 = vst [vmem:[#allocation148_spill] sm:$0xff] %v6862_v29  ;;  %v6867_v28 = vld [vmem:[%s14611_s0 + $0x40] sm:$0x3]  ;;  %v15283_v27 = vld [vmem:[#allocation121_spill] sm:$0xff] }
  0x5f   :  { %v6786_v2 = vadd.f32 %v6710_v17, %v6227_v52  ;;  %v6789_v16 = vadd.f32 %v488_v8, %v6231_v46  ;;  %v6792_v6 = vadd.f32 %v490_v19, %v6235_v45  ;;  %v6795_v50 = vadd.f32 %v493_v54, %v6254_v38  ;;  %v15248_v17 = vld [vmem:[#allocation91_spill] sm:$0xff]  ;;  %v15250_v46 = vld [vmem:[#allocation92_spill] sm:$0xff]  ;;  %v15252_v45 = vld [vmem:[#allocation93_spill] sm:$0xff]  ;;  %15282 = vst [vmem:[#allocation149_spill] sm:$0xff] %v6867_v28 }
  0x60   :  { %v6798_v14 = vadd.f32 %v495_v20, %v6258_v37  ;;  %v6801_v0 = vadd.f32 %v498_v61, %v6262_v36  ;;  %v6804_v13 = vadd.f32 %v500_v47, %v6266_v31  ;;  %v6807_v52 = vadd.f32 %v503_v32, %v15248_v17  ;;  %v15254_v38 = vld [vmem:[#allocation94_spill] sm:$0xff]  ;;  %v15258_v36 = vld [vmem:[#allocation99_spill] sm:$0xff]  ;;  %v15260_v31 = vld [vmem:[#allocation100_spill] sm:$0xff] }
  0x61   :  { %v6810_v8 = vadd.f32 %v505_v18, %v15250_v46  ;;  %v6813_v19 = vadd.f32 %v508_v12, %v15252_v45  ;;  %v6816_v54 = vadd.f32 %v510_v60, %v15254_v38  ;;  %v15256_v37 = vld [vmem:[#allocation98_spill] sm:$0xff]  ;;  %v6822_v61 = vadd.f32 %v515_v5, %v15258_v36  ;;  %v15262_v32 = vld [vmem:[#allocation101_spill] sm:$0xff]  ;;  %v15264_v18 = vld [vmem:[#allocation107_spill] sm:$0xff] }
  0x62   :  { %15245 = vst [vmem:[#allocation144_spill] sm:$0xff] %v6798_v14  ;;  %15246 = vst [vmem:[#allocation145_spill] sm:$0xff] %v6801_v0  ;;  %v6819_v20 = vadd.f32 %v513_v55, %v15256_v37  ;;  %v6825_v47 = vadd.f32 %v518_v23, %v15260_v31  ;;  %v6828_v10 = vadd.f32 %v520_v49, %v15262_v32  ;;  %v15266_v12 = vld [vmem:[#allocation108_spill] sm:$0xff]  ;;  %v15268_v60 = vld [vmem:[#allocation109_spill] sm:$0xff] }
  0x63   :  { %15247 = vst [vmem:[#allocation146_spill] sm:$0xff] %v6804_v13  ;;  %15249 = vst [vmem:[#allocation91_spill] sm:$0xff] %v6807_v52  ;;  %v6831_v1 = vadd.f32 %v523_v56, %v15264_v18  ;;  %v6834_v11 = vadd.f32 %v525_v41, %v15266_v12  ;;  %v6837_v40 = vadd.f32 %v528_v33, %v15268_v60  ;;  %v15270_v55 = vld [vmem:[#allocation110_spill] sm:$0xff]  ;;  %v6845_v5 = vld [vmem:[%s14611_s0 + $0x10] sm:$0x3] }
  0x64   :  { %15251 = vst [vmem:[#allocation92_spill] sm:$0xff] %v6810_v8  ;;  %15253 = vst [vmem:[#allocation93_spill] sm:$0xff] %v6813_v19  ;;  %v6840_v3 = vadd.f32 %v530_v59, %v15270_v55  ;;  %v15273_v23 = vld [vmem:[#allocation114_spill] sm:$0xff]  ;;  %v6851_v53 = vadd.f32 %v535_v34, %v15275_v44  ;;  %v6854_v39 = vadd.f32 %v538_v26, %v15277_v21  ;;  %v15287_v56 = vld [vmem:[#allocation123_spill] sm:$0xff] }
  0x65   :  { %15255 = vst [vmem:[#allocation94_spill] sm:$0xff] %v6816_v54  ;;  %15257 = vst [vmem:[#allocation98_spill] sm:$0xff] %v6819_v20  ;;  %v6848_v49 = vadd.f32 %v533_v35, %v15273_v23  ;;  %v6857_v22 = vadd.f32 %v540_v7, %v15279_v30  ;;  %v6870_v58 = vadd.f32 %v543_v48, %v15283_v27  ;;  %v15285_v57 = vld [vmem:[#allocation122_spill] sm:$0xff]  ;;  %v15289_v33 = vld [vmem:[#allocation124_spill] sm:$0xff] }
  0x66   :  { %15259 = vst [vmem:[#allocation99_spill] sm:$0xff] %v6822_v61  ;;  %15261 = vst [vmem:[#allocation100_spill] sm:$0xff] %v6825_v47  ;;  %v6873_v63 = vadd.f32 %v545_v4, %v15285_v57  ;;  %v6876_v41 = vadd.f32 %v548_v15, %v15287_v56  ;;  %v6879_v51 = vadd.f32 %v550_v43, %v15289_v33  ;;  %v6884_v59 = vld [vmem:[%s14611_s0 + $0x58] sm:$0x3]  ;;  %v15292_v35 = vld [vmem:[#allocation126_spill] sm:$0xff] }
  0x67   :  { %15263 = vst [vmem:[#allocation101_spill] sm:$0xff] %v6828_v10  ;;  %15265 = vst [vmem:[#allocation107_spill] sm:$0xff] %v6831_v1  ;;  %v6887_v34 = vadd.f32 %v553_v24, %v15292_v35  ;;  %v15294_v26 = vld [vmem:[#allocation127_spill] sm:$0xff]  ;;  %v15296_v48 = vld [vmem:[#allocation128_spill] sm:$0xff] }
  0x68   :  { %15267 = vst [vmem:[#allocation108_spill] sm:$0xff] %v6834_v11  ;;  %15269 = vst [vmem:[#allocation109_spill] sm:$0xff] %v6837_v40  ;;  %v6890_v7 = vadd.f32 %v555_v62, %v15294_v26  ;;  %v6893_v4 = vadd.f32 %v558_v42, %v15296_v48  ;;  %v15298_v17 = vld [vmem:[#allocation129_spill] sm:$0xff]  ;;  %v6901_v43 = vld [vmem:[%s14611_s0 + $0x70] sm:$0x3] }
  0x69   :  { %15271 = vst [vmem:[#allocation110_spill] sm:$0xff] %v6840_v3  ;;  %15272 = vst [vmem:[#allocation147_spill] sm:$0xff] %v6845_v5  ;;  %v6896_v15 = vadd.f32 %v560_v9, %v15298_v17  ;;  %v15301_v46 = vld [vmem:[#allocation6_spill] sm:$0xff]  ;;  %v15302_v45 = vld [vmem:[#allocation4_spill] sm:$0xff] }
  0x6a   :  { %15274 = vst [vmem:[#allocation114_spill] sm:$0xff] %v6848_v49  ;;  %15276 = vst [vmem:[#allocation115_spill] sm:$0xff] %v6851_v53  ;;  %v6905_v38 = vmul.f32 %v15302_v45, %v15301_v46  ;;  %v6909_v24 = vmul.f32 %v15302_v45, %v6845_v5  ;;  %v15303_v62 = vld [vmem:[#allocation7_spill] sm:$0xff]  ;;  %v15304_v37 = vld [vmem:[#allocation8_spill] sm:$0xff]  ;;  %v6931_v32 = vmul.f32 %v15302_v45, %v6862_v29 }
  0x6b   :  { %15278 = vst [vmem:[#allocation116_spill] sm:$0xff] %v6854_v39  ;;  %15280 = vst [vmem:[#allocation117_spill] sm:$0xff] %v6857_v22  ;;  %v6913_v42 = vmul.f32 %v15302_v45, %v15303_v62  ;;  %v6917_v9 = vmul.f32 %v15302_v45, %v15304_v37  ;;  %v6922_v36 = vld [vmem:[%s14611_s0 + $0x88] sm:$0x3]  ;;  %v6927_v31 = vld [vmem:[%s14611_s0 + $0xa0] sm:$0x3]  ;;  %v6943_v23 = vmul.f32 %v15302_v45, %v6867_v28 }
  0x6c   :  { %15284 = vst [vmem:[#allocation121_spill] sm:$0xff] %v6870_v58  ;;  %15286 = vst [vmem:[#allocation122_spill] sm:$0xff] %v6873_v63  ;;  %v15307_v18 = vld [vmem:[#allocation9_spill] sm:$0xff]  ;;  %v15308_v60 = vld [vmem:[#allocation10_spill] sm:$0xff]  ;;  %v6960_v56 = vmul.f32 %v15302_v45, %v6884_v59  ;;  %v6977_v46 = vmul.f32 %v15302_v45, %v6901_v43  ;;  %v402_v10 = vrot.slane %v6905_v38, 1  ;;  %v409_v13 = vrot.slane %v6931_v32, 1 }
  0x6d   :  { %15288 = vst [vmem:[#allocation123_spill] sm:$0xff] %v6876_v41  ;;  %15290 = vst [vmem:[#allocation124_spill] sm:$0xff] %v6879_v51  ;;  %v6935_v12 = vmul.f32 %v15302_v45, %v15307_v18  ;;  %v6939_v55 = vmul.f32 %v15302_v45, %v15308_v60  ;;  %v6948_v44 = vld [vmem:[%s14611_s0 + $0xb8] sm:$0x3]  ;;  %v15310_v21 = vld [vmem:[#allocation11_spill] sm:$0xff]  ;;  %v406_v54 = vrot.slane %v6913_v42, 1 }
  0x6e   :  { %15291 = vst [vmem:[#allocation150_spill] sm:$0xff] %v6884_v59  ;;  %15293 = vst [vmem:[#allocation126_spill] sm:$0xff] %v6887_v34  ;;  %v6952_v30 = vmul.f32 %v15302_v45, %v15310_v21  ;;  %v15311_v27 = vld [vmem:[#allocation12_spill] sm:$0xff]  ;;  %v15312_v33 = vld [vmem:[#allocation13_spill] sm:$0xff]  ;;  %v407_v19 = vrot.slane %v6917_v9, 1  ;;  %v414_v14 = vrot.slane %v6943_v23, 1 }
  0x6f   :  { %15295 = vst [vmem:[#allocation127_spill] sm:$0xff] %v6890_v7  ;;  %15297 = vst [vmem:[#allocation128_spill] sm:$0xff] %v6893_v4  ;;  %v6956_v57 = vmul.f32 %v15302_v45, %v15311_v27  ;;  %v6964_v35 = vmul.f32 %v15302_v45, %v15312_v33  ;;  %v6969_v26 = vld [vmem:[%s14611_s0 + $0xd0] sm:$0x3]  ;;  %v15314_v48 = vld [vmem:[#allocation14_spill] sm:$0xff]  ;;  %v6999_v33 = vmul.f32 %v15302_v45, %v6922_v36  ;;  %v419_v32 = vrot.slane %v6960_v56, 1 }
  0x70   :  { %15299 = vst [vmem:[#allocation129_spill] sm:$0xff] %v6896_v15  ;;  %15300 = vst [vmem:[#allocation151_spill] sm:$0xff] %v6901_v43  ;;  %v6973_v17 = vmul.f32 %v15302_v45, %v15314_v48  ;;  %v15315_v62 = vld [vmem:[#allocation15_spill] sm:$0xff]  ;;  %v15316_v18 = vld [vmem:[#allocation16_spill] sm:$0xff]  ;;  %v7011_v43 = vmul.f32 %v15302_v45, %v6927_v31 }
  0x71   :  { %15305 = vst [vmem:[#allocation6_spill] sm:$0xff] %v6922_v36  ;;  %15306 = vst [vmem:[#allocation4_spill] sm:$0xff] %v6927_v31  ;;  %v6981_v37 = vmul.f32 %v15302_v45, %v15315_v62  ;;  %v6985_v60 = vmul.f32 %v15302_v45, %v15316_v18  ;;  %v6990_v21 = vld [vmem:[%s14611_s0 + $0xe8] sm:$0x3]  ;;  %v6995_v27 = vld [vmem:[%s14611_s0 + $0x100] sm:$0x3] }
  0x72   :  { %15309 = vst [vmem:[#allocation7_spill] sm:$0xff] %v6948_v44  ;;  %15313 = vst [vmem:[#allocation8_spill] sm:$0xff] %v6969_v26  ;;  %v15319_v48 = vld [vmem:[#allocation18_spill] sm:$0xff]  ;;  %v15320_v18 = vld [vmem:[#allocation19_spill] sm:$0xff]  ;;  %v429_v23 = vrot.slane %v6999_v33, 1 }
  0x73   :  { %15317 = vst [vmem:[#allocation9_spill] sm:$0xff] %v6990_v21  ;;  %15318 = vst [vmem:[#allocation10_spill] sm:$0xff] %v6995_v27  ;;  %v7003_v62 = vmul.f32 %v15302_v45, %v15319_v48  ;;  %v7007_v25 = vmul.f32 %v15302_v45, %v15320_v18  ;;  %v7016_v59 = vld [vmem:[%s14611_s0 + $0x118] sm:$0x3]  ;;  %v15322_v28 = vld [vmem:[#allocation20_spill] sm:$0xff]  ;;  %v7028_v18 = vmul.f32 %v15302_v45, %v6948_v44 }
  0x74   :  { %15321 = vst [vmem:[#allocation11_spill] sm:$0xff] %v7016_v59  ;;  %v7020_v36 = vmul.f32 %v15302_v45, %v15322_v28  ;;  %v15323_v29 = vld [vmem:[#allocation21_spill] sm:$0xff]  ;;  %v15324_v5 = vld [vmem:[#allocation26_spill] sm:$0xff]  ;;  %v7037_v15 = vld [vmem:[%s14611_s0 + $0x130] sm:$0x3] }
  0x75   :  { %v7024_v48 = vmul.f32 %v15302_v45, %v15323_v29  ;;  %v7032_v31 = vmul.f32 %v15302_v45, %v15324_v5  ;;  %15325 = vst [vmem:[#allocation12_spill] sm:$0xff] %v7037_v15  ;;  %v15326_v4 = vld [vmem:[#allocation27_spill] sm:$0xff]  ;;  %v7045_v29 = vmul.f32 %v15302_v45, %v6969_v26  ;;  %v15327_v7 = vld [vmem:[#allocation28_spill] sm:$0xff]  ;;  %v15328_v34 = vld [vmem:[#allocation29_spill] sm:$0xff] }
  0x76   :  { %v7041_v28 = vmul.f32 %v15302_v45, %v15326_v4  ;;  %v7049_v44 = vmul.f32 %v15302_v45, %v15327_v7  ;;  %v7053_v5 = vmul.f32 %v15302_v45, %v15328_v34  ;;  %v7058_v51 = vld [vmem:[%s14611_s0 + $0x148] sm:$0x3]  ;;  %v7062_v4 = vmul.f32 %v15302_v45, %v6990_v21  ;;  %v15330_v41 = vld [vmem:[#allocation34_spill] sm:$0xff]  ;;  %v15332_v58 = vld [vmem:[#allocation36_spill] sm:$0xff] }
  0x77   :  { %15329 = vst [vmem:[#allocation13_spill] sm:$0xff] %v7058_v51  ;;  %v7066_v26 = vmul.f32 %v15302_v45, %v15330_v41  ;;  %v15331_v63 = vld [vmem:[#allocation35_spill] sm:$0xff]  ;;  %v7074_v34 = vmul.f32 %v15302_v45, %v6995_v27  ;;  %v7078_v22 = vmul.f32 %v15302_v45, %v15332_v58  ;;  %v15333_v39 = vld [vmem:[#allocation37_spill] sm:$0xff]  ;;  %v7086_v41 = vmul.f32 %v15302_v45, %v7016_v59  ;;  %v15334_v53 = vld [vmem:[#allocation42_spill] sm:$0xff] }
  0x78   :  { %v7070_v7 = vmul.f32 %v15302_v45, %v15331_v63  ;;  %v7082_v21 = vmul.f32 %v15302_v45, %v15333_v39  ;;  %v7090_v63 = vmul.f32 %v15302_v45, %v15334_v53  ;;  %v7095_v27 = vld [vmem:[%s14611_s0 + $0x160] sm:$0x3]  ;;  %v15336_v49 = vld [vmem:[#allocation43_spill] sm:$0xff]  ;;  %v7103_v39 = vmul.f32 %v15302_v45, %v7037_v15  ;;  %v15337_v3 = vld [vmem:[#allocation44_spill] sm:$0xff] }
  0x79   :  { %15335 = vst [vmem:[#allocation14_spill] sm:$0xff] %v7095_v27  ;;  %v7099_v58 = vmul.f32 %v15302_v45, %v15336_v49  ;;  %v7107_v59 = vmul.f32 %v15302_v45, %v15337_v3  ;;  %v15338_v40 = vld [vmem:[#allocation45_spill] sm:$0xff]  ;;  %v7120_v49 = vmul.f32 %v15302_v45, %v7058_v51  ;;  %v15340_v1 = vld [vmem:[#allocation131_spill] sm:$0xff]  ;;  %v404_v3 = vrot.slane %v6909_v24, 1  ;;  %v15341_v47 = vld [vmem:[#allocation50_spill] sm:$0xff] }
  0x7a   :  { %v7111_v53 = vmul.f32 %v15302_v45, %v15338_v40  ;;  %v7116_v11 = vld [vmem:[%s14611_s0 + $0x178] sm:$0x3]  ;;  %v401_v15 = vrot.slane %v15340_v1, 1  ;;  %v7127_v61 = vmul.f32 %v15302_v45, %v15341_v47  ;;  %v15342_v40 = vld [vmem:[#allocation51_spill] sm:$0xff]  ;;  %v7137_v51 = vmul.f32 %v15302_v45, %v7095_v27  ;;  %v15343_v1 = vld [vmem:[#allocation52_spill] sm:$0xff] }
  0x7b   :  { %15339 = vst [vmem:[#allocation15_spill] sm:$0xff] %v7116_v11  ;;  %v7131_v20 = vmul.f32 %v15302_v45, %v15342_v40  ;;  %v7141_v38 = vmul.f32 %v15302_v45, %v15343_v1  ;;  %v15344_v24 = vld [vmem:[#allocation53_spill] sm:$0xff]  ;;  %v15345_v8 = vld [vmem:[#allocation3_spill] sm:$0xff]  ;;  %v7153_v42 = vmul.f32 %v15302_v45, %v7116_v11  ;;  %v15347_v9 = vld [vmem:[#allocation58_spill] sm:$0xff]  ;;  %v411_v1 = vrot.slane %v6935_v12, 1 }
  0x7c   :  { %v7145_v47 = vmul.f32 %v15302_v45, %v15344_v24  ;;  %v15346_v52 = vld [vmem:[#allocation17_spill] sm:$0xff]  ;;  %v7157_v27 = vmul.f32 %v15302_v45, %v15347_v9  ;;  %v7162_v0 = vsel %vm400_vm1, %v401_v15, %v402_v10  ;;  %v7165_v24 = vsel %vm400_vm1, %v402_v10, %v404_v3 }
  0x7d   :  { %v7149_v40 = vmul.f32 %v15346_v52, %v15345_v8  ;;  %v412_v8 = vrot.slane %v6939_v55, 1  ;;  %v7170_v11 = vsel %vm400_vm1, %v406_v54, %v407_v19  ;;  %v416_v45 = vrot.slane %v6952_v30, 1 }
  0x7e   :  { %v417_v9 = vrot.slane %v6956_v57, 1  ;;  %v421_v12 = vrot.slane %v6964_v35, 1  ;;  %v422_v15 = vrot.slane %v6973_v17, 1  ;;  %v424_v10 = vrot.slane %v6977_v46, 1 }
  0x7f   :  { %v426_v3 = vrot.slane %v6981_v37, 1  ;;  %v427_v55 = vrot.slane %v6985_v60, 1  ;;  %v431_v54 = vrot.slane %v7003_v62, 1  ;;  %v432_v30 = vrot.slane %v7007_v25, 1 }
  0x80   :  { %v434_v57 = vrot.slane %v7011_v43, 1  ;;  %v436_v56 = vrot.slane %v7020_v36, 1  ;;  %v437_v35 = vrot.slane %v7024_v48, 1  ;;  %v439_v17 = vrot.slane %v7028_v18, 1 }
  0x81   :  { %v410_v46 = vsel %vm400_vm1, %v407_v19, %v409_v13  ;;  %v413_v37 = vsel %vm400_vm1, %v411_v1, %v412_v8  ;;  %v441_v60 = vrot.slane %v7032_v31, 1  ;;  %v442_v33 = vrot.slane %v7041_v28, 1 }
  0x82   :  { %v415_v62 = vsel %vm400_vm1, %v412_v8, %v414_v14  ;;  %v418_v25 = vsel %vm400_vm1, %v416_v45, %v417_v9  ;;  %v420_v43 = vsel %vm400_vm1, %v417_v9, %v419_v32  ;;  %v444_v36 = vrot.slane %v7045_v29, 1 }
  0x83   :  { %v423_v48 = vsel %vm400_vm1, %v421_v12, %v422_v15  ;;  %v425_v18 = vsel %vm400_vm1, %v422_v15, %v424_v10  ;;  %v428_v13 = vsel %vm400_vm1, %v426_v3, %v427_v55  ;;  %v430_v19 = vsel %vm400_vm1, %v427_v55, %v429_v23 }
  0x84   :  { %v433_v31 = vsel %vm400_vm1, %v431_v54, %v432_v30  ;;  %v435_v28 = vsel %vm400_vm1, %v432_v30, %v434_v57  ;;  %v438_v14 = vsel %vm400_vm1, %v436_v56, %v437_v35  ;;  %v440_v1 = vsel %vm400_vm1, %v437_v35, %v439_v17  ;;  %v15348_v17 = vld [vmem:[#allocation132_spill] sm:$0xff] }
  0x85   :  { %v443_v8 = vsel %vm400_vm1, %v441_v60, %v442_v33  ;;  %v446_v29 = vrot.slane %v7049_v44, 1  ;;  %v447_v45 = vrot.slane %v7053_v5, 1  ;;  %v449_v9 = vrot.slane %v7062_v4, 1 }
  0x86   :  { %v445_v32 = vsel %vm400_vm1, %v442_v33, %v444_v36  ;;  %v451_v12 = vrot.slane %v7066_v26, 1  ;;  %v452_v15 = vrot.slane %v7070_v7, 1  ;;  %v454_v10 = vrot.slane %v7074_v34, 1  ;;  %v15350_v36 = vld [vmem:[#allocation22_spill] sm:$0xff] }
  0x87   :  { %v456_v3 = vrot.slane %v7078_v22, 1  ;;  %v457_v55 = vrot.slane %v7082_v21, 1  ;;  %v459_v23 = vrot.slane %v7086_v41, 1  ;;  %v461_v44 = vrot.slane %v7090_v63, 1 }
  0x88   :  { %v462_v5 = vrot.slane %v7099_v58, 1  ;;  %v464_v4 = vrot.slane %v7103_v39, 1  ;;  %v466_v54 = vrot.slane %v7107_v59, 1  ;;  %v467_v26 = vrot.slane %v7111_v53, 1 }
  0x89   :  { %v469_v7 = vrot.slane %v7120_v49, 1  ;;  %v471_v34 = vrot.slane %v7127_v61, 1  ;;  %v472_v22 = vrot.slane %v7131_v20, 1  ;;  %v474_v21 = vrot.slane %v7137_v51, 1 }
  0x8a   :  { %v476_v41 = vrot.slane %v7141_v38, 1  ;;  %v477_v63 = vrot.slane %v7145_v47, 1  ;;  %v479_v58 = vrot.slane %v7153_v42, 1  ;;  %v481_v39 = vrot.slane %v7157_v27, 1 }
  0x8b   :  { %v448_v59 = vsel %vm400_vm1, %v446_v29, %v447_v45  ;;  %v450_v53 = vsel %vm400_vm1, %v447_v45, %v449_v9  ;;  %v453_v49 = vsel %vm400_vm1, %v451_v12, %v452_v15  ;;  %v455_v61 = vsel %vm400_vm1, %v452_v15, %v454_v10  ;;  %v15352_v45 = vld [vmem:[#allocation23_spill] sm:$0xff]  ;;  %v15354_v12 = vld [vmem:[#allocation24_spill] sm:$0xff]  ;;  %v15356_v10 = vld [vmem:[#allocation25_spill] sm:$0xff] }
  0x8c   :  { %v458_v20 = vsel %vm400_vm1, %v456_v3, %v457_v55  ;;  %v460_v51 = vsel %vm400_vm1, %v457_v55, %v459_v23  ;;  %v463_v38 = vsel %vm400_vm1, %v461_v44, %v462_v5  ;;  %v465_v47 = vsel %vm400_vm1, %v462_v5, %v464_v4  ;;  %v15358_v55 = vld [vmem:[#allocation30_spill] sm:$0xff]  ;;  %v15360_v44 = vld [vmem:[#allocation31_spill] sm:$0xff]  ;;  %v15362_v4 = vld [vmem:[#allocation32_spill] sm:$0xff] }
  0x8d   :  { %v468_v42 = vsel %vm400_vm1, %v466_v54, %v467_v26  ;;  %v470_v27 = vsel %vm400_vm1, %v467_v26, %v469_v7  ;;  %v473_v30 = vsel %vm400_vm1, %v471_v34, %v472_v22  ;;  %v475_v57 = vsel %vm400_vm1, %v472_v22, %v474_v21  ;;  %v15364_v54 = vld [vmem:[#allocation33_spill] sm:$0xff] }
  0x8e   :  { %v478_v56 = vsel %vm400_vm1, %v476_v41, %v477_v63  ;;  %v480_v35 = vsel %vm400_vm1, %v477_v63, %v479_v58  ;;  %v15349_v60 = vrot.slane %v15348_v17, 1  ;;  %v7246_v29 = vadd.f32 %v7162_v0, %v15350_v36 }
  0x8f   :  { %v7250_v9 = vadd.f32 %v7165_v24, %v15352_v45  ;;  %v7254_v15 = vadd.f32 %v7170_v11, %v15354_v12  ;;  %v7257_v3 = vadd.f32 %v410_v46, %v15356_v10  ;;  %v7260_v23 = vadd.f32 %v413_v37, %v15358_v55  ;;  %v15366_v24 = vld [vmem:[#allocation38_spill] sm:$0xff]  ;;  %v15368_v11 = vld [vmem:[#allocation39_spill] sm:$0xff]  ;;  %v15370_v46 = vld [vmem:[#allocation40_spill] sm:$0xff] }
  0x90   :  { %v483_v33 = vsel %vm400_vm1, %v481_v39, %v15349_v60  ;;  %15351 = vst [vmem:[#allocation16_spill] sm:$0xff] %v7246_v29  ;;  %v7263_v5 = vadd.f32 %v415_v62, %v15360_v44  ;;  %v7266_v0 = vadd.f32 %v418_v25, %v15362_v4  ;;  %v7269_v26 = vadd.f32 %v420_v43, %v15364_v54  ;;  %v15372_v37 = vld [vmem:[#allocation41_spill] sm:$0xff]  ;;  %v15374_v62 = vld [vmem:[#allocation46_spill] sm:$0xff]  ;;  %v15376_v25 = vld [vmem:[#allocation47_spill] sm:$0xff] }
  0x91   :  { %15353 = vst [vmem:[#allocation18_spill] sm:$0xff] %v7250_v9  ;;  %15355 = vst [vmem:[#allocation19_spill] sm:$0xff] %v7254_v15  ;;  %v7272_v7 = vadd.f32 %v423_v48, %v15366_v24  ;;  %v7275_v34 = vadd.f32 %v425_v18, %v15368_v11  ;;  %v7278_v22 = vadd.f32 %v428_v13, %v15370_v46  ;;  %v15378_v43 = vld [vmem:[#allocation48_spill] sm:$0xff]  ;;  %v15380_v48 = vld [vmem:[#allocation49_spill] sm:$0xff] }
  0x92   :  { %15357 = vst [vmem:[#allocation20_spill] sm:$0xff] %v7257_v3  ;;  %15359 = vst [vmem:[#allocation21_spill] sm:$0xff] %v7260_v23  ;;  %v7281_v21 = vadd.f32 %v430_v19, %v15372_v37  ;;  %v7284_v41 = vadd.f32 %v433_v31, %v15374_v62  ;;  %v7287_v63 = vadd.f32 %v435_v28, %v15376_v25  ;;  %v15382_v18 = vld [vmem:[#allocation54_spill] sm:$0xff]  ;;  %v15384_v13 = vld [vmem:[#allocation55_spill] sm:$0xff] }
  0x93   :  { %15361 = vst [vmem:[#allocation26_spill] sm:$0xff] %v7263_v5  ;;  %15363 = vst [vmem:[#allocation27_spill] sm:$0xff] %v7266_v0  ;;  %v7290_v58 = vadd.f32 %v438_v14, %v15378_v43  ;;  %v7293_v39 = vadd.f32 %v440_v1, %v15380_v48  ;;  %v7296_v17 = vadd.f32 %v443_v8, %v15382_v18  ;;  %v15386_v19 = vld [vmem:[#allocation56_spill] sm:$0xff]  ;;  %v15388_v31 = vld [vmem:[#allocation57_spill] sm:$0xff] }
  0x94   :  { %15365 = vst [vmem:[#allocation28_spill] sm:$0xff] %v7269_v26  ;;  %15367 = vst [vmem:[#allocation29_spill] sm:$0xff] %v7272_v7  ;;  %v7299_v60 = vadd.f32 %v445_v32, %v15384_v13  ;;  %v7302_v36 = vadd.f32 %v448_v59, %v15386_v19  ;;  %v7305_v45 = vadd.f32 %v450_v53, %v15388_v31  ;;  %v15390_v28 = vld [vmem:[#allocation62_spill] sm:$0xff]  ;;  %v15392_v14 = vld [vmem:[#allocation63_spill] sm:$0xff] }
  0x95   :  { %15369 = vst [vmem:[#allocation34_spill] sm:$0xff] %v7275_v34  ;;  %15371 = vst [vmem:[#allocation35_spill] sm:$0xff] %v7278_v22  ;;  %v7308_v12 = vadd.f32 %v453_v49, %v15390_v28  ;;  %v7311_v10 = vadd.f32 %v455_v61, %v15392_v14  ;;  %v15394_v1 = vld [vmem:[#allocation64_spill] sm:$0xff]  ;;  %v15396_v8 = vld [vmem:[#allocation65_spill] sm:$0xff] }
  0x96   :  { %15373 = vst [vmem:[#allocation36_spill] sm:$0xff] %v7281_v21  ;;  %15375 = vst [vmem:[#allocation37_spill] sm:$0xff] %v7284_v41  ;;  %v7314_v55 = vadd.f32 %v458_v20, %v15394_v1  ;;  %v7317_v44 = vadd.f32 %v460_v51, %v15396_v8  ;;  %v15398_v32 = vld [vmem:[#allocation70_spill] sm:$0xff]  ;;  %v15400_v59 = vld [vmem:[#allocation71_spill] sm:$0xff] }
  0x97   :  { %15377 = vst [vmem:[#allocation42_spill] sm:$0xff] %v7287_v63  ;;  %15379 = vst [vmem:[#allocation43_spill] sm:$0xff] %v7290_v58  ;;  %v7320_v4 = vadd.f32 %v463_v38, %v15398_v32  ;;  %v7323_v54 = vadd.f32 %v465_v47, %v15400_v59  ;;  %v15402_v53 = vld [vmem:[#allocation72_spill] sm:$0xff]  ;;  %v15404_v49 = vld [vmem:[#allocation73_spill] sm:$0xff]  ;;  %v969_v63 = vrot.slane %v7149_v40, 2 }
  0x98   :  { %15381 = vst [vmem:[#allocation44_spill] sm:$0xff] %v7293_v39  ;;  %15383 = vst [vmem:[#allocation45_spill] sm:$0xff] %v7296_v17  ;;  %v7326_v24 = vadd.f32 %v468_v42, %v15402_v53  ;;  %v7329_v11 = vadd.f32 %v470_v27, %v15404_v49  ;;  %v15406_v61 = vld [vmem:[#allocation77_spill] sm:$0xff]  ;;  %v15408_v20 = vld [vmem:[#allocation78_spill] sm:$0xff] }
  0x99   :  { %15385 = vst [vmem:[#allocation131_spill] sm:$0xff] %v7299_v60  ;;  %15387 = vst [vmem:[#allocation50_spill] sm:$0xff] %v7302_v36  ;;  %v7332_v46 = vadd.f32 %v473_v30, %v15406_v61  ;;  %v7335_v37 = vadd.f32 %v475_v57, %v15408_v20  ;;  %v15410_v51 = vld [vmem:[#allocation79_spill] sm:$0xff]  ;;  %v15412_v38 = vld [vmem:[#allocation80_spill] sm:$0xff] }
  0x9a   :  { %15389 = vst [vmem:[#allocation51_spill] sm:$0xff] %v7305_v45  ;;  %15391 = vst [vmem:[#allocation52_spill] sm:$0xff] %v7308_v12  ;;  %v7338_v62 = vadd.f32 %v478_v56, %v15410_v51  ;;  %v7341_v25 = vadd.f32 %v480_v35, %v15412_v38  ;;  %v15414_v47 = vld [vmem:[#allocation84_spill] sm:$0xff]  ;;  %v15416_v42 = vld [vmem:[#allocation5_spill] sm:$0xff] }
  0x9b   :  { %15393 = vst [vmem:[#allocation53_spill] sm:$0xff] %v7311_v10  ;;  %15395 = vst [vmem:[#allocation3_spill] sm:$0xff] %v7314_v55  ;;  %v7344_v43 = vadd.f32 %v483_v33, %v15414_v47  ;;  %v7348_v48 = vmul.f32 %v15346_v52, %v15416_v42  ;;  %v15417_v27 = vld [vmem:[#allocation59_spill] sm:$0xff]  ;;  %v15419_v18 = vld [vmem:[#allocation60_spill] sm:$0xff] }
  0x9c   :  { %15397 = vst [vmem:[#allocation17_spill] sm:$0xff] %v7317_v44  ;;  %15399 = vst [vmem:[#allocation58_spill] sm:$0xff] %v7320_v4  ;;  %v7352_v30 = vmul.f32 %v15346_v52, %v15417_v27  ;;  %v7356_v57 = vmul.f32 %v15346_v52, %v15419_v18  ;;  %v15420_v56 = vld [vmem:[#allocation61_spill] sm:$0xff]  ;;  %v15421_v35 = vld [vmem:[#allocation102_spill] sm:$0xff] }
  0x9d   :  { %15401 = vst [vmem:[#allocation132_spill] sm:$0xff] %v7323_v54  ;;  %15403 = vst [vmem:[#allocation22_spill] sm:$0xff] %v7326_v24  ;;  %v7360_v13 = vmul.f32 %v15346_v52, %v15420_v56  ;;  %v7364_v33 = vmul.f32 %v15346_v52, %v15421_v35  ;;  %v15422_v19 = vld [vmem:[#allocation66_spill] sm:$0xff]  ;;  %v15423_v28 = vld [vmem:[#allocation67_spill] sm:$0xff] }
  0x9e   :  { %15405 = vst [vmem:[#allocation23_spill] sm:$0xff] %v7329_v11  ;;  %15407 = vst [vmem:[#allocation24_spill] sm:$0xff] %v7332_v46  ;;  %v7368_v31 = vmul.f32 %v15346_v52, %v15422_v19  ;;  %v7372_v14 = vmul.f32 %v15346_v52, %v15423_v28  ;;  %v15424_v1 = vld [vmem:[#allocation103_spill] sm:$0xff]  ;;  %v15425_v32 = vld [vmem:[#allocation68_spill] sm:$0xff]  ;;  %v14720_v0 = vrot.slane %v7352_v30, 2 }
  0x9f   :  { %15409 = vst [vmem:[#allocation25_spill] sm:$0xff] %v7335_v37  ;;  %15411 = vst [vmem:[#allocation30_spill] sm:$0xff] %v7338_v62  ;;  %v7376_v8 = vmul.f32 %v15346_v52, %v15424_v1  ;;  %v7380_v59 = vmul.f32 %v15346_v52, %v15425_v32  ;;  %v15426_v53 = vld [vmem:[#allocation69_spill] sm:$0xff]  ;;  %v15428_v51 = vld [vmem:[#allocation74_spill] sm:$0xff]  ;;  %v972_v23 = vrot.slane %v7360_v13, 2 }
  0xa0   :  { %15413 = vst [vmem:[#allocation31_spill] sm:$0xff] %v7341_v25  ;;  %15415 = vst [vmem:[#allocation32_spill] sm:$0xff] %v7344_v43  ;;  %v7384_v49 = vmul.f32 %v15346_v52, %v15426_v53  ;;  %v15427_v61 = vld [vmem:[#allocation125_spill] sm:$0xff]  ;;  %v7392_v38 = vmul.f32 %v15346_v52, %v15428_v51  ;;  %v15429_v47 = vld [vmem:[#allocation75_spill] sm:$0xff]  ;;  %v977_v3 = vrot.slane %v7372_v14, 2 }
  0xa1   :  { %15418 = vst [vmem:[#allocation33_spill] sm:$0xff] %v7352_v30  ;;  %v7388_v20 = vmul.f32 %v15346_v52, %v15427_v61  ;;  %v7396_v42 = vmul.f32 %v15346_v52, %v15429_v47  ;;  %v15430_v27 = vld [vmem:[#allocation130_spill] sm:$0xff]  ;;  %v15431_v56 = vld [vmem:[#allocation76_spill] sm:$0xff]  ;;  %v15432_v19 = vld [vmem:[#allocation81_spill] sm:$0xff]  ;;  %v979_v15 = vrot.slane %v7376_v8, 2 }
  0xa2   :  { %v7400_v18 = vmul.f32 %v15346_v52, %v15430_v27  ;;  %v7404_v35 = vmul.f32 %v15346_v52, %v15431_v56  ;;  %v7408_v28 = vmul.f32 %v15346_v52, %v15432_v19  ;;  %v15433_v1 = vld [vmem:[#allocation133_spill] sm:$0xff]  ;;  %v15434_v53 = vld [vmem:[#allocation82_spill] sm:$0xff]  ;;  %v15435_v51 = vld [vmem:[#allocation83_spill] sm:$0xff]  ;;  %v982_v9 = vrot.slane %v7384_v49, 2 }
  0xa3   :  { %v7412_v32 = vmul.f32 %v15346_v52, %v15433_v1  ;;  %v7416_v61 = vmul.f32 %v15346_v52, %v15434_v53  ;;  %v7420_v47 = vmul.f32 %v15346_v52, %v15435_v51  ;;  %v15436_v27 = vld [vmem:[#allocation134_spill] sm:$0xff]  ;;  %v15437_v43 = vld [vmem:[#allocation85_spill] sm:$0xff]  ;;  %v15439_v62 = vld [vmem:[#allocation135_spill] sm:$0xff]  ;;  %v986_v13 = vrot.slane %v7392_v38, 2 }
  0xa4   :  { %v7424_v56 = vmul.f32 %v15346_v52, %v15436_v27  ;;  %v7428_v19 = vmul.f32 %v15346_v52, %v15437_v43  ;;  %v15438_v25 = vld [vmem:[#allocation86_spill] sm:$0xff]  ;;  %v7436_v53 = vmul.f32 %v15346_v52, %v15439_v62  ;;  %v15440_v37 = vld [vmem:[#allocation87_spill] sm:$0xff]  ;;  %v15441_v46 = vld [vmem:[#allocation88_spill] sm:$0xff]  ;;  %v989_v29 = vrot.slane %v7400_v18, 2 }
  0xa5   :  { %v7432_v1 = vmul.f32 %v15346_v52, %v15438_v25  ;;  %v7440_v51 = vmul.f32 %v15346_v52, %v15440_v37  ;;  %v7444_v27 = vmul.f32 %v15346_v52, %v15441_v46  ;;  %v15442_v11 = vld [vmem:[#allocation136_spill] sm:$0xff]  ;;  %v15443_v24 = vld [vmem:[#allocation89_spill] sm:$0xff]  ;;  %v15444_v54 = vld [vmem:[#allocation90_spill] sm:$0xff]  ;;  %v994_v14 = vrot.slane %v7412_v32, 2 }
  0xa6   :  { %v7448_v43 = vmul.f32 %v15346_v52, %v15442_v11  ;;  %v7452_v25 = vmul.f32 %v15346_v52, %v15443_v24  ;;  %v7456_v62 = vmul.f32 %v15346_v52, %v15444_v54  ;;  %v15445_v4 = vld [vmem:[#allocation137_spill] sm:$0xff]  ;;  %v15446_v44 = vld [vmem:[#allocation95_spill] sm:$0xff]  ;;  %v15447_v55 = vld [vmem:[#allocation96_spill] sm:$0xff]  ;;  %v996_v8 = vrot.slane %v7416_v61, 2 }
  0xa7   :  { %v7460_v37 = vmul.f32 %v15346_v52, %v15445_v4  ;;  %v7464_v46 = vmul.f32 %v15346_v52, %v15446_v44  ;;  %v7468_v11 = vmul.f32 %v15346_v52, %v15447_v55  ;;  %v15448_v10 = vld [vmem:[#allocation138_spill] sm:$0xff]  ;;  %v15449_v12 = vld [vmem:[#allocation97_spill] sm:$0xff]  ;;  %v15450_v45 = vld [vmem:[#allocation104_spill] sm:$0xff]  ;;  %v999_v49 = vrot.slane %v7424_v56, 2 }
  0xa8   :  { %v7472_v24 = vmul.f32 %v15346_v52, %v15448_v10  ;;  %v7476_v54 = vmul.f32 %v15346_v52, %v15449_v12  ;;  %v7480_v4 = vmul.f32 %v15346_v52, %v15450_v45  ;;  %v15451_v36 = vld [vmem:[#allocation139_spill] sm:$0xff]  ;;  %v15452_v60 = vld [vmem:[#allocation105_spill] sm:$0xff]  ;;  %v15453_v17 = vld [vmem:[#allocation106_spill] sm:$0xff]  ;;  %v1001_v38 = vrot.slane %v7428_v19, 2 }
  0xa9   :  { %v7484_v44 = vmul.f32 %v15346_v52, %v15451_v36  ;;  %v7488_v55 = vmul.f32 %v15346_v52, %v15452_v60  ;;  %v7492_v10 = vmul.f32 %v15346_v52, %v15453_v17  ;;  %v15454_v39 = vld [vmem:[#allocation140_spill] sm:$0xff]  ;;  %v15455_v58 = vld [vmem:[#allocation111_spill] sm:$0xff]  ;;  %v15457_v60 = vld [vmem:[#allocation141_spill] sm:$0xff]  ;;  %v1004_v18 = vrot.slane %v7436_v53, 2 }
  0xaa   :  { %v7496_v12 = vmul.f32 %v15346_v52, %v15454_v39  ;;  %v7500_v45 = vmul.f32 %v15346_v52, %v15455_v58  ;;  %v15456_v36 = vld [vmem:[#allocation112_spill] sm:$0xff]  ;;  %v7509_v21 = vmul.f32 %v15346_v52, %v15457_v60  ;;  %v15458_v17 = vld [vmem:[#allocation113_spill] sm:$0xff]  ;;  %v15459_v39 = vld [vmem:[#allocation118_spill] sm:$0xff]  ;;  %v980_v32 = vsel %vm885_vm2, %v977_v3, %v979_v15 }
  0xab   :  { %v7505_v41 = vmul.f32 %v15346_v52, %v15456_v36  ;;  %v7513_v22 = vmul.f32 %v15346_v52, %v15458_v17  ;;  %v7517_v34 = vmul.f32 %v15346_v52, %v15459_v39  ;;  %v15460_v58 = vld [vmem:[#allocation142_spill] sm:$0xff]  ;;  %v15461_v40 = vld [vmem:[#allocation119_spill] sm:$0xff]  ;;  %v15462_v26 = vld [vmem:[#allocation120_spill] sm:$0xff]  ;;  %v971_v39 = vrot.slane %v7356_v57, 2 }
  0xac   :  { %v7521_v7 = vmul.f32 %v15346_v52, %v15460_v58  ;;  %v7525_v36 = vmul.f32 %v15346_v52, %v15461_v40  ;;  %v7529_v60 = vmul.f32 %v15346_v52, %v15462_v26  ;;  %v15463_v17 = vld [vmem:[#allocation143_spill] sm:$0xff]  ;;  %v974_v58 = vrot.slane %v7364_v33, 2  ;;  %v7908_v30 = vld [vmem:[%s14611_s0 + $0xe0] sm:$0xff] }
  0xad   :  { %v7534_v5 = vmul.f32 %v15346_v52, %v15463_v17  ;;  %v7542_v40 = vsel %vm885_vm2, %v14720_v0, %v969_v63  ;;  %v976_v26 = vrot.slane %v7368_v31, 2  ;;  %v981_v17 = vrot.slane %v7380_v59, 2  ;;  %15542 = vst [vmem:[#allocation82_spill] sm:$0xff] %v7908_v30 }
  0xae   :  { %v984_v57 = vrot.slane %v7388_v20, 2  ;;  %v987_v33 = vrot.slane %v7396_v42, 2  ;;  %v991_v63 = vrot.slane %v7404_v35, 2  ;;  %v992_v31 = vrot.slane %v7408_v28, 2 }
  0xaf   :  { %v997_v59 = vrot.slane %v7420_v47, 2  ;;  %v973_v20 = vsel %vm885_vm2, %v971_v39, %v972_v23  ;;  %v1002_v42 = vrot.slane %v7432_v1, 2  ;;  %v975_v35 = vsel %vm885_vm2, %v972_v23, %v974_v58 }
  0xb0   :  { %v978_v28 = vsel %vm885_vm2, %v976_v26, %v977_v3  ;;  %v983_v61 = vsel %vm885_vm2, %v981_v17, %v982_v9  ;;  %v985_v47 = vsel %vm885_vm2, %v982_v9, %v984_v57  ;;  %v988_v56 = vsel %vm885_vm2, %v986_v13, %v987_v33 }
  0xb1   :  { %v990_v39 = vsel %vm885_vm2, %v987_v33, %v989_v29  ;;  %v993_v19 = vsel %vm885_vm2, %v991_v63, %v992_v31  ;;  %v995_v1 = vsel %vm885_vm2, %v992_v31, %v994_v14  ;;  %v998_v53 = vsel %vm885_vm2, %v996_v8, %v997_v59 }
  0xb2   :  { %v1000_v23 = vsel %vm885_vm2, %v997_v59, %v999_v49  ;;  %v1006_v58 = vrot.slane %v7440_v51, 2  ;;  %v1003_v15 = vsel %vm885_vm2, %v1001_v38, %v1002_v42  ;;  %v1005_v3 = vsel %vm885_vm2, %v1002_v42, %v1004_v18 }
  0xb3   :  { %v1007_v9 = vrot.slane %v7444_v27, 2  ;;  %v1009_v26 = vrot.slane %v7448_v43, 2  ;;  %v1011_v29 = vrot.slane %v7452_v25, 2  ;;  %v1012_v17 = vrot.slane %v7456_v62, 2 }
  0xb4   :  { %v1014_v57 = vrot.slane %v7460_v37, 2  ;;  %v1016_v13 = vrot.slane %v7464_v46, 2  ;;  %v1017_v33 = vrot.slane %v7468_v11, 2  ;;  %v1019_v51 = vrot.slane %v7472_v24, 2 }
  0xb5   :  { %v1021_v63 = vrot.slane %v7476_v54, 2  ;;  %v1022_v31 = vrot.slane %v7480_v4, 2  ;;  %v1024_v27 = vrot.slane %v7484_v44, 2  ;;  %v1026_v43 = vrot.slane %v7488_v55, 2 }
  0xb6   :  { %v1027_v25 = vrot.slane %v7492_v10, 2  ;;  %v1029_v62 = vrot.slane %v7496_v12, 2  ;;  %v1031_v37 = vrot.slane %v7500_v45, 2  ;;  %v1032_v46 = vrot.slane %v7505_v41, 2 }
  0xb7   :  { %v1034_v11 = vrot.slane %v7509_v21, 2  ;;  %v1036_v24 = vrot.slane %v7513_v22, 2  ;;  %v1037_v54 = vrot.slane %v7517_v34, 2  ;;  %v1039_v4 = vrot.slane %v7521_v7, 2 }
  0xb8   :  { %v1041_v44 = vrot.slane %v7525_v36, 2  ;;  %v1042_v55 = vrot.slane %v7529_v60, 2  ;;  %v1008_v10 = vsel %vm885_vm2, %v1006_v58, %v1007_v9  ;;  %v1010_v12 = vsel %vm885_vm2, %v1007_v9, %v1009_v26 }
  0xb9   :  { %v1013_v45 = vsel %vm885_vm2, %v1011_v29, %v1012_v17  ;;  %v1044_v41 = vrot.slane %v7534_v5, 2  ;;  %v1015_v21 = vsel %vm885_vm2, %v1012_v17, %v1014_v57  ;;  %v1018_v22 = vsel %vm885_vm2, %v1016_v13, %v1017_v33  ;;  %v15464_v29 = vld [vmem:[#allocation144_spill] sm:$0xff]  ;;  %v15465_v57 = vld [vmem:[#allocation145_spill] sm:$0xff] }
  0xba   :  { %v1020_v34 = vsel %vm885_vm2, %v1017_v33, %v1019_v51  ;;  %v1023_v7 = vsel %vm885_vm2, %v1021_v63, %v1022_v31  ;;  %v1025_v36 = vsel %vm885_vm2, %v1022_v31, %v1024_v27  ;;  %v1028_v60 = vsel %vm885_vm2, %v1026_v43, %v1027_v25  ;;  %v15466_v33 = vld [vmem:[#allocation146_spill] sm:$0xff] }
  0xbb   :  { %v1030_v14 = vsel %vm885_vm2, %v1027_v25, %v1029_v62  ;;  %v1033_v8 = vsel %vm885_vm2, %v1031_v37, %v1032_v46  ;;  %v1035_v59 = vsel %vm885_vm2, %v1032_v46, %v1034_v11  ;;  %v1038_v5 = vsel %vm885_vm2, %v1036_v24, %v1037_v54 }
  0xbc   :  { %v1040_v49 = vsel %vm885_vm2, %v1037_v54, %v1039_v4  ;;  %v1043_v38 = vsel %vm885_vm2, %v1041_v44, %v1042_v55  ;;  %v1045_v42 = vsel %vm885_vm2, %v1042_v55, %v1044_v41  ;;  %v7618_v18 = vadd.f32 %v7542_v40, %v6786_v2  ;;  %v15467_v2 = vld [vmem:[#allocation91_spill] sm:$0xff]  ;;  %v15482_v4 = vld [vmem:[#allocation117_spill] sm:$0xff] }
  0xbd   :  { %v7621_v58 = vadd.f32 %v973_v20, %v6789_v16  ;;  %v7624_v9 = vadd.f32 %v975_v35, %v6792_v6  ;;  %v7627_v26 = vadd.f32 %v978_v28, %v6795_v50  ;;  %v7630_v17 = vadd.f32 %v980_v32, %v15464_v29  ;;  %v15468_v16 = vld [vmem:[#allocation92_spill] sm:$0xff]  ;;  %v15469_v6 = vld [vmem:[#allocation93_spill] sm:$0xff]  ;;  %v15470_v50 = vld [vmem:[#allocation94_spill] sm:$0xff] }
  0xbe   :  { %v7633_v13 = vadd.f32 %v983_v61, %v15465_v57  ;;  %v7636_v51 = vadd.f32 %v985_v47, %v15466_v33  ;;  %v7639_v40 = vadd.f32 %v988_v56, %v15467_v2  ;;  %v7642_v20 = vadd.f32 %v990_v39, %v15468_v16  ;;  %v15471_v32 = vld [vmem:[#allocation98_spill] sm:$0xff]  ;;  %v15472_v61 = vld [vmem:[#allocation99_spill] sm:$0xff]  ;;  %v15473_v47 = vld [vmem:[#allocation100_spill] sm:$0xff] }
  0xbf   :  { %v7645_v35 = vadd.f32 %v993_v19, %v15469_v6  ;;  %v7648_v28 = vadd.f32 %v995_v1, %v15470_v50  ;;  %v7651_v63 = vadd.f32 %v998_v53, %v15471_v32  ;;  %v7654_v31 = vadd.f32 %v1000_v23, %v15472_v61  ;;  %v15474_v56 = vld [vmem:[#allocation101_spill] sm:$0xff]  ;;  %v15475_v39 = vld [vmem:[#allocation107_spill] sm:$0xff]  ;;  %v15476_v19 = vld [vmem:[#allocation108_spill] sm:$0xff] }
  0xc0   :  { %v7657_v27 = vadd.f32 %v1003_v15, %v15473_v47  ;;  %v7660_v43 = vadd.f32 %v1005_v3, %v15474_v56  ;;  %v7663_v25 = vadd.f32 %v1008_v10, %v15475_v39  ;;  %v7666_v62 = vadd.f32 %v1010_v12, %v15476_v19  ;;  %v15477_v1 = vld [vmem:[#allocation109_spill] sm:$0xff]  ;;  %v15478_v53 = vld [vmem:[#allocation110_spill] sm:$0xff]  ;;  %v15480_v15 = vld [vmem:[#allocation115_spill] sm:$0xff] }
  0xc1   :  { %v7669_v37 = vadd.f32 %v1013_v45, %v15477_v1  ;;  %v7672_v46 = vadd.f32 %v1015_v21, %v15478_v53  ;;  %v15479_v23 = vld [vmem:[#allocation114_spill] sm:$0xff]  ;;  %v7678_v24 = vadd.f32 %v1020_v34, %v15480_v15  ;;  %v15481_v3 = vld [vmem:[#allocation116_spill] sm:$0xff]  ;;  %v7684_v44 = vadd.f32 %v1025_v36, %v15482_v4  ;;  %v15483_v55 = vld [vmem:[#allocation121_spill] sm:$0xff] }
  0xc2   :  { %v7675_v11 = vadd.f32 %v1018_v22, %v15479_v23  ;;  %v7681_v54 = vadd.f32 %v1023_v7, %v15481_v3  ;;  %v7687_v10 = vadd.f32 %v1028_v60, %v15483_v55  ;;  %v15484_v12 = vld [vmem:[#allocation122_spill] sm:$0xff]  ;;  %v15485_v41 = vld [vmem:[#allocation123_spill] sm:$0xff]  ;;  %v15487_v22 = vld [vmem:[#allocation124_spill] sm:$0xff] }
  0xc3   :  { %v7690_v45 = vadd.f32 %v1030_v14, %v15484_v12  ;;  %v7693_v21 = vadd.f32 %v1033_v8, %v15485_v41  ;;  %v7696_v29 = vadd.f32 %v1035_v59, %v15487_v22  ;;  %v15489_v34 = vld [vmem:[#allocation126_spill] sm:$0xff]  ;;  %v15491_v7 = vld [vmem:[#allocation127_spill] sm:$0xff]  ;;  %v15493_v36 = vld [vmem:[#allocation128_spill] sm:$0xff] }
  0xc4   :  { %v7699_v57 = vadd.f32 %v1038_v5, %v15489_v34  ;;  %v7702_v33 = vadd.f32 %v1040_v49, %v15491_v7  ;;  %v7705_v2 = vadd.f32 %v1043_v38, %v15493_v36  ;;  %v15495_v60 = vld [vmem:[#allocation129_spill] sm:$0xff]  ;;  %v5456_v14 = vld [vmem:[%s14611_s0 + $0x8] sm:$0xff]  ;;  %v15500_v50 = vld [vmem:[#allocation148_spill] sm:$0xff] }
  0xc5   :  { %15486 = vst [vmem:[#allocation38_spill] sm:$0xff] %v7693_v21  ;;  %15488 = vst [vmem:[#allocation39_spill] sm:$0xff] %v7696_v29  ;;  %v7708_v16 = vadd.f32 %v1045_v42, %v15495_v60  ;;  %v7714_v8 = vmul.f32 %v5456_v14, %v15346_v52  ;;  %v15497_v59 = vld [vmem:[#allocation147_spill] sm:$0xff]  ;;  %v7723_v49 = vld [vmem:[%s14611_s0 + $0x18] sm:$0xff]  ;;  %v7740_v32 = vmul.f32 %v15346_v52, %v15500_v50 }
  0xc6   :  { %15490 = vst [vmem:[#allocation40_spill] sm:$0xff] %v7699_v57  ;;  %15492 = vst [vmem:[#allocation41_spill] sm:$0xff] %v7702_v33  ;;  %v7718_v5 = vmul.f32 %v15346_v52, %v15497_v59  ;;  %v7727_v38 = vmul.f32 %v7723_v49, %v15346_v52  ;;  %v7732_v42 = vld [vmem:[%s14611_s0 + $0x20] sm:$0xff]  ;;  %v7745_v61 = vld [vmem:[%s14611_s0 + $0x30] sm:$0xff] }
  0xc7   :  { %15494 = vst [vmem:[#allocation46_spill] sm:$0xff] %v7705_v2  ;;  %15496 = vst [vmem:[#allocation47_spill] sm:$0xff] %v7708_v16  ;;  %v7736_v6 = vmul.f32 %v7732_v42, %v15346_v52  ;;  %v7749_v47 = vmul.f32 %v7745_v61, %v15346_v52  ;;  %v7754_v56 = vld [vmem:[%s14611_s0 + $0x38] sm:$0xff]  ;;  %v7767_v53 = vld [vmem:[%s14611_s0 + $0x48] sm:$0xff] }
  0xc8   :  { %15498 = vst [vmem:[#allocation48_spill] sm:$0xff] %v7723_v49  ;;  %15499 = vst [vmem:[#allocation49_spill] sm:$0xff] %v7732_v42  ;;  %v7758_v39 = vmul.f32 %v7754_v56, %v15346_v52  ;;  %v15503_v19 = vld [vmem:[#allocation149_spill] sm:$0xff]  ;;  %v7771_v23 = vmul.f32 %v7767_v53, %v15346_v52  ;;  %v7776_v15 = vld [vmem:[%s14611_s0 + $0x50] sm:$0xff]  ;;  %v891_v2 = vrot.slane %v7727_v38, 2 }
  0xc9   :  { %15501 = vst [vmem:[#allocation54_spill] sm:$0xff] %v7745_v61  ;;  %15502 = vst [vmem:[#allocation55_spill] sm:$0xff] %v7754_v56  ;;  %v7762_v1 = vmul.f32 %v15346_v52, %v15503_v19  ;;  %v7780_v3 = vmul.f32 %v7776_v15, %v15346_v52  ;;  %v15508_v4 = vld [vmem:[#allocation150_spill] sm:$0xff]  ;;  %v7798_v22 = vld [vmem:[%s14611_s0 + $0x68] sm:$0xff]  ;;  %v896_v33 = vrot.slane %v7749_v47, 2 }
  0xca   :  { %15504 = vst [vmem:[#allocation56_spill] sm:$0xff] %v7767_v53  ;;  %15505 = vst [vmem:[#allocation57_spill] sm:$0xff] %v7771_v23  ;;  %v7784_v55 = vmul.f32 %v15346_v52, %v15508_v4  ;;  %v7789_v12 = vld [vmem:[%s14611_s0 + $0x60] sm:$0xff]  ;;  %v7802_v34 = vmul.f32 %v7798_v22, %v15346_v52  ;;  %v15514_v7 = vld [vmem:[#allocation151_spill] sm:$0xff]  ;;  %v897_v57 = vrot.slane %v7758_v39, 2 }
  0xcb   :  { %15506 = vst [vmem:[#allocation62_spill] sm:$0xff] %v7776_v15  ;;  %15507 = vst [vmem:[#allocation63_spill] sm:$0xff] %v7780_v3  ;;  %v7793_v41 = vmul.f32 %v7789_v12, %v15346_v52  ;;  %v7806_v36 = vmul.f32 %v15346_v52, %v15514_v7  ;;  %v7811_v60 = vld [vmem:[%s14611_s0 + $0x78] sm:$0xff]  ;;  %v7820_v59 = vld [vmem:[%s14611_s0 + $0x80] sm:$0xff] }
  0xcc   :  { %15509 = vst [vmem:[#allocation64_spill] sm:$0xff] %v7784_v55  ;;  %15510 = vst [vmem:[#allocation65_spill] sm:$0xff] %v7789_v12  ;;  %v7815_v14 = vmul.f32 %v7811_v60, %v15346_v52  ;;  %v7824_v50 = vmul.f32 %v7820_v59, %v15346_v52  ;;  %v15520_v19 = vld [vmem:[#allocation6_spill] sm:$0xff]  ;;  %v7833_v7 = vld [vmem:[%s14611_s0 + $0x90] sm:$0xff] }
  0xcd   :  { %15511 = vst [vmem:[#allocation70_spill] sm:$0xff] %v7793_v41  ;;  %15512 = vst [vmem:[#allocation71_spill] sm:$0xff] %v7798_v22  ;;  %v7828_v4 = vmul.f32 %v15346_v52, %v15520_v19  ;;  %v7837_v0 = vmul.f32 %v7833_v7, %v15346_v52  ;;  %v15526_v19 = vld [vmem:[#allocation4_spill] sm:$0xff]  ;;  %v7855_v12 = vld [vmem:[%s14611_s0 + $0xa8] sm:$0xff] }
  0xce   :  { %15513 = vst [vmem:[#allocation72_spill] sm:$0xff] %v7802_v34  ;;  %15515 = vst [vmem:[#allocation73_spill] sm:$0xff] %v7806_v36  ;;  %v7850_v22 = vmul.f32 %v15346_v52, %v15526_v19  ;;  %v7864_v15 = vld [vmem:[%s14611_s0 + $0xb0] sm:$0xff]  ;;  %v15532_v19 = vld [vmem:[#allocation7_spill] sm:$0xff] }
  0xcf   :  { %15516 = vst [vmem:[#allocation77_spill] sm:$0xff] %v7811_v60  ;;  %15517 = vst [vmem:[#allocation78_spill] sm:$0xff] %v7815_v14  ;;  %v7842_v60 = vld [vmem:[%s14611_s0 + $0x98] sm:$0xff]  ;;  %v7872_v53 = vmul.f32 %v15346_v52, %v15532_v19  ;;  %v7877_v56 = vld [vmem:[%s14611_s0 + $0xc0] sm:$0xff] }
  0xd0   :  { %15518 = vst [vmem:[#allocation79_spill] sm:$0xff] %v7820_v59  ;;  %15519 = vst [vmem:[#allocation80_spill] sm:$0xff] %v7824_v50  ;;  %v7846_v59 = vmul.f32 %v7842_v60, %v15346_v52  ;;  %v7886_v61 = vld [vmem:[%s14611_s0 + $0xc8] sm:$0xff]  ;;  %v15538_v19 = vld [vmem:[#allocation8_spill] sm:$0xff] }
  0xd1   :  { %15521 = vst [vmem:[#allocation84_spill] sm:$0xff] %v7828_v4  ;;  %15522 = vst [vmem:[#allocation5_spill] sm:$0xff] %v7833_v7  ;;  %v7859_v7 = vmul.f32 %v7855_v12, %v15346_v52  ;;  %v7894_v42 = vmul.f32 %v15346_v52, %v15538_v19  ;;  %v7899_v49 = vld [vmem:[%s14611_s0 + $0xd8] sm:$0xff]  ;;  %v7921_v16 = vld [vmem:[%s14611_s0 + $0xf0] sm:$0xff] }
  0xd2   :  { %15523 = vst [vmem:[#allocation59_spill] sm:$0xff] %v7837_v0  ;;  %15524 = vst [vmem:[#allocation60_spill] sm:$0xff] %v7842_v60  ;;  %v7868_v60 = vmul.f32 %v7864_v15, %v15346_v52  ;;  %v15544_v19 = vld [vmem:[#allocation9_spill] sm:$0xff]  ;;  %v8040_v47 = vld [vmem:[%s14611_s0 + $0x168] sm:$0xff] }
  0xd3   :  { %15525 = vst [vmem:[#allocation61_spill] sm:$0xff] %v7846_v59  ;;  %15527 = vst [vmem:[#allocation102_spill] sm:$0xff] %v7850_v22  ;;  %v15568_v29 = vld [vmem:[#allocation13_spill] sm:$0xff]  ;;  %v8044_v39 = vmul.f32 %v8040_v47, %v15346_v52  ;;  %v8304_v50 = vld [vmem:[%s14611_s0 + $0x308] sm:$0xff] }
  0xd4   :  { %15528 = vst [vmem:[#allocation66_spill] sm:$0xff] %v7855_v12  ;;  %15529 = vst [vmem:[#allocation67_spill] sm:$0xff] %v7859_v7  ;;  %v7881_v12 = vmul.f32 %v7877_v56, %v15346_v52  ;;  %v8311_v36 = vld [vmem:[%s14611_s0 + $0x318] sm:$0xff]  ;;  %v8318_v41 = vld [vmem:[%s14611_s0 + $0x320] sm:$0xff] }
  0xd5   :  { %15530 = vst [vmem:[#allocation103_spill] sm:$0xff] %v7864_v15  ;;  %15531 = vst [vmem:[#allocation68_spill] sm:$0xff] %v7868_v60  ;;  %v7890_v15 = vmul.f32 %v7886_v61, %v15346_v52 }
  0xd6   :  { %15533 = vst [vmem:[#allocation69_spill] sm:$0xff] %v7872_v53  ;;  %15534 = vst [vmem:[#allocation125_spill] sm:$0xff] %v7877_v56  ;;  %v7903_v56 = vmul.f32 %v7899_v49, %v15346_v52 }
  0xd7   :  { %15535 = vst [vmem:[#allocation74_spill] sm:$0xff] %v7881_v12  ;;  %15536 = vst [vmem:[#allocation75_spill] sm:$0xff] %v7886_v61  ;;  %v7912_v61 = vmul.f32 %v7908_v30, %v15346_v52 }
  0xd8   :  { %15537 = vst [vmem:[#allocation130_spill] sm:$0xff] %v7890_v15  ;;  %15539 = vst [vmem:[#allocation76_spill] sm:$0xff] %v7894_v42  ;;  %v7916_v42 = vmul.f32 %v15346_v52, %v15544_v19  ;;  %v15550_v19 = vld [vmem:[#allocation10_spill] sm:$0xff] }
  0xd9   :  { %15540 = vst [vmem:[#allocation81_spill] sm:$0xff] %v7899_v49  ;;  %15541 = vst [vmem:[#allocation133_spill] sm:$0xff] %v7903_v56  ;;  %v7925_v49 = vmul.f32 %v7921_v16, %v15346_v52  ;;  %v7930_v56 = vld [vmem:[%s14611_s0 + $0xf8] sm:$0xff] }
  0xda   :  { %15543 = vst [vmem:[#allocation83_spill] sm:$0xff] %v7912_v61  ;;  %15545 = vst [vmem:[#allocation134_spill] sm:$0xff] %v7916_v42  ;;  %v7934_v30 = vmul.f32 %v7930_v56, %v15346_v52  ;;  %v7938_v42 = vmul.f32 %v15346_v52, %v15550_v19  ;;  %v7943_v61 = vld [vmem:[%s14611_s0 + $0x108] sm:$0xff] }
  0xdb   :  { %15546 = vst [vmem:[#allocation85_spill] sm:$0xff] %v7921_v16  ;;  %15547 = vst [vmem:[#allocation86_spill] sm:$0xff] %v7925_v49  ;;  %v7947_v16 = vmul.f32 %v7943_v61, %v15346_v52  ;;  %v7952_v49 = vld [vmem:[%s14611_s0 + $0x110] sm:$0xff]  ;;  %v15556_v19 = vld [vmem:[#allocation11_spill] sm:$0xff] }
  0xdc   :  { %15548 = vst [vmem:[#allocation135_spill] sm:$0xff] %v7930_v56  ;;  %15549 = vst [vmem:[#allocation87_spill] sm:$0xff] %v7934_v30  ;;  %v7956_v56 = vmul.f32 %v7952_v49, %v15346_v52  ;;  %v7965_v30 = vld [vmem:[%s14611_s0 + $0x120] sm:$0xff] }
  0xdd   :  { %15551 = vst [vmem:[#allocation88_spill] sm:$0xff] %v7938_v42  ;;  %15552 = vst [vmem:[#allocation136_spill] sm:$0xff] %v7943_v61  ;;  %v7960_v42 = vmul.f32 %v15346_v52, %v15556_v19  ;;  %v7969_v61 = vmul.f32 %v7965_v30, %v15346_v52  ;;  %v15562_v19 = vld [vmem:[#allocation12_spill] sm:$0xff] }
  0xde   :  { %15553 = vst [vmem:[#allocation89_spill] sm:$0xff] %v7947_v16  ;;  %15554 = vst [vmem:[#allocation90_spill] sm:$0xff] %v7952_v49  ;;  %v7974_v16 = vld [vmem:[%s14611_s0 + $0x128] sm:$0xff] }
  0xdf   :  { %15555 = vst [vmem:[#allocation137_spill] sm:$0xff] %v7956_v56  ;;  %15557 = vst [vmem:[#allocation95_spill] sm:$0xff] %v7960_v42  ;;  %v7978_v49 = vmul.f32 %v7974_v16, %v15346_v52  ;;  %v7982_v42 = vmul.f32 %v15346_v52, %v15562_v19  ;;  %v7987_v56 = vld [vmem:[%s14611_s0 + $0x138] sm:$0xff]  ;;  %v886_v19 = vrot.slane %v7348_v48, 2  ;;  %v8017_v48 = vld [vmem:[%s14611_s0 + $0x150] sm:$0xff] }
  0xe0   :  { %15558 = vst [vmem:[#allocation96_spill] sm:$0xff] %v7965_v30  ;;  %15559 = vst [vmem:[#allocation138_spill] sm:$0xff] %v7969_v61  ;;  %v7991_v30 = vmul.f32 %v7987_v56, %v15346_v52  ;;  %v7996_v61 = vld [vmem:[%s14611_s0 + $0x140] sm:$0xff] }
  0xe1   :  { %15560 = vst [vmem:[#allocation97_spill] sm:$0xff] %v7974_v16  ;;  %15561 = vst [vmem:[#allocation104_spill] sm:$0xff] %v7978_v49  ;;  %v8000_v16 = vmul.f32 %v7996_v61, %v15346_v52  ;;  %v889_v49 = vrot.slane %v7718_v5, 2  ;;  %v8026_v5 = vld [vmem:[%s14611_s0 + $0x158] sm:$0xff] }
  0xe2   :  { %15563 = vst [vmem:[#allocation139_spill] sm:$0xff] %v7982_v42  ;;  %15564 = vst [vmem:[#allocation105_spill] sm:$0xff] %v7987_v56  ;;  %v887_v42 = vrot.slane %v7714_v8, 2  ;;  %v892_v56 = vrot.slane %v7736_v6, 2  ;;  %v8021_v8 = vmul.f32 %v8017_v48, %v15346_v52  ;;  %v8030_v38 = vmul.f32 %v8026_v5, %v15346_v52  ;;  %v15574_v6 = vld [vmem:[#allocation14_spill] sm:$0xff] }
  0xe3   :  { %15565 = vst [vmem:[#allocation106_spill] sm:$0xff] %v7991_v30  ;;  %15566 = vst [vmem:[#allocation140_spill] sm:$0xff] %v7996_v61  ;;  %v894_v30 = vrot.slane %v7740_v32, 2  ;;  %v8012_v61 = vmul.f32 %v15346_v52, %v15568_v29  ;;  %v899_v29 = vrot.slane %v7762_v1, 2  ;;  %v8035_v32 = vmul.f32 %v15346_v52, %v15574_v6  ;;  %v15580_v6 = vld [vmem:[#allocation15_spill] sm:$0xff] }
  0xe4   :  { %15567 = vst [vmem:[#allocation111_spill] sm:$0xff] %v8000_v16  ;;  %15570 = vst [vmem:[#allocation141_spill] sm:$0xff] %v8017_v48  ;;  %v8057_v48 = vmul.f32 %v15346_v52, %v15580_v6  ;;  %v8229_v16 = vld [vmem:[%s14611_s0 + $0x290] sm:$0xff] }
  0xe5   :  { %15569 = vst [vmem:[#allocation112_spill] sm:$0xff] %v8012_v61  ;;  %15571 = vst [vmem:[#allocation113_spill] sm:$0xff] %v8021_v8  ;;  %v15585_v8 = vld [vmem:[#allocation2_spill] sm:$0xff]  ;;  %v8076_v6 = vsel %vm885_vm2, %v892_v56, %v894_v30  ;;  %v8222_v61 = vld [vmem:[%s14611_s0 + $0x288] sm:$0xff] }
  0xe6   :  { %15572 = vst [vmem:[#allocation118_spill] sm:$0xff] %v8026_v5  ;;  %15573 = vst [vmem:[#allocation142_spill] sm:$0xff] %v8030_v38  ;;  %v8049_v5 = vld [vmem:[%s14611_s0 + $0x170] sm:$0xff]  ;;  %v8069_v38 = vsel %vm885_vm2, %v887_v42, %v889_v49  ;;  %v8119_v30 = vld [vmem:[%s14611_s0 + $0x1e0] sm:$0xff] }
  0xe7   :  { %15575 = vst [vmem:[#allocation119_spill] sm:$0xff] %v8035_v32  ;;  %15576 = vst [vmem:[#allocation120_spill] sm:$0xff] %v8040_v47  ;;  %v8053_v1 = vmul.f32 %v8049_v5, %v15346_v52  ;;  %v5487_v32 = vld [vmem:[%s14611_s0 + $0x1b0] sm:$0xff]  ;;  %v8140_v49 = vld [vmem:[%s14611_s0 + $0x200] sm:$0xff] }
  0xe8   :  { %15577 = vst [vmem:[#allocation143_spill] sm:$0xff] %v8044_v39  ;;  %15578 = vst [vmem:[#allocation144_spill] sm:$0xff] %v8049_v5  ;;  %v8063_v47 = vmul.f32 %v5487_v32, %v15346_v52  ;;  %v8066_v39 = vsel %vm885_vm2, %v886_v19, %v887_v42  ;;  %v1176_v5 = vsub.s32 3, %v15585_v8  ;;  %v8083_v32 = vsel %vm885_vm2, %v897_v57, %v899_v29  ;;  %v8098_v29 = vld [vmem:[%s14610_s1] sm:$0xff]  ;;  %v8126_v52 = vld [vmem:[%s14611_s0 + $0x1e8] sm:$0xff] }
  0xe9   :  { %15579 = vst [vmem:[#allocation145_spill] sm:$0xff] %v8053_v1  ;;  %15581 = vst [vmem:[#allocation146_spill] sm:$0xff] %v8057_v48  ;;  %v8073_v1 = vsel %vm885_vm2, %v891_v2, %v892_v56  ;;  %v8079_v48 = vsel %vm885_vm2, %v896_v33, %v897_v57  ;;  %v8112_v2 = vld [vmem:[%s14611_s0 + $0x1d0] sm:$0xff]  ;;  %v8133_v33 = vld [vmem:[%s14611_s0 + $0x1f8] sm:$0xff] }
  0xea   :  { %15582 = vst [vmem:[#allocation91_spill] sm:$0xff] %v8063_v47  ;;  %15583 = vst [vmem:[#allocation92_spill] sm:$0xff] %v8066_v39  ;;  %v8101_v42 = vrot.slane %v8098_v29, %v1176_v5  ;;  %v8215_v47 = vld [vmem:[%s14611_s0 + $0x278] sm:$0xff] }
  0xeb   :  { %15584 = vst [vmem:[#allocation93_spill] sm:$0xff] %v8069_v38  ;;  %15586 = vst [vmem:[#allocation94_spill] sm:$0xff] %v8073_v1 }
  0xec   :  { %15587 = vst [vmem:[#allocation98_spill] sm:$0xff] %v8076_v6  ;;  %15588 = vst [vmem:[#allocation99_spill] sm:$0xff] %v8079_v48  ;;  %v1211_v5 = vmul.f32 %v8112_v2, %v8101_v42  ;;  %v1212_v56 = vmul.f32 %v8119_v30, %v8101_v42  ;;  %v1213_v57 = vmul.f32 %v8126_v52, %v8101_v42 }
  0xed   :  { %15589 = vst [vmem:[#allocation100_spill] sm:$0xff] %v8083_v32  ;;  %15590 = vst [vmem:[#allocation101_spill] sm:$0xff] %v8098_v29  ;;  %v1214_v8 = vmul.f32 %v8133_v33, %v8101_v42  ;;  %v1215_v19 = vmul.f32 %v8140_v49, %v8101_v42  ;;  %v1227_v12 = vmul.f32 %v8229_v16, %v8101_v42 }
  0xee   :  { %15591 = vst [vmem:[#allocation107_spill] sm:$0xff] %v8112_v2  ;;  %15592 = vst [vmem:[#allocation108_spill] sm:$0xff] %v8119_v30  ;;  %v1239_v34 = vmul.f32 %v8318_v41, %v8101_v42  ;;  %v8327_v23 = vadd.f32 %v1211_v5, %v7618_v18  ;;  %v8330_v3 = vadd.f32 %v1212_v56, %v7621_v58 }
  0xef   :  { %15593 = vst [vmem:[#allocation109_spill] sm:$0xff] %v8126_v52  ;;  %15594 = vst [vmem:[#allocation110_spill] sm:$0xff] %v8133_v33  ;;  %v8147_v52 = vld [vmem:[%s14611_s0 + $0x210] sm:$0xff]  ;;  %v8154_v33 = vld [vmem:[%s14611_s0 + $0x218] sm:$0xff]  ;;  %v8336_v21 = vadd.f32 %v1214_v8, %v7627_v26 }
  0xf0   :  { %15595 = vst [vmem:[#allocation114_spill] sm:$0xff] %v8140_v49  ;;  %15596 = vst [vmem:[#allocation115_spill] sm:$0xff] %v8147_v52  ;;  %v1216_v30 = vmul.f32 %v8147_v52, %v8101_v42  ;;  %v1217_v2 = vmul.f32 %v8154_v33, %v8101_v42  ;;  %v8161_v49 = vld [vmem:[%s14611_s0 + $0x228] sm:$0xff]  ;;  %v8168_v52 = vld [vmem:[%s14611_s0 + $0x230] sm:$0xff] }
  0xf1   :  { %15597 = vst [vmem:[#allocation116_spill] sm:$0xff] %v8154_v33  ;;  %15598 = vst [vmem:[#allocation117_spill] sm:$0xff] %v8161_v49  ;;  %v1218_v29 = vmul.f32 %v8161_v49, %v8101_v42  ;;  %v1219_v32 = vmul.f32 %v8168_v52, %v8101_v42  ;;  %v8175_v33 = vld [vmem:[%s14611_s0 + $0x240] sm:$0xff]  ;;  %v8182_v49 = vld [vmem:[%s14611_s0 + $0x248] sm:$0xff] }
  0xf2   :  { %15599 = vst [vmem:[#allocation121_spill] sm:$0xff] %v8168_v52  ;;  %15600 = vst [vmem:[#allocation122_spill] sm:$0xff] %v8175_v33  ;;  %v1220_v48 = vmul.f32 %v8175_v33, %v8101_v42  ;;  %v1221_v6 = vmul.f32 %v8182_v49, %v8101_v42  ;;  %v8189_v52 = vld [vmem:[%s14611_s0 + $0x258] sm:$0xff]  ;;  %v8196_v33 = vld [vmem:[%s14611_s0 + $0x260] sm:$0xff] }
  0xf3   :  { %15601 = vst [vmem:[#allocation123_spill] sm:$0xff] %v8182_v49  ;;  %15602 = vst [vmem:[#allocation124_spill] sm:$0xff] %v8189_v52  ;;  %v1222_v1 = vmul.f32 %v8189_v52, %v8101_v42  ;;  %v1223_v38 = vmul.f32 %v8196_v33, %v8101_v42  ;;  %v8203_v49 = vld [vmem:[%s14611_s0 + $0x270] sm:$0xff]  ;;  %v8348_v18 = vadd.f32 %v1218_v29, %v7639_v40 }
  0xf4   :  { %15603 = vst [vmem:[#allocation126_spill] sm:$0xff] %v8196_v33  ;;  %15604 = vst [vmem:[#allocation127_spill] sm:$0xff] %v8203_v49  ;;  %v1224_v39 = vmul.f32 %v8203_v49, %v8101_v42  ;;  %v8210_v52 = vld [vmem:[%s14611_s0 + $0x330] sm:$0xff]  ;;  %v1225_v33 = vmul.f32 %v8215_v47, %v8101_v42  ;;  %v1226_v49 = vmul.f32 %v8222_v61, %v8101_v42 }
  0xf5   :  { %15605 = vst [vmem:[#allocation128_spill] sm:$0xff] %v8210_v52  ;;  %15606 = vst [vmem:[#allocation129_spill] sm:$0xff] %v8215_v47  ;;  %v8236_v47 = vld [vmem:[%s14611_s0 + $0x2a0] sm:$0xff]  ;;  %v1240_v55 = vmul.f32 %v8101_v42, %v8210_v52  ;;  %v8342_v52 = vadd.f32 %v1216_v30, %v7633_v13  ;;  %v8351_v58 = vadd.f32 %v1219_v32, %v7642_v20 }
  0xf6   :  { %15607 = vst [vmem:[#allocation147_spill] sm:$0xff] %v8222_v61  ;;  %15608 = vst [vmem:[#allocation148_spill] sm:$0xff] %v8229_v16  ;;  %v1228_v15 = vmul.f32 %v8236_v47, %v8101_v42  ;;  %v8243_v61 = vld [vmem:[%s14611_s0 + $0x2a8] sm:$0xff]  ;;  %v8250_v16 = vld [vmem:[%s14611_s0 + $0x2b8] sm:$0xff]  ;;  %v8357_v26 = vadd.f32 %v1221_v6, %v7648_v28  ;;  %v8363_v13 = vadd.f32 %v1223_v38, %v7654_v31 }
  0xf7   :  { %15609 = vst [vmem:[#allocation149_spill] sm:$0xff] %v8236_v47  ;;  %15610 = vst [vmem:[#allocation150_spill] sm:$0xff] %v8243_v61  ;;  %v1229_v53 = vmul.f32 %v8243_v61, %v8101_v42  ;;  %v1230_v7 = vmul.f32 %v8250_v16, %v8101_v42  ;;  %v8257_v47 = vld [vmem:[%s14611_s0 + $0x2c0] sm:$0xff]  ;;  %v8264_v61 = vld [vmem:[%s14611_s0 + $0x2d0] sm:$0xff]  ;;  %v8369_v40 = vadd.f32 %v1225_v33, %v7660_v43 }
  0xf8   :  { %15611 = vst [vmem:[#allocation151_spill] sm:$0xff] %v8250_v16  ;;  %15612 = vst [vmem:[#allocation6_spill] sm:$0xff] %v8257_v47  ;;  %v1231_v60 = vmul.f32 %v8257_v47, %v8101_v42  ;;  %v1232_v22 = vmul.f32 %v8264_v61, %v8101_v42  ;;  %v8271_v16 = vld [vmem:[%s14611_s0 + $0x2d8] sm:$0xff]  ;;  %v8278_v47 = vld [vmem:[%s14611_s0 + $0x2e8] sm:$0xff]  ;;  %v8372_v20 = vadd.f32 %v1226_v49, %v7663_v25 }
  0xf9   :  { %15613 = vst [vmem:[#allocation4_spill] sm:$0xff] %v8264_v61  ;;  %15614 = vst [vmem:[#allocation7_spill] sm:$0xff] %v8271_v16  ;;  %v1233_v0 = vmul.f32 %v8271_v16, %v8101_v42  ;;  %v1234_v59 = vmul.f32 %v8278_v47, %v8101_v42  ;;  %v8285_v61 = vld [vmem:[%s14611_s0 + $0x2f0] sm:$0xff]  ;;  %v8292_v16 = vld [vmem:[%s14611_s0 + $0x300] sm:$0xff]  ;;  %v8378_v28 = vadd.f32 %v1228_v15, %v7669_v37 }
  0xfa   :  { %15615 = vst [vmem:[#allocation8_spill] sm:$0xff] %v8278_v47  ;;  %15616 = vst [vmem:[#allocation9_spill] sm:$0xff] %v8285_v61  ;;  %v1235_v4 = vmul.f32 %v8285_v61, %v8101_v42  ;;  %v1236_v14 = vmul.f32 %v8292_v16, %v8101_v42  ;;  %v8299_v47 = vld [vmem:[%s14611_s0 + $0x338] sm:$0xff]  ;;  %v1237_v61 = vmul.f32 %v8304_v50, %v8101_v42  ;;  %v15673_v49 = vld [vmem:[#allocation80_spill] sm:$0xff] }
  0xfb   :  { %15617 = vst [vmem:[#allocation10_spill] sm:$0xff] %v8292_v16  ;;  %15618 = vst [vmem:[#allocation11_spill] sm:$0xff] %v8299_v47  ;;  %v1238_v16 = vmul.f32 %v8311_v36, %v8101_v42  ;;  %v8384_v31 = vadd.f32 %v1230_v7, %v7675_v11  ;;  %v8390_v43 = vadd.f32 %v1232_v22, %v7681_v54  ;;  %v15649_v11 = vld [vmem:[#allocation39_spill] sm:$0xff]  ;;  %v15653_v54 = vld [vmem:[#allocation41_spill] sm:$0xff] }
  0xfc   :  { %15619 = vst [vmem:[#allocation12_spill] sm:$0xff] %v8304_v50  ;;  %15620 = vst [vmem:[#allocation13_spill] sm:$0xff] %v8311_v36  ;;  %v1241_v50 = vmul.f32 %v8101_v42, %v8299_v47  ;;  %v8333_v36 = vadd.f32 %v1213_v57, %v7624_v9  ;;  %v8345_v47 = vadd.f32 %v1217_v2, %v7636_v51  ;;  %v15674_v2 = vrot.slane %v15673_v49, 2  ;;  %v15675_v30 = vld [vmem:[#allocation78_spill] sm:$0xff]  ;;  %v15677_v57 = vld [vmem:[#allocation84_spill] sm:$0xff] }
  0xfd   :  { %15621 = vst [vmem:[#allocation14_spill] sm:$0xff] %v8318_v41  ;;  %15622 = vst [vmem:[#allocation15_spill] sm:$0xff] %v8327_v23  ;;  %v8339_v41 = vadd.f32 %v1215_v19, %v7630_v17  ;;  %v8354_v9 = vadd.f32 %v1220_v48, %v7645_v35  ;;  %v8360_v17 = vadd.f32 %v1222_v1, %v7651_v63  ;;  %v15676_v33 = vrot.slane %v15675_v30, 2  ;;  %v15791_v23 = vld [vmem:[#allocation125_spill] sm:$0xff] }
  0xfe   :  { %15623 = vst [vmem:[#allocation152_spill] sm:$0xff] %v8330_v3  ;;  %15624 = vst [vmem:[#allocation153_spill] sm:$0xff] %v8333_v36  ;;  %v8366_v51 = vadd.f32 %v1224_v39, %v7657_v27  ;;  %v8375_v35 = vadd.f32 %v1227_v12, %v7666_v62  ;;  %v8381_v63 = vadd.f32 %v1229_v53, %v7672_v46  ;;  %v15647_v46 = vld [vmem:[#allocation38_spill] sm:$0xff]  ;;  %v15678_v29 = vrot.slane %v15677_v57, 2  ;;  %v15790_v36 = vld [vmem:[#allocation103_spill] sm:$0xff] }
  0xff   :  { %15625 = vst [vmem:[#allocation154_spill] sm:$0xff] %v8336_v21  ;;  %15626 = vst [vmem:[#allocation155_spill] sm:$0xff] %v8339_v41  ;;  %v8387_v27 = vadd.f32 %v1231_v60, %v7678_v24  ;;  %v8393_v25 = vadd.f32 %v1233_v0, %v7684_v44  ;;  %v8396_v62 = vadd.f32 %v1234_v59, %v7687_v10  ;;  %v15651_v24 = vld [vmem:[#allocation40_spill] sm:$0xff]  ;;  %v15655_v0 = vld [vmem:[#allocation46_spill] sm:$0xff]  ;;  %v15679_v5 = vmov %v15674_v2 }
 0x100   :  { %15627 = vst [vmem:[#allocation156_spill] sm:$0xff] %v8342_v52  ;;  %15628 = vst [vmem:[#allocation157_spill] sm:$0xff] %v8345_v47  ;;  %v8399_v37 = vadd.f32 %v1235_v4, %v7690_v45  ;;  %v8402_v53 = vadd.f32 %v1236_v14, %v15647_v46  ;;  %v8405_v15 = vadd.f32 %v1237_v61, %v15649_v11  ;;  %v15657_v10 = vld [vmem:[#allocation47_spill] sm:$0xff]  ;;  %v15661_v4 = vld [vmem:[#allocation57_spill] sm:$0xff] }
 0x101   :  { %15629 = vst [vmem:[#allocation158_spill] sm:$0xff] %v8348_v18  ;;  %15630 = vst [vmem:[#allocation159_spill] sm:$0xff] %v8351_v58  ;;  %v8408_v12 = vadd.f32 %v1238_v16, %v15651_v24  ;;  %v8411_v22 = vadd.f32 %v1239_v34, %v15653_v54  ;;  %v8414_v44 = vadd.f32 %v1240_v55, %v15655_v0  ;;  %v15659_v45 = vld [vmem:[#allocation63_spill] sm:$0xff]  ;;  %v15662_v14 = vrot.slane %v15661_v4, 2  ;;  %v15663_v61 = vld [vmem:[#allocation64_spill] sm:$0xff] }
 0x102   :  { %15631 = vst [vmem:[#allocation160_spill] sm:$0xff] %v8354_v9  ;;  %15632 = vst [vmem:[#allocation161_spill] sm:$0xff] %v8357_v26  ;;  %v8417_v60 = vadd.f32 %v1241_v50, %v15657_v10  ;;  %v15660_v59 = vrot.slane %v15659_v45, 2  ;;  %v15664_v48 = vrot.slane %v15663_v61, 2  ;;  %v15666_v34 = vld [vmem:[#allocation72_spill] sm:$0xff]  ;;  %v15668_v39 = vld [vmem:[#allocation70_spill] sm:$0xff]  ;;  %v913_v56 = vsel %vm885_vm2, %v15676_v33, %v15674_v2 }
 0x103   :  { %15633 = vst [vmem:[#allocation162_spill] sm:$0xff] %v8360_v17  ;;  %15634 = vst [vmem:[#allocation163_spill] sm:$0xff] %v8363_v13  ;;  %v15667_v38 = vrot.slane %v15666_v34, 2  ;;  %v15669_v55 = vrot.slane %v15668_v39, 2  ;;  %v15670_v50 = vld [vmem:[#allocation73_spill] sm:$0xff]  ;;  %v915_v46 = vsel %vm885_vm2, %v15679_v5, %v15678_v29  ;;  %v15682_v54 = vld [vmem:[#allocation59_spill] sm:$0xff]  ;;  %v1191_v3 = vmul.f32 %v15790_v36, %v8101_v42 }
 0x104   :  { %15635 = vst [vmem:[#allocation164_spill] sm:$0xff] %v8366_v51  ;;  %15636 = vst [vmem:[#allocation165_spill] sm:$0xff] %v8369_v40  ;;  %v903_v7 = vsel %vm885_vm2, %v15662_v14, %v15660_v59  ;;  %v15665_v16 = vmov %v15660_v59  ;;  %v15671_v6 = vrot.slane %v15670_v50, 2  ;;  %v15680_v11 = vld [vmem:[#allocation61_spill] sm:$0xff]  ;;  %v15683_v0 = vrot.slane %v15682_v54, 2  ;;  %v15684_v45 = vld [vmem:[#allocation102_spill] sm:$0xff] }
 0x105   :  { %15637 = vst [vmem:[#allocation166_spill] sm:$0xff] %v8372_v20  ;;  %15638 = vst [vmem:[#allocation167_spill] sm:$0xff] %v8375_v35  ;;  %v905_v8 = vsel %vm885_vm2, %v15665_v16, %v15664_v48  ;;  %v908_v1 = vsel %vm885_vm2, %v15669_v55, %v15667_v38  ;;  %v15672_v32 = vmov %v15667_v38  ;;  %v15681_v24 = vrot.slane %v15680_v11, 2  ;;  %v15687_v61 = vld [vmem:[#allocation68_spill] sm:$0xff]  ;;  %v15689_v16 = vld [vmem:[#allocation67_spill] sm:$0xff] }
 0x106   :  { %15639 = vst [vmem:[#allocation168_spill] sm:$0xff] %v8378_v28  ;;  %15640 = vst [vmem:[#allocation169_spill] sm:$0xff] %v8381_v63  ;;  %v910_v19 = vsel %vm885_vm2, %v15672_v32, %v15671_v6  ;;  %v15685_v59 = vrot.slane %v15684_v45, 2  ;;  %v15688_v48 = vrot.slane %v15687_v61, 2  ;;  %v15690_v34 = vrot.slane %v15689_v16, 2  ;;  %v15691_v39 = vld [vmem:[#allocation69_spill] sm:$0xff] }
 0x107   :  { %15641 = vst [vmem:[#allocation170_spill] sm:$0xff] %v8384_v31  ;;  %15642 = vst [vmem:[#allocation171_spill] sm:$0xff] %v8387_v27  ;;  %v918_v10 = vsel %vm885_vm2, %v15683_v0, %v15681_v24  ;;  %v15686_v4 = vmov %v15681_v24  ;;  %v15692_v55 = vrot.slane %v15691_v39, 2  ;;  %v15694_v32 = vld [vmem:[#allocation76_spill] sm:$0xff]  ;;  %v15695_v2 = vld [vmem:[#allocation133_spill] sm:$0xff] }
 0x108   :  { %15643 = vst [vmem:[#allocation172_spill] sm:$0xff] %v8390_v43  ;;  %15644 = vst [vmem:[#allocation173_spill] sm:$0xff] %v8393_v25  ;;  %v920_v14 = vsel %vm885_vm2, %v15686_v4, %v15685_v59  ;;  %v923_v38 = vsel %vm885_vm2, %v15690_v34, %v15688_v48  ;;  %v15693_v50 = vmov %v15688_v48  ;;  %v929_v49 = vrot.slane %v15694_v32, 2  ;;  %v15696_v33 = vld [vmem:[#allocation130_spill] sm:$0xff]  ;;  %v15700_v24 = vld [vmem:[#allocation83_spill] sm:$0xff] }
 0x109   :  { %15645 = vst [vmem:[#allocation174_spill] sm:$0xff] %v8396_v62  ;;  %15646 = vst [vmem:[#allocation175_spill] sm:$0xff] %v8399_v37  ;;  %v925_v6 = vsel %vm885_vm2, %v15693_v50, %v15692_v55  ;;  %v931_v30 = vrot.slane %v15695_v2, 2  ;;  %v15697_v57 = vrot.slane %v15696_v33, 2  ;;  %v15698_v29 = vld [vmem:[#allocation74_spill] sm:$0xff]  ;;  %v932_v54 = vrot.slane %v15700_v24, 2 }
 0x10a   :  { %15648 = vst [vmem:[#allocation38_spill] sm:$0xff] %v8402_v53  ;;  %15650 = vst [vmem:[#allocation39_spill] sm:$0xff] %v8405_v15  ;;  %v15699_v5 = vrot.slane %v15698_v29, 2  ;;  %v15701_v0 = vld [vmem:[#allocation134_spill] sm:$0xff]  ;;  %v15703_v48 = vld [vmem:[#allocation87_spill] sm:$0xff] }
 0x10b   :  { %15652 = vst [vmem:[#allocation40_spill] sm:$0xff] %v8408_v12  ;;  %15654 = vst [vmem:[#allocation41_spill] sm:$0xff] %v8411_v22  ;;  %v934_v45 = vrot.slane %v15701_v0, 2  ;;  %v15702_v59 = vld [vmem:[#allocation86_spill] sm:$0xff]  ;;  %v937_v61 = vrot.slane %v15703_v48, 2  ;;  %v15704_v16 = vld [vmem:[#allocation88_spill] sm:$0xff] }
 0x10c   :  { %15656 = vst [vmem:[#allocation46_spill] sm:$0xff] %v8414_v44  ;;  %15658 = vst [vmem:[#allocation47_spill] sm:$0xff] %v8417_v60  ;;  %v928_v11 = vsel %vm885_vm2, %v15699_v5, %v15697_v57  ;;  %v936_v4 = vrot.slane %v15702_v59, 2  ;;  %v939_v34 = vrot.slane %v15704_v16, 2  ;;  %v15705_v39 = vld [vmem:[#allocation89_spill] sm:$0xff]  ;;  %v15707_v2 = vld [vmem:[#allocation95_spill] sm:$0xff] }
 0x10d   :  { %v941_v55 = vrot.slane %v15705_v39, 2  ;;  %v15706_v50 = vld [vmem:[#allocation137_spill] sm:$0xff]  ;;  %v944_v60 = vrot.slane %v15707_v2, 2  ;;  %v15708_v44 = vld [vmem:[#allocation138_spill] sm:$0xff]  ;;  %v15709_v22 = vld [vmem:[#allocation104_spill] sm:$0xff] }
 0x10e   :  { %v942_v32 = vrot.slane %v15706_v50, 2  ;;  %v946_v29 = vrot.slane %v15708_v44, 2  ;;  %v947_v57 = vrot.slane %v15709_v22, 2  ;;  %v15710_v5 = vld [vmem:[#allocation139_spill] sm:$0xff]  ;;  %v15711_v12 = vld [vmem:[#allocation106_spill] sm:$0xff]  ;;  %v15713_v53 = vld [vmem:[#allocation112_spill] sm:$0xff] }
 0x10f   :  { %v949_v24 = vrot.slane %v15710_v5, 2  ;;  %v951_v0 = vrot.slane %v15711_v12, 2  ;;  %v15712_v15 = vld [vmem:[#allocation111_spill] sm:$0xff]  ;;  %v954_v48 = vrot.slane %v15713_v53, 2  ;;  %v15714_v37 = vld [vmem:[#allocation113_spill] sm:$0xff]  ;;  %v15715_v62 = vld [vmem:[#allocation142_spill] sm:$0xff]  ;;  %v933_v12 = vsel %vm885_vm2, %v931_v30, %v932_v54 }
 0x110   :  { %v952_v59 = vrot.slane %v15712_v15, 2  ;;  %v956_v16 = vrot.slane %v15714_v37, 2  ;;  %v957_v39 = vrot.slane %v15715_v62, 2  ;;  %v15716_v25 = vld [vmem:[#allocation119_spill] sm:$0xff]  ;;  %v15718_v27 = vld [vmem:[#allocation145_spill] sm:$0xff]  ;;  %v15719_v22 = vrot.slane %v15696_v33, 2 }
 0x111   :  { %v959_v50 = vrot.slane %v15716_v25, 2  ;;  %v15717_v43 = vld [vmem:[#allocation143_spill] sm:$0xff]  ;;  %v962_v44 = vrot.slane %v15718_v27, 2  ;;  %v15720_v31 = vld [vmem:[#allocation146_spill] sm:$0xff]  ;;  %v935_v37 = vsel %vm885_vm2, %v932_v54, %v934_v45  ;;  %v938_v62 = vsel %vm885_vm2, %v936_v4, %v937_v61  ;;  %v15787_v58 = vld [vmem:[#allocation5_spill] sm:$0xff] }
 0x112   :  { %v961_v2 = vrot.slane %v15717_v43, 2  ;;  %v930_v5 = vsel %vm885_vm2, %v15719_v22, %v929_v49  ;;  %v964_v15 = vrot.slane %v15720_v31, 2  ;;  %v15721_v63 = vld [vmem:[#allocation91_spill] sm:$0xff]  ;;  %v940_v25 = vsel %vm885_vm2, %v937_v61, %v939_v34  ;;  %v15722_v61 = vld [vmem:[#allocation33_spill] sm:$0xff]  ;;  %v15739_v28 = vld [vmem:[#allocation34_spill] sm:$0xff] }
 0x113   :  { %v966_v53 = vrot.slane %v15721_v63, 2  ;;  %v943_v43 = vsel %vm885_vm2, %v941_v55, %v942_v32  ;;  %v945_v27 = vsel %vm885_vm2, %v942_v32, %v944_v60  ;;  %v948_v33 = vsel %vm885_vm2, %v946_v29, %v947_v57  ;;  %v15724_v55 = vld [vmem:[#allocation16_spill] sm:$0xff]  ;;  %v15733_v22 = vld [vmem:[#allocation99_spill] sm:$0xff]  ;;  %v15760_v40 = vld [vmem:[#allocation22_spill] sm:$0xff] }
 0x114   :  { %v950_v49 = vsel %vm885_vm2, %v947_v57, %v949_v24  ;;  %v953_v30 = vsel %vm885_vm2, %v951_v0, %v952_v59  ;;  %v955_v31 = vsel %vm885_vm2, %v952_v59, %v954_v48  ;;  %v958_v63 = vsel %vm885_vm2, %v956_v16, %v957_v39  ;;  %v15725_v32 = vld [vmem:[#allocation92_spill] sm:$0xff]  ;;  %v15726_v57 = vld [vmem:[#allocation18_spill] sm:$0xff]  ;;  %v15727_v24 = vld [vmem:[#allocation93_spill] sm:$0xff] }
 0x115   :  { %v960_v54 = vsel %vm885_vm2, %v957_v39, %v959_v50  ;;  %v963_v45 = vsel %vm885_vm2, %v961_v2, %v962_v44  ;;  %v965_v4 = vsel %vm885_vm2, %v962_v44, %v964_v15  ;;  %v15723_v34 = vrot.slane %v15722_v61, 2  ;;  %v15728_v59 = vld [vmem:[#allocation19_spill] sm:$0xff]  ;;  %v15729_v48 = vld [vmem:[#allocation94_spill] sm:$0xff]  ;;  %v15730_v39 = vld [vmem:[#allocation20_spill] sm:$0xff] }
 0x116   :  { %v8519_v29 = vadd.f32 %v15725_v32, %v15724_v55  ;;  %v8523_v0 = vadd.f32 %v15727_v24, %v15726_v57  ;;  %v8527_v16 = vadd.f32 %v15729_v48, %v15728_v59  ;;  %v15731_v50 = vld [vmem:[#allocation98_spill] sm:$0xff]  ;;  %v15732_v44 = vld [vmem:[#allocation21_spill] sm:$0xff]  ;;  %v15735_v61 = vld [vmem:[#allocation100_spill] sm:$0xff]  ;;  %v1188_v18 = vmul.f32 %v15787_v58, %v8101_v42 }
 0x117   :  { %v968_v60 = vsel %vm885_vm2, %v966_v53, %v15723_v34  ;;  %v8531_v2 = vadd.f32 %v15731_v50, %v15730_v39  ;;  %v8535_v15 = vadd.f32 %v15733_v22, %v15732_v44  ;;  %v15734_v53 = vld [vmem:[#allocation26_spill] sm:$0xff]  ;;  %v15736_v55 = vld [vmem:[#allocation27_spill] sm:$0xff]  ;;  %v15737_v57 = vld [vmem:[#allocation28_spill] sm:$0xff]  ;;  %v8551_v39 = vadd.f32 %v910_v19, %v15739_v28 }
 0x118   :  { %v8539_v34 = vadd.f32 %v15735_v61, %v15734_v53  ;;  %v8542_v32 = vadd.f32 %v903_v7, %v15736_v55  ;;  %v8545_v24 = vadd.f32 %v905_v8, %v15737_v57  ;;  %v15738_v59 = vld [vmem:[#allocation29_spill] sm:$0xff]  ;;  %v15740_v50 = vld [vmem:[#allocation35_spill] sm:$0xff]  ;;  %v15741_v44 = vld [vmem:[#allocation36_spill] sm:$0xff] }
 0x119   :  { %v8548_v48 = vadd.f32 %v908_v1, %v15738_v59  ;;  %v8554_v35 = vadd.f32 %v913_v56, %v15740_v50  ;;  %v8557_v22 = vadd.f32 %v915_v46, %v15741_v44  ;;  %v15742_v53 = vld [vmem:[#allocation37_spill] sm:$0xff]  ;;  %v15743_v7 = vld [vmem:[#allocation42_spill] sm:$0xff]  ;;  %v15744_v8 = vld [vmem:[#allocation43_spill] sm:$0xff] }
 0x11a   :  { %v8560_v61 = vadd.f32 %v918_v10, %v15742_v53  ;;  %v8563_v55 = vadd.f32 %v920_v14, %v15743_v7  ;;  %v8566_v57 = vadd.f32 %v923_v38, %v15744_v8  ;;  %v15745_v1 = vld [vmem:[#allocation44_spill] sm:$0xff]  ;;  %v15746_v28 = vld [vmem:[#allocation45_spill] sm:$0xff]  ;;  %v15747_v56 = vld [vmem:[#allocation131_spill] sm:$0xff] }
 0x11b   :  { %v8569_v59 = vadd.f32 %v925_v6, %v15745_v1  ;;  %v8572_v19 = vadd.f32 %v928_v11, %v15746_v28  ;;  %v8575_v50 = vadd.f32 %v930_v5, %v15747_v56  ;;  %v15748_v46 = vld [vmem:[#allocation50_spill] sm:$0xff]  ;;  %v15749_v10 = vld [vmem:[#allocation51_spill] sm:$0xff]  ;;  %v15751_v8 = vld [vmem:[#allocation52_spill] sm:$0xff] }
 0x11c   :  { %v8578_v44 = vadd.f32 %v933_v12, %v15748_v46  ;;  %v8581_v53 = vadd.f32 %v935_v37, %v15749_v10  ;;  %v15750_v14 = vld [vmem:[#allocation2_spill] sm:$0xff]  ;;  %v8586_v20 = vadd.f32 %v938_v62, %v15751_v8  ;;  %v15752_v6 = vld [vmem:[#allocation53_spill] sm:$0xff]  ;;  %v15753_v11 = vld [vmem:[#allocation3_spill] sm:$0xff] }
 0x11d   :  { %v1308_v7 = vsub.s32 4, %v15750_v14  ;;  %v1792_v38 = vsub.s32 5, %v15750_v14  ;;  %v8589_v1 = vadd.f32 %v940_v25, %v15752_v6  ;;  %v8592_v28 = vadd.f32 %v943_v43, %v15753_v11  ;;  %v15754_v5 = vld [vmem:[#allocation17_spill] sm:$0xff]  ;;  %v15756_v12 = vld [vmem:[#allocation58_spill] sm:$0xff]  ;;  %v15758_v37 = vld [vmem:[#allocation132_spill] sm:$0xff] }
 0x11e   :  { %v8595_v56 = vadd.f32 %v945_v27, %v15754_v5  ;;  %v8598_v46 = vadd.f32 %v948_v33, %v15756_v12  ;;  %v8601_v10 = vadd.f32 %v950_v49, %v15758_v37  ;;  %v8604_v14 = vadd.f32 %v953_v30, %v15760_v40  ;;  %v15762_v62 = vld [vmem:[#allocation23_spill] sm:$0xff]  ;;  %v15764_v25 = vld [vmem:[#allocation24_spill] sm:$0xff]  ;;  %v15766_v43 = vld [vmem:[#allocation25_spill] sm:$0xff] }
 0x11f   :  { %v8607_v8 = vadd.f32 %v955_v31, %v15762_v62  ;;  %v8610_v6 = vadd.f32 %v958_v63, %v15764_v25  ;;  %v8613_v11 = vadd.f32 %v960_v54, %v15766_v43  ;;  %v15768_v27 = vld [vmem:[#allocation30_spill] sm:$0xff]  ;;  %v15770_v33 = vld [vmem:[#allocation31_spill] sm:$0xff]  ;;  %v15772_v49 = vld [vmem:[#allocation32_spill] sm:$0xff] }
 0x120   :  { %15755 = vst [vmem:[#allocation63_spill] sm:$0xff] %v8595_v56  ;;  %15757 = vst [vmem:[#allocation57_spill] sm:$0xff] %v8598_v46  ;;  %v8616_v5 = vadd.f32 %v963_v45, %v15768_v27  ;;  %v8619_v12 = vadd.f32 %v965_v4, %v15770_v33  ;;  %v8622_v37 = vadd.f32 %v968_v60, %v15772_v49  ;;  %v15774_v40 = vld [vmem:[#allocation48_spill] sm:$0xff]  ;;  %v15775_v31 = vld [vmem:[#allocation101_spill] sm:$0xff] }
 0x121   :  { %15759 = vst [vmem:[#allocation64_spill] sm:$0xff] %v8601_v10  ;;  %15761 = vst [vmem:[#allocation72_spill] sm:$0xff] %v8604_v14  ;;  %v1178_v30 = vmul.f32 %v15774_v40, %v8101_v42  ;;  %v8627_v62 = vrot.slane %v15775_v31, %v1308_v7  ;;  %v8630_v63 = vrot.slane %v15775_v31, %v1792_v38  ;;  %v15778_v54 = vld [vmem:[#allocation49_spill] sm:$0xff]  ;;  %v15779_v45 = vld [vmem:[#allocation54_spill] sm:$0xff] }
 0x122   :  { %15763 = vst [vmem:[#allocation70_spill] sm:$0xff] %v8607_v8  ;;  %15765 = vst [vmem:[#allocation73_spill] sm:$0xff] %v8610_v6  ;;  %v1179_v25 = vmul.f32 %v15778_v54, %v8101_v42  ;;  %v1180_v43 = vmul.f32 %v15779_v45, %v8101_v42  ;;  %v15780_v4 = vld [vmem:[#allocation55_spill] sm:$0xff]  ;;  %v15781_v60 = vld [vmem:[#allocation56_spill] sm:$0xff] }
 0x123   :  { %15767 = vst [vmem:[#allocation80_spill] sm:$0xff] %v8613_v11  ;;  %15769 = vst [vmem:[#allocation78_spill] sm:$0xff] %v8616_v5  ;;  %v1181_v27 = vmul.f32 %v15780_v4, %v8101_v42  ;;  %v1182_v33 = vmul.f32 %v15781_v60, %v8101_v42  ;;  %v15782_v49 = vld [vmem:[#allocation62_spill] sm:$0xff]  ;;  %v15783_v7 = vld [vmem:[#allocation65_spill] sm:$0xff] }
 0x124   :  { %15771 = vst [vmem:[#allocation84_spill] sm:$0xff] %v8619_v12  ;;  %15773 = vst [vmem:[#allocation61_spill] sm:$0xff] %v8622_v37  ;;  %v1183_v51 = vmul.f32 %v15782_v49, %v8101_v42  ;;  %v1184_v13 = vmul.f32 %v15783_v7, %v8101_v42  ;;  %v15784_v38 = vld [vmem:[#allocation71_spill] sm:$0xff]  ;;  %v15788_v47 = vld [vmem:[#allocation60_spill] sm:$0xff] }
 0x125   :  { %15776 = vst [vmem:[#allocation59_spill] sm:$0xff] %v8627_v62  ;;  %15777 = vst [vmem:[#allocation102_spill] sm:$0xff] %v8630_v63  ;;  %v1185_v31 = vmul.f32 %v15784_v38, %v8101_v42  ;;  %v15785_v63 = vld [vmem:[#allocation77_spill] sm:$0xff]  ;;  %v15786_v26 = vld [vmem:[#allocation79_spill] sm:$0xff]  ;;  %v1189_v52 = vmul.f32 %v15788_v47, %v8101_v42  ;;  %v1192_v38 = vmul.f32 %v15791_v23, %v8101_v42 }
 0x126   :  { %v1186_v17 = vmul.f32 %v15785_v63, %v8101_v42  ;;  %v1187_v9 = vmul.f32 %v15786_v26, %v8101_v42  ;;  %v15789_v41 = vld [vmem:[#allocation66_spill] sm:$0xff]  ;;  %v15792_v63 = vld [vmem:[#allocation75_spill] sm:$0xff]  ;;  %v15793_v26 = vld [vmem:[#allocation81_spill] sm:$0xff]  ;;  %v8727_v56 = vadd.f32 %v1183_v51, %v8539_v34 }
 0x127   :  { %v1190_v21 = vmul.f32 %v15789_v41, %v8101_v42  ;;  %v1193_v7 = vmul.f32 %v15792_v63, %v8101_v42  ;;  %v1194_v49 = vmul.f32 %v15793_v26, %v8101_v42  ;;  %v8667_v58 = vld [vmem:[%s14611_s0 + $0x180] sm:$0xff]  ;;  %v15796_v60 = vld [vmem:[#allocation85_spill] sm:$0xff]  ;;  %v15797_v4 = vld [vmem:[#allocation135_spill] sm:$0xff]  ;;  %v8754_v34 = vadd.f32 %v1192_v38, %v8566_v57 }
 0x128   :  { %15794 = vst [vmem:[#allocation68_spill] sm:$0xff] %v8667_v58  ;;  %v15795_v47 = vld [vmem:[#allocation82_spill] sm:$0xff]  ;;  %v1196_v36 = vmul.f32 %v15796_v60, %v8101_v42  ;;  %v1197_v23 = vmul.f32 %v15797_v4, %v8101_v42  ;;  %v15798_v45 = vld [vmem:[#allocation136_spill] sm:$0xff]  ;;  %v15801_v37 = vld [vmem:[#allocation97_spill] sm:$0xff]  ;;  %v1208_v10 = vmul.f32 %v8101_v42, %v8667_v58  ;;  %v8721_v58 = vadd.f32 %v1181_v27, %v8531_v2 }
 0x129   :  { %v1195_v41 = vmul.f32 %v15795_v47, %v8101_v42  ;;  %v1198_v63 = vmul.f32 %v15798_v45, %v8101_v42  ;;  %v15799_v54 = vld [vmem:[#allocation90_spill] sm:$0xff]  ;;  %v15800_v40 = vld [vmem:[#allocation96_spill] sm:$0xff]  ;;  %v1201_v12 = vmul.f32 %v15801_v37, %v8101_v42  ;;  %v15802_v47 = vld [vmem:[#allocation105_spill] sm:$0xff]  ;;  %15814 = vst [vmem:[#allocation83_spill] sm:$0xff] %v8727_v56  ;;  %v8742_v2 = vadd.f32 %v1188_v18, %v8554_v35 }
 0x12a   :  { %v1199_v26 = vmul.f32 %v15799_v54, %v8101_v42  ;;  %v1200_v62 = vmul.f32 %v15800_v40, %v8101_v42  ;;  %v1202_v5 = vmul.f32 %v15802_v47, %v8101_v42  ;;  %v8688_v60 = vld [vmem:[%s14611_s0 + $0x188] sm:$0xff]  ;;  %v15804_v4 = vld [vmem:[#allocation140_spill] sm:$0xff]  ;;  %v15805_v11 = vld [vmem:[#allocation141_spill] sm:$0xff]  ;;  %15812 = vst [vmem:[#allocation130_spill] sm:$0xff] %v8721_v58  ;;  %v8748_v51 = vadd.f32 %v1190_v21, %v8560_v61 }
 0x12b   :  { %15803 = vst [vmem:[#allocation67_spill] sm:$0xff] %v8688_v60  ;;  %v1203_v45 = vmul.f32 %v15804_v4, %v8101_v42  ;;  %v1204_v54 = vmul.f32 %v15805_v11, %v8101_v42  ;;  %v15806_v6 = vld [vmem:[#allocation118_spill] sm:$0xff]  ;;  %v15807_v8 = vld [vmem:[#allocation120_spill] sm:$0xff]  ;;  %v1209_v46 = vmul.f32 %v8101_v42, %v8688_v60  ;;  %v8707_v4 = vld [vmem:[%s14611_s0 + $0x1c8] sm:$0xff]  ;;  %v8712_v11 = vadd.f32 %v1178_v30, %v8519_v29 }
 0x12c   :  { %v1205_v40 = vmul.f32 %v15806_v6, %v8101_v42  ;;  %v1206_v37 = vmul.f32 %v15807_v8, %v8101_v42  ;;  %v15808_v14 = vld [vmem:[#allocation144_spill] sm:$0xff]  ;;  %v1210_v6 = vmul.f32 %v8707_v4, %v8101_v42  ;;  %v8715_v8 = vadd.f32 %v1179_v25, %v8523_v0  ;;  %15819 = vst [vmem:[#allocation89_spill] sm:$0xff] %v8742_v2  ;;  %v8838_v25 = vld [vmem:[%s14611_s0 + $0x40] sm:$0x3] }
 0x12d   :  { %v1207_v47 = vmul.f32 %v15808_v14, %v8101_v42  ;;  %15809 = vst [vmem:[#allocation69_spill] sm:$0xff] %v8712_v11  ;;  %v8718_v14 = vadd.f32 %v1180_v43, %v8527_v16  ;;  %v8724_v60 = vadd.f32 %v1182_v33, %v8535_v15  ;;  %v8730_v42 = vadd.f32 %v1184_v13, %v8542_v32  ;;  %v15853_v30 = vld [vmem:[#allocation48_spill] sm:$0xff]  ;;  %v15862_v33 = vld [vmem:[#allocation62_spill] sm:$0xff]  ;;  %v15917_v11 = vld [vmem:[#allocation11_spill] sm:$0xff] }
 0x12e   :  { %15810 = vst [vmem:[#allocation76_spill] sm:$0xff] %v8715_v8  ;;  %v8733_v29 = vadd.f32 %v1185_v31, %v8545_v24  ;;  %v8736_v0 = vadd.f32 %v1186_v17, %v8548_v48  ;;  %v8739_v16 = vadd.f32 %v1187_v9, %v8551_v39  ;;  %v8745_v15 = vadd.f32 %v1189_v52, %v8557_v22  ;;  %v15832_v24 = vld [vmem:[#allocation63_spill] sm:$0xff]  ;;  %v15860_v43 = vld [vmem:[#allocation56_spill] sm:$0xff]  ;;  %v15866_v31 = vld [vmem:[#allocation65_spill] sm:$0xff] }
 0x12f   :  { %15811 = vst [vmem:[#allocation133_spill] sm:$0xff] %v8718_v14  ;;  %15813 = vst [vmem:[#allocation74_spill] sm:$0xff] %v8724_v60  ;;  %v8751_v13 = vadd.f32 %v1191_v3, %v8563_v55  ;;  %v8757_v17 = vadd.f32 %v1193_v7, %v8569_v59  ;;  %v8760_v9 = vadd.f32 %v1194_v49, %v8572_v19  ;;  %v15844_v59 = vld [vmem:[#allocation80_spill] sm:$0xff]  ;;  %v8855_v7 = vld [vmem:[%s14611_s0 + $0x58] sm:$0x3] }
 0x130   :  { %15815 = vst [vmem:[#allocation134_spill] sm:$0xff] %v8730_v42  ;;  %15816 = vst [vmem:[#allocation86_spill] sm:$0xff] %v8733_v29  ;;  %v8763_v18 = vadd.f32 %v1195_v41, %v8575_v50  ;;  %v8766_v52 = vadd.f32 %v1196_v36, %v8578_v44  ;;  %v8769_v21 = vadd.f32 %v1197_v23, %v8581_v53  ;;  %v15834_v41 = vld [vmem:[#allocation57_spill] sm:$0xff]  ;;  %v15836_v36 = vld [vmem:[#allocation64_spill] sm:$0xff] }
 0x131   :  { %15817 = vst [vmem:[#allocation87_spill] sm:$0xff] %v8736_v0  ;;  %15818 = vst [vmem:[#allocation88_spill] sm:$0xff] %v8739_v16  ;;  %v8772_v3 = vadd.f32 %v1198_v63, %v8586_v20  ;;  %v8775_v35 = vadd.f32 %v1199_v26, %v8589_v1  ;;  %v8778_v32 = vadd.f32 %v1200_v62, %v8592_v28  ;;  %v15838_v23 = vld [vmem:[#allocation72_spill] sm:$0xff]  ;;  %v15840_v20 = vld [vmem:[#allocation70_spill] sm:$0xff] }
 0x132   :  { %15820 = vst [vmem:[#allocation137_spill] sm:$0xff] %v8745_v15  ;;  %15821 = vst [vmem:[#allocation95_spill] sm:$0xff] %v8748_v51  ;;  %v8781_v48 = vadd.f32 %v1201_v12, %v15832_v24  ;;  %v8784_v39 = vadd.f32 %v1202_v5, %v15834_v41  ;;  %v8787_v22 = vadd.f32 %v1203_v45, %v15836_v36  ;;  %v15842_v26 = vld [vmem:[#allocation73_spill] sm:$0xff]  ;;  %v15846_v50 = vld [vmem:[#allocation78_spill] sm:$0xff] }
 0x133   :  { %15822 = vst [vmem:[#allocation138_spill] sm:$0xff] %v8751_v13  ;;  %15823 = vst [vmem:[#allocation104_spill] sm:$0xff] %v8754_v34  ;;  %v8790_v61 = vadd.f32 %v1204_v54, %v15838_v23  ;;  %v8793_v55 = vadd.f32 %v1205_v40, %v15840_v20  ;;  %v8796_v57 = vadd.f32 %v1206_v37, %v15842_v26  ;;  %v15848_v53 = vld [vmem:[#allocation84_spill] sm:$0xff]  ;;  %v15850_v28 = vld [vmem:[#allocation61_spill] sm:$0xff] }
 0x134   :  { %15824 = vst [vmem:[#allocation139_spill] sm:$0xff] %v8757_v17  ;;  %15825 = vst [vmem:[#allocation106_spill] sm:$0xff] %v8760_v9  ;;  %v8799_v19 = vadd.f32 %v1207_v47, %v15844_v59  ;;  %v8802_v44 = vadd.f32 %v1208_v10, %v15846_v50  ;;  %v8805_v1 = vadd.f32 %v1209_v46, %v15848_v53  ;;  %v15852_v12 = vld [vmem:[#allocation59_spill] sm:$0xff]  ;;  %v15854_v40 = vld [vmem:[#allocation49_spill] sm:$0xff] }
 0x135   :  { %15826 = vst [vmem:[#allocation111_spill] sm:$0xff] %v8763_v18  ;;  %15827 = vst [vmem:[#allocation112_spill] sm:$0xff] %v8766_v52  ;;  %v8808_v5 = vadd.f32 %v1210_v6, %v15850_v28  ;;  %v8812_v62 = vmul.f32 %v15853_v30, %v15852_v12  ;;  %v8816_v37 = vmul.f32 %v15854_v40, %v15852_v12  ;;  %v8821_v47 = vld [vmem:[%s14611_s0 + $0x28] sm:$0x3]  ;;  %v15856_v10 = vld [vmem:[#allocation54_spill] sm:$0xff] }
 0x136   :  { %15828 = vst [vmem:[#allocation113_spill] sm:$0xff] %v8769_v21  ;;  %15829 = vst [vmem:[#allocation142_spill] sm:$0xff] %v8772_v3  ;;  %v8825_v46 = vmul.f32 %v8821_v47, %v15852_v12  ;;  %v8829_v6 = vmul.f32 %v15856_v10, %v15852_v12  ;;  %v15857_v63 = vld [vmem:[#allocation55_spill] sm:$0xff]  ;;  %v8842_v45 = vmul.f32 %v8838_v25, %v15852_v12  ;;  %v8876_v26 = vld [vmem:[%s14611_s0 + $0x1d8] sm:$0x3] }
 0x137   :  { %15830 = vst [vmem:[#allocation119_spill] sm:$0xff] %v8775_v35  ;;  %15831 = vst [vmem:[#allocation143_spill] sm:$0xff] %v8778_v32  ;;  %v8833_v54 = vmul.f32 %v15857_v63, %v15852_v12  ;;  %v8846_v27 = vmul.f32 %v15860_v43, %v15852_v12  ;;  %v8850_v49 = vmul.f32 %v15862_v33, %v15852_v12  ;;  %v15868_v41 = vld [vmem:[#allocation71_spill] sm:$0xff]  ;;  %v15873_v50 = vld [vmem:[#allocation108_spill] sm:$0xff] }
 0x138   :  { %15833 = vst [vmem:[#allocation145_spill] sm:$0xff] %v8781_v48  ;;  %15835 = vst [vmem:[#allocation146_spill] sm:$0xff] %v8784_v39  ;;  %v8859_v38 = vmul.f32 %v8855_v7, %v15852_v12  ;;  %v8863_v24 = vmul.f32 %v15866_v31, %v15852_v12  ;;  %v8867_v36 = vmul.f32 %v15868_v41, %v15852_v12  ;;  %v15870_v23 = vld [vmem:[#allocation107_spill] sm:$0xff]  ;;  %v15874_v28 = vld [vmem:[#allocation109_spill] sm:$0xff] }
 0x139   :  { %15837 = vst [vmem:[#allocation91_spill] sm:$0xff] %v8787_v22  ;;  %15839 = vst [vmem:[#allocation33_spill] sm:$0xff] %v8790_v61  ;;  %v8871_v20 = vmul.f32 %v15870_v23, %v15852_v12  ;;  %v8880_v59 = vmul.f32 %v8876_v26, %v15852_v12  ;;  %v8884_v53 = vmul.f32 %v15873_v50, %v15852_v12  ;;  %v8893_v40 = vld [vmem:[%s14611_s0 + $0x1f0] sm:$0x3]  ;;  %v15876_v63 = vld [vmem:[#allocation110_spill] sm:$0xff] }
 0x13a   :  { %15841 = vst [vmem:[#allocation16_spill] sm:$0xff] %v8793_v55  ;;  %15843 = vst [vmem:[#allocation92_spill] sm:$0xff] %v8796_v57  ;;  %v8888_v30 = vmul.f32 %v15874_v28, %v15852_v12  ;;  %v8897_v10 = vmul.f32 %v8893_v40, %v15852_v12  ;;  %v8901_v43 = vmul.f32 %v15876_v63, %v15852_v12  ;;  %v15877_v33 = vld [vmem:[#allocation114_spill] sm:$0xff]  ;;  %v8910_v41 = vld [vmem:[%s14611_s0 + $0x208] sm:$0x3] }
 0x13b   :  { %15845 = vst [vmem:[#allocation18_spill] sm:$0xff] %v8799_v19  ;;  %15847 = vst [vmem:[#allocation93_spill] sm:$0xff] %v8802_v44  ;;  %v8905_v31 = vmul.f32 %v15877_v33, %v15852_v12  ;;  %v8914_v23 = vmul.f32 %v8910_v41, %v15852_v12  ;;  %v15879_v50 = vld [vmem:[#allocation115_spill] sm:$0xff]  ;;  %v15880_v63 = vld [vmem:[#allocation116_spill] sm:$0xff]  ;;  %v1585_v29 = vrot.slane %v8880_v59, 1 }
 0x13c   :  { %15849 = vst [vmem:[#allocation19_spill] sm:$0xff] %v8805_v1  ;;  %15851 = vst [vmem:[#allocation94_spill] sm:$0xff] %v8808_v5  ;;  %v8918_v28 = vmul.f32 %v15879_v50, %v15852_v12  ;;  %v8927_v33 = vld [vmem:[%s14611_s0 + $0x220] sm:$0x3]  ;;  %v15883_v50 = vld [vmem:[#allocation121_spill] sm:$0xff] }
 0x13d   :  { %15855 = vst [vmem:[#allocation20_spill] sm:$0xff] %v8821_v47  ;;  %15858 = vst [vmem:[#allocation98_spill] sm:$0xff] %v8838_v25  ;;  %v8939_v25 = vmul.f32 %v15883_v50, %v15852_v12  ;;  %v8961_v50 = vld [vmem:[%s14611_s0 + $0x250] sm:$0x3]  ;;  %v9085_v16 = vld [vmem:[%s14611_s0 + $0x2f8] sm:$0x3] }
 0x13e   :  { %15859 = vst [vmem:[#allocation21_spill] sm:$0xff] %v8842_v45  ;;  %15861 = vst [vmem:[#allocation99_spill] sm:$0xff] %v8846_v27  ;;  %v8965_v44 = vmul.f32 %v8961_v50, %v15852_v12  ;;  %v15911_v42 = vld [vmem:[#allocation12_spill] sm:$0xff]  ;;  %v1595_v27 = vrot.slane %v8914_v23, 1 }
 0x13f   :  { %15863 = vst [vmem:[#allocation26_spill] sm:$0xff] %v8850_v49  ;;  %15864 = vst [vmem:[#allocation100_spill] sm:$0xff] %v8855_v7  ;;  %v9098_v56 = vmul.f32 %v15911_v42, %v15852_v12  ;;  %v9120_v42 = vld [vmem:[%s14611_s0 + $0x328] sm:$0x3]  ;;  %v15916_v8 = vld [vmem:[#allocation128_spill] sm:$0xff]  ;;  %v1593_v49 = vrot.slane %v8905_v31, 1 }
 0x140   :  { %15865 = vst [vmem:[#allocation27_spill] sm:$0xff] %v8859_v38  ;;  %15867 = vst [vmem:[#allocation28_spill] sm:$0xff] %v8863_v24  ;;  %v9124_v14 = vmul.f32 %v9120_v42, %v15852_v12  ;;  %v1587_v24 = vrot.slane %v8884_v53, 1  ;;  %v1588_v38 = vrot.slane %v8888_v30, 1  ;;  %v1610_v31 = vrot.slane %v8965_v44, 1 }
 0x141   :  { %15869 = vst [vmem:[#allocation29_spill] sm:$0xff] %v8867_v36  ;;  %15871 = vst [vmem:[#allocation34_spill] sm:$0xff] %v8871_v20  ;;  %v1596_v44 = vsel %vm400_vm1, %v1593_v49, %v1595_v27 }
 0x142   :  { %15872 = vst [vmem:[#allocation35_spill] sm:$0xff] %v8876_v26  ;;  %15875 = vst [vmem:[#allocation36_spill] sm:$0xff] %v8893_v40  ;;  %v8922_v40 = vmul.f32 %v15880_v63, %v15852_v12  ;;  %v8931_v26 = vmul.f32 %v8927_v33, %v15852_v12  ;;  %v8944_v63 = vld [vmem:[%s14611_s0 + $0x238] sm:$0x3] }
 0x143   :  { %15878 = vst [vmem:[#allocation37_spill] sm:$0xff] %v8910_v41  ;;  %15881 = vst [vmem:[#allocation42_spill] sm:$0xff] %v8927_v33  ;;  %v15882_v41 = vld [vmem:[#allocation117_spill] sm:$0xff]  ;;  %v8948_v47 = vmul.f32 %v8944_v63, %v15852_v12  ;;  %v15885_v33 = vld [vmem:[#allocation122_spill] sm:$0xff] }
 0x144   :  { %v8935_v7 = vmul.f32 %v15882_v41, %v15852_v12  ;;  %15884 = vst [vmem:[#allocation43_spill] sm:$0xff] %v8944_v63  ;;  %v8952_v5 = vmul.f32 %v15885_v33, %v15852_v12  ;;  %v15886_v41 = vld [vmem:[#allocation123_spill] sm:$0xff]  ;;  %15887 = vst [vmem:[#allocation44_spill] sm:$0xff] %v8961_v50  ;;  %v15888_v63 = vld [vmem:[#allocation124_spill] sm:$0xff]  ;;  %v1598_v45 = vrot.slane %v8922_v40, 1  ;;  %v1600_v53 = vrot.slane %v8931_v26, 1 }
 0x145   :  { %v8956_v1 = vmul.f32 %v15886_v41, %v15852_v12  ;;  %v8969_v19 = vmul.f32 %v15888_v63, %v15852_v12  ;;  %v15889_v33 = vld [vmem:[#allocation126_spill] sm:$0xff]  ;;  %v8978_v41 = vld [vmem:[%s14611_s0 + $0x268] sm:$0x3]  ;;  %v15892_v63 = vld [vmem:[#allocation129_spill] sm:$0xff]  ;;  %15909 = vst [vmem:[#allocation17_spill] sm:$0xff] %v9085_v16  ;;  %v1589_v26 = vsel %vm400_vm1, %v1587_v24, %v1588_v38 }
 0x146   :  { %v8973_v57 = vmul.f32 %v15889_v33, %v15852_v12  ;;  %15890 = vst [vmem:[#allocation45_spill] sm:$0xff] %v8978_v41  ;;  %v8982_v55 = vmul.f32 %v8978_v41, %v15852_v12  ;;  %v15891_v50 = vld [vmem:[#allocation127_spill] sm:$0xff]  ;;  %v8990_v22 = vmul.f32 %v15892_v63, %v15852_v12  ;;  %v8995_v33 = vld [vmem:[%s14611_s0 + $0x280] sm:$0x3]  ;;  %v9012_v63 = vld [vmem:[%s14611_s0 + $0x298] sm:$0x3] }
 0x147   :  { %v8986_v61 = vmul.f32 %v15891_v50, %v15852_v12  ;;  %15893 = vst [vmem:[#allocation131_spill] sm:$0xff] %v8995_v33  ;;  %v8999_v39 = vmul.f32 %v8995_v33, %v15852_v12  ;;  %v15894_v41 = vld [vmem:[#allocation147_spill] sm:$0xff]  ;;  %v15895_v50 = vld [vmem:[#allocation148_spill] sm:$0xff]  ;;  %15896 = vst [vmem:[#allocation50_spill] sm:$0xff] %v9012_v63  ;;  %v9016_v35 = vmul.f32 %v9012_v63, %v15852_v12  ;;  %v1602_v30 = vrot.slane %v8935_v7, 1 }
 0x148   :  { %v9003_v48 = vmul.f32 %v15894_v41, %v15852_v12  ;;  %v9007_v32 = vmul.f32 %v15895_v50, %v15852_v12  ;;  %v15897_v33 = vld [vmem:[#allocation149_spill] sm:$0xff]  ;;  %v15898_v41 = vld [vmem:[#allocation150_spill] sm:$0xff]  ;;  %v9029_v50 = vld [vmem:[%s14611_s0 + $0x2b0] sm:$0x3]  ;;  %15915 = vst [vmem:[#allocation132_spill] sm:$0xff] %v9120_v42  ;;  %v1590_v42 = vrot.slane %v8897_v10, 1 }
 0x149   :  { %v9020_v3 = vmul.f32 %v15897_v33, %v15852_v12  ;;  %v9024_v21 = vmul.f32 %v15898_v41, %v15852_v12  ;;  %15899 = vst [vmem:[#allocation51_spill] sm:$0xff] %v9029_v50  ;;  %v9033_v52 = vmul.f32 %v9029_v50, %v15852_v12  ;;  %v15900_v63 = vld [vmem:[#allocation151_spill] sm:$0xff]  ;;  %v15901_v33 = vld [vmem:[#allocation6_spill] sm:$0xff]  ;;  %v15903_v50 = vld [vmem:[#allocation4_spill] sm:$0xff]  ;;  %v1603_v10 = vrot.slane %v8939_v25, 1 }
 0x14a   :  { %v9037_v18 = vmul.f32 %v15900_v63, %v15852_v12  ;;  %v9041_v9 = vmul.f32 %v15901_v33, %v15852_v12  ;;  %v9046_v41 = vld [vmem:[%s14611_s0 + $0x2c8] sm:$0x3]  ;;  %v9054_v34 = vmul.f32 %v15903_v50, %v15852_v12  ;;  %v9063_v33 = vld [vmem:[%s14611_s0 + $0x2e0] sm:$0x3]  ;;  %v1612_v23 = vrot.slane %v8969_v19, 1 }
 0x14b   :  { %15902 = vst [vmem:[#allocation52_spill] sm:$0xff] %v9046_v41  ;;  %v9050_v17 = vmul.f32 %v9046_v41, %v15852_v12  ;;  %v15904_v63 = vld [vmem:[#allocation7_spill] sm:$0xff]  ;;  %15905 = vst [vmem:[#allocation53_spill] sm:$0xff] %v9063_v33  ;;  %v9067_v51 = vmul.f32 %v9063_v33, %v15852_v12  ;;  %v15906_v41 = vld [vmem:[#allocation8_spill] sm:$0xff]  ;;  %v9089_v33 = vmul.f32 %v9085_v16, %v15852_v12  ;;  %v1615_v40 = vrot.slane %v8982_v55, 1 }
 0x14c   :  { %v9058_v13 = vmul.f32 %v15904_v63, %v15852_v12  ;;  %v9071_v15 = vmul.f32 %v15906_v41, %v15852_v12  ;;  %v9076_v50 = vld [vmem:[%s14611_s0 + $0x340] sm:$0x3]  ;;  %v15908_v63 = vld [vmem:[#allocation9_spill] sm:$0xff]  ;;  %v1617_v7 = vrot.slane %v8986_v61, 1  ;;  %v1618_v25 = vrot.slane %v8990_v22, 1 }
 0x14d   :  { %15907 = vst [vmem:[#allocation3_spill] sm:$0xff] %v9076_v50  ;;  %v9080_v2 = vmul.f32 %v15908_v63, %v15852_v12  ;;  %v15910_v41 = vld [vmem:[#allocation10_spill] sm:$0xff]  ;;  %v9103_v63 = vld [vmem:[%s14611_s0 + $0x310] sm:$0x3]  ;;  %v15913_v16 = vld [vmem:[#allocation13_spill] sm:$0xff]  ;;  %v9137_v36 = vmul.f32 %v15852_v12, %v9076_v50  ;;  %v1597_v50 = vrot.slane %v8918_v28, 1  ;;  %v1604_v55 = vsel %vm400_vm1, %v1602_v30, %v1603_v10 }
 0x14e   :  { %v9093_v0 = vmul.f32 %v15910_v41, %v15852_v12  ;;  %15912 = vst [vmem:[#allocation58_spill] sm:$0xff] %v9103_v63  ;;  %v9107_v60 = vmul.f32 %v9103_v63, %v15852_v12  ;;  %v9111_v58 = vmul.f32 %v15913_v16, %v15852_v12  ;;  %v15914_v41 = vld [vmem:[#allocation14_spill] sm:$0xff]  ;;  %v9128_v63 = vmul.f32 %v15852_v12, %v15916_v8 }
 0x14f   :  { %v9115_v59 = vmul.f32 %v15914_v41, %v15852_v12  ;;  %v9132_v16 = vmul.f32 %v15852_v12, %v15917_v11  ;;  %v14863_v41 = vrot.slane %v8871_v20, 1  ;;  %v1592_v11 = vrot.slane %v8901_v43, 1 }
 0x150   :  { %v1605_v20 = vrot.slane %v8948_v47, 1  ;;  %v1608_v43 = vrot.slane %v8956_v1, 1  ;;  %v1613_v28 = vrot.slane %v8973_v57, 1  ;;  %v1620_v47 = vrot.slane %v8999_v39, 1 }
 0x151   :  { %v9145_v8 = vsel %vm400_vm1, %v14863_v41, %v1585_v29  ;;  %v1607_v29 = vrot.slane %v8952_v5, 1  ;;  %v1591_v5 = vsel %vm400_vm1, %v1588_v38, %v1590_v42  ;;  %v1594_v1 = vsel %vm400_vm1, %v1592_v11, %v1593_v49 }
 0x152   :  { %v1599_v19 = vsel %vm400_vm1, %v1597_v50, %v1598_v45  ;;  %v1601_v57 = vsel %vm400_vm1, %v1598_v45, %v1600_v53  ;;  %v1606_v24 = vsel %vm400_vm1, %v1603_v10, %v1605_v20  ;;  %v1611_v22 = vsel %vm400_vm1, %v1608_v43, %v1610_v31 }
 0x153   :  { %v1609_v61 = vsel %vm400_vm1, %v1607_v29, %v1608_v43  ;;  %v1614_v39 = vsel %vm400_vm1, %v1612_v23, %v1613_v28  ;;  %v1616_v38 = vsel %vm400_vm1, %v1613_v28, %v1615_v40  ;;  %v1622_v42 = vrot.slane %v9003_v48, 1 }
 0x154   :  { %v1619_v27 = vsel %vm400_vm1, %v1617_v7, %v1618_v25  ;;  %v1621_v49 = vsel %vm400_vm1, %v1618_v25, %v1620_v47  ;;  %v1623_v45 = vrot.slane %v9007_v32, 1  ;;  %v1625_v50 = vrot.slane %v9016_v35, 1  ;;  %v15918_v47 = vld [vmem:[#allocation15_spill] sm:$0xff] }
 0x155   :  { %v1627_v20 = vrot.slane %v9020_v3, 1  ;;  %v1628_v11 = vrot.slane %v9024_v21, 1  ;;  %v1630_v53 = vrot.slane %v9033_v52, 1  ;;  %v1632_v30 = vrot.slane %v9037_v18, 1 }
 0x156   :  { %v1633_v10 = vrot.slane %v9041_v9, 1  ;;  %v1635_v48 = vrot.slane %v9050_v17, 1  ;;  %v1637_v29 = vrot.slane %v9054_v34, 1  ;;  %v1638_v43 = vrot.slane %v9058_v13, 1 }
 0x157   :  { %v1640_v32 = vrot.slane %v9067_v51, 1  ;;  %v1642_v35 = vrot.slane %v9071_v15, 1  ;;  %v1643_v3 = vrot.slane %v9080_v2, 1  ;;  %v1645_v21 = vrot.slane %v9089_v33, 1 }
 0x158   :  { %v1647_v52 = vrot.slane %v9093_v0, 1  ;;  %v1648_v18 = vrot.slane %v9098_v56, 1  ;;  %v1650_v9 = vrot.slane %v9107_v60, 1  ;;  %v1652_v17 = vrot.slane %v9111_v58, 1 }
 0x159   :  { %v1653_v34 = vrot.slane %v9115_v59, 1  ;;  %v1655_v13 = vrot.slane %v9124_v14, 1  ;;  %v1657_v51 = vrot.slane %v9128_v63, 1  ;;  %v1658_v15 = vrot.slane %v9132_v16, 1 }
 0x15a   :  { %v1624_v2 = vsel %vm400_vm1, %v1622_v42, %v1623_v45  ;;  %v1626_v33 = vsel %vm400_vm1, %v1623_v45, %v1625_v50  ;;  %v1629_v0 = vsel %vm400_vm1, %v1627_v20, %v1628_v11  ;;  %v1660_v56 = vrot.slane %v9137_v36, 1  ;;  %v15919_v45 = vld [vmem:[#allocation152_spill] sm:$0xff]  ;;  %v15920_v20 = vld [vmem:[#allocation153_spill] sm:$0xff] }
 0x15b   :  { %v1631_v60 = vsel %vm400_vm1, %v1628_v11, %v1630_v53  ;;  %v1634_v58 = vsel %vm400_vm1, %v1632_v30, %v1633_v10  ;;  %v1636_v59 = vsel %vm400_vm1, %v1633_v10, %v1635_v48  ;;  %v1639_v14 = vsel %vm400_vm1, %v1637_v29, %v1638_v43  ;;  %v15921_v53 = vld [vmem:[#allocation154_spill] sm:$0xff]  ;;  %v15922_v10 = vld [vmem:[#allocation155_spill] sm:$0xff]  ;;  %v15923_v29 = vld [vmem:[#allocation156_spill] sm:$0xff] }
 0x15c   :  { %v1641_v63 = vsel %vm400_vm1, %v1638_v43, %v1640_v32  ;;  %v1644_v16 = vsel %vm400_vm1, %v1642_v35, %v1643_v3  ;;  %v1646_v31 = vsel %vm400_vm1, %v1643_v3, %v1645_v21  ;;  %v1649_v23 = vsel %vm400_vm1, %v1647_v52, %v1648_v18  ;;  %v15925_v32 = vld [vmem:[#allocation157_spill] sm:$0xff] }
 0x15d   :  { %v1651_v28 = vsel %vm400_vm1, %v1648_v18, %v1650_v9  ;;  %v1654_v36 = vsel %vm400_vm1, %v1652_v17, %v1653_v34  ;;  %v1656_v40 = vsel %vm400_vm1, %v1653_v34, %v1655_v13  ;;  %v1659_v7 = vsel %vm400_vm1, %v1657_v51, %v1658_v15 }
 0x15e   :  { %v1661_v25 = vsel %vm400_vm1, %v1658_v15, %v1660_v56  ;;  %v9221_v42 = vadd.f32 %v9145_v8, %v15918_v47  ;;  %v9224_v50 = vadd.f32 %v1589_v26, %v15919_v45  ;;  %v9227_v11 = vadd.f32 %v1591_v5, %v15920_v20  ;;  %v15927_v8 = vld [vmem:[#allocation158_spill] sm:$0xff]  ;;  %v15929_v26 = vld [vmem:[#allocation159_spill] sm:$0xff]  ;;  %v15931_v5 = vld [vmem:[#allocation160_spill] sm:$0xff] }
 0x15f   :  { %v9230_v30 = vadd.f32 %v1594_v1, %v15921_v53  ;;  %v9233_v48 = vadd.f32 %v1596_v44, %v15922_v10  ;;  %v9236_v43 = vadd.f32 %v1599_v19, %v15923_v29  ;;  %v9239_v35 = vadd.f32 %v1601_v57, %v15925_v32  ;;  %v15933_v1 = vld [vmem:[#allocation161_spill] sm:$0xff]  ;;  %v15935_v44 = vld [vmem:[#allocation162_spill] sm:$0xff]  ;;  %v15937_v19 = vld [vmem:[#allocation163_spill] sm:$0xff] }
 0x160   :  { %v9242_v3 = vadd.f32 %v1604_v55, %v15927_v8  ;;  %v9245_v21 = vadd.f32 %v1606_v24, %v15929_v26  ;;  %v9248_v52 = vadd.f32 %v1609_v61, %v15931_v5  ;;  %v9251_v18 = vadd.f32 %v1611_v22, %v15933_v1  ;;  %v15939_v57 = vld [vmem:[#allocation164_spill] sm:$0xff]  ;;  %v15941_v55 = vld [vmem:[#allocation165_spill] sm:$0xff]  ;;  %v15943_v24 = vld [vmem:[#allocation166_spill] sm:$0xff] }
 0x161   :  { %15924 = vst [vmem:[#allocation22_spill] sm:$0xff] %v9236_v43  ;;  %15926 = vst [vmem:[#allocation23_spill] sm:$0xff] %v9239_v35  ;;  %v9254_v9 = vadd.f32 %v1614_v39, %v15935_v44  ;;  %v9257_v17 = vadd.f32 %v1616_v38, %v15937_v19  ;;  %v9260_v34 = vadd.f32 %v1619_v27, %v15939_v57  ;;  %v15945_v61 = vld [vmem:[#allocation167_spill] sm:$0xff]  ;;  %v15947_v22 = vld [vmem:[#allocation168_spill] sm:$0xff] }
 0x162   :  { %15928 = vst [vmem:[#allocation24_spill] sm:$0xff] %v9242_v3  ;;  %15930 = vst [vmem:[#allocation25_spill] sm:$0xff] %v9245_v21  ;;  %v9263_v13 = vadd.f32 %v1621_v49, %v15941_v55  ;;  %v9266_v51 = vadd.f32 %v1624_v2, %v15943_v24  ;;  %v9269_v15 = vadd.f32 %v1626_v33, %v15945_v61  ;;  %v15949_v39 = vld [vmem:[#allocation169_spill] sm:$0xff]  ;;  %v15951_v38 = vld [vmem:[#allocation170_spill] sm:$0xff] }
 0x163   :  { %15932 = vst [vmem:[#allocation30_spill] sm:$0xff] %v9248_v52  ;;  %15934 = vst [vmem:[#allocation31_spill] sm:$0xff] %v9251_v18  ;;  %v9272_v56 = vadd.f32 %v1629_v0, %v15947_v22  ;;  %v9275_v47 = vadd.f32 %v1631_v60, %v15949_v39  ;;  %v9278_v45 = vadd.f32 %v1634_v58, %v15951_v38  ;;  %v15953_v27 = vld [vmem:[#allocation171_spill] sm:$0xff]  ;;  %v15955_v49 = vld [vmem:[#allocation172_spill] sm:$0xff] }
 0x164   :  { %15936 = vst [vmem:[#allocation32_spill] sm:$0xff] %v9254_v9  ;;  %15938 = vst [vmem:[#allocation101_spill] sm:$0xff] %v9257_v17  ;;  %v9281_v20 = vadd.f32 %v1636_v59, %v15953_v27  ;;  %v9284_v53 = vadd.f32 %v1639_v14, %v15955_v49  ;;  %v15957_v2 = vld [vmem:[#allocation173_spill] sm:$0xff]  ;;  %v15959_v33 = vld [vmem:[#allocation174_spill] sm:$0xff] }
 0x165   :  { %15940 = vst [vmem:[#allocation63_spill] sm:$0xff] %v9260_v34  ;;  %15942 = vst [vmem:[#allocation57_spill] sm:$0xff] %v9263_v13  ;;  %v9287_v10 = vadd.f32 %v1641_v63, %v15957_v2  ;;  %v9290_v29 = vadd.f32 %v1644_v16, %v15959_v33  ;;  %v15961_v0 = vld [vmem:[#allocation175_spill] sm:$0xff]  ;;  %v15963_v60 = vld [vmem:[#allocation38_spill] sm:$0xff]  ;;  %v1507_v13 = vrot.slane %v8829_v6, 1 }
 0x166   :  { %15944 = vst [vmem:[#allocation64_spill] sm:$0xff] %v9266_v51  ;;  %15946 = vst [vmem:[#allocation72_spill] sm:$0xff] %v9269_v15  ;;  %v9293_v32 = vadd.f32 %v1646_v31, %v15961_v0  ;;  %v9296_v8 = vadd.f32 %v1649_v23, %v15963_v60  ;;  %v15965_v58 = vld [vmem:[#allocation39_spill] sm:$0xff]  ;;  %v15967_v59 = vld [vmem:[#allocation40_spill] sm:$0xff]  ;;  %v9531_v51 = vmul.f32 %v8707_v4, %v15852_v12 }
 0x167   :  { %15948 = vst [vmem:[#allocation70_spill] sm:$0xff] %v9272_v56  ;;  %15950 = vst [vmem:[#allocation73_spill] sm:$0xff] %v9275_v47  ;;  %v9299_v26 = vadd.f32 %v1651_v28, %v15965_v58  ;;  %v9302_v5 = vadd.f32 %v1654_v36, %v15967_v59  ;;  %v15969_v14 = vld [vmem:[#allocation41_spill] sm:$0xff]  ;;  %v15971_v63 = vld [vmem:[#allocation46_spill] sm:$0xff] }
 0x168   :  { %15952 = vst [vmem:[#allocation80_spill] sm:$0xff] %v9278_v45  ;;  %15954 = vst [vmem:[#allocation78_spill] sm:$0xff] %v9281_v20  ;;  %v9305_v1 = vadd.f32 %v1656_v40, %v15969_v14  ;;  %v9308_v44 = vadd.f32 %v1659_v7, %v15971_v63  ;;  %v15973_v16 = vld [vmem:[#allocation47_spill] sm:$0xff]  ;;  %v9316_v31 = vld [vmem:[%s14611_s0 + $0x70] sm:$0x3] }
 0x169   :  { %15956 = vst [vmem:[#allocation84_spill] sm:$0xff] %v9284_v53  ;;  %15958 = vst [vmem:[#allocation61_spill] sm:$0xff] %v9287_v10  ;;  %v9311_v19 = vadd.f32 %v1661_v25, %v15973_v16  ;;  %v9320_v23 = vmul.f32 %v9316_v31, %v15852_v12  ;;  %v15976_v28 = vld [vmem:[#allocation77_spill] sm:$0xff]  ;;  %v15977_v40 = vld [vmem:[#allocation79_spill] sm:$0xff]  ;;  %v1503_v10 = vrot.slane %v8816_v37, 1 }
 0x16a   :  { %15960 = vst [vmem:[#allocation59_spill] sm:$0xff] %v9290_v29  ;;  %15962 = vst [vmem:[#allocation48_spill] sm:$0xff] %v9293_v32  ;;  %v9324_v36 = vmul.f32 %v15976_v28, %v15852_v12  ;;  %v9328_v7 = vmul.f32 %v15977_v40, %v15852_v12  ;;  %v9333_v25 = vld [vmem:[%s14611_s0 + $0x88] sm:$0x3]  ;;  %v15979_v55 = vld [vmem:[#allocation5_spill] sm:$0xff] }
 0x16b   :  { %15964 = vst [vmem:[#allocation49_spill] sm:$0xff] %v9296_v8  ;;  %15966 = vst [vmem:[#allocation54_spill] sm:$0xff] %v9299_v26  ;;  %v9337_v57 = vmul.f32 %v9333_v25, %v15852_v12  ;;  %v9341_v24 = vmul.f32 %v15979_v55, %v15852_v12  ;;  %v15980_v61 = vld [vmem:[#allocation60_spill] sm:$0xff]  ;;  %v9350_v39 = vld [vmem:[%s14611_s0 + $0xa0] sm:$0x3] }
 0x16c   :  { %15968 = vst [vmem:[#allocation55_spill] sm:$0xff] %v9302_v5  ;;  %15970 = vst [vmem:[#allocation56_spill] sm:$0xff] %v9305_v1  ;;  %v9345_v22 = vmul.f32 %v15980_v61, %v15852_v12  ;;  %v9354_v38 = vmul.f32 %v9350_v39, %v15852_v12  ;;  %v15982_v27 = vld [vmem:[#allocation66_spill] sm:$0xff]  ;;  %v15983_v2 = vld [vmem:[#allocation103_spill] sm:$0xff] }
 0x16d   :  { %15972 = vst [vmem:[#allocation62_spill] sm:$0xff] %v9308_v44  ;;  %15974 = vst [vmem:[#allocation65_spill] sm:$0xff] %v9311_v19  ;;  %v9358_v49 = vmul.f32 %v15982_v27, %v15852_v12  ;;  %v9362_v33 = vmul.f32 %v15983_v2, %v15852_v12  ;;  %v9367_v0 = vld [vmem:[%s14611_s0 + $0xb8] sm:$0x3]  ;;  %v15986_v14 = vld [vmem:[#allocation75_spill] sm:$0xff]  ;;  %v1525_v43 = vrot.slane %v9337_v57, 1 }
 0x16e   :  { %15975 = vst [vmem:[#allocation71_spill] sm:$0xff] %v9316_v31  ;;  %15978 = vst [vmem:[#allocation107_spill] sm:$0xff] %v9333_v25  ;;  %v9371_v60 = vmul.f32 %v9367_v0, %v15852_v12  ;;  %v15985_v58 = vld [vmem:[#allocation125_spill] sm:$0xff]  ;;  %v9379_v63 = vmul.f32 %v15986_v14, %v15852_v12  ;;  %v9384_v16 = vld [vmem:[%s14611_s0 + $0xd0] sm:$0x3] }
 0x16f   :  { %15981 = vst [vmem:[#allocation108_spill] sm:$0xff] %v9350_v39  ;;  %15984 = vst [vmem:[#allocation109_spill] sm:$0xff] %v9367_v0  ;;  %v9375_v59 = vmul.f32 %v15985_v58, %v15852_v12  ;;  %v9388_v28 = vmul.f32 %v9384_v16, %v15852_v12  ;;  %v15988_v40 = vld [vmem:[#allocation81_spill] sm:$0xff]  ;;  %v15989_v61 = vld [vmem:[#allocation82_spill] sm:$0xff] }
 0x170   :  { %15987 = vst [vmem:[#allocation110_spill] sm:$0xff] %v9384_v16  ;;  %v9392_v55 = vmul.f32 %v15988_v40, %v15852_v12  ;;  %v9396_v27 = vmul.f32 %v15989_v61, %v15852_v12  ;;  %v9401_v2 = vld [vmem:[%s14611_s0 + $0xe8] sm:$0x3]  ;;  %v15991_v14 = vld [vmem:[#allocation85_spill] sm:$0xff]  ;;  %v9418_v61 = vld [vmem:[%s14611_s0 + $0x100] sm:$0x3] }
 0x171   :  { %15990 = vst [vmem:[#allocation114_spill] sm:$0xff] %v9401_v2  ;;  %v9405_v58 = vmul.f32 %v9401_v2, %v15852_v12  ;;  %v9409_v41 = vmul.f32 %v15991_v14, %v15852_v12  ;;  %v15992_v40 = vld [vmem:[#allocation135_spill] sm:$0xff]  ;;  %15993 = vst [vmem:[#allocation115_spill] sm:$0xff] %v9418_v61  ;;  %v9422_v0 = vmul.f32 %v9418_v61, %v15852_v12  ;;  %v15994_v2 = vld [vmem:[#allocation136_spill] sm:$0xff] }
 0x172   :  { %v9413_v16 = vmul.f32 %v15992_v40, %v15852_v12  ;;  %v9426_v39 = vmul.f32 %v15994_v2, %v15852_v12  ;;  %v15995_v14 = vld [vmem:[#allocation90_spill] sm:$0xff]  ;;  %v9435_v40 = vld [vmem:[%s14611_s0 + $0x118] sm:$0x3]  ;;  %v15997_v61 = vld [vmem:[#allocation96_spill] sm:$0xff] }
 0x173   :  { %v9430_v25 = vmul.f32 %v15995_v14, %v15852_v12  ;;  %15996 = vst [vmem:[#allocation116_spill] sm:$0xff] %v9435_v40  ;;  %v9439_v31 = vmul.f32 %v9435_v40, %v15852_v12  ;;  %v9443_v19 = vmul.f32 %v15997_v61, %v15852_v12  ;;  %v15998_v2 = vld [vmem:[#allocation97_spill] sm:$0xff]  ;;  %v9452_v14 = vld [vmem:[%s14611_s0 + $0x190] sm:$0x3]  ;;  %v9474_v8 = vld [vmem:[%s14611_s0 + $0x148] sm:$0x3] }
 0x174   :  { %v9447_v44 = vmul.f32 %v15998_v2, %v15852_v12  ;;  %15999 = vst [vmem:[#allocation117_spill] sm:$0xff] %v9452_v14  ;;  %v9457_v1 = vld [vmem:[%s14611_s0 + $0x130] sm:$0x3]  ;;  %v16001_v61 = vld [vmem:[#allocation105_spill] sm:$0xff]  ;;  %16003 = vst [vmem:[#allocation122_spill] sm:$0xff] %v9474_v8  ;;  %v9478_v32 = vmul.f32 %v9474_v8, %v15852_v12 }
 0x175   :  { %16000 = vst [vmem:[#allocation121_spill] sm:$0xff] %v9457_v1  ;;  %v9461_v40 = vmul.f32 %v9457_v1, %v15852_v12  ;;  %v9465_v5 = vmul.f32 %v16001_v61, %v15852_v12  ;;  %v16002_v2 = vld [vmem:[#allocation140_spill] sm:$0xff]  ;;  %v16004_v1 = vld [vmem:[#allocation141_spill] sm:$0xff]  ;;  %v1502_v61 = vrot.slane %v8812_v62, 1  ;;  %v16005_v53 = vld [vmem:[#allocation118_spill] sm:$0xff] }
 0x176   :  { %v9469_v26 = vmul.f32 %v16002_v2, %v15852_v12  ;;  %v9482_v29 = vmul.f32 %v16004_v1, %v15852_v12  ;;  %v1505_v2 = vrot.slane %v8825_v46, 1  ;;  %v9489_v20 = vmul.f32 %v16005_v53, %v15852_v12  ;;  %v9494_v45 = vld [vmem:[%s14611_s0 + $0x160] sm:$0x3]  ;;  %v16007_v1 = vld [vmem:[#allocation120_spill] sm:$0xff]  ;;  %v9511_v53 = vld [vmem:[%s14611_s0 + $0x178] sm:$0x3] }
 0x177   :  { %16006 = vst [vmem:[#allocation123_spill] sm:$0xff] %v9494_v45  ;;  %v9498_v8 = vmul.f32 %v9494_v45, %v15852_v12  ;;  %v9502_v62 = vmul.f32 %v16007_v1, %v15852_v12  ;;  %v16008_v37 = vld [vmem:[#allocation144_spill] sm:$0xff]  ;;  %16009 = vst [vmem:[#allocation124_spill] sm:$0xff] %v9511_v53  ;;  %v9515_v47 = vmul.f32 %v9511_v53, %v15852_v12  ;;  %v16011_v15 = vld [vmem:[#allocation67_spill] sm:$0xff]  ;;  %v1508_v53 = vrot.slane %v8833_v54, 1 }
 0x178   :  { %v9506_v46 = vmul.f32 %v16008_v37, %v15852_v12  ;;  %v16010_v56 = vld [vmem:[#allocation68_spill] sm:$0xff]  ;;  %v9523_v1 = vmul.f32 %v15852_v12, %v16011_v15  ;;  %v9527_v37 = vmul.f32 %v15852_v12, %v9452_v14  ;;  %v16012_v34 = vld [vmem:[#allocation21_spill] sm:$0xff]  ;;  %v9540_v15 = vsel %vm400_vm1, %v1503_v10, %v1505_v2  ;;  %v16013_v9 = vld [vmem:[#allocation99_spill] sm:$0xff] }
 0x179   :  { %v9519_v45 = vmul.f32 %v15852_v12, %v16010_v56  ;;  %v1510_v17 = vrot.slane %v16012_v34, 1  ;;  %v9537_v56 = vsel %vm400_vm1, %v1502_v61, %v1503_v10  ;;  %v1512_v18 = vrot.slane %v16013_v9, 1  ;;  %v16014_v14 = vld [vmem:[#allocation26_spill] sm:$0xff]  ;;  %v16015_v21 = vld [vmem:[#allocation27_spill] sm:$0xff]  ;;  %v16016_v4 = vld [vmem:[#allocation28_spill] sm:$0xff] }
 0x17a   :  { %v1513_v52 = vrot.slane %v16014_v14, 1  ;;  %v1515_v3 = vrot.slane %v16015_v21, 1  ;;  %v1517_v12 = vrot.slane %v16016_v4, 1  ;;  %v16017_v35 = vld [vmem:[#allocation29_spill] sm:$0xff]  ;;  %v1520_v54 = vrot.slane %v9320_v23, 1 }
 0x17b   :  { %v1518_v6 = vrot.slane %v16017_v35, 1  ;;  %v1522_v34 = vrot.slane %v9324_v36, 1  ;;  %v1523_v61 = vrot.slane %v9328_v7, 1  ;;  %v1527_v10 = vrot.slane %v9341_v24, 1 }
 0x17c   :  { %v1528_v9 = vrot.slane %v9345_v22, 1  ;;  %v1530_v14 = vrot.slane %v9354_v38, 1  ;;  %v1532_v21 = vrot.slane %v9358_v49, 1  ;;  %v1533_v2 = vrot.slane %v9362_v33, 1 }
 0x17d   :  { %v1535_v35 = vrot.slane %v9371_v60, 1  ;;  %v1537_v23 = vrot.slane %v9375_v59, 1  ;;  %v1538_v36 = vrot.slane %v9379_v63, 1  ;;  %v1540_v7 = vrot.slane %v9388_v28, 1 }
 0x17e   :  { %v1509_v57 = vsel %vm400_vm1, %v1507_v13, %v1508_v53  ;;  %v1511_v24 = vsel %vm400_vm1, %v1508_v53, %v1510_v17  ;;  %v1542_v22 = vrot.slane %v9392_v55, 1  ;;  %v1543_v38 = vrot.slane %v9396_v27, 1 }
 0x17f   :  { %v1514_v49 = vsel %vm400_vm1, %v1512_v18, %v1513_v52  ;;  %v1516_v33 = vsel %vm400_vm1, %v1513_v52, %v1515_v3  ;;  %v1519_v60 = vsel %vm400_vm1, %v1517_v12, %v1518_v6  ;;  %v1521_v59 = vsel %vm400_vm1, %v1518_v6, %v1520_v54 }
 0x180   :  { %v1524_v63 = vsel %vm400_vm1, %v1522_v34, %v1523_v61  ;;  %v1526_v28 = vsel %vm400_vm1, %v1523_v61, %v1525_v43  ;;  %v1529_v13 = vsel %vm400_vm1, %v1527_v10, %v1528_v9  ;;  %v1531_v17 = vsel %vm400_vm1, %v1528_v9, %v1530_v14 }
 0x181   :  { %v1534_v55 = vsel %vm400_vm1, %v1532_v21, %v1533_v2  ;;  %v1536_v27 = vsel %vm400_vm1, %v1533_v2, %v1535_v35  ;;  %v1539_v18 = vsel %vm400_vm1, %v1537_v23, %v1538_v36  ;;  %v1541_v3 = vsel %vm400_vm1, %v1538_v36, %v1540_v7  ;;  %v16018_v36 = vld [vmem:[#allocation34_spill] sm:$0xff] }
 0x182   :  { %v1544_v52 = vsel %vm400_vm1, %v1542_v22, %v1543_v38  ;;  %v1545_v53 = vrot.slane %v9405_v58, 1  ;;  %v1547_v4 = vrot.slane %v9409_v41, 1  ;;  %v1548_v43 = vrot.slane %v9413_v16, 1 }
 0x183   :  { %v1550_v12 = vrot.slane %v9422_v0, 1  ;;  %v1552_v6 = vrot.slane %v9426_v39, 1  ;;  %v1553_v54 = vrot.slane %v9430_v25, 1  ;;  %v1555_v34 = vrot.slane %v9439_v31, 1 }
 0x184   :  { %v1557_v61 = vrot.slane %v9443_v19, 1  ;;  %v1558_v10 = vrot.slane %v9447_v44, 1  ;;  %v1560_v9 = vrot.slane %v9461_v40, 1  ;;  %v1562_v58 = vrot.slane %v9465_v5, 1 }
 0x185   :  { %v1563_v41 = vrot.slane %v9469_v26, 1  ;;  %v1565_v16 = vrot.slane %v9478_v32, 1  ;;  %v1567_v0 = vrot.slane %v9482_v29, 1  ;;  %v1568_v39 = vrot.slane %v9489_v20, 1 }
 0x186   :  { %v1570_v25 = vrot.slane %v9498_v8, 1  ;;  %v1572_v31 = vrot.slane %v9502_v62, 1  ;;  %v1573_v19 = vrot.slane %v9506_v46, 1  ;;  %v1575_v44 = vrot.slane %v9515_v47, 1 }
 0x187   :  { %v1577_v40 = vrot.slane %v9519_v45, 1  ;;  %v1578_v5 = vrot.slane %v9523_v1, 1  ;;  %v1580_v26 = vrot.slane %v9527_v37, 1  ;;  %v1582_v32 = vrot.slane %v9531_v51, 1 }
 0x188   :  { %v1546_v29 = vsel %vm400_vm1, %v1543_v38, %v1545_v53  ;;  %v1549_v20 = vsel %vm400_vm1, %v1547_v4, %v1548_v43  ;;  %v1551_v8 = vsel %vm400_vm1, %v1548_v43, %v1550_v12  ;;  %v1554_v62 = vsel %vm400_vm1, %v1552_v6, %v1553_v54  ;;  %v16020_v38 = vld [vmem:[#allocation69_spill] sm:$0xff]  ;;  %v16022_v4 = vld [vmem:[#allocation76_spill] sm:$0xff] }
 0x189   :  { %v1556_v46 = vsel %vm400_vm1, %v1553_v54, %v1555_v34  ;;  %v1559_v47 = vsel %vm400_vm1, %v1557_v61, %v1558_v10  ;;  %v1561_v45 = vsel %vm400_vm1, %v1558_v10, %v1560_v9  ;;  %v1564_v1 = vsel %vm400_vm1, %v1562_v58, %v1563_v41  ;;  %v16024_v12 = vld [vmem:[#allocation133_spill] sm:$0xff]  ;;  %v16026_v54 = vld [vmem:[#allocation130_spill] sm:$0xff]  ;;  %v16030_v9 = vld [vmem:[#allocation83_spill] sm:$0xff] }
 0x18a   :  { %v1566_v37 = vsel %vm400_vm1, %v1563_v41, %v1565_v16  ;;  %v1569_v51 = vsel %vm400_vm1, %v1567_v0, %v1568_v39  ;;  %v1571_v14 = vsel %vm400_vm1, %v1568_v39, %v1570_v25  ;;  %v1574_v21 = vsel %vm400_vm1, %v1572_v31, %v1573_v19  ;;  %v16028_v61 = vld [vmem:[#allocation74_spill] sm:$0xff] }
 0x18b   :  { %v1576_v2 = vsel %vm400_vm1, %v1573_v19, %v1575_v44  ;;  %v1579_v35 = vsel %vm400_vm1, %v1577_v40, %v1578_v5  ;;  %v1581_v23 = vsel %vm400_vm1, %v1578_v5, %v1580_v26  ;;  %v16019_v7 = vrot.slane %v16018_v36, 1  ;;  %v16032_v41 = vld [vmem:[#allocation134_spill] sm:$0xff] }
 0x18c   :  { %v9620_v53 = vadd.f32 %v9537_v56, %v16020_v38  ;;  %v9624_v43 = vadd.f32 %v9540_v15, %v16022_v4  ;;  %v9627_v6 = vadd.f32 %v1509_v57, %v16024_v12  ;;  %v9630_v34 = vadd.f32 %v1511_v24, %v16026_v54  ;;  %v16034_v56 = vld [vmem:[#allocation86_spill] sm:$0xff]  ;;  %v16036_v15 = vld [vmem:[#allocation87_spill] sm:$0xff]  ;;  %v16038_v57 = vld [vmem:[#allocation88_spill] sm:$0xff] }
 0x18d   :  { %v1584_v22 = vsel %vm400_vm1, %v1582_v32, %v16019_v7  ;;  %v9633_v10 = vadd.f32 %v1514_v49, %v16028_v61  ;;  %v9636_v58 = vadd.f32 %v1516_v33, %v16030_v9  ;;  %v9639_v16 = vadd.f32 %v1519_v60, %v16032_v41  ;;  %v16040_v24 = vld [vmem:[#allocation89_spill] sm:$0xff]  ;;  %v16044_v33 = vld [vmem:[#allocation95_spill] sm:$0xff]  ;;  %v16046_v60 = vld [vmem:[#allocation138_spill] sm:$0xff] }
 0x18e   :  { %16021 = vst [vmem:[#allocation126_spill] sm:$0xff] %v9620_v53  ;;  %16023 = vst [vmem:[#allocation127_spill] sm:$0xff] %v9624_v43  ;;  %v9642_v0 = vadd.f32 %v1521_v59, %v16034_v56  ;;  %v9645_v39 = vadd.f32 %v1524_v63, %v16036_v15  ;;  %v9648_v25 = vadd.f32 %v1526_v28, %v16038_v57  ;;  %v16042_v49 = vld [vmem:[#allocation137_spill] sm:$0xff]  ;;  %v16048_v59 = vld [vmem:[#allocation104_spill] sm:$0xff] }
 0x18f   :  { %16025 = vst [vmem:[#allocation129_spill] sm:$0xff] %v9627_v6  ;;  %16027 = vst [vmem:[#allocation147_spill] sm:$0xff] %v9630_v34  ;;  %v9651_v31 = vadd.f32 %v1529_v13, %v16040_v24  ;;  %v9654_v19 = vadd.f32 %v1531_v17, %v16042_v49  ;;  %v9657_v44 = vadd.f32 %v1534_v55, %v16044_v33  ;;  %v16050_v63 = vld [vmem:[#allocation139_spill] sm:$0xff]  ;;  %v16052_v28 = vld [vmem:[#allocation106_spill] sm:$0xff] }
 0x190   :  { %16029 = vst [vmem:[#allocation148_spill] sm:$0xff] %v9633_v10  ;;  %16031 = vst [vmem:[#allocation149_spill] sm:$0xff] %v9636_v58  ;;  %v9660_v40 = vadd.f32 %v1536_v27, %v16046_v60  ;;  %v9663_v5 = vadd.f32 %v1539_v18, %v16048_v59  ;;  %v9666_v26 = vadd.f32 %v1541_v3, %v16050_v63  ;;  %v16054_v13 = vld [vmem:[#allocation111_spill] sm:$0xff]  ;;  %v16056_v17 = vld [vmem:[#allocation112_spill] sm:$0xff] }
 0x191   :  { %16033 = vst [vmem:[#allocation150_spill] sm:$0xff] %v9639_v16  ;;  %16035 = vst [vmem:[#allocation151_spill] sm:$0xff] %v9642_v0  ;;  %v9669_v32 = vadd.f32 %v1544_v52, %v16052_v28  ;;  %v9672_v36 = vadd.f32 %v1546_v29, %v16054_v13  ;;  %v9675_v7 = vadd.f32 %v1549_v20, %v16056_v17  ;;  %v16058_v55 = vld [vmem:[#allocation113_spill] sm:$0xff]  ;;  %v16060_v27 = vld [vmem:[#allocation142_spill] sm:$0xff] }
 0x192   :  { %16037 = vst [vmem:[#allocation6_spill] sm:$0xff] %v9645_v39  ;;  %16039 = vst [vmem:[#allocation4_spill] sm:$0xff] %v9648_v25  ;;  %v9678_v38 = vadd.f32 %v1551_v8, %v16058_v55  ;;  %v9681_v4 = vadd.f32 %v1554_v62, %v16060_v27  ;;  %v16062_v18 = vld [vmem:[#allocation119_spill] sm:$0xff]  ;;  %v16066_v52 = vld [vmem:[#allocation145_spill] sm:$0xff] }
 0x193   :  { %16041 = vst [vmem:[#allocation7_spill] sm:$0xff] %v9651_v31  ;;  %16043 = vst [vmem:[#allocation8_spill] sm:$0xff] %v9654_v19  ;;  %v9684_v12 = vadd.f32 %v1556_v46, %v16062_v18  ;;  %v16064_v3 = vld [vmem:[#allocation143_spill] sm:$0xff]  ;;  %v9690_v61 = vadd.f32 %v1561_v45, %v16066_v52  ;;  %v16068_v29 = vld [vmem:[#allocation146_spill] sm:$0xff] }
 0x194   :  { %16045 = vst [vmem:[#allocation9_spill] sm:$0xff] %v9657_v44  ;;  %16047 = vst [vmem:[#allocation10_spill] sm:$0xff] %v9660_v40  ;;  %v9687_v54 = vadd.f32 %v1559_v47, %v16064_v3  ;;  %v9693_v9 = vadd.f32 %v1564_v1, %v16068_v29  ;;  %v16070_v20 = vld [vmem:[#allocation91_spill] sm:$0xff]  ;;  %v16072_v8 = vld [vmem:[#allocation33_spill] sm:$0xff] }
 0x195   :  { %16049 = vst [vmem:[#allocation12_spill] sm:$0xff] %v9663_v5  ;;  %16051 = vst [vmem:[#allocation13_spill] sm:$0xff] %v9666_v26  ;;  %v9696_v41 = vadd.f32 %v1566_v37, %v16070_v20  ;;  %v9699_v56 = vadd.f32 %v1569_v51, %v16072_v8  ;;  %v16074_v62 = vld [vmem:[#allocation16_spill] sm:$0xff]  ;;  %v16078_v47 = vld [vmem:[#allocation18_spill] sm:$0xff] }
 0x196   :  { %16053 = vst [vmem:[#allocation14_spill] sm:$0xff] %v9669_v32  ;;  %16055 = vst [vmem:[#allocation128_spill] sm:$0xff] %v9672_v36  ;;  %v9702_v15 = vadd.f32 %v1571_v14, %v16074_v62  ;;  %v16076_v46 = vld [vmem:[#allocation92_spill] sm:$0xff]  ;;  %v9708_v24 = vadd.f32 %v1576_v2, %v16078_v47  ;;  %v16080_v45 = vld [vmem:[#allocation93_spill] sm:$0xff] }
 0x197   :  { %16057 = vst [vmem:[#allocation11_spill] sm:$0xff] %v9675_v7  ;;  %16059 = vst [vmem:[#allocation15_spill] sm:$0xff] %v9678_v38  ;;  %v9705_v57 = vadd.f32 %v1574_v21, %v16076_v46  ;;  %v9711_v49 = vadd.f32 %v1579_v35, %v16080_v45  ;;  %v16082_v1 = vld [vmem:[#allocation19_spill] sm:$0xff]  ;;  %v16084_v37 = vld [vmem:[#allocation94_spill] sm:$0xff] }
 0x198   :  { %16061 = vst [vmem:[#allocation152_spill] sm:$0xff] %v9681_v4  ;;  %16063 = vst [vmem:[#allocation153_spill] sm:$0xff] %v9684_v12  ;;  %v9714_v33 = vadd.f32 %v1581_v23, %v16082_v1  ;;  %v9717_v60 = vadd.f32 %v1584_v22, %v16084_v37  ;;  %v5549_v51 = vld [vmem:[%s14611_s0 + $0x18] sm:$0xff]  ;;  %v16086_v14 = vld [vmem:[#allocation102_spill] sm:$0xff] }
 0x199   :  { %16065 = vst [vmem:[#allocation154_spill] sm:$0xff] %v9687_v54  ;;  %16067 = vst [vmem:[#allocation155_spill] sm:$0xff] %v9690_v61  ;;  %v9723_v59 = vmul.f32 %v5549_v51, %v16086_v14  ;;  %v5550_v21 = vld [vmem:[%s14611_s0 + $0x20] sm:$0xff]  ;;  %v16088_v35 = vld [vmem:[#allocation20_spill] sm:$0xff] }
 0x19a   :  { %16069 = vst [vmem:[#allocation156_spill] sm:$0xff] %v9693_v9  ;;  %16071 = vst [vmem:[#allocation157_spill] sm:$0xff] %v9696_v41  ;;  %v9729_v2 = vmul.f32 %v5550_v21, %v16086_v14  ;;  %v9733_v23 = vmul.f32 %v16088_v35, %v16086_v14  ;;  %v9738_v22 = vld [vmem:[%s14611_s0 + $0x30] sm:$0xff]  ;;  %v9747_v28 = vld [vmem:[%s14611_s0 + $0x38] sm:$0xff] }
 0x19b   :  { %16073 = vst [vmem:[#allocation158_spill] sm:$0xff] %v9699_v56  ;;  %16075 = vst [vmem:[#allocation159_spill] sm:$0xff] %v9702_v15  ;;  %v9742_v63 = vmul.f32 %v9738_v22, %v16086_v14  ;;  %v9751_v13 = vmul.f32 %v9747_v28, %v16086_v14  ;;  %v16094_v17 = vld [vmem:[#allocation98_spill] sm:$0xff]  ;;  %v9760_v27 = vld [vmem:[%s14611_s0 + $0x48] sm:$0xff] }
 0x19c   :  { %16077 = vst [vmem:[#allocation160_spill] sm:$0xff] %v9705_v57  ;;  %16079 = vst [vmem:[#allocation161_spill] sm:$0xff] %v9708_v24  ;;  %v9755_v55 = vmul.f32 %v16094_v17, %v16086_v14  ;;  %v9764_v18 = vmul.f32 %v9760_v27, %v16086_v14  ;;  %v9769_v3 = vld [vmem:[%s14611_s0 + $0x50] sm:$0xff]  ;;  %v9782_v8 = vld [vmem:[%s14611_s0 + $0x60] sm:$0xff] }
 0x19d   :  { %16081 = vst [vmem:[#allocation162_spill] sm:$0xff] %v9711_v49  ;;  %16083 = vst [vmem:[#allocation163_spill] sm:$0xff] %v9714_v33  ;;  %v9773_v52 = vmul.f32 %v9769_v3, %v16086_v14  ;;  %v16100_v29 = vld [vmem:[#allocation100_spill] sm:$0xff]  ;;  %v9786_v62 = vmul.f32 %v9782_v8, %v16086_v14  ;;  %v9791_v46 = vld [vmem:[%s14611_s0 + $0x68] sm:$0xff] }
 0x19e   :  { %16085 = vst [vmem:[#allocation164_spill] sm:$0xff] %v9717_v60  ;;  %16087 = vst [vmem:[#allocation165_spill] sm:$0xff] %v9729_v2  ;;  %v9777_v20 = vmul.f32 %v16100_v29, %v16086_v14  ;;  %v9795_v47 = vmul.f32 %v9791_v46, %v16086_v14  ;;  %v5557_v45 = vld [vmem:[%s14611_s0 + $0x1d0] sm:$0xff]  ;;  %v16107_v37 = vld [vmem:[#allocation35_spill] sm:$0xff] }
 0x19f   :  { %16089 = vst [vmem:[#allocation166_spill] sm:$0xff] %v9733_v23  ;;  %16090 = vst [vmem:[#allocation167_spill] sm:$0xff] %v9738_v22  ;;  %v9801_v1 = vmul.f32 %v5557_v45, %v16086_v14  ;;  %v9805_v51 = vmul.f32 %v16107_v37, %v16086_v14  ;;  %v9810_v21 = vld [vmem:[%s14611_s0 + $0x1e0] sm:$0xff]  ;;  %v9819_v17 = vld [vmem:[%s14611_s0 + $0x1e8] sm:$0xff] }
 0x1a0   :  { %16091 = vst [vmem:[#allocation168_spill] sm:$0xff] %v9742_v63  ;;  %16092 = vst [vmem:[#allocation169_spill] sm:$0xff] %v9747_v28  ;;  %v9814_v35 = vmul.f32 %v9810_v21, %v16086_v14  ;;  %v9823_v29 = vmul.f32 %v9819_v17, %v16086_v14  ;;  %v16110_v45 = vld [vmem:[#allocation36_spill] sm:$0xff]  ;;  %v9863_v60 = vld [vmem:[%s14611_s0 + $0x218] sm:$0xff] }
 0x1a1   :  { %16093 = vst [vmem:[#allocation170_spill] sm:$0xff] %v9751_v13  ;;  %16095 = vst [vmem:[#allocation171_spill] sm:$0xff] %v9755_v55  ;;  %v9827_v37 = vmul.f32 %v16110_v45, %v16086_v14  ;;  %v16113_v45 = vld [vmem:[#allocation37_spill] sm:$0xff]  ;;  %v9854_v28 = vld [vmem:[%s14611_s0 + $0x210] sm:$0xff]  ;;  %v9867_v33 = vmul.f32 %v9863_v60, %v16086_v14 }
 0x1a2   :  { %16096 = vst [vmem:[#allocation172_spill] sm:$0xff] %v9760_v27  ;;  %16097 = vst [vmem:[#allocation173_spill] sm:$0xff] %v9764_v18  ;;  %v9849_v27 = vmul.f32 %v16113_v45, %v16086_v14  ;;  %v9858_v22 = vmul.f32 %v9854_v28, %v16086_v14  ;;  %v16116_v45 = vld [vmem:[#allocation42_spill] sm:$0xff]  ;;  %v9876_v24 = vld [vmem:[%s14611_s0 + $0x228] sm:$0xff]  ;;  %v2071_v18 = vrot.slane %v9814_v35, 2 }
 0x1a3   :  { %16098 = vst [vmem:[#allocation174_spill] sm:$0xff] %v9769_v3  ;;  %16099 = vst [vmem:[#allocation175_spill] sm:$0xff] %v9773_v52  ;;  %v9871_v49 = vmul.f32 %v16116_v45, %v16086_v14  ;;  %v9880_v57 = vmul.f32 %v9876_v24, %v16086_v14  ;;  %v9885_v15 = vld [vmem:[%s14611_s0 + $0x230] sm:$0xff]  ;;  %v16119_v45 = vld [vmem:[#allocation43_spill] sm:$0xff]  ;;  %v2074_v55 = vrot.slane %v9827_v37, 2  ;;  %v2082_v2 = vrot.slane %v9867_v33, 2 }
 0x1a4   :  { %16101 = vst [vmem:[#allocation38_spill] sm:$0xff] %v9777_v20  ;;  %16102 = vst [vmem:[#allocation39_spill] sm:$0xff] %v9782_v8  ;;  %v9841_v8 = vld [vmem:[%s14611_s0 + $0x200] sm:$0xff]  ;;  %v9889_v56 = vmul.f32 %v9885_v15, %v16086_v14  ;;  %v9893_v41 = vmul.f32 %v16119_v45, %v16086_v14  ;;  %v9907_v54 = vld [vmem:[%s14611_s0 + $0x248] sm:$0xff]  ;;  %v2079_v23 = vrot.slane %v9849_v27, 2 }
 0x1a5   :  { %16103 = vst [vmem:[#allocation40_spill] sm:$0xff] %v9786_v62  ;;  %16104 = vst [vmem:[#allocation41_spill] sm:$0xff] %v9791_v46  ;;  %v9832_v46 = vld [vmem:[%s14611_s0 + $0x1f8] sm:$0xff]  ;;  %v9845_v3 = vmul.f32 %v9841_v8, %v16086_v14  ;;  %v9898_v9 = vld [vmem:[%s14611_s0 + $0x240] sm:$0xff]  ;;  %v9911_v12 = vmul.f32 %v9907_v54, %v16086_v14  ;;  %v2084_v35 = vrot.slane %v9871_v49, 2 }
 0x1a6   :  { %16105 = vst [vmem:[#allocation46_spill] sm:$0xff] %v9795_v47  ;;  %16106 = vst [vmem:[#allocation47_spill] sm:$0xff] %v9801_v1  ;;  %v9902_v61 = vmul.f32 %v9898_v9, %v16086_v14  ;;  %v16122_v45 = vld [vmem:[#allocation44_spill] sm:$0xff]  ;;  %v9920_v38 = vld [vmem:[%s14611_s0 + $0x258] sm:$0xff]  ;;  %v2087_v37 = vrot.slane %v9889_v56, 2 }
 0x1a7   :  { %16108 = vst [vmem:[#allocation77_spill] sm:$0xff] %v9810_v21  ;;  %16109 = vst [vmem:[#allocation79_spill] sm:$0xff] %v9819_v17  ;;  %v9836_v21 = vmul.f32 %v9832_v46, %v16086_v14  ;;  %v9915_v4 = vmul.f32 %v16122_v45, %v16086_v14  ;;  %v9924_v7 = vmul.f32 %v9920_v38, %v16086_v14  ;;  %v9929_v36 = vld [vmem:[%s14611_s0 + $0x260] sm:$0xff]  ;;  %v16125_v45 = vld [vmem:[#allocation45_spill] sm:$0xff]  ;;  %v2077_v63 = vrot.slane %v9845_v3, 2 }
 0x1a8   :  { %16111 = vst [vmem:[#allocation5_spill] sm:$0xff] %v9832_v46  ;;  %16112 = vst [vmem:[#allocation60_spill] sm:$0xff] %v9841_v8  ;;  %v9933_v32 = vmul.f32 %v9929_v36, %v16086_v14  ;;  %v9937_v26 = vmul.f32 %v16125_v45, %v16086_v14  ;;  %v9942_v5 = vld [vmem:[%s14611_s0 + $0x270] sm:$0xff]  ;;  %v9951_v44 = vld [vmem:[%s14611_s0 + $0x278] sm:$0xff] }
 0x1a9   :  { %16114 = vst [vmem:[#allocation66_spill] sm:$0xff] %v9854_v28  ;;  %16115 = vst [vmem:[#allocation103_spill] sm:$0xff] %v9863_v60  ;;  %v9946_v40 = vmul.f32 %v9942_v5, %v16086_v14  ;;  %v9955_v19 = vmul.f32 %v9951_v44, %v16086_v14  ;;  %v16128_v45 = vld [vmem:[#allocation131_spill] sm:$0xff]  ;;  %v9973_v0 = vld [vmem:[%s14611_s0 + $0x290] sm:$0xff]  ;;  %v2069_v60 = vrot.slane %v9805_v51, 2  ;;  %v2094_v3 = vrot.slane %v9915_v4, 2 }
 0x1aa   :  { %16117 = vst [vmem:[#allocation125_spill] sm:$0xff] %v9876_v24  ;;  %16118 = vst [vmem:[#allocation75_spill] sm:$0xff] %v9885_v15  ;;  %v9959_v31 = vmul.f32 %v16128_v45, %v16086_v14  ;;  %v9964_v25 = vld [vmem:[%s14611_s0 + $0x288] sm:$0xff]  ;;  %v9977_v16 = vmul.f32 %v9973_v0, %v16086_v14  ;;  %v16131_v45 = vld [vmem:[#allocation50_spill] sm:$0xff]  ;;  %v2096_v27 = vrot.slane %v9924_v7, 2  ;;  %v2099_v33 = vrot.slane %v9937_v26, 2 }
 0x1ab   :  { %16120 = vst [vmem:[#allocation81_spill] sm:$0xff] %v9898_v9  ;;  %16121 = vst [vmem:[#allocation82_spill] sm:$0xff] %v9907_v54  ;;  %v9968_v39 = vmul.f32 %v9964_v25, %v16086_v14  ;;  %v9981_v58 = vmul.f32 %v16131_v45, %v16086_v14  ;;  %v9986_v10 = vld [vmem:[%s14611_s0 + $0x2a0] sm:$0xff]  ;;  %v9995_v6 = vld [vmem:[%s14611_s0 + $0x2a8] sm:$0xff]  ;;  %v2102_v56 = vrot.slane %v9955_v19, 2  ;;  %v2080_v4 = vsel %vm885_vm2, %v2077_v63, %v2079_v23 }
 0x1ac   :  { %16123 = vst [vmem:[#allocation85_spill] sm:$0xff] %v9920_v38  ;;  %16124 = vst [vmem:[#allocation135_spill] sm:$0xff] %v9929_v36  ;;  %v9990_v34 = vmul.f32 %v9986_v10, %v16086_v14  ;;  %v9999_v43 = vmul.f32 %v9995_v6, %v16086_v14  ;;  %v16134_v45 = vld [vmem:[#allocation51_spill] sm:$0xff]  ;;  %v10039_v36 = vld [vmem:[%s14611_s0 + $0x2d8] sm:$0xff] }
 0x1ad   :  { %16126 = vst [vmem:[#allocation136_spill] sm:$0xff] %v9942_v5  ;;  %16127 = vst [vmem:[#allocation90_spill] sm:$0xff] %v9951_v44  ;;  %v10003_v53 = vmul.f32 %v16134_v45, %v16086_v14  ;;  %v16137_v45 = vld [vmem:[#allocation52_spill] sm:$0xff]  ;;  %v10052_v54 = vld [vmem:[%s14611_s0 + $0x2e8] sm:$0xff] }
 0x1ae   :  { %16129 = vst [vmem:[#allocation96_spill] sm:$0xff] %v9964_v25  ;;  %16130 = vst [vmem:[#allocation97_spill] sm:$0xff] %v9973_v0  ;;  %v10008_v0 = vld [vmem:[%s14611_s0 + $0x2b8] sm:$0xff]  ;;  %v10017_v25 = vld [vmem:[%s14611_s0 + $0x2c0] sm:$0xff]  ;;  %v10025_v44 = vmul.f32 %v16137_v45, %v16086_v14 }
 0x1af   :  { %16132 = vst [vmem:[#allocation105_spill] sm:$0xff] %v9986_v10  ;;  %16133 = vst [vmem:[#allocation140_spill] sm:$0xff] %v9995_v6  ;;  %v10012_v10 = vmul.f32 %v10008_v0, %v16086_v14  ;;  %v10021_v6 = vmul.f32 %v10017_v25, %v16086_v14  ;;  %v10030_v5 = vld [vmem:[%s14611_s0 + $0x2d0] sm:$0xff]  ;;  %v16140_v45 = vld [vmem:[#allocation53_spill] sm:$0xff] }
 0x1b0   :  { %16135 = vst [vmem:[#allocation141_spill] sm:$0xff] %v10008_v0  ;;  %16136 = vst [vmem:[#allocation118_spill] sm:$0xff] %v10017_v25  ;;  %v10034_v0 = vmul.f32 %v10030_v5, %v16086_v14  ;;  %v10043_v25 = vmul.f32 %v10039_v36, %v16086_v14  ;;  %v10047_v38 = vmul.f32 %v16140_v45, %v16086_v14  ;;  %v10061_v9 = vld [vmem:[%s14611_s0 + $0x2f0] sm:$0xff]  ;;  %v16143_v45 = vld [vmem:[#allocation17_spill] sm:$0xff] }
 0x1b1   :  { %16138 = vst [vmem:[#allocation120_spill] sm:$0xff] %v10030_v5  ;;  %16139 = vst [vmem:[#allocation144_spill] sm:$0xff] %v10039_v36  ;;  %v10056_v5 = vmul.f32 %v10052_v54, %v16086_v14  ;;  %v10065_v36 = vmul.f32 %v10061_v9, %v16086_v14  ;;  %v10069_v15 = vmul.f32 %v16143_v45, %v16086_v14  ;;  %v10074_v24 = vld [vmem:[%s14611_s0 + $0x300] sm:$0xff]  ;;  %v10119_v47 = vld [vmem:[%s14611_s0 + $0x330] sm:$0xff] }
 0x1b2   :  { %16141 = vst [vmem:[#allocation68_spill] sm:$0xff] %v10052_v54  ;;  %16142 = vst [vmem:[#allocation67_spill] sm:$0xff] %v10061_v9  ;;  %v10078_v54 = vmul.f32 %v10074_v24, %v16086_v14  ;;  %v10084_v9 = vld [vmem:[%s14611_s0 + $0x308] sm:$0xff]  ;;  %v16146_v28 = vld [vmem:[#allocation58_spill] sm:$0xff] }
 0x1b3   :  { %16144 = vst [vmem:[#allocation21_spill] sm:$0xff] %v10074_v24  ;;  %16145 = vst [vmem:[#allocation99_spill] sm:$0xff] %v10084_v9  ;;  %v10088_v45 = vmul.f32 %v10084_v9, %v16086_v14  ;;  %v10092_v8 = vmul.f32 %v16146_v28, %v16086_v14  ;;  %v10097_v24 = vld [vmem:[%s14611_s0 + $0x318] sm:$0xff]  ;;  %v10106_v46 = vld [vmem:[%s14611_s0 + $0x320] sm:$0xff] }
 0x1b4   :  { %16147 = vst [vmem:[#allocation26_spill] sm:$0xff] %v10097_v24  ;;  %v10101_v51 = vmul.f32 %v10097_v24, %v16086_v14  ;;  %16148 = vst [vmem:[#allocation27_spill] sm:$0xff] %v10106_v46  ;;  %v10110_v9 = vmul.f32 %v10106_v46, %v16086_v14  ;;  %v16149_v28 = vld [vmem:[#allocation132_spill] sm:$0xff]  ;;  %v10123_v24 = vmul.f32 %v10119_v47, %v16086_v14  ;;  %v10128_v62 = vld [vmem:[%s14611_s0 + $0x338] sm:$0xff] }
 0x1b5   :  { %v10114_v17 = vmul.f32 %v16149_v28, %v16086_v14  ;;  %16150 = vst [vmem:[#allocation28_spill] sm:$0xff] %v10119_v47  ;;  %16151 = vst [vmem:[#allocation29_spill] sm:$0xff] %v10128_v62  ;;  %v10132_v46 = vmul.f32 %v10128_v62, %v16086_v14  ;;  %v14949_v28 = vrot.slane %v9801_v1, 2  ;;  %v16152_v20 = vld [vmem:[#allocation3_spill] sm:$0xff]  ;;  %v2072_v47 = vrot.slane %v9823_v29, 2 }
 0x1b6   :  { %v10137_v52 = vmul.f32 %v16086_v14, %v16152_v20  ;;  %v2076_v62 = vrot.slane %v9836_v21, 2  ;;  %v2081_v20 = vrot.slane %v9858_v22, 2  ;;  %v2086_v29 = vrot.slane %v9880_v57, 2 }
 0x1b7   :  { %v10145_v13 = vsel %vm885_vm2, %v14949_v28, %v2069_v60  ;;  %v2089_v1 = vrot.slane %v9893_v41, 2  ;;  %v2091_v60 = vrot.slane %v9902_v61, 2  ;;  %v2092_v21 = vrot.slane %v9911_v12, 2 }
 0x1b8   :  { %v2097_v22 = vrot.slane %v9933_v32, 2  ;;  %v2073_v49 = vsel %vm885_vm2, %v2071_v18, %v2072_v47  ;;  %v2101_v57 = vrot.slane %v9946_v40, 2  ;;  %v2104_v41 = vrot.slane %v9959_v31, 2 }
 0x1b9   :  { %v2075_v61 = vsel %vm885_vm2, %v2072_v47, %v2074_v55  ;;  %v2078_v12 = vsel %vm885_vm2, %v2076_v62, %v2077_v63  ;;  %v2083_v7 = vsel %vm885_vm2, %v2081_v20, %v2082_v2  ;;  %v2085_v32 = vsel %vm885_vm2, %v2082_v2, %v2084_v35 }
 0x1ba   :  { %v2088_v26 = vsel %vm885_vm2, %v2086_v29, %v2087_v37  ;;  %v2090_v18 = vsel %vm885_vm2, %v2087_v37, %v2089_v1  ;;  %v2093_v40 = vsel %vm885_vm2, %v2091_v60, %v2092_v21  ;;  %v2095_v19 = vsel %vm885_vm2, %v2092_v21, %v2094_v3 }
 0x1bb   :  { %v2098_v31 = vsel %vm885_vm2, %v2096_v27, %v2097_v22  ;;  %v2100_v55 = vsel %vm885_vm2, %v2097_v22, %v2099_v33  ;;  %v2106_v62 = vrot.slane %v9968_v39, 2  ;;  %v2103_v23 = vsel %vm885_vm2, %v2101_v57, %v2102_v56 }
 0x1bc   :  { %v2105_v63 = vsel %vm885_vm2, %v2102_v56, %v2104_v41  ;;  %v2107_v2 = vrot.slane %v9977_v16, 2  ;;  %v2109_v47 = vrot.slane %v9981_v58, 2  ;;  %v2111_v1 = vrot.slane %v9990_v34, 2 }
 0x1bd   :  { %v2112_v20 = vrot.slane %v9999_v43, 2  ;;  %v2114_v35 = vrot.slane %v10003_v53, 2  ;;  %v2116_v29 = vrot.slane %v10012_v10, 2  ;;  %v2117_v37 = vrot.slane %v10021_v6, 2 }
 0x1be   :  { %v2119_v39 = vrot.slane %v10025_v44, 2  ;;  %v2121_v60 = vrot.slane %v10034_v0, 2  ;;  %v2122_v21 = vrot.slane %v10043_v25, 2  ;;  %v2124_v16 = vrot.slane %v10047_v38, 2 }
 0x1bf   :  { %v2126_v58 = vrot.slane %v10056_v5, 2  ;;  %v2127_v34 = vrot.slane %v10065_v36, 2  ;;  %v2129_v43 = vrot.slane %v10069_v15, 2  ;;  %v2131_v53 = vrot.slane %v10078_v54, 2 }
 0x1c0   :  { %v2132_v10 = vrot.slane %v10088_v45, 2  ;;  %v2134_v6 = vrot.slane %v10092_v8, 2  ;;  %v2136_v44 = vrot.slane %v10101_v51, 2  ;;  %v2137_v0 = vrot.slane %v10110_v9, 2 }
 0x1c1   :  { %v2139_v25 = vrot.slane %v10114_v17, 2  ;;  %v2141_v38 = vrot.slane %v10123_v24, 2  ;;  %v2142_v5 = vrot.slane %v10132_v46, 2  ;;  %v2108_v36 = vsel %vm885_vm2, %v2106_v62, %v2107_v2 }
 0x1c2   :  { %v2110_v15 = vsel %vm885_vm2, %v2107_v2, %v2109_v47  ;;  %v2113_v54 = vsel %vm885_vm2, %v2111_v1, %v2112_v20  ;;  %v2144_v45 = vrot.slane %v10137_v52, 2  ;;  %v2115_v8 = vsel %vm885_vm2, %v2112_v20, %v2114_v35  ;;  %v16153_v20 = vld [vmem:[#allocation22_spill] sm:$0xff] }
 0x1c3   :  { %v2118_v51 = vsel %vm885_vm2, %v2116_v29, %v2117_v37  ;;  %v2120_v9 = vsel %vm885_vm2, %v2117_v37, %v2119_v39  ;;  %v2123_v17 = vsel %vm885_vm2, %v2121_v60, %v2122_v21  ;;  %v2125_v24 = vsel %vm885_vm2, %v2122_v21, %v2124_v16  ;;  %v16154_v29 = vld [vmem:[#allocation23_spill] sm:$0xff] }
 0x1c4   :  { %v2128_v46 = vsel %vm885_vm2, %v2126_v58, %v2127_v34  ;;  %v2130_v3 = vsel %vm885_vm2, %v2127_v34, %v2129_v43  ;;  %v2133_v27 = vsel %vm885_vm2, %v2131_v53, %v2132_v10  ;;  %v2135_v22 = vsel %vm885_vm2, %v2132_v10, %v2134_v6 }
 0x1c5   :  { %v2138_v52 = vsel %vm885_vm2, %v2136_v44, %v2137_v0  ;;  %v2140_v33 = vsel %vm885_vm2, %v2137_v0, %v2139_v25  ;;  %v2143_v57 = vsel %vm885_vm2, %v2141_v38, %v2142_v5  ;;  %v2145_v56 = vsel %vm885_vm2, %v2142_v5, %v2144_v45  ;;  %v16170_v44 = vld [vmem:[#allocation61_spill] sm:$0xff]  ;;  %v16171_v25 = vld [vmem:[#allocation59_spill] sm:$0xff]  ;;  %v16172_v5 = vld [vmem:[#allocation48_spill] sm:$0xff] }
 0x1c6   :  { %v10221_v41 = vadd.f32 %v10145_v13, %v9221_v42  ;;  %v10224_v62 = vadd.f32 %v2073_v49, %v9224_v50  ;;  %v10227_v2 = vadd.f32 %v2075_v61, %v9227_v11  ;;  %v10230_v47 = vadd.f32 %v2078_v12, %v9230_v30  ;;  %v16155_v42 = vld [vmem:[#allocation24_spill] sm:$0xff]  ;;  %v16156_v50 = vld [vmem:[#allocation25_spill] sm:$0xff]  ;;  %v16157_v11 = vld [vmem:[#allocation30_spill] sm:$0xff] }
 0x1c7   :  { %v10233_v1 = vadd.f32 %v2080_v4, %v9233_v48  ;;  %v10236_v35 = vadd.f32 %v2083_v7, %v16153_v20  ;;  %v10239_v37 = vadd.f32 %v2085_v32, %v16154_v29  ;;  %v10242_v13 = vadd.f32 %v2088_v26, %v16155_v42  ;;  %v16158_v30 = vld [vmem:[#allocation31_spill] sm:$0xff]  ;;  %v16159_v48 = vld [vmem:[#allocation32_spill] sm:$0xff]  ;;  %v16160_v7 = vld [vmem:[#allocation101_spill] sm:$0xff] }
 0x1c8   :  { %v10245_v49 = vadd.f32 %v2090_v18, %v16156_v50  ;;  %v10248_v61 = vadd.f32 %v2093_v40, %v16157_v11  ;;  %v10251_v12 = vadd.f32 %v2095_v19, %v16158_v30  ;;  %v10254_v4 = vadd.f32 %v2098_v31, %v16159_v48  ;;  %v16161_v32 = vld [vmem:[#allocation63_spill] sm:$0xff]  ;;  %v16162_v26 = vld [vmem:[#allocation57_spill] sm:$0xff]  ;;  %v16163_v18 = vld [vmem:[#allocation64_spill] sm:$0xff] }
 0x1c9   :  { %v10257_v39 = vadd.f32 %v2100_v55, %v16160_v7  ;;  %v10260_v60 = vadd.f32 %v2103_v23, %v16161_v32  ;;  %v10263_v21 = vadd.f32 %v2105_v63, %v16162_v26  ;;  %v10266_v16 = vadd.f32 %v2108_v36, %v16163_v18  ;;  %v16164_v40 = vld [vmem:[#allocation72_spill] sm:$0xff]  ;;  %v16165_v19 = vld [vmem:[#allocation70_spill] sm:$0xff]  ;;  %v16166_v31 = vld [vmem:[#allocation73_spill] sm:$0xff] }
 0x1ca   :  { %v10269_v58 = vadd.f32 %v2110_v15, %v16164_v40  ;;  %v10272_v34 = vadd.f32 %v2113_v54, %v16165_v19  ;;  %v10275_v43 = vadd.f32 %v2115_v8, %v16166_v31  ;;  %v16167_v55 = vld [vmem:[#allocation80_spill] sm:$0xff]  ;;  %v16168_v23 = vld [vmem:[#allocation78_spill] sm:$0xff]  ;;  %v10287_v0 = vadd.f32 %v2125_v24, %v16170_v44  ;;  %v16173_v15 = vld [vmem:[#allocation49_spill] sm:$0xff] }
 0x1cb   :  { %v10278_v53 = vadd.f32 %v2118_v51, %v16167_v55  ;;  %v10281_v10 = vadd.f32 %v2120_v9, %v16168_v23  ;;  %v16169_v63 = vld [vmem:[#allocation84_spill] sm:$0xff]  ;;  %v10290_v38 = vadd.f32 %v2128_v46, %v16171_v25  ;;  %v10293_v36 = vadd.f32 %v2130_v3, %v16172_v5  ;;  %v16174_v45 = vld [vmem:[#allocation54_spill] sm:$0xff]  ;;  %v16175_v51 = vld [vmem:[#allocation55_spill] sm:$0xff] }
 0x1cc   :  { %v10284_v6 = vadd.f32 %v2123_v17, %v16169_v63  ;;  %v10296_v54 = vadd.f32 %v2133_v27, %v16173_v15  ;;  %v10299_v8 = vadd.f32 %v2135_v22, %v16174_v45  ;;  %v10302_v9 = vadd.f32 %v2138_v52, %v16175_v51  ;;  %v16177_v17 = vld [vmem:[#allocation56_spill] sm:$0xff]  ;;  %v16179_v24 = vld [vmem:[#allocation62_spill] sm:$0xff]  ;;  %v16181_v46 = vld [vmem:[#allocation65_spill] sm:$0xff] }
 0x1cd   :  { %v10305_v20 = vadd.f32 %v2140_v33, %v16177_v17  ;;  %v10308_v29 = vadd.f32 %v2143_v57, %v16179_v24  ;;  %v10311_v42 = vadd.f32 %v2145_v56, %v16181_v46  ;;  %v16183_v3 = vld [vmem:[#allocation71_spill] sm:$0xff]  ;;  %v10320_v27 = vld [vmem:[%s14611_s0 + $0x78] sm:$0xff]  ;;  %v10329_v52 = vld [vmem:[%s14611_s0 + $0x80] sm:$0xff] }
 0x1ce   :  { %16176 = vst [vmem:[#allocation34_spill] sm:$0xff] %v10302_v9  ;;  %v10315_v50 = vmul.f32 %v16183_v3, %v16086_v14  ;;  %16184 = vst [vmem:[#allocation130_spill] sm:$0xff] %v10320_v27  ;;  %v10324_v22 = vmul.f32 %v10320_v27, %v16086_v14  ;;  %v10333_v33 = vmul.f32 %v10329_v52, %v16086_v14  ;;  %v16186_v57 = vld [vmem:[#allocation107_spill] sm:$0xff]  ;;  %v10342_v11 = vld [vmem:[%s14611_s0 + $0x90] sm:$0xff] }
 0x1cf   :  { %16178 = vst [vmem:[#allocation69_spill] sm:$0xff] %v10305_v20  ;;  %16180 = vst [vmem:[#allocation76_spill] sm:$0xff] %v10308_v29  ;;  %v10337_v56 = vmul.f32 %v16186_v57, %v16086_v14  ;;  %v10346_v30 = vmul.f32 %v10342_v11, %v16086_v14  ;;  %v10351_v48 = vld [vmem:[%s14611_s0 + $0x98] sm:$0xff]  ;;  %v16189_v32 = vld [vmem:[#allocation108_spill] sm:$0xff] }
 0x1d0   :  { %16182 = vst [vmem:[#allocation133_spill] sm:$0xff] %v10311_v42  ;;  %16185 = vst [vmem:[#allocation74_spill] sm:$0xff] %v10329_v52  ;;  %v10355_v7 = vmul.f32 %v10351_v48, %v16086_v14  ;;  %v10359_v26 = vmul.f32 %v16189_v32, %v16086_v14  ;;  %v10364_v18 = vld [vmem:[%s14611_s0 + $0xa8] sm:$0xff]  ;;  %v10373_v19 = vld [vmem:[%s14611_s0 + $0xb0] sm:$0xff] }
 0x1d1   :  { %16187 = vst [vmem:[#allocation83_spill] sm:$0xff] %v10342_v11  ;;  %16188 = vst [vmem:[#allocation134_spill] sm:$0xff] %v10351_v48  ;;  %v10368_v40 = vmul.f32 %v10364_v18, %v16086_v14  ;;  %v10377_v31 = vmul.f32 %v10373_v19, %v16086_v14  ;;  %v16192_v55 = vld [vmem:[#allocation109_spill] sm:$0xff]  ;;  %v10386_v63 = vld [vmem:[%s14611_s0 + $0xc0] sm:$0xff] }
 0x1d2   :  { %16190 = vst [vmem:[#allocation86_spill] sm:$0xff] %v10364_v18  ;;  %16191 = vst [vmem:[#allocation87_spill] sm:$0xff] %v10373_v19  ;;  %v10381_v23 = vmul.f32 %v16192_v55, %v16086_v14  ;;  %v10390_v44 = vmul.f32 %v10386_v63, %v16086_v14  ;;  %v10395_v25 = vld [vmem:[%s14611_s0 + $0xc8] sm:$0xff]  ;;  %v16195_v15 = vld [vmem:[#allocation110_spill] sm:$0xff] }
 0x1d3   :  { %16193 = vst [vmem:[#allocation88_spill] sm:$0xff] %v10386_v63  ;;  %16194 = vst [vmem:[#allocation89_spill] sm:$0xff] %v10395_v25  ;;  %v10399_v5 = vmul.f32 %v10395_v25, %v16086_v14  ;;  %v10403_v45 = vmul.f32 %v16195_v15, %v16086_v14  ;;  %v10408_v51 = vld [vmem:[%s14611_s0 + $0xd8] sm:$0xff]  ;;  %v10417_v24 = vld [vmem:[%s14611_s0 + $0xe0] sm:$0xff] }
 0x1d4   :  { %16196 = vst [vmem:[#allocation137_spill] sm:$0xff] %v10408_v51  ;;  %v10412_v17 = vmul.f32 %v10408_v51, %v16086_v14  ;;  %16198 = vst [vmem:[#allocation138_spill] sm:$0xff] %v10417_v24  ;;  %v10421_v46 = vmul.f32 %v10417_v24, %v16086_v14  ;;  %v16200_v3 = vld [vmem:[#allocation114_spill] sm:$0xff]  ;;  %v10430_v32 = vld [vmem:[%s14611_s0 + $0xf0] sm:$0xff] }
 0x1d5   :  { %v10425_v57 = vmul.f32 %v16200_v3, %v16086_v14  ;;  %16202 = vst [vmem:[#allocation106_spill] sm:$0xff] %v10430_v32  ;;  %v10434_v55 = vmul.f32 %v10430_v32, %v16086_v14  ;;  %v10439_v15 = vld [vmem:[%s14611_s0 + $0xf8] sm:$0xff]  ;;  %v16206_v3 = vld [vmem:[#allocation115_spill] sm:$0xff]  ;;  %v10461_v25 = vld [vmem:[%s14611_s0 + $0x110] sm:$0xff] }
 0x1d6   :  { %16197 = vst [vmem:[#allocation95_spill] sm:$0xff] %v10412_v17  ;;  %16199 = vst [vmem:[#allocation104_spill] sm:$0xff] %v10421_v46  ;;  %v10443_v28 = vmul.f32 %v10439_v15, %v16086_v14  ;;  %v10447_v24 = vmul.f32 %v16206_v3, %v16086_v14  ;;  %v10452_v51 = vld [vmem:[%s14611_s0 + $0x108] sm:$0xff]  ;;  %v16212_v3 = vld [vmem:[#allocation116_spill] sm:$0xff] }
 0x1d7   :  { %16201 = vst [vmem:[#allocation139_spill] sm:$0xff] %v10425_v57  ;;  %16203 = vst [vmem:[#allocation111_spill] sm:$0xff] %v10434_v55  ;;  %v10456_v32 = vmul.f32 %v10452_v51, %v16086_v14  ;;  %v10469_v63 = vmul.f32 %v16212_v3, %v16086_v14  ;;  %v10474_v19 = vld [vmem:[%s14611_s0 + $0x120] sm:$0xff]  ;;  %v10483_v18 = vld [vmem:[%s14611_s0 + $0x128] sm:$0xff] }
 0x1d8   :  { %16204 = vst [vmem:[#allocation112_spill] sm:$0xff] %v10439_v15  ;;  %16205 = vst [vmem:[#allocation113_spill] sm:$0xff] %v10443_v28  ;;  %v10465_v15 = vmul.f32 %v10461_v25, %v16086_v14  ;;  %v16218_v3 = vld [vmem:[#allocation121_spill] sm:$0xff]  ;;  %v10505_v52 = vld [vmem:[%s14611_s0 + $0x140] sm:$0xff] }
 0x1d9   :  { %16207 = vst [vmem:[#allocation142_spill] sm:$0xff] %v10447_v24  ;;  %16208 = vst [vmem:[#allocation119_spill] sm:$0xff] %v10452_v51  ;;  %v10478_v51 = vmul.f32 %v10474_v19, %v16086_v14  ;;  %v10491_v48 = vmul.f32 %v16218_v3, %v16086_v14  ;;  %v10496_v11 = vld [vmem:[%s14611_s0 + $0x138] sm:$0xff]  ;;  %v16224_v3 = vld [vmem:[#allocation122_spill] sm:$0xff] }
 0x1da   :  { %16209 = vst [vmem:[#allocation143_spill] sm:$0xff] %v10456_v32  ;;  %16210 = vst [vmem:[#allocation145_spill] sm:$0xff] %v10461_v25  ;;  %v10487_v25 = vmul.f32 %v10483_v18, %v16086_v14  ;;  %v10513_v27 = vmul.f32 %v16224_v3, %v16086_v14  ;;  %v10530_v3 = vld [vmem:[%s14611_s0 + $0x158] sm:$0xff]  ;;  %v16253_v55 = vld [vmem:[#allocation175_spill] sm:$0xff] }
 0x1db   :  { %16211 = vst [vmem:[#allocation146_spill] sm:$0xff] %v10465_v15  ;;  %16213 = vst [vmem:[#allocation91_spill] sm:$0xff] %v10469_v63  ;;  %v16229_v63 = vld [vmem:[#allocation166_spill] sm:$0xff]  ;;  %v16256_v29 = vld [vmem:[#allocation40_spill] sm:$0xff] }
 0x1dc   :  { %16214 = vst [vmem:[#allocation33_spill] sm:$0xff] %v10474_v19  ;;  %16215 = vst [vmem:[#allocation16_spill] sm:$0xff] %v10478_v51  ;;  %v10500_v19 = vmul.f32 %v10496_v11, %v16086_v14  ;;  %v16255_v57 = vld [vmem:[#allocation38_spill] sm:$0xff] }
 0x1dd   :  { %16216 = vst [vmem:[#allocation92_spill] sm:$0xff] %v10483_v18  ;;  %16217 = vst [vmem:[#allocation18_spill] sm:$0xff] %v10487_v25  ;;  %v10509_v18 = vmul.f32 %v10505_v52, %v16086_v14  ;;  %v16228_v25 = vld [vmem:[#allocation165_spill] sm:$0xff]  ;;  %v1999_v42 = vrot.slane %v16255_v57, 2  ;;  %v2014_v57 = vrot.slane %v10359_v26, 2 }
 0x1de   :  { %16219 = vst [vmem:[#allocation93_spill] sm:$0xff] %v10491_v48  ;;  %16220 = vst [vmem:[#allocation19_spill] sm:$0xff] %v10496_v11  ;;  %v10518_v48 = vld [vmem:[%s14611_s0 + $0x150] sm:$0xff]  ;;  %v1987_v51 = vrot.slane %v16228_v25, 2 }
 0x1df   :  { %16221 = vst [vmem:[#allocation94_spill] sm:$0xff] %v10500_v19  ;;  %16222 = vst [vmem:[#allocation102_spill] sm:$0xff] %v10505_v52  ;;  %v10522_v11 = vmul.f32 %v10518_v48, %v16086_v14  ;;  %v1986_v19 = vrot.slane %v9723_v59, 2  ;;  %v1989_v52 = vrot.slane %v16229_v63, 2  ;;  %v16235_v59 = vld [vmem:[#allocation170_spill] sm:$0xff]  ;;  %v10545_v63 = vld [vmem:[%s14611_s0 + $0x168] sm:$0xff] }
 0x1e0   :  { %16223 = vst [vmem:[#allocation20_spill] sm:$0xff] %v10509_v18  ;;  %16225 = vst [vmem:[#allocation98_spill] sm:$0xff] %v10513_v27  ;;  %v10534_v27 = vmul.f32 %v10530_v3, %v16086_v14  ;;  %v16232_v18 = vld [vmem:[#allocation123_spill] sm:$0xff]  ;;  %v1992_v32 = vrot.slane %v16235_v59, 2  ;;  %v10549_v25 = vmul.f32 %v10545_v63, %v16086_v14 }
 0x1e1   :  { %16226 = vst [vmem:[#allocation100_spill] sm:$0xff] %v10518_v48  ;;  %16227 = vst [vmem:[#allocation35_spill] sm:$0xff] %v10522_v11  ;;  %v10538_v15 = vmul.f32 %v16232_v18, %v16086_v14  ;;  %v16234_v48 = vld [vmem:[#allocation168_spill] sm:$0xff]  ;;  %v10594_v24 = vsel %vm885_vm2, %v1986_v19, %v1987_v51  ;;  %v10597_v28 = vsel %vm885_vm2, %v1987_v51, %v1989_v52  ;;  %v2006_v19 = vrot.slane %v10324_v22, 2  ;;  %v16258_v51 = vld [vmem:[#allocation2_spill] sm:$0xff] }
 0x1e2   :  { %16230 = vst [vmem:[#allocation36_spill] sm:$0xff] %v10530_v3  ;;  %16231 = vst [vmem:[#allocation37_spill] sm:$0xff] %v10534_v27  ;;  %v1991_v11 = vrot.slane %v16234_v48, 2  ;;  %v10554_v3 = vld [vmem:[%s14611_s0 + $0x170] sm:$0xff]  ;;  %v2007_v52 = vrot.slane %v10333_v33, 2  ;;  %v2019_v22 = vrot.slane %v10381_v23, 2 }
 0x1e3   :  { %16233 = vst [vmem:[#allocation42_spill] sm:$0xff] %v10538_v15  ;;  %16236 = vst [vmem:[#allocation43_spill] sm:$0xff] %v10545_v63  ;;  %v10558_v18 = vmul.f32 %v10554_v3, %v16086_v14  ;;  %v16240_v48 = vld [vmem:[#allocation124_spill] sm:$0xff]  ;;  %v10567_v15 = vld [vmem:[%s14611_s0 + $0x180] sm:$0xff] }
 0x1e4   :  { %16237 = vst [vmem:[#allocation44_spill] sm:$0xff] %v10549_v25  ;;  %16238 = vst [vmem:[#allocation45_spill] sm:$0xff] %v10554_v3  ;;  %v10562_v59 = vmul.f32 %v16240_v48, %v16086_v14  ;;  %v10571_v63 = vmul.f32 %v10567_v15, %v16086_v14  ;;  %v10576_v25 = vld [vmem:[%s14611_s0 + $0x188] sm:$0xff]  ;;  %v16246_v48 = vld [vmem:[#allocation117_spill] sm:$0xff] }
 0x1e5   :  { %16239 = vst [vmem:[#allocation131_spill] sm:$0xff] %v10558_v18  ;;  %16242 = vst [vmem:[#allocation51_spill] sm:$0xff] %v10567_v15  ;;  %v10580_v3 = vmul.f32 %v10576_v25, %v16086_v14  ;;  %v5612_v18 = vld [vmem:[%s14611_s0 + $0x1c8] sm:$0xff]  ;;  %v10644_v23 = vld [vmem:[%s14610_s1] sm:$0xff] }
 0x1e6   :  { %16241 = vst [vmem:[#allocation50_spill] sm:$0xff] %v10562_v59  ;;  %16243 = vst [vmem:[#allocation52_spill] sm:$0xff] %v10571_v63  ;;  %v10584_v59 = vmul.f32 %v16086_v14, %v16246_v48  ;;  %v10590_v15 = vmul.f32 %v5612_v18, %v16086_v14  ;;  %v16249_v63 = vld [vmem:[#allocation171_spill] sm:$0xff]  ;;  %v1997_v48 = vrot.slane %v16253_v55, 2  ;;  %v2001_v14 = vrot.slane %v16256_v29, 2  ;;  %v16257_v18 = vld [vmem:[#allocation46_spill] sm:$0xff] }
 0x1e7   :  { %16244 = vst [vmem:[#allocation53_spill] sm:$0xff] %v10576_v25  ;;  %16245 = vst [vmem:[#allocation17_spill] sm:$0xff] %v10580_v3  ;;  %v1994_v27 = vrot.slane %v16249_v63, 2  ;;  %v16252_v25 = vld [vmem:[#allocation173_spill] sm:$0xff]  ;;  %v2004_v63 = vrot.slane %v10315_v50, 2  ;;  %v2011_v55 = vrot.slane %v10346_v30, 2 }
 0x1e8   :  { %16247 = vst [vmem:[#allocation58_spill] sm:$0xff] %v10584_v59  ;;  %16248 = vst [vmem:[#allocation132_spill] sm:$0xff] %v10590_v15  ;;  %v1996_v3 = vrot.slane %v16252_v25, 2  ;;  %v10602_v59 = vsel %vm885_vm2, %v1991_v11, %v1992_v32  ;;  %v2002_v15 = vrot.slane %v16257_v18, 2  ;;  %v2009_v25 = vrot.slane %v10337_v56, 2  ;;  %v10624_v33 = vld [vmem:[%s14611_s0 + $0x348] sm:$0xff] }
 0x1e9   :  { %16250 = vst [vmem:[#allocation3_spill] sm:$0xff] %v10594_v24  ;;  %16251 = vst [vmem:[#allocation22_spill] sm:$0xff] %v10597_v28  ;;  %v2276_v28 = vsub.s32 6, %v16258_v51  ;;  %v2012_v11 = vrot.slane %v10355_v7, 2  ;;  %v10616_v29 = vsel %vm885_vm2, %v1992_v32, %v1994_v27  ;;  %v2016_v18 = vrot.slane %v10368_v40, 2 }
 0x1ea   :  { %16254 = vst [vmem:[#allocation23_spill] sm:$0xff] %v10602_v59  ;;  %16259 = vst [vmem:[#allocation24_spill] sm:$0xff] %v10616_v29  ;;  %v2017_v50 = vrot.slane %v10377_v31, 2  ;;  %v10627_v56 = vsel %vm885_vm2, %v1996_v3, %v1997_v48  ;;  %v2021_v30 = vrot.slane %v10390_v44, 2  ;;  %v2022_v7 = vrot.slane %v10399_v5, 2  ;;  %v10652_v5 = vld [vmem:[%s14611_s0 + $0x350] sm:$0xff] }
 0x1eb   :  { %16260 = vst [vmem:[#allocation25_spill] sm:$0xff] %v10624_v33  ;;  %16261 = vst [vmem:[#allocation30_spill] sm:$0xff] %v10627_v56  ;;  %v2024_v27 = vrot.slane %v10403_v45, 2  ;;  %v10633_v26 = vsel %vm885_vm2, %v1997_v48, %v1999_v42  ;;  %v10636_v40 = vsel %vm885_vm2, %v2001_v14, %v2002_v15  ;;  %v10639_v31 = vsel %vm885_vm2, %v2002_v15, %v2004_v63 }
 0x1ec   :  { %16262 = vst [vmem:[#allocation31_spill] sm:$0xff] %v10633_v26  ;;  %16263 = vst [vmem:[#allocation32_spill] sm:$0xff] %v10636_v40  ;;  %v10647_v44 = vrot.slane %v10644_v23, %v2276_v28  ;;  %v10655_v42 = vsel %vm885_vm2, %v2006_v19, %v2007_v52  ;;  %v10658_v45 = vsel %vm885_vm2, %v2007_v52, %v2009_v25  ;;  %v16283_v25 = vld [vmem:[#allocation75_spill] sm:$0xff] }
 0x1ed   :  { %16264 = vst [vmem:[#allocation101_spill] sm:$0xff] %v10639_v31  ;;  %16265 = vst [vmem:[#allocation63_spill] sm:$0xff] %v10644_v23  ;;  %v10661_v32 = vsel %vm885_vm2, %v2011_v55, %v2012_v11  ;;  %v10664_v15 = vsel %vm885_vm2, %v2012_v11, %v2014_v57  ;;  %v10667_v28 = vsel %vm885_vm2, %v2016_v18, %v2017_v50  ;;  %v16277_v55 = vld [vmem:[#allocation79_spill] sm:$0xff]  ;;  %v16278_v57 = vld [vmem:[#allocation5_spill] sm:$0xff] }
 0x1ee   :  { %16266 = vst [vmem:[#allocation57_spill] sm:$0xff] %v10652_v5  ;;  %16267 = vst [vmem:[#allocation64_spill] sm:$0xff] %v10655_v42  ;;  %v10670_v3 = vsel %vm885_vm2, %v2017_v50, %v2019_v22  ;;  %v10674_v48 = vmul.f32 %v10647_v44, %v10624_v33  ;;  %v10678_v14 = vmul.f32 %v10647_v44, %v10652_v5  ;;  %v16279_v50 = vld [vmem:[#allocation60_spill] sm:$0xff]  ;;  %v16280_v5 = vld [vmem:[#allocation66_spill] sm:$0xff] }
 0x1ef   :  { %16268 = vst [vmem:[#allocation72_spill] sm:$0xff] %v10658_v45  ;;  %16269 = vst [vmem:[#allocation70_spill] sm:$0xff] %v10661_v32  ;;  %v10681_v63 = vsel %vm885_vm2, %v2021_v30, %v2022_v7  ;;  %v10684_v19 = vsel %vm885_vm2, %v2022_v7, %v2024_v27  ;;  %v2311_v11 = vmul.f32 %v16277_v55, %v10647_v44  ;;  %v16281_v33 = vld [vmem:[#allocation103_spill] sm:$0xff]  ;;  %v16282_v27 = vld [vmem:[#allocation125_spill] sm:$0xff] }
 0x1f0   :  { %16270 = vst [vmem:[#allocation73_spill] sm:$0xff] %v10664_v15  ;;  %16271 = vst [vmem:[#allocation80_spill] sm:$0xff] %v10667_v28  ;;  %v2312_v18 = vmul.f32 %v16278_v57, %v10647_v44  ;;  %v2313_v22 = vmul.f32 %v16279_v50, %v10647_v44  ;;  %v2314_v30 = vmul.f32 %v16280_v5, %v10647_v44  ;;  %v16284_v55 = vld [vmem:[#allocation81_spill] sm:$0xff]  ;;  %v16285_v57 = vld [vmem:[#allocation82_spill] sm:$0xff] }
 0x1f1   :  { %16272 = vst [vmem:[#allocation78_spill] sm:$0xff] %v10670_v3  ;;  %16273 = vst [vmem:[#allocation84_spill] sm:$0xff] %v10674_v48  ;;  %v2315_v7 = vmul.f32 %v16281_v33, %v10647_v44  ;;  %v2316_v52 = vmul.f32 %v16282_v27, %v10647_v44  ;;  %v2317_v23 = vmul.f32 %v16283_v25, %v10647_v44  ;;  %v16286_v50 = vld [vmem:[#allocation85_spill] sm:$0xff]  ;;  %v16287_v5 = vld [vmem:[#allocation135_spill] sm:$0xff] }
 0x1f2   :  { %16274 = vst [vmem:[#allocation61_spill] sm:$0xff] %v10678_v14  ;;  %16275 = vst [vmem:[#allocation59_spill] sm:$0xff] %v10681_v63  ;;  %v2318_v51 = vmul.f32 %v16284_v55, %v10647_v44  ;;  %v2320_v63 = vmul.f32 %v16286_v50, %v10647_v44  ;;  %v2321_v3 = vmul.f32 %v16287_v5, %v10647_v44  ;;  %v16288_v33 = vld [vmem:[#allocation136_spill] sm:$0xff]  ;;  %v16289_v27 = vld [vmem:[#allocation90_spill] sm:$0xff] }
 0x1f3   :  { %16276 = vst [vmem:[#allocation48_spill] sm:$0xff] %v10684_v19  ;;  %v2319_v19 = vmul.f32 %v16285_v57, %v10647_v44  ;;  %v2322_v28 = vmul.f32 %v16288_v33, %v10647_v44  ;;  %v2323_v15 = vmul.f32 %v16289_v27, %v10647_v44  ;;  %v16290_v25 = vld [vmem:[#allocation96_spill] sm:$0xff]  ;;  %v16291_v55 = vld [vmem:[#allocation97_spill] sm:$0xff]  ;;  %v16295_v33 = vld [vmem:[#allocation118_spill] sm:$0xff] }
 0x1f4   :  { %v2324_v32 = vmul.f32 %v16290_v25, %v10647_v44  ;;  %v2325_v45 = vmul.f32 %v16291_v55, %v10647_v44  ;;  %v16292_v57 = vld [vmem:[#allocation105_spill] sm:$0xff]  ;;  %v16293_v50 = vld [vmem:[#allocation140_spill] sm:$0xff]  ;;  %v2329_v26 = vmul.f32 %v16295_v33, %v10647_v44  ;;  %v16302_v33 = vld [vmem:[#allocation26_spill] sm:$0xff] }
 0x1f5   :  { %v2326_v42 = vmul.f32 %v16292_v57, %v10647_v44  ;;  %v2327_v31 = vmul.f32 %v16293_v50, %v10647_v44  ;;  %v16294_v5 = vld [vmem:[#allocation141_spill] sm:$0xff]  ;;  %v16296_v27 = vld [vmem:[#allocation120_spill] sm:$0xff]  ;;  %v16299_v57 = vld [vmem:[#allocation67_spill] sm:$0xff]  ;;  %v2336_v14 = vmul.f32 %v16302_v33, %v10647_v44  ;;  %v10756_v33 = vadd.f32 %v2314_v30, %v10230_v47 }
 0x1f6   :  { %v2328_v40 = vmul.f32 %v16294_v5, %v10647_v44  ;;  %v2330_v56 = vmul.f32 %v16296_v27, %v10647_v44  ;;  %v16297_v25 = vld [vmem:[#allocation144_spill] sm:$0xff]  ;;  %v2333_v24 = vmul.f32 %v16299_v57, %v10647_v44  ;;  %v16300_v50 = vld [vmem:[#allocation21_spill] sm:$0xff]  ;;  %v16301_v5 = vld [vmem:[#allocation99_spill] sm:$0xff]  ;;  %v10747_v57 = vadd.f32 %v2311_v11, %v10221_v41 }
 0x1f7   :  { %v2331_v29 = vmul.f32 %v16297_v25, %v10647_v44  ;;  %v16298_v55 = vld [vmem:[#allocation68_spill] sm:$0xff]  ;;  %v2334_v17 = vmul.f32 %v16300_v50, %v10647_v44  ;;  %v2335_v46 = vmul.f32 %v16301_v5, %v10647_v44  ;;  %v16303_v27 = vld [vmem:[#allocation27_spill] sm:$0xff]  ;;  %v10750_v50 = vadd.f32 %v2312_v18, %v10224_v62  ;;  %16309 = vst [vmem:[#allocation56_spill] sm:$0xff] %v10756_v33  ;;  %v16355_v11 = vld [vmem:[#allocation18_spill] sm:$0xff] }
 0x1f8   :  { %v2332_v59 = vmul.f32 %v16298_v55, %v10647_v44  ;;  %v2337_v48 = vmul.f32 %v16303_v27, %v10647_v44  ;;  %v16304_v25 = vld [vmem:[#allocation28_spill] sm:$0xff]  ;;  %v16305_v55 = vld [vmem:[#allocation29_spill] sm:$0xff]  ;;  %16306 = vst [vmem:[#allocation49_spill] sm:$0xff] %v10747_v57  ;;  %v10753_v5 = vadd.f32 %v2313_v22, %v10227_v2  ;;  %v10759_v27 = vadd.f32 %v2315_v7, %v10233_v1  ;;  %v16357_v7 = vld [vmem:[#allocation94_spill] sm:$0xff] }
 0x1f9   :  { %v2338_v20 = vmul.f32 %v16304_v25, %v10647_v44  ;;  %v2339_v9 = vmul.f32 %v16305_v55, %v10647_v44  ;;  %16307 = vst [vmem:[#allocation54_spill] sm:$0xff] %v10750_v50  ;;  %v10762_v25 = vadd.f32 %v2316_v52, %v10236_v35  ;;  %v10765_v55 = vadd.f32 %v2317_v23, %v10239_v37  ;;  %v16356_v22 = vld [vmem:[#allocation93_spill] sm:$0xff]  ;;  %v16466_v33 = vld [vmem:[#allocation83_spill] sm:$0xff]  ;;  %v16468_v57 = vld [vmem:[#allocation86_spill] sm:$0xff] }
 0x1fa   :  { %16308 = vst [vmem:[#allocation55_spill] sm:$0xff] %v10753_v5  ;;  %16310 = vst [vmem:[#allocation62_spill] sm:$0xff] %v10759_v27  ;;  %v10768_v41 = vadd.f32 %v2318_v51, %v10242_v13  ;;  %v10771_v62 = vadd.f32 %v2319_v19, %v10245_v49  ;;  %v10774_v2 = vadd.f32 %v2320_v63, %v10248_v61  ;;  %v16354_v19 = vld [vmem:[#allocation16_spill] sm:$0xff]  ;;  %v2042_v18 = vrot.slane %v16355_v11, 2 }
 0x1fb   :  { %16311 = vst [vmem:[#allocation65_spill] sm:$0xff] %v10762_v25  ;;  %16312 = vst [vmem:[#allocation71_spill] sm:$0xff] %v10765_v55  ;;  %v10777_v47 = vadd.f32 %v2321_v3, %v10251_v12  ;;  %v10780_v1 = vadd.f32 %v2322_v28, %v10254_v4  ;;  %v10783_v35 = vadd.f32 %v2323_v15, %v10257_v39  ;;  %v16351_v15 = vld [vmem:[#allocation143_spill] sm:$0xff]  ;;  %v16352_v3 = vld [vmem:[#allocation146_spill] sm:$0xff]  ;;  %v2041_v52 = vrot.slane %v16354_v19, 2 }
 0x1fc   :  { %16313 = vst [vmem:[#allocation107_spill] sm:$0xff] %v10768_v41  ;;  %16314 = vst [vmem:[#allocation108_spill] sm:$0xff] %v10771_v62  ;;  %v10786_v37 = vadd.f32 %v2324_v32, %v10260_v60  ;;  %v10789_v13 = vadd.f32 %v2325_v45, %v10263_v21  ;;  %v10792_v49 = vadd.f32 %v2326_v42, %v10266_v16  ;;  %v16350_v45 = vld [vmem:[#allocation142_spill] sm:$0xff]  ;;  %v2036_v28 = vrot.slane %v16351_v15, 2  ;;  %v16364_v15 = vld [vmem:[#allocation131_spill] sm:$0xff] }
 0x1fd   :  { %16315 = vst [vmem:[#allocation109_spill] sm:$0xff] %v10774_v2  ;;  %16316 = vst [vmem:[#allocation110_spill] sm:$0xff] %v10777_v47  ;;  %v10795_v61 = vadd.f32 %v2327_v31, %v10269_v58  ;;  %v10798_v12 = vadd.f32 %v2328_v40, %v10272_v34  ;;  %v10801_v4 = vadd.f32 %v2329_v26, %v10275_v43  ;;  %v16347_v40 = vld [vmem:[#allocation139_spill] sm:$0xff]  ;;  %v2034_v32 = vrot.slane %v16350_v45, 2  ;;  %v16366_v11 = vld [vmem:[#allocation52_spill] sm:$0xff] }
 0x1fe   :  { %16317 = vst [vmem:[#allocation114_spill] sm:$0xff] %v10780_v1  ;;  %16318 = vst [vmem:[#allocation115_spill] sm:$0xff] %v10783_v35  ;;  %v10804_v39 = vadd.f32 %v2330_v56, %v10278_v53  ;;  %v10807_v60 = vadd.f32 %v2331_v29, %v10281_v10  ;;  %v10810_v21 = vadd.f32 %v2332_v59, %v10284_v6  ;;  %v16333_v10 = vld [vmem:[#allocation34_spill] sm:$0xff]  ;;  %v16335_v6 = vld [vmem:[#allocation69_spill] sm:$0xff]  ;;  %v2044_v30 = vrot.slane %v16356_v22, 2 }
 0x1ff   :  { %16319 = vst [vmem:[#allocation116_spill] sm:$0xff] %v10786_v37  ;;  %16320 = vst [vmem:[#allocation121_spill] sm:$0xff] %v10789_v13  ;;  %v10813_v16 = vadd.f32 %v2333_v24, %v10287_v0  ;;  %v10816_v58 = vadd.f32 %v2334_v17, %v10290_v38  ;;  %v10819_v34 = vadd.f32 %v2335_v46, %v10293_v36  ;;  %v16337_v0 = vld [vmem:[#allocation76_spill] sm:$0xff]  ;;  %v16340_v38 = vld [vmem:[#allocation133_spill] sm:$0xff]  ;;  %v2061_v22 = vrot.slane %v16366_v11, 2 }
 0x200   :  { %16321 = vst [vmem:[#allocation122_spill] sm:$0xff] %v10792_v49  ;;  %16322 = vst [vmem:[#allocation165_spill] sm:$0xff] %v10795_v61  ;;  %v10822_v43 = vadd.f32 %v2336_v14, %v10296_v54  ;;  %v10825_v53 = vadd.f32 %v2337_v48, %v10299_v8  ;;  %v10828_v51 = vadd.f32 %v2338_v20, %v16333_v10  ;;  %v16338_v24 = vld [vmem:[#allocation84_spill] sm:$0xff]  ;;  %v16341_v17 = vld [vmem:[#allocation61_spill] sm:$0xff]  ;;  %v2029_v20 = vrot.slane %v16347_v40, 2 }
 0x201   :  { %16323 = vst [vmem:[#allocation166_spill] sm:$0xff] %v10798_v12  ;;  %16324 = vst [vmem:[#allocation123_spill] sm:$0xff] %v10801_v4  ;;  %v10831_v59 = vadd.f32 %v2339_v9, %v16335_v6  ;;  %v10835_v29 = vadd.f32 %v16338_v24, %v16337_v0  ;;  %v10839_v36 = vadd.f32 %v16341_v17, %v16340_v38  ;;  %v16343_v46 = vld [vmem:[#allocation104_spill] sm:$0xff]  ;;  %v16345_v56 = vld [vmem:[#allocation95_spill] sm:$0xff]  ;;  %v2037_v48 = vrot.slane %v16352_v3, 2 }
 0x202   :  { %16325 = vst [vmem:[#allocation168_spill] sm:$0xff] %v10804_v39  ;;  %16326 = vst [vmem:[#allocation170_spill] sm:$0xff] %v10807_v60  ;;  %v16344_v54 = vrot.slane %v16343_v46, 2  ;;  %v16346_v26 = vrot.slane %v16345_v56, 2  ;;  %v16348_v31 = vld [vmem:[#allocation111_spill] sm:$0xff]  ;;  %v16349_v9 = vld [vmem:[#allocation113_spill] sm:$0xff]  ;;  %v2043_v11 = vsel %vm885_vm2, %v2041_v52, %v2042_v18  ;;  %v2286_v5 = vmul.f32 %v16466_v33, %v10647_v44 }
 0x203   :  { %16327 = vst [vmem:[#allocation124_spill] sm:$0xff] %v10810_v21  ;;  %16328 = vst [vmem:[#allocation117_spill] sm:$0xff] %v10813_v16  ;;  %v2031_v23 = vrot.slane %v16348_v31, 2  ;;  %v2032_v42 = vrot.slane %v16349_v9, 2  ;;  %v16353_v14 = vld [vmem:[#allocation91_spill] sm:$0xff]  ;;  %v2046_v10 = vrot.slane %v16357_v7, 2 }
 0x204   :  { %16329 = vst [vmem:[#allocation171_spill] sm:$0xff] %v10816_v58  ;;  %16330 = vst [vmem:[#allocation173_spill] sm:$0xff] %v10819_v34  ;;  %v2028_v8 = vsel %vm885_vm2, %v16346_v26, %v16344_v54  ;;  %v2039_v63 = vrot.slane %v16353_v14, 2  ;;  %v16358_v6 = vld [vmem:[#allocation20_spill] sm:$0xff]  ;;  %v16359_v24 = vld [vmem:[#allocation98_spill] sm:$0xff]  ;;  %v2057_v3 = vrot.slane %v16364_v15, 2  ;;  %v2038_v15 = vsel %vm885_vm2, %v2036_v28, %v2037_v48 }
 0x205   :  { %16331 = vst [vmem:[#allocation175_spill] sm:$0xff] %v10822_v43  ;;  %16332 = vst [vmem:[#allocation38_spill] sm:$0xff] %v10825_v53  ;;  %v2047_v0 = vrot.slane %v16358_v6, 2  ;;  %v2049_v38 = vrot.slane %v16359_v24, 2  ;;  %v16360_v17 = vld [vmem:[#allocation35_spill] sm:$0xff]  ;;  %v16361_v56 = vld [vmem:[#allocation37_spill] sm:$0xff] }
 0x206   :  { %16334 = vst [vmem:[#allocation40_spill] sm:$0xff] %v10828_v51  ;;  %16336 = vst [vmem:[#allocation46_spill] sm:$0xff] %v10831_v59  ;;  %v2051_v54 = vrot.slane %v16360_v17, 2  ;;  %v2052_v26 = vrot.slane %v16361_v56, 2  ;;  %v16362_v40 = vld [vmem:[#allocation42_spill] sm:$0xff]  ;;  %v16363_v9 = vld [vmem:[#allocation44_spill] sm:$0xff] }
 0x207   :  { %16339 = vst [vmem:[#allocation34_spill] sm:$0xff] %v10835_v29  ;;  %16342 = vst [vmem:[#allocation69_spill] sm:$0xff] %v10839_v36  ;;  %v2054_v31 = vrot.slane %v16362_v40, 2  ;;  %v2056_v45 = vrot.slane %v16363_v9, 2  ;;  %v16365_v14 = vld [vmem:[#allocation50_spill] sm:$0xff]  ;;  %v16367_v36 = vld [vmem:[#allocation17_spill] sm:$0xff]  ;;  %v2033_v40 = vsel %vm885_vm2, %v2031_v23, %v2032_v42  ;;  %v2035_v9 = vsel %vm885_vm2, %v2032_v42, %v2034_v32 }
 0x208   :  { %v2059_v19 = vrot.slane %v16365_v14, 2  ;;  %v2062_v7 = vrot.slane %v16367_v36, 2  ;;  %v16368_v29 = vld [vmem:[#allocation58_spill] sm:$0xff]  ;;  %v16369_v59 = vld [vmem:[#allocation132_spill] sm:$0xff]  ;;  %v16370_v17 = vrot.slane %v16343_v46, 2  ;;  %v2040_v14 = vsel %vm885_vm2, %v2037_v48, %v2039_v63  ;;  %v16371_v48 = vld [vmem:[#allocation47_spill] sm:$0xff] }
 0x209   :  { %v2064_v6 = vrot.slane %v16368_v29, 2  ;;  %v2066_v24 = vrot.slane %v16369_v59, 2  ;;  %v2045_v36 = vsel %vm885_vm2, %v2042_v18, %v2044_v30  ;;  %v2048_v29 = vsel %vm885_vm2, %v2046_v10, %v2047_v0  ;;  %v16373_v18 = vld [vmem:[#allocation126_spill] sm:$0xff]  ;;  %v16374_v30 = vld [vmem:[#allocation3_spill] sm:$0xff]  ;;  %v16388_v51 = vld [vmem:[#allocation101_spill] sm:$0xff] }
 0x20a   :  { %v2030_v56 = vsel %vm885_vm2, %v16370_v17, %v2029_v20  ;;  %v2050_v59 = vsel %vm885_vm2, %v2047_v0, %v2049_v38  ;;  %v2053_v46 = vsel %vm885_vm2, %v2051_v54, %v2052_v26  ;;  %v2055_v20 = vsel %vm885_vm2, %v2052_v26, %v2054_v31  ;;  %v16375_v0 = vld [vmem:[#allocation127_spill] sm:$0xff]  ;;  %v16376_v38 = vld [vmem:[#allocation22_spill] sm:$0xff]  ;;  %v16377_v26 = vld [vmem:[#allocation129_spill] sm:$0xff] }
 0x20b   :  { %v2058_v23 = vsel %vm885_vm2, %v2056_v45, %v2057_v3  ;;  %v2060_v42 = vsel %vm885_vm2, %v2057_v3, %v2059_v19  ;;  %v2063_v32 = vsel %vm885_vm2, %v2061_v22, %v2062_v7  ;;  %v2065_v28 = vsel %vm885_vm2, %v2062_v7, %v2064_v6  ;;  %v16378_v31 = vld [vmem:[#allocation23_spill] sm:$0xff]  ;;  %v16380_v19 = vld [vmem:[#allocation24_spill] sm:$0xff]  ;;  %v16382_v6 = vld [vmem:[#allocation30_spill] sm:$0xff] }
 0x20c   :  { %v16372_v63 = vrot.slane %v16371_v48, 2  ;;  %v10891_v10 = vadd.f32 %v16374_v30, %v16373_v18  ;;  %v10895_v54 = vadd.f32 %v16376_v38, %v16375_v0  ;;  %v10899_v45 = vadd.f32 %v16378_v31, %v16377_v26  ;;  %v16379_v3 = vld [vmem:[#allocation147_spill] sm:$0xff]  ;;  %v16381_v7 = vld [vmem:[#allocation148_spill] sm:$0xff]  ;;  %v16385_v18 = vld [vmem:[#allocation150_spill] sm:$0xff] }
 0x20d   :  { %v10903_v22 = vadd.f32 %v16380_v19, %v16379_v3  ;;  %v10907_v17 = vadd.f32 %v16382_v6, %v16381_v7  ;;  %v16384_v48 = vld [vmem:[#allocation31_spill] sm:$0xff]  ;;  %v16386_v30 = vld [vmem:[#allocation32_spill] sm:$0xff]  ;;  %v16389_v31 = vld [vmem:[#allocation6_spill] sm:$0xff] }
 0x20e   :  { %v2068_v52 = vsel %vm885_vm2, %v2066_v24, %v16372_v63  ;;  %v16383_v24 = vld [vmem:[#allocation149_spill] sm:$0xff]  ;;  %v10915_v0 = vadd.f32 %v16386_v30, %v16385_v18  ;;  %v16387_v38 = vld [vmem:[#allocation151_spill] sm:$0xff]  ;;  %v16390_v53 = vld [vmem:[#allocation64_spill] sm:$0xff] }
 0x20f   :  { %v10911_v63 = vadd.f32 %v16384_v48, %v16383_v24  ;;  %v10919_v26 = vadd.f32 %v16388_v51, %v16387_v38  ;;  %v10923_v3 = vadd.f32 %v16390_v53, %v16389_v31  ;;  %v16391_v19 = vld [vmem:[#allocation4_spill] sm:$0xff]  ;;  %v16393_v6 = vld [vmem:[#allocation7_spill] sm:$0xff]  ;;  %v16394_v34 = vld [vmem:[#allocation70_spill] sm:$0xff] }
 0x210   :  { %v16392_v43 = vld [vmem:[#allocation72_spill] sm:$0xff]  ;;  %v10931_v24 = vadd.f32 %v16394_v34, %v16393_v6  ;;  %v16396_v58 = vld [vmem:[#allocation73_spill] sm:$0xff]  ;;  %v16399_v38 = vld [vmem:[#allocation10_spill] sm:$0xff] }
 0x211   :  { %v10927_v7 = vadd.f32 %v16392_v43, %v16391_v19  ;;  %v16395_v48 = vld [vmem:[#allocation8_spill] sm:$0xff]  ;;  %v16397_v30 = vld [vmem:[#allocation9_spill] sm:$0xff]  ;;  %v16400_v21 = vld [vmem:[#allocation78_spill] sm:$0xff] }
 0x212   :  { %v10935_v18 = vadd.f32 %v16396_v58, %v16395_v48  ;;  %v16398_v16 = vld [vmem:[#allocation80_spill] sm:$0xff]  ;;  %v10943_v53 = vadd.f32 %v16400_v21, %v16399_v38  ;;  %v16402_v60 = vld [vmem:[#allocation59_spill] sm:$0xff]  ;;  %v16403_v19 = vld [vmem:[#allocation13_spill] sm:$0xff] }
 0x213   :  { %v10939_v51 = vadd.f32 %v16398_v16, %v16397_v30  ;;  %v16401_v31 = vld [vmem:[#allocation12_spill] sm:$0xff]  ;;  %v16405_v6 = vld [vmem:[#allocation14_spill] sm:$0xff]  ;;  %v16407_v16 = vld [vmem:[#allocation11_spill] sm:$0xff] }
 0x214   :  { %v10947_v43 = vadd.f32 %v16402_v60, %v16401_v31  ;;  %v16404_v39 = vld [vmem:[#allocation48_spill] sm:$0xff]  ;;  %v10954_v4 = vadd.f32 %v2028_v8, %v16405_v6  ;;  %v10960_v30 = vadd.f32 %v2033_v40, %v16407_v16  ;;  %v16408_v12 = vld [vmem:[#allocation15_spill] sm:$0xff]  ;;  %v16411_v31 = vld [vmem:[#allocation153_spill] sm:$0xff] }
 0x215   :  { %v10951_v34 = vadd.f32 %v16404_v39, %v16403_v19  ;;  %v16406_v58 = vld [vmem:[#allocation128_spill] sm:$0xff]  ;;  %v10963_v21 = vadd.f32 %v2035_v9, %v16408_v12  ;;  %v10968_v60 = vld [vmem:[%s14610_s1 + $0x8] ss:$0 sm:$0xff]  ;;  %v10974_v8 = vadd.f32 %v2040_v14, %v16411_v31  ;;  %v16412_v19 = vld [vmem:[#allocation154_spill] sm:$0xff] }
 0x216   :  { %v10957_v48 = vadd.f32 %v2030_v56, %v16406_v58  ;;  %16409 = vst [vmem:[#allocation76_spill] sm:$0xff] %v10968_v60  ;;  %v16410_v38 = vld [vmem:[#allocation152_spill] sm:$0xff]  ;;  %v10977_v56 = vadd.f32 %v2043_v11, %v16412_v19  ;;  %v16413_v6 = vld [vmem:[#allocation155_spill] sm:$0xff]  ;;  %v16417_v9 = vld [vmem:[#allocation157_spill] sm:$0xff] }
 0x217   :  { %v10971_v39 = vadd.f32 %v2038_v15, %v16410_v38  ;;  %v10980_v40 = vadd.f32 %v2045_v36, %v16413_v6  ;;  %v16415_v58 = vld [vmem:[#allocation156_spill] sm:$0xff]  ;;  %v10986_v16 = vadd.f32 %v2050_v59, %v16417_v9  ;;  %v16419_v61 = vld [vmem:[#allocation158_spill] sm:$0xff]  ;;  %v16422_v13 = vld [vmem:[#allocation159_spill] sm:$0xff] }
 0x218   :  { %v10983_v12 = vadd.f32 %v2048_v29, %v16415_v58  ;;  %v10989_v49 = vadd.f32 %v2053_v46, %v16419_v61  ;;  %v16421_v15 = vld [vmem:[#allocation2_spill] sm:$0xff]  ;;  %v10993_v14 = vadd.f32 %v2055_v20, %v16422_v13  ;;  %v16424_v31 = vld [vmem:[#allocation160_spill] sm:$0xff]  ;;  %v16426_v19 = vld [vmem:[#allocation161_spill] sm:$0xff] }
 0x219   :  { %16414 = vst [vmem:[#allocation84_spill] sm:$0xff] %v10980_v40  ;;  %16418 = vst [vmem:[#allocation61_spill] sm:$0xff] %v10986_v16  ;;  %v2408_v38 = vsub.s32 7, %v16421_v15  ;;  %v10996_v11 = vadd.f32 %v2058_v23, %v16424_v31  ;;  %v10999_v36 = vadd.f32 %v2060_v42, %v16426_v19  ;;  %v16428_v6 = vld [vmem:[#allocation162_spill] sm:$0xff]  ;;  %v16430_v58 = vld [vmem:[#allocation163_spill] sm:$0xff] }
 0x21a   :  { %16416 = vst [vmem:[#allocation133_spill] sm:$0xff] %v10983_v12  ;;  %16420 = vst [vmem:[#allocation104_spill] sm:$0xff] %v10989_v49  ;;  %v11002_v29 = vadd.f32 %v2063_v32, %v16428_v6  ;;  %v11005_v59 = vadd.f32 %v2065_v28, %v16430_v58  ;;  %v16432_v9 = vld [vmem:[#allocation164_spill] sm:$0xff]  ;;  %v16434_v46 = vld [vmem:[#allocation167_spill] sm:$0xff] }
 0x21b   :  { %16423 = vst [vmem:[#allocation95_spill] sm:$0xff] %v10993_v14  ;;  %16425 = vst [vmem:[#allocation139_spill] sm:$0xff] %v10996_v11  ;;  %v11008_v61 = vadd.f32 %v2068_v52, %v16432_v9  ;;  %v11012_v15 = vmul.f32 %v16434_v46, %v10968_v60  ;;  %v16436_v13 = vld [vmem:[#allocation169_spill] sm:$0xff]  ;;  %v11021_v23 = vld [vmem:[%s14611_s0 + $0x40] sm:$0x3] }
 0x21c   :  { %16427 = vst [vmem:[#allocation111_spill] sm:$0xff] %v10999_v36  ;;  %16429 = vst [vmem:[#allocation113_spill] sm:$0xff] %v11002_v29  ;;  %v11016_v20 = vmul.f32 %v16436_v13, %v10968_v60  ;;  %v11025_v42 = vmul.f32 %v11021_v23, %v10968_v60  ;;  %v16440_v32 = vld [vmem:[#allocation172_spill] sm:$0xff]  ;;  %v16442_v52 = vld [vmem:[#allocation174_spill] sm:$0xff] }
 0x21d   :  { %16431 = vst [vmem:[#allocation142_spill] sm:$0xff] %v11005_v59  ;;  %16433 = vst [vmem:[#allocation143_spill] sm:$0xff] %v11008_v61  ;;  %v11029_v28 = vmul.f32 %v16440_v32, %v10968_v60  ;;  %v11033_v31 = vmul.f32 %v16442_v52, %v10968_v60  ;;  %v11038_v19 = vld [vmem:[%s14611_s0 + $0x58] sm:$0x3]  ;;  %v16447_v9 = vld [vmem:[#allocation63_spill] sm:$0xff]  ;;  %v2280_v2 = vmul.f32 %v16440_v32, %v10647_v44 }
 0x21e   :  { %16435 = vst [vmem:[#allocation146_spill] sm:$0xff] %v11012_v15  ;;  %16437 = vst [vmem:[#allocation91_spill] sm:$0xff] %v11016_v20  ;;  %v11042_v6 = vmul.f32 %v11038_v19, %v10968_v60  ;;  %v11047_v58 = vld [vmem:[%s14611_s0 + $0x358] sm:$0x3]  ;;  %v16473_v33 = vld [vmem:[#allocation138_spill] sm:$0xff] }
 0x21f   :  { %16438 = vst [vmem:[#allocation16_spill] sm:$0xff] %v11021_v23  ;;  %16439 = vst [vmem:[#allocation18_spill] sm:$0xff] %v11025_v42  ;;  %v16449_v42 = vld [vmem:[#allocation39_spill] sm:$0xff]  ;;  %v16451_v20 = vld [vmem:[#allocation41_spill] sm:$0xff] }
 0x220   :  { %16441 = vst [vmem:[#allocation93_spill] sm:$0xff] %v11029_v28  ;;  %16443 = vst [vmem:[#allocation94_spill] sm:$0xff] %v11033_v31  ;;  %v11050_v28 = vrot.slane %v16447_v9, %v2408_v38  ;;  %v11054_v31 = vmul.f32 %v16449_v42, %v10968_v60  ;;  %v11058_v15 = vmul.f32 %v16451_v20, %v10968_v60  ;;  %v16455_v9 = vld [vmem:[#allocation130_spill] sm:$0xff]  ;;  %v16461_v41 = vld [vmem:[#allocation25_spill] sm:$0xff] }
 0x221   :  { %16444 = vst [vmem:[#allocation20_spill] sm:$0xff] %v11038_v19  ;;  %16445 = vst [vmem:[#allocation98_spill] sm:$0xff] %v11042_v6  ;;  %v11063_v6 = vld [vmem:[%s14611_s0 + $0x70] sm:$0x3]  ;;  %v2278_v38 = vmul.f32 %v16434_v46, %v10647_v44  ;;  %v11073_v35 = vmul.f32 %v16455_v9, %v10968_v60  ;;  %v2283_v62 = vmul.f32 %v16451_v20, %v10647_v44  ;;  %v16478_v32 = vld [vmem:[#allocation145_spill] sm:$0xff] }
 0x222   :  { %16446 = vst [vmem:[#allocation35_spill] sm:$0xff] %v11047_v58  ;;  %16448 = vst [vmem:[#allocation37_spill] sm:$0xff] %v11050_v28  ;;  %v11067_v37 = vmul.f32 %v11063_v6, %v10968_v60  ;;  %v11100_v55 = vmul.f32 %v11050_v28, %v16461_v41  ;;  %v2284_v25 = vmul.f32 %v16455_v9, %v10647_v44  ;;  %v16467_v41 = vld [vmem:[#allocation134_spill] sm:$0xff]  ;;  %v16471_v9 = vld [vmem:[#allocation89_spill] sm:$0xff] }
 0x223   :  { %16450 = vst [vmem:[#allocation42_spill] sm:$0xff] %v11054_v31  ;;  %16452 = vst [vmem:[#allocation44_spill] sm:$0xff] %v11058_v15  ;;  %v16457_v31 = vld [vmem:[#allocation74_spill] sm:$0xff]  ;;  %v11082_v15 = vld [vmem:[%s14611_s0 + $0x88] sm:$0x3]  ;;  %v2287_v50 = vmul.f32 %v16467_v41, %v10647_v44 }
 0x224   :  { %16453 = vst [vmem:[#allocation131_spill] sm:$0xff] %v11063_v6  ;;  %16454 = vst [vmem:[#allocation50_spill] sm:$0xff] %v11067_v37  ;;  %v11077_v1 = vmul.f32 %v16457_v31, %v10968_v60  ;;  %v11086_v47 = vmul.f32 %v11082_v15, %v10968_v60  ;;  %v2279_v37 = vmul.f32 %v16436_v13, %v10647_v44  ;;  %v16474_v41 = vld [vmem:[#allocation106_spill] sm:$0xff]  ;;  %v16479_v23 = vld [vmem:[#allocation33_spill] sm:$0xff] }
 0x225   :  { %16456 = vst [vmem:[#allocation52_spill] sm:$0xff] %v11073_v35  ;;  %16459 = vst [vmem:[#allocation58_spill] sm:$0xff] %v11082_v15  ;;  %v2281_v35 = vmul.f32 %v16442_v52, %v10647_v44  ;;  %v11108_v15 = vmul.f32 %v11050_v28, %v11047_v58  ;;  %v2285_v27 = vmul.f32 %v16457_v31, %v10647_v44  ;;  %v16470_v58 = vld [vmem:[#allocation88_spill] sm:$0xff]  ;;  %v16472_v31 = vld [vmem:[#allocation137_spill] sm:$0xff] }
 0x226   :  { %16458 = vst [vmem:[#allocation17_spill] sm:$0xff] %v11077_v1  ;;  %16460 = vst [vmem:[#allocation132_spill] sm:$0xff] %v11086_v47  ;;  %v2282_v1 = vmul.f32 %v16449_v42, %v10647_v44  ;;  %v16463_v47 = vld [vmem:[#allocation57_spill] sm:$0xff]  ;;  %v2291_v6 = vmul.f32 %v16471_v9, %v10647_v44  ;;  %v2292_v20 = vmul.f32 %v16472_v31, %v10647_v44  ;;  %v16480_v13 = vld [vmem:[#allocation92_spill] sm:$0xff] }
 0x227   :  { %16462 = vst [vmem:[#allocation47_spill] sm:$0xff] %v11100_v55  ;;  %v11104_v60 = vmul.f32 %v11050_v28, %v16463_v47  ;;  %16465 = vst [vmem:[#allocation3_spill] sm:$0xff] %v11108_v15  ;;  %v2288_v47 = vmul.f32 %v16468_v57, %v10647_v44  ;;  %v2290_v15 = vmul.f32 %v16470_v58, %v10647_v44  ;;  %v16475_v57 = vld [vmem:[#allocation112_spill] sm:$0xff]  ;;  %v16477_v58 = vld [vmem:[#allocation119_spill] sm:$0xff] }
 0x228   :  { %v2293_v42 = vmul.f32 %v16473_v33, %v10647_v44  ;;  %v2294_v19 = vmul.f32 %v16474_v41, %v10647_v44  ;;  %v2295_v52 = vmul.f32 %v16475_v57, %v10647_v44  ;;  %v2296_v9 = vmul.f32 %v16477_v58, %v10647_v44  ;;  %v16481_v46 = vld [vmem:[#allocation19_spill] sm:$0xff]  ;;  %v16482_v28 = vld [vmem:[#allocation102_spill] sm:$0xff]  ;;  %v16483_v59 = vld [vmem:[#allocation100_spill] sm:$0xff] }
 0x229   :  { %16464 = vst [vmem:[#allocation126_spill] sm:$0xff] %v11104_v60  ;;  %v16469_v60 = vld [vmem:[#allocation87_spill] sm:$0xff]  ;;  %v2297_v31 = vmul.f32 %v16478_v32, %v10647_v44  ;;  %v2298_v33 = vmul.f32 %v16479_v23, %v10647_v44  ;;  %v2299_v41 = vmul.f32 %v16480_v13, %v10647_v44  ;;  %v2300_v57 = vmul.f32 %v16481_v46, %v10647_v44  ;;  %v16484_v58 = vld [vmem:[#allocation36_spill] sm:$0xff]  ;;  %v11158_v32 = vld [vmem:[%s14611_s0 + $0x1a0] sm:$0xff] }
 0x22a   :  { %v2289_v55 = vmul.f32 %v16469_v60, %v10647_v44  ;;  %v11137_v60 = vld [vmem:[%s14611_s0 + $0x198] sm:$0xff]  ;;  %v2301_v61 = vmul.f32 %v16482_v28, %v10647_v44  ;;  %v2302_v29 = vmul.f32 %v16483_v59, %v10647_v44  ;;  %v2303_v36 = vmul.f32 %v16484_v58, %v10647_v44  ;;  %16485 = vst [vmem:[#allocation22_spill] sm:$0xff] %v11158_v32  ;;  %v16486_v23 = vld [vmem:[#allocation43_spill] sm:$0xff] }
 0x22b   :  { %16476 = vst [vmem:[#allocation127_spill] sm:$0xff] %v11137_v60  ;;  %v2304_v13 = vmul.f32 %v16486_v23, %v10647_v44  ;;  %v16487_v11 = vld [vmem:[#allocation45_spill] sm:$0xff]  ;;  %v16488_v14 = vld [vmem:[#allocation51_spill] sm:$0xff]  ;;  %v2308_v58 = vmul.f32 %v10647_v44, %v11137_v60  ;;  %v2309_v16 = vmul.f32 %v10647_v44, %v11158_v32  ;;  %v11175_v23 = vadd.f32 %v2278_v38, %v10891_v10 }
 0x22c   :  { %v2305_v46 = vmul.f32 %v16487_v11, %v10647_v44  ;;  %v2306_v28 = vmul.f32 %v16488_v14, %v10647_v44  ;;  %v16489_v49 = vld [vmem:[#allocation53_spill] sm:$0xff]  ;;  %v11178_v11 = vadd.f32 %v2279_v37, %v10895_v54  ;;  %v11181_v14 = vadd.f32 %v2280_v2, %v10899_v45  ;;  %v16543_v38 = vld [vmem:[#allocation131_spill] sm:$0xff] }
 0x22d   :  { %v2307_v59 = vmul.f32 %v16489_v49, %v10647_v44  ;;  %v16490_v12 = vld [vmem:[#allocation77_spill] sm:$0xff]  ;;  %16491 = vst [vmem:[#allocation129_spill] sm:$0xff] %v11175_v23  ;;  %v11184_v49 = vadd.f32 %v2281_v35, %v10903_v22  ;;  %v11187_v60 = vadd.f32 %v2282_v1, %v10907_v17  ;;  %v11190_v32 = vadd.f32 %v2283_v62, %v10911_v63 }
 0x22e   :  { %v2310_v40 = vmul.f32 %v16490_v12, %v10647_v44  ;;  %16492 = vst [vmem:[#allocation23_spill] sm:$0xff] %v11178_v11  ;;  %16493 = vst [vmem:[#allocation147_spill] sm:$0xff] %v11181_v14  ;;  %v11193_v44 = vadd.f32 %v2284_v25, %v10915_v0  ;;  %v11196_v10 = vadd.f32 %v2285_v27, %v10919_v26  ;;  %v16516_v26 = vld [vmem:[#allocation133_spill] sm:$0xff] }
 0x22f   :  { %16494 = vst [vmem:[#allocation24_spill] sm:$0xff] %v11184_v49  ;;  %16495 = vst [vmem:[#allocation148_spill] sm:$0xff] %v11187_v60  ;;  %v11199_v37 = vadd.f32 %v2286_v5, %v10923_v3  ;;  %v11202_v2 = vadd.f32 %v2287_v50, %v10927_v7  ;;  %v11205_v35 = vadd.f32 %v2288_v47, %v10931_v24  ;;  %v16518_v7 = vld [vmem:[#allocation61_spill] sm:$0xff] }
 0x230   :  { %16496 = vst [vmem:[#allocation30_spill] sm:$0xff] %v11190_v32  ;;  %16497 = vst [vmem:[#allocation149_spill] sm:$0xff] %v11193_v44  ;;  %v11208_v1 = vadd.f32 %v2289_v55, %v10935_v18  ;;  %v11211_v62 = vadd.f32 %v2290_v15, %v10939_v51  ;;  %v11214_v25 = vadd.f32 %v2291_v6, %v10943_v53  ;;  %v16520_v18 = vld [vmem:[#allocation104_spill] sm:$0xff]  ;;  %v16542_v6 = vld [vmem:[#allocation41_spill] sm:$0xff] }
 0x231   :  { %16498 = vst [vmem:[#allocation31_spill] sm:$0xff] %v11196_v10  ;;  %16499 = vst [vmem:[#allocation150_spill] sm:$0xff] %v11199_v37  ;;  %v11217_v27 = vadd.f32 %v2292_v20, %v10947_v43  ;;  %v11220_v5 = vadd.f32 %v2293_v42, %v10951_v34  ;;  %v11223_v50 = vadd.f32 %v2294_v19, %v10954_v4  ;;  %v16514_v4 = vld [vmem:[#allocation84_spill] sm:$0xff]  ;;  %v16524_v43 = vld [vmem:[#allocation139_spill] sm:$0xff] }
 0x232   :  { %16500 = vst [vmem:[#allocation32_spill] sm:$0xff] %v11202_v2  ;;  %16501 = vst [vmem:[#allocation151_spill] sm:$0xff] %v11205_v35  ;;  %v11226_v54 = vadd.f32 %v2295_v52, %v10957_v48  ;;  %v11229_v55 = vadd.f32 %v2296_v9, %v10960_v30  ;;  %v11232_v45 = vadd.f32 %v2297_v31, %v10963_v21  ;;  %v16528_v30 = vld [vmem:[#allocation113_spill] sm:$0xff]  ;;  %v16538_v20 = vld [vmem:[#allocation172_spill] sm:$0xff] }
 0x233   :  { %16502 = vst [vmem:[#allocation101_spill] sm:$0xff] %v11208_v1  ;;  %16503 = vst [vmem:[#allocation6_spill] sm:$0xff] %v11211_v62  ;;  %v11235_v22 = vadd.f32 %v2298_v33, %v10971_v39  ;;  %v11238_v17 = vadd.f32 %v2299_v41, %v10974_v8  ;;  %v11241_v63 = vadd.f32 %v2300_v57, %v10977_v56  ;;  %v16522_v33 = vld [vmem:[#allocation95_spill] sm:$0xff]  ;;  %v16530_v39 = vld [vmem:[#allocation142_spill] sm:$0xff] }
 0x234   :  { %16504 = vst [vmem:[#allocation64_spill] sm:$0xff] %v11214_v25  ;;  %16505 = vst [vmem:[#allocation4_spill] sm:$0xff] %v11217_v27  ;;  %v11244_v0 = vadd.f32 %v2301_v61, %v16514_v4  ;;  %v11247_v3 = vadd.f32 %v2302_v29, %v16516_v26  ;;  %v11250_v24 = vadd.f32 %v2303_v36, %v16518_v7  ;;  %v16526_v57 = vld [vmem:[#allocation111_spill] sm:$0xff]  ;;  %v16534_v36 = vld [vmem:[#allocation37_spill] sm:$0xff] }
 0x235   :  { %16506 = vst [vmem:[#allocation72_spill] sm:$0xff] %v11220_v5  ;;  %16507 = vst [vmem:[#allocation7_spill] sm:$0xff] %v11223_v50  ;;  %v11253_v51 = vadd.f32 %v2304_v13, %v16520_v18  ;;  %v11256_v53 = vadd.f32 %v2305_v46, %v16522_v33  ;;  %v11259_v34 = vadd.f32 %v2306_v28, %v16524_v43  ;;  %v16532_v56 = vld [vmem:[#allocation143_spill] sm:$0xff]  ;;  %v16536_v46 = vld [vmem:[#allocation169_spill] sm:$0xff] }
 0x236   :  { %16508 = vst [vmem:[#allocation70_spill] sm:$0xff] %v11226_v54  ;;  %16509 = vst [vmem:[#allocation8_spill] sm:$0xff] %v11229_v55  ;;  %v11262_v48 = vadd.f32 %v2307_v59, %v16526_v57  ;;  %v11265_v21 = vadd.f32 %v2308_v58, %v16528_v30  ;;  %v11268_v8 = vadd.f32 %v2309_v16, %v16530_v39  ;;  %v16535_v29 = vld [vmem:[#allocation167_spill] sm:$0xff]  ;;  %v16537_v59 = vld [vmem:[#allocation16_spill] sm:$0xff] }
 0x237   :  { %16510 = vst [vmem:[#allocation73_spill] sm:$0xff] %v11232_v45  ;;  %16511 = vst [vmem:[#allocation9_spill] sm:$0xff] %v11235_v22  ;;  %v11271_v12 = vadd.f32 %v2310_v40, %v16532_v56  ;;  %v11275_v61 = vmul.f32 %v16535_v29, %v16534_v36  ;;  %v11279_v15 = vmul.f32 %v16536_v46, %v16534_v36  ;;  %v16539_v16 = vld [vmem:[#allocation174_spill] sm:$0xff]  ;;  %v16540_v28 = vld [vmem:[#allocation20_spill] sm:$0xff] }
 0x238   :  { %16512 = vst [vmem:[#allocation80_spill] sm:$0xff] %v11238_v17  ;;  %16513 = vst [vmem:[#allocation10_spill] sm:$0xff] %v11241_v63  ;;  %v11283_v13 = vmul.f32 %v16537_v59, %v16534_v36  ;;  %v11287_v42 = vmul.f32 %v16538_v20, %v16534_v36  ;;  %v11291_v40 = vmul.f32 %v16539_v16, %v16534_v36  ;;  %v16541_v31 = vld [vmem:[#allocation39_spill] sm:$0xff]  ;;  %v16544_v41 = vld [vmem:[#allocation130_spill] sm:$0xff] }
 0x239   :  { %16515 = vst [vmem:[#allocation78_spill] sm:$0xff] %v11244_v0  ;;  %16517 = vst [vmem:[#allocation12_spill] sm:$0xff] %v11247_v3  ;;  %v11295_v52 = vmul.f32 %v16540_v28, %v16534_v36  ;;  %v11299_v19 = vmul.f32 %v16541_v31, %v16534_v36  ;;  %v11303_v58 = vmul.f32 %v16542_v6, %v16534_v36  ;;  %v16546_v4 = vld [vmem:[#allocation74_spill] sm:$0xff]  ;;  %v16548_v7 = vld [vmem:[#allocation79_spill] sm:$0xff] }
 0x23a   :  { %16519 = vst [vmem:[#allocation59_spill] sm:$0xff] %v11250_v24  ;;  %16521 = vst [vmem:[#allocation13_spill] sm:$0xff] %v11253_v51  ;;  %v11307_v9 = vmul.f32 %v16543_v38, %v16534_v36  ;;  %v11311_v47 = vmul.f32 %v16544_v41, %v16534_v36  ;;  %v11315_v26 = vmul.f32 %v16546_v4, %v16534_v36  ;;  %v11324_v33 = vld [vmem:[%s14611_s0 + $0x1f0] sm:$0x3]  ;;  %v16551_v57 = vld [vmem:[#allocation5_spill] sm:$0xff] }
 0x23b   :  { %16523 = vst [vmem:[#allocation48_spill] sm:$0xff] %v11256_v53  ;;  %16525 = vst [vmem:[#allocation14_spill] sm:$0xff] %v11259_v34  ;;  %v11319_v18 = vmul.f32 %v16548_v7, %v16534_v36  ;;  %v11328_v43 = vmul.f32 %v11324_v33, %v16534_v36  ;;  %v11332_v30 = vmul.f32 %v16551_v57, %v16534_v36  ;;  %v16552_v39 = vld [vmem:[#allocation60_spill] sm:$0xff]  ;;  %v11341_v29 = vld [vmem:[%s14611_s0 + $0x208] sm:$0x3] }
 0x23c   :  { %16527 = vst [vmem:[#allocation128_spill] sm:$0xff] %v11262_v48  ;;  %16529 = vst [vmem:[#allocation11_spill] sm:$0xff] %v11265_v21  ;;  %v11336_v56 = vmul.f32 %v16552_v39, %v16534_v36  ;;  %v11345_v46 = vmul.f32 %v11341_v29, %v16534_v36  ;;  %v16554_v59 = vld [vmem:[#allocation66_spill] sm:$0xff]  ;;  %v16555_v16 = vld [vmem:[#allocation103_spill] sm:$0xff] }
 0x23d   :  { %16531 = vst [vmem:[#allocation15_spill] sm:$0xff] %v11268_v8  ;;  %16533 = vst [vmem:[#allocation152_spill] sm:$0xff] %v11271_v12  ;;  %v11349_v20 = vmul.f32 %v16554_v59, %v16534_v36  ;;  %v11353_v28 = vmul.f32 %v16555_v16, %v16534_v36  ;;  %v11358_v31 = vld [vmem:[%s14611_s0 + $0x220] sm:$0x3]  ;;  %v16557_v38 = vld [vmem:[#allocation125_spill] sm:$0xff]  ;;  %v2685_v60 = vrot.slane %v11328_v43, 1 }
 0x23e   :  { %16545 = vst [vmem:[#allocation153_spill] sm:$0xff] %v11311_v47  ;;  %16547 = vst [vmem:[#allocation154_spill] sm:$0xff] %v11315_v26  ;;  %v11362_v6 = vmul.f32 %v11358_v31, %v16534_v36  ;;  %v11366_v41 = vmul.f32 %v16557_v38, %v16534_v36  ;;  %v16558_v4 = vld [vmem:[#allocation75_spill] sm:$0xff]  ;;  %v11375_v57 = vld [vmem:[%s14611_s0 + $0x238] sm:$0x3]  ;;  %v2687_v49 = vrot.slane %v11332_v30, 1 }
 0x23f   :  { %16549 = vst [vmem:[#allocation155_spill] sm:$0xff] %v11319_v18  ;;  %16550 = vst [vmem:[#allocation156_spill] sm:$0xff] %v11324_v33  ;;  %v11370_v7 = vmul.f32 %v16558_v4, %v16534_v36  ;;  %v11379_v39 = vmul.f32 %v11375_v57, %v16534_v36  ;;  %v16560_v59 = vld [vmem:[#allocation81_spill] sm:$0xff]  ;;  %v16561_v38 = vld [vmem:[#allocation82_spill] sm:$0xff]  ;;  %v2688_v14 = vrot.slane %v11336_v56, 1  ;;  %v2690_v11 = vrot.slane %v11345_v46, 1 }
 0x240   :  { %16553 = vst [vmem:[#allocation157_spill] sm:$0xff] %v11341_v29  ;;  %16556 = vst [vmem:[#allocation158_spill] sm:$0xff] %v11358_v31  ;;  %v11383_v16 = vmul.f32 %v16560_v59, %v16534_v36  ;;  %v11387_v12 = vmul.f32 %v16561_v38, %v16534_v36  ;;  %v11392_v4 = vld [vmem:[%s14611_s0 + $0x250] sm:$0x3]  ;;  %v16563_v21 = vld [vmem:[#allocation85_spill] sm:$0xff]  ;;  %v2693_v23 = vrot.slane %v11353_v28, 1 }
 0x241   :  { %16559 = vst [vmem:[#allocation2_spill] sm:$0xff] %v11375_v57  ;;  %16562 = vst [vmem:[#allocation159_spill] sm:$0xff] %v11392_v4  ;;  %v11396_v8 = vmul.f32 %v11392_v4, %v16534_v36  ;;  %v11400_v48 = vmul.f32 %v16563_v21, %v16534_v36  ;;  %v16564_v59 = vld [vmem:[#allocation135_spill] sm:$0xff]  ;;  %v16566_v4 = vld [vmem:[#allocation136_spill] sm:$0xff]  ;;  %v2697_v26 = vrot.slane %v11366_v41, 1  ;;  %v2689_v47 = vsel %vm400_vm1, %v2687_v49, %v2688_v14 }
 0x242   :  { %v11404_v34 = vmul.f32 %v16564_v59, %v16534_v36  ;;  %v11409_v38 = vld [vmem:[%s14611_s0 + $0x268] sm:$0x3]  ;;  %v11417_v31 = vmul.f32 %v16566_v4, %v16534_v36  ;;  %v16567_v21 = vld [vmem:[#allocation90_spill] sm:$0xff]  ;;  %v16570_v4 = vld [vmem:[#allocation97_spill] sm:$0xff]  ;;  %v2702_v43 = vrot.slane %v11383_v16, 1  ;;  %v2703_v30 = vrot.slane %v11387_v12, 1 }
 0x243   :  { %16565 = vst [vmem:[#allocation160_spill] sm:$0xff] %v11409_v38  ;;  %v11413_v57 = vmul.f32 %v11409_v38, %v16534_v36  ;;  %v11421_v29 = vmul.f32 %v16567_v21, %v16534_v36  ;;  %v11426_v59 = vld [vmem:[%s14611_s0 + $0x280] sm:$0x3]  ;;  %v16569_v38 = vld [vmem:[#allocation96_spill] sm:$0xff]  ;;  %v11438_v51 = vmul.f32 %v16570_v4, %v16534_v36  ;;  %v11443_v21 = vld [vmem:[%s14611_s0 + $0x298] sm:$0x3] }
 0x244   :  { %16568 = vst [vmem:[#allocation161_spill] sm:$0xff] %v11426_v59  ;;  %v11430_v33 = vmul.f32 %v11426_v59, %v16534_v36  ;;  %v11434_v53 = vmul.f32 %v16569_v38, %v16534_v36  ;;  %16571 = vst [vmem:[#allocation162_spill] sm:$0xff] %v11443_v21  ;;  %v11447_v24 = vmul.f32 %v11443_v21, %v16534_v36  ;;  %v16572_v59 = vld [vmem:[#allocation105_spill] sm:$0xff]  ;;  %v16573_v38 = vld [vmem:[#allocation140_spill] sm:$0xff]  ;;  %v2705_v56 = vrot.slane %v11396_v8, 1 }
 0x245   :  { %v11451_v3 = vmul.f32 %v16572_v59, %v16534_v36  ;;  %v11455_v0 = vmul.f32 %v16573_v38, %v16534_v36  ;;  %v11460_v4 = vld [vmem:[%s14611_s0 + $0x2b0] sm:$0x3]  ;;  %v16575_v21 = vld [vmem:[#allocation141_spill] sm:$0xff]  ;;  %v16576_v59 = vld [vmem:[#allocation118_spill] sm:$0xff]  ;;  %v2707_v28 = vrot.slane %v11400_v48, 1  ;;  %v2710_v41 = vrot.slane %v11413_v57, 1 }
 0x246   :  { %16574 = vst [vmem:[#allocation163_spill] sm:$0xff] %v11460_v4  ;;  %v11464_v63 = vmul.f32 %v11460_v4, %v16534_v36  ;;  %v11468_v17 = vmul.f32 %v16575_v21, %v16534_v36  ;;  %v11472_v22 = vmul.f32 %v16576_v59, %v16534_v36  ;;  %v11477_v38 = vld [vmem:[%s14611_s0 + $0x2c8] sm:$0x3]  ;;  %v16578_v4 = vld [vmem:[#allocation120_spill] sm:$0xff]  ;;  %v11494_v59 = vld [vmem:[%s14611_s0 + $0x2e0] sm:$0x3] }
 0x247   :  { %16577 = vst [vmem:[#allocation164_spill] sm:$0xff] %v11477_v38  ;;  %v11481_v45 = vmul.f32 %v11477_v38, %v16534_v36  ;;  %v11485_v55 = vmul.f32 %v16578_v4, %v16534_v36  ;;  %v16579_v21 = vld [vmem:[#allocation144_spill] sm:$0xff]  ;;  %16580 = vst [vmem:[#allocation63_spill] sm:$0xff] %v11494_v59  ;;  %v11498_v50 = vmul.f32 %v11494_v59, %v16534_v36  ;;  %v16582_v4 = vld [vmem:[#allocation67_spill] sm:$0xff]  ;;  %v2712_v8 = vrot.slane %v11417_v31, 1 }
 0x248   :  { %v11489_v54 = vmul.f32 %v16579_v21, %v16534_v36  ;;  %v16581_v38 = vld [vmem:[#allocation68_spill] sm:$0xff]  ;;  %v11506_v27 = vmul.f32 %v16582_v4, %v16534_v36  ;;  %v11511_v21 = vld [vmem:[%s14611_s0 + $0x2f8] sm:$0x3]  ;;  %v11576_v46 = vld [vmem:[%s14611_s0 + $0x340] sm:$0x3]  ;;  %v2715_v16 = vrot.slane %v11430_v33, 1  ;;  %v2706_v31 = vsel %vm400_vm1, %v2703_v30, %v2705_v56 }
 0x249   :  { %v11502_v5 = vmul.f32 %v16581_v38, %v16534_v36  ;;  %16583 = vst [vmem:[#allocation25_spill] sm:$0xff] %v11511_v21  ;;  %v11515_v25 = vmul.f32 %v11511_v21, %v16534_v36  ;;  %v16584_v59 = vld [vmem:[#allocation21_spill] sm:$0xff]  ;;  %v16585_v38 = vld [vmem:[#allocation99_spill] sm:$0xff]  ;;  %v11528_v4 = vld [vmem:[%s14611_s0 + $0x310] sm:$0x3]  ;;  %v2717_v49 = vrot.slane %v11434_v53, 1 }
 0x24a   :  { %v11519_v62 = vmul.f32 %v16584_v59, %v16534_v36  ;;  %v11523_v1 = vmul.f32 %v16585_v38, %v16534_v36  ;;  %16586 = vst [vmem:[#allocation57_spill] sm:$0xff] %v11528_v4  ;;  %v11532_v35 = vmul.f32 %v11528_v4, %v16534_v36  ;;  %v16587_v21 = vld [vmem:[#allocation26_spill] sm:$0xff]  ;;  %v16588_v59 = vld [vmem:[#allocation27_spill] sm:$0xff]  ;;  %v16590_v4 = vld [vmem:[#allocation28_spill] sm:$0xff]  ;;  %v2725_v53 = vrot.slane %v11464_v63, 1 }
 0x24b   :  { %v11536_v2 = vmul.f32 %v16587_v21, %v16534_v36  ;;  %v11540_v37 = vmul.f32 %v16588_v59, %v16534_v36  ;;  %v11545_v38 = vld [vmem:[%s14611_s0 + $0x328] sm:$0x3]  ;;  %v11553_v44 = vmul.f32 %v16590_v4, %v16534_v36  ;;  %v16591_v21 = vld [vmem:[#allocation29_spill] sm:$0xff]  ;;  %v2695_v4 = vrot.slane %v11362_v6, 1  ;;  %16592 = vst [vmem:[#allocation84_spill] sm:$0xff] %v11576_v46 }
 0x24c   :  { %16589 = vst [vmem:[#allocation77_spill] sm:$0xff] %v11545_v38  ;;  %v11549_v10 = vmul.f32 %v11545_v38, %v16534_v36  ;;  %v11557_v32 = vmul.f32 %v16591_v21, %v16534_v36  ;;  %v2692_v38 = vrot.slane %v11349_v20, 1  ;;  %v2698_v21 = vrot.slane %v11370_v7, 1  ;;  %v16596_v56 = vld [vmem:[#allocation3_spill] sm:$0xff] }
 0x24d   :  { %v2700_v59 = vrot.slane %v11379_v39, 1  ;;  %v11580_v20 = vmul.f32 %v11576_v46, %v16534_v36  ;;  %v2708_v6 = vrot.slane %v11404_v34, 1  ;;  %v16593_v7 = vrot.slane %v11319_v18, 1 }
 0x24e   :  { %v2713_v39 = vrot.slane %v11421_v29, 1  ;;  %v2691_v46 = vsel %vm400_vm1, %v2688_v14, %v2690_v11  ;;  %v2694_v48 = vsel %vm400_vm1, %v2692_v38, %v2693_v23  ;;  %v2696_v34 = vsel %vm400_vm1, %v2693_v23, %v2695_v4  ;;  %v16594_v38 = vld [vmem:[#allocation47_spill] sm:$0xff] }
 0x24f   :  { %v2686_v12 = vsel %vm400_vm1, %v16593_v7, %v2685_v60  ;;  %v2699_v57 = vsel %vm400_vm1, %v2697_v26, %v2698_v21  ;;  %v2701_v18 = vsel %vm400_vm1, %v2698_v21, %v2700_v59  ;;  %v2704_v60 = vsel %vm400_vm1, %v2702_v43, %v2703_v30  ;;  %v16595_v43 = vld [vmem:[#allocation126_spill] sm:$0xff] }
 0x250   :  { %v2709_v29 = vsel %vm400_vm1, %v2707_v28, %v2708_v6  ;;  %v2711_v33 = vsel %vm400_vm1, %v2708_v6, %v2710_v41  ;;  %v2718_v14 = vrot.slane %v11438_v51, 1  ;;  %v2714_v11 = vsel %vm400_vm1, %v2712_v8, %v2713_v39 }
 0x251   :  { %v2716_v23 = vsel %vm400_vm1, %v2713_v39, %v2715_v16  ;;  %v2720_v26 = vrot.slane %v11447_v24, 1  ;;  %v2757_v59 = vrot.slane %v16594_v38, 1  ;;  %v2722_v4 = vrot.slane %v11451_v3, 1 }
 0x252   :  { %v2723_v21 = vrot.slane %v11455_v0, 1  ;;  %v2758_v30 = vrot.slane %v16595_v43, 1  ;;  %v2760_v28 = vrot.slane %v16596_v56, 1  ;;  %v2727_v51 = vrot.slane %v11468_v17, 1  ;;  %v16597_v43 = vld [vmem:[#allocation49_spill] sm:$0xff]  ;;  %v16599_v56 = vld [vmem:[#allocation54_spill] sm:$0xff] }
 0x253   :  { %v2728_v6 = vrot.slane %v11472_v22, 1  ;;  %v2730_v41 = vrot.slane %v11481_v45, 1  ;;  %v2732_v24 = vrot.slane %v11485_v55, 1  ;;  %v2733_v7 = vrot.slane %v11489_v54, 1 }
 0x254   :  { %v2759_v3 = vsel %vm400_vm1, %v2757_v59, %v2758_v30  ;;  %v2761_v0 = vsel %vm400_vm1, %v2758_v30, %v2760_v28  ;;  %v2735_v8 = vrot.slane %v11498_v50, 1  ;;  %v2737_v39 = vrot.slane %v11502_v5, 1 }
 0x255   :  { %v2738_v63 = vrot.slane %v11506_v27, 1  ;;  %v2740_v17 = vrot.slane %v11515_v25, 1  ;;  %v2742_v22 = vrot.slane %v11519_v62, 1  ;;  %v2743_v45 = vrot.slane %v11523_v1, 1 }
 0x256   :  { %v2745_v55 = vrot.slane %v11532_v35, 1  ;;  %v2747_v54 = vrot.slane %v11536_v2, 1  ;;  %v2748_v16 = vrot.slane %v11540_v37, 1  ;;  %v2750_v38 = vrot.slane %v11549_v10, 1 }
 0x257   :  { %v2752_v50 = vrot.slane %v11553_v44, 1  ;;  %v2753_v5 = vrot.slane %v11557_v32, 1  ;;  %v2719_v27 = vsel %vm400_vm1, %v2717_v49, %v2718_v14  ;;  %v2721_v25 = vsel %vm400_vm1, %v2718_v14, %v2720_v26 }
 0x258   :  { %v2724_v62 = vsel %vm400_vm1, %v2722_v4, %v2723_v21  ;;  %v2755_v1 = vrot.slane %v11580_v20, 1  ;;  %v2726_v35 = vsel %vm400_vm1, %v2723_v21, %v2725_v53  ;;  %v2729_v2 = vsel %vm400_vm1, %v2727_v51, %v2728_v6  ;;  %v16601_v53 = vld [vmem:[#allocation55_spill] sm:$0xff] }
 0x259   :  { %v2731_v37 = vsel %vm400_vm1, %v2728_v6, %v2730_v41  ;;  %v2734_v10 = vsel %vm400_vm1, %v2732_v24, %v2733_v7  ;;  %v2736_v44 = vsel %vm400_vm1, %v2733_v7, %v2735_v8  ;;  %v2739_v32 = vsel %vm400_vm1, %v2737_v39, %v2738_v63  ;;  %v16603_v6 = vld [vmem:[#allocation56_spill] sm:$0xff]  ;;  %v16605_v24 = vld [vmem:[#allocation62_spill] sm:$0xff]  ;;  %v16607_v8 = vld [vmem:[#allocation65_spill] sm:$0xff] }
 0x25a   :  { %v2741_v49 = vsel %vm400_vm1, %v2738_v63, %v2740_v17  ;;  %v2744_v14 = vsel %vm400_vm1, %v2742_v22, %v2743_v45  ;;  %v2746_v26 = vsel %vm400_vm1, %v2743_v45, %v2745_v55  ;;  %v2749_v20 = vsel %vm400_vm1, %v2747_v54, %v2748_v16  ;;  %v16609_v63 = vld [vmem:[#allocation71_spill] sm:$0xff] }
 0x25b   :  { %v2751_v59 = vsel %vm400_vm1, %v2748_v16, %v2750_v38  ;;  %v2754_v4 = vsel %vm400_vm1, %v2752_v50, %v2753_v5  ;;  %v2756_v21 = vsel %vm400_vm1, %v2753_v5, %v2755_v1  ;;  %v11649_v30 = vadd.f32 %v2686_v12, %v16597_v43  ;;  %v16611_v12 = vld [vmem:[#allocation107_spill] sm:$0xff] }
 0x25c   :  { %v11652_v28 = vadd.f32 %v2689_v47, %v16599_v56  ;;  %v11655_v51 = vadd.f32 %v2691_v46, %v16601_v53  ;;  %v11658_v41 = vadd.f32 %v2694_v48, %v16603_v6  ;;  %v11661_v7 = vadd.f32 %v2696_v34, %v16605_v24  ;;  %v16613_v47 = vld [vmem:[#allocation108_spill] sm:$0xff]  ;;  %v16615_v46 = vld [vmem:[#allocation109_spill] sm:$0xff]  ;;  %v16617_v48 = vld [vmem:[#allocation110_spill] sm:$0xff] }
 0x25d   :  { %16598 = vst [vmem:[#allocation133_spill] sm:$0xff] %v11649_v30  ;;  %v11664_v39 = vadd.f32 %v2699_v57, %v16607_v8  ;;  %v11667_v17 = vadd.f32 %v2701_v18, %v16609_v63  ;;  %v11670_v22 = vadd.f32 %v2704_v60, %v16611_v12  ;;  %v11673_v45 = vadd.f32 %v2706_v31, %v16613_v47  ;;  %v16619_v34 = vld [vmem:[#allocation114_spill] sm:$0xff]  ;;  %v16621_v57 = vld [vmem:[#allocation115_spill] sm:$0xff]  ;;  %v16623_v18 = vld [vmem:[#allocation116_spill] sm:$0xff] }
 0x25e   :  { %16600 = vst [vmem:[#allocation61_spill] sm:$0xff] %v11652_v28  ;;  %16602 = vst [vmem:[#allocation104_spill] sm:$0xff] %v11655_v51  ;;  %v11676_v55 = vadd.f32 %v2709_v29, %v16615_v46  ;;  %v11679_v54 = vadd.f32 %v2711_v33, %v16617_v48  ;;  %v11682_v16 = vadd.f32 %v2714_v11, %v16619_v34  ;;  %v16625_v60 = vld [vmem:[#allocation121_spill] sm:$0xff]  ;;  %v16627_v31 = vld [vmem:[#allocation122_spill] sm:$0xff] }
 0x25f   :  { %16604 = vst [vmem:[#allocation95_spill] sm:$0xff] %v11658_v41  ;;  %16606 = vst [vmem:[#allocation139_spill] sm:$0xff] %v11661_v7  ;;  %v11685_v38 = vadd.f32 %v2716_v23, %v16621_v57  ;;  %v11688_v50 = vadd.f32 %v2719_v27, %v16623_v18  ;;  %v11691_v5 = vadd.f32 %v2721_v25, %v16625_v60  ;;  %v16629_v29 = vld [vmem:[#allocation165_spill] sm:$0xff]  ;;  %v16631_v33 = vld [vmem:[#allocation166_spill] sm:$0xff]  ;;  %v2613_v7 = vrot.slane %v11303_v58, 1 }
 0x260   :  { %16608 = vst [vmem:[#allocation111_spill] sm:$0xff] %v11664_v39  ;;  %16610 = vst [vmem:[#allocation113_spill] sm:$0xff] %v11667_v17  ;;  %v11694_v1 = vadd.f32 %v2724_v62, %v16627_v31  ;;  %v11697_v43 = vadd.f32 %v2726_v35, %v16629_v29  ;;  %v11700_v56 = vadd.f32 %v2729_v2, %v16631_v33  ;;  %v16633_v11 = vld [vmem:[#allocation123_spill] sm:$0xff]  ;;  %v16635_v23 = vld [vmem:[#allocation168_spill] sm:$0xff]  ;;  %v2612_v39 = vrot.slane %v11299_v19, 1 }
 0x261   :  { %16612 = vst [vmem:[#allocation142_spill] sm:$0xff] %v11670_v22  ;;  %16614 = vst [vmem:[#allocation143_spill] sm:$0xff] %v11673_v45  ;;  %v11703_v53 = vadd.f32 %v2731_v37, %v16633_v11  ;;  %v11706_v6 = vadd.f32 %v2734_v10, %v16635_v23  ;;  %v16637_v27 = vld [vmem:[#allocation170_spill] sm:$0xff]  ;;  %v16639_v25 = vld [vmem:[#allocation124_spill] sm:$0xff]  ;;  %v2608_v22 = vrot.slane %v11291_v40, 1  ;;  %v2615_v41 = vrot.slane %v11307_v9, 1 }
 0x262   :  { %16616 = vst [vmem:[#allocation37_spill] sm:$0xff] %v11676_v55  ;;  %16618 = vst [vmem:[#allocation167_spill] sm:$0xff] %v11679_v54  ;;  %v11709_v24 = vadd.f32 %v2736_v44, %v16637_v27  ;;  %v11712_v8 = vadd.f32 %v2739_v32, %v16639_v25  ;;  %v16641_v62 = vld [vmem:[#allocation117_spill] sm:$0xff]  ;;  %v16643_v35 = vld [vmem:[#allocation171_spill] sm:$0xff] }
 0x263   :  { %16620 = vst [vmem:[#allocation169_spill] sm:$0xff] %v11682_v16  ;;  %16622 = vst [vmem:[#allocation16_spill] sm:$0xff] %v11685_v38  ;;  %v11715_v63 = vadd.f32 %v2741_v49, %v16641_v62  ;;  %v11718_v12 = vadd.f32 %v2744_v14, %v16643_v35  ;;  %v16645_v2 = vld [vmem:[#allocation173_spill] sm:$0xff]  ;;  %v16647_v37 = vld [vmem:[#allocation175_spill] sm:$0xff] }
 0x264   :  { %16624 = vst [vmem:[#allocation172_spill] sm:$0xff] %v11688_v50  ;;  %16626 = vst [vmem:[#allocation174_spill] sm:$0xff] %v11691_v5  ;;  %v11721_v47 = vadd.f32 %v2746_v26, %v16645_v2  ;;  %v11724_v46 = vadd.f32 %v2749_v20, %v16647_v37  ;;  %v16649_v10 = vld [vmem:[#allocation38_spill] sm:$0xff]  ;;  %v16651_v44 = vld [vmem:[#allocation40_spill] sm:$0xff] }
 0x265   :  { %16628 = vst [vmem:[#allocation20_spill] sm:$0xff] %v11694_v1  ;;  %16630 = vst [vmem:[#allocation39_spill] sm:$0xff] %v11697_v43  ;;  %v11727_v48 = vadd.f32 %v2751_v59, %v16649_v10  ;;  %v11730_v34 = vadd.f32 %v2754_v4, %v16651_v44  ;;  %v16653_v32 = vld [vmem:[#allocation46_spill] sm:$0xff]  ;;  %v16657_v14 = vld [vmem:[#allocation69_spill] sm:$0xff]  ;;  %v2603_v1 = vrot.slane %v11279_v15, 1 }
 0x266   :  { %16632 = vst [vmem:[#allocation41_spill] sm:$0xff] %v11700_v56  ;;  %16634 = vst [vmem:[#allocation131_spill] sm:$0xff] %v11703_v53  ;;  %v11733_v57 = vadd.f32 %v2756_v21, %v16653_v32  ;;  %v16655_v49 = vld [vmem:[#allocation34_spill] sm:$0xff]  ;;  %v11739_v60 = vadd.f32 %v2761_v0, %v16657_v14  ;;  %v16660_v20 = vld [vmem:[#allocation83_spill] sm:$0xff] }
 0x267   :  { %16636 = vst [vmem:[#allocation130_spill] sm:$0xff] %v11706_v6  ;;  %16638 = vst [vmem:[#allocation74_spill] sm:$0xff] %v11709_v24  ;;  %v11736_v18 = vadd.f32 %v2759_v3, %v16655_v49  ;;  %v16659_v26 = vld [vmem:[#allocation58_spill] sm:$0xff]  ;;  %v11747_v59 = vmul.f32 %v16660_v20, %v16534_v36  ;;  %v16663_v11 = vld [vmem:[#allocation87_spill] sm:$0xff] }
 0x268   :  { %16640 = vst [vmem:[#allocation79_spill] sm:$0xff] %v11712_v8  ;;  %16642 = vst [vmem:[#allocation5_spill] sm:$0xff] %v11715_v63  ;;  %v11743_v31 = vmul.f32 %v16659_v26, %v16534_v36  ;;  %v16661_v4 = vld [vmem:[#allocation134_spill] sm:$0xff]  ;;  %v11768_v23 = vmul.f32 %v16663_v11, %v16534_v36  ;;  %v11773_v27 = vld [vmem:[%s14611_s0 + $0xb8] sm:$0x3] }
 0x269   :  { %16644 = vst [vmem:[#allocation60_spill] sm:$0xff] %v11718_v12  ;;  %16646 = vst [vmem:[#allocation66_spill] sm:$0xff] %v11721_v47  ;;  %v11751_v29 = vmul.f32 %v16661_v4, %v16534_v36  ;;  %v11756_v3 = vld [vmem:[%s14611_s0 + $0xa0] sm:$0x3]  ;;  %v11777_v25 = vmul.f32 %v11773_v27, %v16534_v36  ;;  %v16664_v62 = vld [vmem:[#allocation88_spill] sm:$0xff] }
 0x26a   :  { %16648 = vst [vmem:[#allocation103_spill] sm:$0xff] %v11724_v46  ;;  %16650 = vst [vmem:[#allocation125_spill] sm:$0xff] %v11727_v48  ;;  %v11760_v0 = vmul.f32 %v11756_v3, %v16534_v36  ;;  %v16662_v21 = vld [vmem:[#allocation86_spill] sm:$0xff]  ;;  %v11781_v35 = vmul.f32 %v16664_v62, %v16534_v36  ;;  %v16665_v2 = vld [vmem:[#allocation89_spill] sm:$0xff]  ;;  %v2620_v40 = vrot.slane %v11743_v31, 1  ;;  %v2628_v19 = vrot.slane %v11768_v23, 1 }
 0x26b   :  { %16652 = vst [vmem:[#allocation75_spill] sm:$0xff] %v11730_v34  ;;  %16654 = vst [vmem:[#allocation81_spill] sm:$0xff] %v11733_v57  ;;  %v11764_v33 = vmul.f32 %v16662_v21, %v16534_v36  ;;  %v11785_v37 = vmul.f32 %v16665_v2, %v16534_v36  ;;  %v11790_v10 = vld [vmem:[%s14611_s0 + $0xd0] sm:$0x3]  ;;  %v16667_v32 = vld [vmem:[#allocation137_spill] sm:$0xff]  ;;  %v2630_v58 = vrot.slane %v11777_v25, 1 }
 0x26c   :  { %16656 = vst [vmem:[#allocation82_spill] sm:$0xff] %v11736_v18  ;;  %16658 = vst [vmem:[#allocation85_spill] sm:$0xff] %v11739_v60  ;;  %v11794_v44 = vmul.f32 %v11790_v10, %v16534_v36  ;;  %v11798_v49 = vmul.f32 %v16667_v32, %v16534_v36  ;;  %v16668_v14 = vld [vmem:[#allocation138_spill] sm:$0xff]  ;;  %v11807_v20 = vld [vmem:[%s14611_s0 + $0xe8] sm:$0x3]  ;;  %v2625_v28 = vrot.slane %v11760_v0, 1 }
 0x26d   :  { %16666 = vst [vmem:[#allocation135_spill] sm:$0xff] %v11790_v10  ;;  %v11802_v26 = vmul.f32 %v16668_v14, %v16534_v36  ;;  %16669 = vst [vmem:[#allocation136_spill] sm:$0xff] %v11807_v20  ;;  %v11811_v4 = vmul.f32 %v11807_v20, %v16534_v36  ;;  %v16670_v21 = vld [vmem:[#allocation106_spill] sm:$0xff]  ;;  %v16671_v62 = vld [vmem:[#allocation112_spill] sm:$0xff]  ;;  %v2632_v9 = vrot.slane %v11781_v35, 1  ;;  %v2614_v35 = vsel %vm400_vm1, %v2612_v39, %v2613_v7 }
 0x26e   :  { %v11815_v11 = vmul.f32 %v16670_v21, %v16534_v36  ;;  %v11819_v2 = vmul.f32 %v16671_v62, %v16534_v36  ;;  %v11824_v32 = vld [vmem:[%s14611_s0 + $0x100] sm:$0x3]  ;;  %v16673_v20 = vld [vmem:[#allocation119_spill] sm:$0xff]  ;;  %v16674_v21 = vld [vmem:[#allocation145_spill] sm:$0xff]  ;;  %v2637_v31 = vrot.slane %v11798_v49, 1 }
 0x26f   :  { %16672 = vst [vmem:[#allocation90_spill] sm:$0xff] %v11824_v32  ;;  %v11828_v14 = vmul.f32 %v11824_v32, %v16534_v36  ;;  %v11832_v10 = vmul.f32 %v16673_v20, %v16534_v36  ;;  %v11836_v57 = vmul.f32 %v16674_v21, %v16534_v36  ;;  %v11841_v62 = vld [vmem:[%s14611_s0 + $0x118] sm:$0x3]  ;;  %v16677_v20 = vld [vmem:[#allocation92_spill] sm:$0xff]  ;;  %v11880_v8 = vld [vmem:[%s14611_s0 + $0x148] sm:$0x3] }
 0x270   :  { %16675 = vst [vmem:[#allocation96_spill] sm:$0xff] %v11841_v62  ;;  %v11845_v34 = vmul.f32 %v11841_v62, %v16534_v36  ;;  %v16676_v32 = vld [vmem:[#allocation33_spill] sm:$0xff]  ;;  %v11853_v46 = vmul.f32 %v16677_v20, %v16534_v36  ;;  %v11858_v21 = vld [vmem:[%s14611_s0 + $0x130] sm:$0x3]  ;;  %v16679_v62 = vld [vmem:[#allocation19_spill] sm:$0xff]  ;;  %v2642_v23 = vrot.slane %v11815_v11, 1 }
 0x271   :  { %v11849_v48 = vmul.f32 %v16676_v32, %v16534_v36  ;;  %16678 = vst [vmem:[#allocation97_spill] sm:$0xff] %v11858_v21  ;;  %v11862_v47 = vmul.f32 %v11858_v21, %v16534_v36  ;;  %v11866_v12 = vmul.f32 %v16679_v62, %v16534_v36  ;;  %v16680_v32 = vld [vmem:[#allocation102_spill] sm:$0xff]  ;;  %v11875_v20 = vld [vmem:[%s14611_s0 + $0x1a8] sm:$0x3]  ;;  %16682 = vst [vmem:[#allocation140_spill] sm:$0xff] %v11880_v8  ;;  %v2643_v25 = vrot.slane %v11819_v2, 1 }
 0x272   :  { %v11870_v63 = vmul.f32 %v16680_v32, %v16534_v36  ;;  %16681 = vst [vmem:[#allocation105_spill] sm:$0xff] %v11875_v20  ;;  %v11884_v21 = vmul.f32 %v11880_v8, %v16534_v36  ;;  %v16683_v62 = vld [vmem:[#allocation100_spill] sm:$0xff]  ;;  %v11897_v53 = vld [vmem:[%s14611_s0 + $0x160] sm:$0x3]  ;;  %v16686_v8 = vld [vmem:[#allocation43_spill] sm:$0xff] }
 0x273   :  { %v11888_v24 = vmul.f32 %v16683_v62, %v16534_v36  ;;  %v16684_v32 = vld [vmem:[#allocation36_spill] sm:$0xff]  ;;  %16685 = vst [vmem:[#allocation141_spill] sm:$0xff] %v11897_v53  ;;  %v11901_v56 = vmul.f32 %v11897_v53, %v16534_v36  ;;  %v11905_v43 = vmul.f32 %v16686_v8, %v16534_v36  ;;  %v2602_v62 = vrot.slane %v11275_v61, 1  ;;  %v16687_v5 = vld [vmem:[#allocation45_spill] sm:$0xff]  ;;  %v16689_v8 = vld [vmem:[#allocation51_spill] sm:$0xff] }
 0x274   :  { %v11892_v6 = vmul.f32 %v16684_v32, %v16534_v36  ;;  %v2605_v32 = vrot.slane %v11283_v13, 1  ;;  %v11912_v50 = vmul.f32 %v16687_v5, %v16534_v36  ;;  %v11917_v38 = vld [vmem:[%s14611_s0 + $0x178] sm:$0x3]  ;;  %v11925_v61 = vmul.f32 %v16689_v8, %v16534_v36  ;;  %v11934_v5 = vld [vmem:[%s14611_s0 + $0x190] sm:$0x3]  ;;  %v16692_v54 = vld [vmem:[#allocation127_spill] sm:$0xff] }
 0x275   :  { %16688 = vst [vmem:[#allocation118_spill] sm:$0xff] %v11917_v38  ;;  %v11921_v53 = vmul.f32 %v11917_v38, %v16534_v36  ;;  %v16690_v15 = vld [vmem:[#allocation53_spill] sm:$0xff]  ;;  %16691 = vst [vmem:[#allocation120_spill] sm:$0xff] %v11934_v5  ;;  %v11938_v16 = vmul.f32 %v11934_v5, %v16534_v36  ;;  %v11942_v38 = vmul.f32 %v16534_v36, %v16692_v54  ;;  %v16693_v55 = vld [vmem:[#allocation22_spill] sm:$0xff]  ;;  %v2607_v54 = vrot.slane %v11287_v42, 1 }
 0x276   :  { %v11929_v13 = vmul.f32 %v16690_v15, %v16534_v36  ;;  %v11946_v8 = vmul.f32 %v16534_v36, %v16693_v55  ;;  %v11950_v15 = vmul.f32 %v16534_v36, %v11875_v20  ;;  %v11955_v45 = vld [vmem:[%s14611_s0 + $0x1e0] sm:$0xff]  ;;  %v2610_v55 = vrot.slane %v11295_v52, 1 }
 0x277   :  { %16696 = vst [vmem:[#allocation67_spill] sm:$0xff] %v11955_v45  ;;  %v11959_v5 = vmul.f32 %v11955_v45, %v16534_v36  ;;  %v11965_v17 = vsel %vm400_vm1, %v2602_v62, %v2603_v1  ;;  %v11968_v20 = vsel %vm400_vm1, %v2603_v1, %v2605_v32  ;;  %v16698_v36 = vld [vmem:[#allocation153_spill] sm:$0xff]  ;;  %v16699_v51 = vld [vmem:[#allocation154_spill] sm:$0xff]  ;;  %v2622_v52 = vrot.slane %v11747_v59, 1 }
 0x278   :  { %16694 = vst [vmem:[#allocation144_spill] sm:$0xff] %v11946_v8  ;;  %16695 = vst [vmem:[#allocation68_spill] sm:$0xff] %v11950_v15  ;;  %v2617_v45 = vrot.slane %v16698_v36, 1  ;;  %v2618_v42 = vrot.slane %v16699_v51, 1  ;;  %v2623_v62 = vrot.slane %v11751_v29, 1  ;;  %v2627_v1 = vrot.slane %v11764_v33, 1 }
 0x279   :  { %16697 = vst [vmem:[#allocation21_spill] sm:$0xff] %v11959_v5  ;;  %v2633_v32 = vrot.slane %v11785_v37, 1  ;;  %v2635_v51 = vrot.slane %v11794_v44, 1  ;;  %v2638_v59 = vrot.slane %v11802_v26, 1  ;;  %v2640_v29 = vrot.slane %v11811_v4, 1  ;;  %v16786_v60 = vld [vmem:[#allocation98_spill] sm:$0xff] }
 0x27a   :  { %v2609_v0 = vsel %vm400_vm1, %v2607_v54, %v2608_v22  ;;  %v2611_v33 = vsel %vm400_vm1, %v2608_v22, %v2610_v55  ;;  %v2616_v37 = vsel %vm400_vm1, %v2613_v7, %v2615_v41  ;;  %v2619_v44 = vsel %vm400_vm1, %v2617_v45, %v2618_v42 }
 0x27b   :  { %v2621_v49 = vsel %vm400_vm1, %v2618_v42, %v2620_v40  ;;  %v2624_v26 = vsel %vm400_vm1, %v2622_v52, %v2623_v62  ;;  %v2626_v4 = vsel %vm400_vm1, %v2623_v62, %v2625_v28  ;;  %v2629_v54 = vsel %vm400_vm1, %v2627_v1, %v2628_v19 }
 0x27c   :  { %v2631_v22 = vsel %vm400_vm1, %v2628_v19, %v2630_v58  ;;  %v2634_v11 = vsel %vm400_vm1, %v2632_v9, %v2633_v32  ;;  %v2636_v2 = vsel %vm400_vm1, %v2633_v32, %v2635_v51  ;;  %v2639_v39 = vsel %vm400_vm1, %v2637_v31, %v2638_v59 }
 0x27d   :  { %v2641_v41 = vsel %vm400_vm1, %v2638_v59, %v2640_v29  ;;  %v2644_v7 = vsel %vm400_vm1, %v2642_v23, %v2643_v25  ;;  %v2645_v45 = vrot.slane %v11828_v14, 1  ;;  %v2647_v55 = vrot.slane %v11832_v10, 1  ;;  %v16703_v23 = vld [vmem:[#allocation129_spill] sm:$0xff] }
 0x27e   :  { %v2648_v28 = vrot.slane %v11836_v57, 1  ;;  %v2650_v36 = vrot.slane %v11845_v34, 1  ;;  %v2652_v42 = vrot.slane %v11849_v48, 1  ;;  %v2653_v40 = vrot.slane %v11853_v46, 1 }
 0x27f   :  { %v2655_v52 = vrot.slane %v11862_v47, 1  ;;  %v2657_v62 = vrot.slane %v11866_v12, 1  ;;  %v2658_v1 = vrot.slane %v11870_v63, 1  ;;  %v2660_v19 = vrot.slane %v11884_v21, 1 }
 0x280   :  { %v2662_v14 = vrot.slane %v11888_v24, 1  ;;  %v2663_v10 = vrot.slane %v11892_v6, 1  ;;  %v2665_v57 = vrot.slane %v11901_v56, 1  ;;  %v2667_v34 = vrot.slane %v11905_v43, 1 }
 0x281   :  { %v2668_v48 = vrot.slane %v11912_v50, 1  ;;  %v2670_v46 = vrot.slane %v11921_v53, 1  ;;  %v2672_v47 = vrot.slane %v11925_v61, 1  ;;  %v2673_v12 = vrot.slane %v11929_v13, 1 }
 0x282   :  { %v2675_v63 = vrot.slane %v11938_v16, 1  ;;  %v2646_v21 = vsel %vm400_vm1, %v2643_v25, %v2645_v45  ;;  %v2649_v24 = vsel %vm400_vm1, %v2647_v55, %v2648_v28  ;;  %v2677_v6 = vrot.slane %v11942_v38, 1  ;;  %v16705_v45 = vld [vmem:[#allocation23_spill] sm:$0xff] }
 0x283   :  { %v15052_v56 = vrot.slane %v11946_v8, 1  ;;  %v2651_v43 = vsel %vm400_vm1, %v2648_v28, %v2650_v36  ;;  %v2654_v50 = vsel %vm400_vm1, %v2652_v42, %v2653_v40  ;;  %v2656_v53 = vsel %vm400_vm1, %v2653_v40, %v2655_v52  ;;  %v16707_v28 = vld [vmem:[#allocation147_spill] sm:$0xff]  ;;  %v16709_v42 = vld [vmem:[#allocation24_spill] sm:$0xff] }
 0x284   :  { %v2659_v61 = vsel %vm400_vm1, %v2657_v62, %v2658_v1  ;;  %v2661_v13 = vsel %vm400_vm1, %v2658_v1, %v2660_v19  ;;  %v2664_v16 = vsel %vm400_vm1, %v2662_v14, %v2663_v10  ;;  %v2666_v58 = vsel %vm400_vm1, %v2663_v10, %v2665_v57  ;;  %v16711_v52 = vld [vmem:[#allocation148_spill] sm:$0xff]  ;;  %v16713_v1 = vld [vmem:[#allocation30_spill] sm:$0xff]  ;;  %v16715_v14 = vld [vmem:[#allocation149_spill] sm:$0xff] }
 0x285   :  { %v2669_v9 = vsel %vm400_vm1, %v2667_v34, %v2668_v48  ;;  %v2671_v38 = vsel %vm400_vm1, %v2668_v48, %v2670_v46  ;;  %v12038_v32 = vsel %vm400_vm1, %v2672_v47, %v2673_v12  ;;  %v12041_v51 = vsel %vm400_vm1, %v2673_v12, %v2675_v63 }
 0x286   :  { %16700 = vst [vmem:[#allocation99_spill] sm:$0xff] %v12038_v32  ;;  %16701 = vst [vmem:[#allocation26_spill] sm:$0xff] %v12041_v51  ;;  %v12047_v59 = vsel %vm400_vm1, %v2677_v6, %v15052_v56  ;;  %v12052_v25 = vadd.f32 %v11965_v17, %v16703_v23  ;;  %v12056_v55 = vadd.f32 %v11968_v20, %v16705_v45  ;;  %v16717_v17 = vld [vmem:[#allocation31_spill] sm:$0xff]  ;;  %v16719_v20 = vld [vmem:[#allocation150_spill] sm:$0xff]  ;;  %v3094_v18 = vrot.slane %v16786_v60, 2 }
 0x287   :  { %16702 = vst [vmem:[#allocation27_spill] sm:$0xff] %v12047_v59  ;;  %v12059_v36 = vadd.f32 %v2609_v0, %v16707_v28  ;;  %v12062_v40 = vadd.f32 %v2611_v33, %v16709_v42  ;;  %v12065_v62 = vadd.f32 %v2614_v35, %v16711_v52  ;;  %v12068_v19 = vadd.f32 %v2616_v37, %v16713_v1  ;;  %v16721_v0 = vld [vmem:[#allocation32_spill] sm:$0xff]  ;;  %v16723_v33 = vld [vmem:[#allocation151_spill] sm:$0xff]  ;;  %v16725_v35 = vld [vmem:[#allocation101_spill] sm:$0xff] }
 0x288   :  { %16704 = vst [vmem:[#allocation28_spill] sm:$0xff] %v12052_v25  ;;  %16706 = vst [vmem:[#allocation29_spill] sm:$0xff] %v12056_v55  ;;  %v12071_v10 = vadd.f32 %v2619_v44, %v16715_v14  ;;  %v12074_v57 = vadd.f32 %v2621_v49, %v16717_v17  ;;  %v12077_v34 = vadd.f32 %v2624_v26, %v16719_v20  ;;  %v16727_v37 = vld [vmem:[#allocation6_spill] sm:$0xff]  ;;  %v16729_v44 = vld [vmem:[#allocation64_spill] sm:$0xff] }
 0x289   :  { %16708 = vst [vmem:[#allocation47_spill] sm:$0xff] %v12059_v36  ;;  %16710 = vst [vmem:[#allocation126_spill] sm:$0xff] %v12062_v40  ;;  %v12080_v48 = vadd.f32 %v2626_v4, %v16721_v0  ;;  %v12083_v46 = vadd.f32 %v2629_v54, %v16723_v33  ;;  %v12086_v47 = vadd.f32 %v2631_v22, %v16725_v35  ;;  %v16731_v49 = vld [vmem:[#allocation4_spill] sm:$0xff]  ;;  %v16735_v4 = vld [vmem:[#allocation7_spill] sm:$0xff] }
 0x28a   :  { %16712 = vst [vmem:[#allocation3_spill] sm:$0xff] %v12065_v62  ;;  %16714 = vst [vmem:[#allocation49_spill] sm:$0xff] %v12068_v19  ;;  %v12089_v12 = vadd.f32 %v2634_v11, %v16727_v37  ;;  %v12092_v63 = vadd.f32 %v2636_v2, %v16729_v44  ;;  %v12095_v6 = vadd.f32 %v2639_v39, %v16731_v49  ;;  %v16733_v26 = vld [vmem:[#allocation72_spill] sm:$0xff]  ;;  %v16737_v54 = vld [vmem:[#allocation70_spill] sm:$0xff] }
 0x28b   :  { %16716 = vst [vmem:[#allocation54_spill] sm:$0xff] %v12071_v10  ;;  %16718 = vst [vmem:[#allocation55_spill] sm:$0xff] %v12074_v57  ;;  %v12098_v23 = vadd.f32 %v2641_v41, %v16733_v26  ;;  %v12101_v45 = vadd.f32 %v2644_v7, %v16735_v4  ;;  %v12104_v28 = vadd.f32 %v2646_v21, %v16737_v54  ;;  %v16739_v22 = vld [vmem:[#allocation8_spill] sm:$0xff]  ;;  %v16741_v11 = vld [vmem:[#allocation73_spill] sm:$0xff] }
 0x28c   :  { %16720 = vst [vmem:[#allocation56_spill] sm:$0xff] %v12077_v34  ;;  %16722 = vst [vmem:[#allocation62_spill] sm:$0xff] %v12080_v48  ;;  %v12107_v42 = vadd.f32 %v2649_v24, %v16739_v22  ;;  %v12110_v52 = vadd.f32 %v2651_v43, %v16741_v11  ;;  %v16743_v2 = vld [vmem:[#allocation9_spill] sm:$0xff]  ;;  %v16745_v39 = vld [vmem:[#allocation80_spill] sm:$0xff] }
 0x28d   :  { %16724 = vst [vmem:[#allocation65_spill] sm:$0xff] %v12083_v46  ;;  %16726 = vst [vmem:[#allocation71_spill] sm:$0xff] %v12086_v47  ;;  %v12113_v1 = vadd.f32 %v2654_v50, %v16743_v2  ;;  %v12116_v14 = vadd.f32 %v2656_v53, %v16745_v39  ;;  %v16747_v41 = vld [vmem:[#allocation10_spill] sm:$0xff]  ;;  %v16751_v21 = vld [vmem:[#allocation12_spill] sm:$0xff] }
 0x28e   :  { %16728 = vst [vmem:[#allocation107_spill] sm:$0xff] %v12089_v12  ;;  %16730 = vst [vmem:[#allocation108_spill] sm:$0xff] %v12092_v63  ;;  %v12119_v17 = vadd.f32 %v2659_v61, %v16747_v41  ;;  %v16749_v7 = vld [vmem:[#allocation78_spill] sm:$0xff]  ;;  %v12125_v0 = vadd.f32 %v2664_v16, %v16751_v21  ;;  %v16753_v24 = vld [vmem:[#allocation59_spill] sm:$0xff] }
 0x28f   :  { %16732 = vst [vmem:[#allocation109_spill] sm:$0xff] %v12095_v6  ;;  %16734 = vst [vmem:[#allocation110_spill] sm:$0xff] %v12098_v23  ;;  %v12122_v20 = vadd.f32 %v2661_v13, %v16749_v7  ;;  %v12128_v33 = vadd.f32 %v2666_v58, %v16753_v24  ;;  %v16755_v43 = vld [vmem:[#allocation13_spill] sm:$0xff]  ;;  %v16757_v50 = vld [vmem:[#allocation48_spill] sm:$0xff] }
 0x290   :  { %16736 = vst [vmem:[#allocation114_spill] sm:$0xff] %v12101_v45  ;;  %16738 = vst [vmem:[#allocation115_spill] sm:$0xff] %v12104_v28  ;;  %v12131_v35 = vadd.f32 %v2669_v9, %v16755_v43  ;;  %v12134_v37 = vadd.f32 %v2671_v38, %v16757_v50  ;;  %v5645_v53 = vld [vmem:[%s14611_s0 + $0x90] sm:$0xff]  ;;  %v5646_v13 = vld [vmem:[%s14611_s0 + $0x98] sm:$0xff] }
 0x291   :  { %16740 = vst [vmem:[#allocation116_spill] sm:$0xff] %v12107_v42  ;;  %16742 = vst [vmem:[#allocation121_spill] sm:$0xff] %v12110_v52  ;;  %v16759_v61 = vld [vmem:[#allocation76_spill] sm:$0xff]  ;;  %v5647_v9 = vld [vmem:[%s14611_s0 + $0xa8] sm:$0xff] }
 0x292   :  { %16744 = vst [vmem:[#allocation122_spill] sm:$0xff] %v12113_v1  ;;  %16746 = vst [vmem:[#allocation165_spill] sm:$0xff] %v12116_v14  ;;  %v12140_v44 = vmul.f32 %v5645_v53, %v16759_v61  ;;  %v12146_v16 = vmul.f32 %v5646_v13, %v16759_v61  ;;  %v12150_v58 = vmul.f32 %v11756_v3, %v16759_v61  ;;  %v5648_v49 = vld [vmem:[%s14611_s0 + $0xb0] sm:$0xff]  ;;  %v5649_v3 = vld [vmem:[%s14611_s0 + $0xc0] sm:$0xff] }
 0x293   :  { %16748 = vst [vmem:[#allocation166_spill] sm:$0xff] %v12119_v17  ;;  %16750 = vst [vmem:[#allocation123_spill] sm:$0xff] %v12122_v20  ;;  %v12156_v38 = vmul.f32 %v5647_v9, %v16759_v61  ;;  %v12162_v26 = vmul.f32 %v5648_v49, %v16759_v61  ;;  %v12166_v4 = vmul.f32 %v11773_v27, %v16759_v61  ;;  %v5650_v22 = vld [vmem:[%s14611_s0 + $0xc8] sm:$0xff]  ;;  %v16766_v39 = vld [vmem:[#allocation156_spill] sm:$0xff] }
 0x294   :  { %16752 = vst [vmem:[#allocation168_spill] sm:$0xff] %v12125_v0  ;;  %16754 = vst [vmem:[#allocation170_spill] sm:$0xff] %v12128_v33  ;;  %v12172_v54 = vmul.f32 %v5649_v3, %v16759_v61  ;;  %v12178_v11 = vmul.f32 %v5650_v22, %v16759_v61  ;;  %v5651_v2 = vld [vmem:[%s14611_s0 + $0x1e8] sm:$0xff]  ;;  %v12188_v41 = vmul.f32 %v16766_v39, %v16759_v61  ;;  %v5652_v7 = vld [vmem:[%s14611_s0 + $0x1f8] sm:$0xff] }
 0x295   :  { %16756 = vst [vmem:[#allocation124_spill] sm:$0xff] %v12131_v35  ;;  %16758 = vst [vmem:[#allocation117_spill] sm:$0xff] %v12134_v37  ;;  %v12184_v27 = vmul.f32 %v5651_v2, %v16759_v61  ;;  %v12194_v21 = vmul.f32 %v5652_v7, %v16759_v61  ;;  %v5653_v24 = vld [vmem:[%s14611_s0 + $0x200] sm:$0xff]  ;;  %v16767_v50 = vld [vmem:[#allocation157_spill] sm:$0xff] }
 0x296   :  { %16760 = vst [vmem:[#allocation171_spill] sm:$0xff] %v12150_v58  ;;  %16761 = vst [vmem:[#allocation173_spill] sm:$0xff] %v12156_v38  ;;  %v12200_v43 = vmul.f32 %v5653_v24, %v16759_v61  ;;  %v12204_v53 = vmul.f32 %v16767_v50, %v16759_v61  ;;  %v5654_v13 = vld [vmem:[%s14611_s0 + $0x210] sm:$0xff]  ;;  %v5655_v49 = vld [vmem:[%s14611_s0 + $0x218] sm:$0xff] }
 0x297   :  { %16762 = vst [vmem:[#allocation175_spill] sm:$0xff] %v12162_v26  ;;  %16763 = vst [vmem:[#allocation38_spill] sm:$0xff] %v12166_v4  ;;  %v12210_v9 = vmul.f32 %v5654_v13, %v16759_v61  ;;  %v12216_v3 = vmul.f32 %v5655_v49, %v16759_v61  ;;  %v16768_v22 = vld [vmem:[#allocation158_spill] sm:$0xff]  ;;  %v5656_v39 = vld [vmem:[%s14611_s0 + $0x228] sm:$0xff] }
 0x298   :  { %16764 = vst [vmem:[#allocation40_spill] sm:$0xff] %v12172_v54  ;;  %16765 = vst [vmem:[#allocation46_spill] sm:$0xff] %v12178_v11  ;;  %v12220_v2 = vmul.f32 %v16768_v22, %v16759_v61  ;;  %v12226_v7 = vmul.f32 %v5656_v39, %v16759_v61  ;;  %v5657_v24 = vld [vmem:[%s14611_s0 + $0x230] sm:$0xff]  ;;  %v16769_v13 = vld [vmem:[#allocation2_spill] sm:$0xff] }
 0x299   :  { %v12232_v50 = vmul.f32 %v5657_v24, %v16759_v61  ;;  %v12236_v49 = vmul.f32 %v16769_v13, %v16759_v61  ;;  %v5658_v22 = vld [vmem:[%s14611_s0 + $0x240] sm:$0xff]  ;;  %v5659_v39 = vld [vmem:[%s14611_s0 + $0x248] sm:$0xff]  ;;  %v5660_v13 = vld [vmem:[%s14611_s0 + $0x258] sm:$0xff] }
 0x29a   :  { %v12242_v29 = vmul.f32 %v5658_v22, %v16759_v61  ;;  %v12248_v56 = vmul.f32 %v5659_v39, %v16759_v61  ;;  %v16770_v24 = vld [vmem:[#allocation159_spill] sm:$0xff]  ;;  %v12258_v5 = vmul.f32 %v5660_v13, %v16759_v61  ;;  %v5661_v22 = vld [vmem:[%s14611_s0 + $0x260] sm:$0xff]  ;;  %v16771_v39 = vld [vmem:[#allocation160_spill] sm:$0xff] }
 0x29b   :  { %v12252_v31 = vmul.f32 %v16770_v24, %v16759_v61  ;;  %v12264_v59 = vmul.f32 %v5661_v22, %v16759_v61  ;;  %v12268_v8 = vmul.f32 %v16771_v39, %v16759_v61  ;;  %v5662_v24 = vld [vmem:[%s14611_s0 + $0x270] sm:$0xff]  ;;  %v5663_v13 = vld [vmem:[%s14611_s0 + $0x278] sm:$0xff]  ;;  %v5664_v39 = vld [vmem:[%s14611_s0 + $0x288] sm:$0xff] }
 0x29c   :  { %v12274_v15 = vmul.f32 %v5662_v24, %v16759_v61  ;;  %v12280_v37 = vmul.f32 %v5663_v13, %v16759_v61  ;;  %v16772_v22 = vld [vmem:[#allocation161_spill] sm:$0xff]  ;;  %v12290_v35 = vmul.f32 %v5664_v39, %v16759_v61  ;;  %v5665_v24 = vld [vmem:[%s14611_s0 + $0x290] sm:$0xff]  ;;  %v16773_v13 = vld [vmem:[#allocation162_spill] sm:$0xff] }
 0x29d   :  { %v12284_v51 = vmul.f32 %v16772_v22, %v16759_v61  ;;  %v12296_v33 = vmul.f32 %v5665_v24, %v16759_v61  ;;  %v12300_v32 = vmul.f32 %v16773_v13, %v16759_v61  ;;  %v5666_v22 = vld [vmem:[%s14611_s0 + $0x2a0] sm:$0xff]  ;;  %v5667_v39 = vld [vmem:[%s14611_s0 + $0x2a8] sm:$0xff]  ;;  %v5668_v13 = vld [vmem:[%s14611_s0 + $0x2b8] sm:$0xff] }
 0x29e   :  { %v12306_v0 = vmul.f32 %v5666_v22, %v16759_v61  ;;  %v12312_v20 = vmul.f32 %v5667_v39, %v16759_v61  ;;  %v16774_v24 = vld [vmem:[#allocation163_spill] sm:$0xff]  ;;  %v12322_v14 = vmul.f32 %v5668_v13, %v16759_v61  ;;  %v5669_v22 = vld [vmem:[%s14611_s0 + $0x2c0] sm:$0xff]  ;;  %v16775_v39 = vld [vmem:[#allocation164_spill] sm:$0xff] }
 0x29f   :  { %v12316_v17 = vmul.f32 %v16774_v24, %v16759_v61  ;;  %v12328_v1 = vmul.f32 %v5669_v22, %v16759_v61  ;;  %v12332_v52 = vmul.f32 %v16775_v39, %v16759_v61  ;;  %v5670_v24 = vld [vmem:[%s14611_s0 + $0x2d0] sm:$0xff]  ;;  %v5671_v13 = vld [vmem:[%s14611_s0 + $0x2d8] sm:$0xff]  ;;  %v16776_v22 = vld [vmem:[#allocation63_spill] sm:$0xff] }
 0x2a0   :  { %v12338_v42 = vmul.f32 %v5670_v24, %v16759_v61  ;;  %v12344_v28 = vmul.f32 %v5671_v13, %v16759_v61  ;;  %v12348_v45 = vmul.f32 %v16776_v22, %v16759_v61  ;;  %v5672_v39 = vld [vmem:[%s14611_s0 + $0x2e8] sm:$0xff]  ;;  %v5673_v24 = vld [vmem:[%s14611_s0 + $0x2f0] sm:$0xff]  ;;  %v16777_v13 = vld [vmem:[#allocation25_spill] sm:$0xff] }
 0x2a1   :  { %v12354_v23 = vmul.f32 %v5672_v39, %v16759_v61  ;;  %v12360_v6 = vmul.f32 %v5673_v24, %v16759_v61  ;;  %v12364_v63 = vmul.f32 %v16777_v13, %v16759_v61  ;;  %v5674_v22 = vld [vmem:[%s14611_s0 + $0x300] sm:$0xff]  ;;  %v5675_v39 = vld [vmem:[%s14611_s0 + $0x308] sm:$0xff]  ;;  %v16778_v24 = vld [vmem:[#allocation57_spill] sm:$0xff] }
 0x2a2   :  { %v12370_v12 = vmul.f32 %v5674_v22, %v16759_v61  ;;  %v12376_v47 = vmul.f32 %v5675_v39, %v16759_v61  ;;  %v12380_v46 = vmul.f32 %v16778_v24, %v16759_v61  ;;  %v5676_v13 = vld [vmem:[%s14611_s0 + $0x318] sm:$0xff]  ;;  %v5677_v22 = vld [vmem:[%s14611_s0 + $0x320] sm:$0xff]  ;;  %v16782_v4 = vld [vmem:[#allocation91_spill] sm:$0xff] }
 0x2a3   :  { %v12386_v48 = vmul.f32 %v5676_v13, %v16759_v61  ;;  %v12392_v11 = vmul.f32 %v5677_v22, %v16759_v61  ;;  %v16779_v39 = vld [vmem:[#allocation77_spill] sm:$0xff]  ;;  %v16781_v24 = vld [vmem:[#allocation146_spill] sm:$0xff]  ;;  %v3087_v57 = vrot.slane %v16782_v4, 2  ;;  %v16788_v22 = vld [vmem:[#allocation44_spill] sm:$0xff] }
 0x2a4   :  { %v12396_v54 = vmul.f32 %v16779_v39, %v16759_v61  ;;  %v3086_v34 = vrot.slane %v16781_v24, 2  ;;  %v16783_v26 = vld [vmem:[#allocation18_spill] sm:$0xff]  ;;  %v16784_v10 = vld [vmem:[#allocation93_spill] sm:$0xff]  ;;  %v3097_v40 = vrot.slane %v16788_v22, 2  ;;  %v5678_v39 = vld [vmem:[%s14611_s0 + $0x330] sm:$0xff] }
 0x2a5   :  { %v3089_v38 = vrot.slane %v16783_v26, 2  ;;  %v3091_v13 = vrot.slane %v16784_v10, 2  ;;  %v16785_v58 = vld [vmem:[#allocation94_spill] sm:$0xff]  ;;  %v12411_v4 = vmul.f32 %v5678_v39, %v16759_v61  ;;  %v5679_v10 = vld [vmem:[%s14611_s0 + $0x338] sm:$0xff]  ;;  %v16792_v60 = vld [vmem:[#allocation52_spill] sm:$0xff] }
 0x2a6   :  { %16780 = vst [vmem:[#allocation34_spill] sm:$0xff] %v12396_v54  ;;  %v3092_v30 = vrot.slane %v16785_v58, 2  ;;  %v16787_v19 = vld [vmem:[#allocation42_spill] sm:$0xff]  ;;  %v12417_v58 = vmul.f32 %v5679_v10, %v16759_v61  ;;  %v16793_v26 = vld [vmem:[#allocation17_spill] sm:$0xff]  ;;  %v5680_v39 = vld [vmem:[%s14611_s0 + $0x348] sm:$0xff] }
 0x2a7   :  { %v3096_v62 = vrot.slane %v16787_v19, 2  ;;  %v16789_v36 = vld [vmem:[#allocation50_spill] sm:$0xff]  ;;  %16790 = vst [vmem:[#allocation69_spill] sm:$0xff] %v12411_v4  ;;  %v3101_v19 = vrot.slane %v16792_v60, 2  ;;  %v12429_v25 = vmul.f32 %v5680_v39, %v16759_v61  ;;  %v5681_v10 = vld [vmem:[%s14611_s0 + $0x350] sm:$0xff]  ;;  %v16796_v60 = vld [vmem:[#allocation35_spill] sm:$0xff] }
 0x2a8   :  { %v3099_v55 = vrot.slane %v16789_v36, 2  ;;  %16791 = vst [vmem:[#allocation58_spill] sm:$0xff] %v12417_v58  ;;  %v16794_v36 = vld [vmem:[#allocation84_spill] sm:$0xff]  ;;  %v12435_v58 = vmul.f32 %v5681_v10, %v16759_v61  ;;  %v12439_v24 = vmul.f32 %v16759_v61, %v16796_v60  ;;  %v12448_v39 = vsel %vm885_vm2, %v3091_v13, %v3092_v30 }
 0x2a9   :  { %v12423_v22 = vmul.f32 %v16794_v36, %v16759_v61  ;;  %v12442_v36 = vsel %vm885_vm2, %v3086_v34, %v3087_v57  ;;  %v3169_v4 = vrot.slane %v12188_v41, 2  ;;  %v12452_v54 = vsel %vm885_vm2, %v3092_v30, %v3094_v18  ;;  %v16798_v60 = vld [vmem:[#allocation132_spill] sm:$0xff] }
 0x2aa   :  { %16797 = vst [vmem:[#allocation134_spill] sm:$0xff] %v12442_v36  ;;  %v12455_v10 = vsel %vm885_vm2, %v3096_v62, %v3097_v40  ;;  %v12458_v61 = vsel %vm885_vm2, %v3097_v40, %v3099_v55  ;;  %v16799_v36 = vrot.slane %v16793_v26, 2  ;;  %v15056_v30 = vrot.slane %v12184_v27, 2 }
 0x2ab   :  { %16795 = vst [vmem:[#allocation83_spill] sm:$0xff] %v12423_v22  ;;  %v12445_v22 = vsel %vm885_vm2, %v3087_v57, %v3089_v38  ;;  %v3171_v18 = vrot.slane %v12194_v21, 2  ;;  %v3172_v62 = vrot.slane %v12200_v43, 2  ;;  %v3174_v55 = vrot.slane %v12204_v53, 2 }
 0x2ac   :  { %v12464_v57 = vsel %vm885_vm2, %v3101_v19, %v16799_v36  ;;  %v3176_v40 = vrot.slane %v12210_v9, 2  ;;  %v12476_v13 = vsel %vm885_vm2, %v15056_v30, %v3169_v4  ;;  %v3177_v19 = vrot.slane %v12216_v3, 2  ;;  %v16865_v30 = vld [vmem:[#allocation136_spill] sm:$0xff] }
 0x2ad   :  { %v3179_v36 = vrot.slane %v12220_v2, 2  ;;  %v3181_v38 = vrot.slane %v12226_v7, 2  ;;  %v3182_v41 = vrot.slane %v12232_v50, 2  ;;  %v3184_v21 = vrot.slane %v12236_v49, 2 }
 0x2ae   :  { %v3186_v43 = vrot.slane %v12242_v29, 2  ;;  %v3187_v53 = vrot.slane %v12248_v56, 2  ;;  %v3189_v9 = vrot.slane %v12252_v31, 2  ;;  %v3191_v34 = vrot.slane %v12258_v5, 2 }
 0x2af   :  { %v3192_v4 = vrot.slane %v12264_v59, 2  ;;  %v3194_v3 = vrot.slane %v12268_v8, 2  ;;  %v12490_v2 = vsel %vm885_vm2, %v3171_v18, %v3172_v62  ;;  %v3196_v7 = vrot.slane %v12274_v15, 2 }
 0x2b0   :  { %v3197_v50 = vrot.slane %v12280_v37, 2  ;;  %v3199_v49 = vrot.slane %v12284_v51, 2  ;;  %v12496_v29 = vsel %vm885_vm2, %v3172_v62, %v3174_v55  ;;  %v3201_v56 = vrot.slane %v12290_v35, 2 }
 0x2b1   :  { %v3202_v5 = vrot.slane %v12296_v33, 2  ;;  %v3204_v31 = vrot.slane %v12300_v32, 2  ;;  %v12502_v8 = vsel %vm885_vm2, %v3176_v40, %v3177_v19  ;;  %v12505_v59 = vsel %vm885_vm2, %v3177_v19, %v3179_v36 }
 0x2b2   :  { %v12508_v15 = vsel %vm885_vm2, %v3181_v38, %v3182_v41  ;;  %v12511_v51 = vsel %vm885_vm2, %v3182_v41, %v3184_v21  ;;  %v12514_v37 = vsel %vm885_vm2, %v3186_v43, %v3187_v53  ;;  %v12517_v35 = vsel %vm885_vm2, %v3187_v53, %v3189_v9 }
 0x2b3   :  { %v12520_v32 = vsel %vm885_vm2, %v3191_v34, %v3192_v4  ;;  %v12523_v33 = vsel %vm885_vm2, %v3192_v4, %v3194_v3  ;;  %v12526_v18 = vsel %vm885_vm2, %v3196_v7, %v3197_v50  ;;  %v12529_v38 = vsel %vm885_vm2, %v3197_v50, %v3199_v49  ;;  %v16800_v3 = vld [vmem:[#allocation34_spill] sm:$0xff]  ;;  %v16801_v7 = vld [vmem:[#allocation69_spill] sm:$0xff]  ;;  %v16803_v49 = vld [vmem:[#allocation83_spill] sm:$0xff] }
 0x2b4   :  { %v3206_v41 = vrot.slane %v12306_v0, 2  ;;  %v3207_v62 = vrot.slane %v12312_v20, 2  ;;  %v3203_v55 = vsel %vm885_vm2, %v3201_v56, %v3202_v5  ;;  %v3205_v40 = vsel %vm885_vm2, %v3202_v5, %v3204_v31  ;;  %v16802_v50 = vld [vmem:[#allocation58_spill] sm:$0xff] }
 0x2b5   :  { %v3209_v34 = vrot.slane %v12316_v17, 2  ;;  %v3211_v19 = vrot.slane %v12322_v14, 2  ;;  %v3212_v36 = vrot.slane %v12328_v1, 2  ;;  %v3214_v21 = vrot.slane %v12332_v52, 2 }
 0x2b6   :  { %v3216_v43 = vrot.slane %v12338_v42, 2  ;;  %v3217_v53 = vrot.slane %v12344_v28, 2  ;;  %v3219_v0 = vrot.slane %v12348_v45, 2  ;;  %v3221_v20 = vrot.slane %v12354_v23, 2 }
 0x2b7   :  { %v3222_v9 = vrot.slane %v12360_v6, 2  ;;  %v3224_v4 = vrot.slane %v12364_v63, 2  ;;  %v3226_v17 = vrot.slane %v12370_v12, 2  ;;  %v3227_v14 = vrot.slane %v12376_v47, 2 }
 0x2b8   :  { %v3229_v1 = vrot.slane %v12380_v46, 2  ;;  %v3231_v52 = vrot.slane %v12386_v48, 2  ;;  %v3232_v42 = vrot.slane %v12392_v11, 2  ;;  %v3241_v28 = vrot.slane %v12429_v25, 2 }
 0x2b9   :  { %v3242_v45 = vrot.slane %v12435_v58, 2  ;;  %v3244_v23 = vrot.slane %v12439_v24, 2  ;;  %v3234_v6 = vrot.slane %v16800_v3, 2  ;;  %v3236_v63 = vrot.slane %v16801_v7, 2  ;;  %v16812_v7 = vld [vmem:[#allocation85_spill] sm:$0xff] }
 0x2ba   :  { %v3237_v12 = vrot.slane %v16802_v50, 2  ;;  %v3239_v47 = vrot.slane %v16803_v49, 2  ;;  %v3208_v46 = vsel %vm885_vm2, %v3206_v41, %v3207_v62  ;;  %v3210_v48 = vsel %vm885_vm2, %v3207_v62, %v3209_v34  ;;  %v16814_v50 = vld [vmem:[#allocation61_spill] sm:$0xff]  ;;  %v16816_v49 = vld [vmem:[#allocation95_spill] sm:$0xff] }
 0x2bb   :  { %v3213_v11 = vsel %vm885_vm2, %v3211_v19, %v3212_v36  ;;  %v3215_v25 = vsel %vm885_vm2, %v3212_v36, %v3214_v21  ;;  %v3218_v58 = vsel %vm885_vm2, %v3216_v43, %v3217_v53  ;;  %v3220_v24 = vsel %vm885_vm2, %v3217_v53, %v3219_v0  ;;  %v16804_v43 = vld [vmem:[#allocation28_spill] sm:$0xff]  ;;  %v16805_v53 = vld [vmem:[#allocation134_spill] sm:$0xff] }
 0x2bc   :  { %v3223_v56 = vsel %vm885_vm2, %v3221_v20, %v3222_v9  ;;  %v3225_v5 = vsel %vm885_vm2, %v3222_v9, %v3224_v4  ;;  %v3228_v31 = vsel %vm885_vm2, %v3226_v17, %v3227_v14  ;;  %v3230_v3 = vsel %vm885_vm2, %v3227_v14, %v3229_v1  ;;  %v16806_v20 = vld [vmem:[#allocation29_spill] sm:$0xff]  ;;  %v16807_v4 = vld [vmem:[#allocation47_spill] sm:$0xff]  ;;  %v16808_v14 = vld [vmem:[#allocation126_spill] sm:$0xff] }
 0x2bd   :  { %v3243_v41 = vsel %vm885_vm2, %v3241_v28, %v3242_v45  ;;  %v3245_v62 = vsel %vm885_vm2, %v3242_v45, %v3244_v23  ;;  %v3233_v34 = vsel %vm885_vm2, %v3231_v52, %v3232_v42  ;;  %v3235_v19 = vsel %vm885_vm2, %v3232_v42, %v3234_v6  ;;  %v16809_v28 = vld [vmem:[#allocation3_spill] sm:$0xff]  ;;  %v16810_v42 = vld [vmem:[#allocation49_spill] sm:$0xff]  ;;  %v16811_v23 = vld [vmem:[#allocation82_spill] sm:$0xff] }
 0x2be   :  { %v3238_v36 = vsel %vm885_vm2, %v3236_v63, %v3237_v12  ;;  %v3240_v21 = vsel %vm885_vm2, %v3237_v12, %v3239_v47  ;;  %v3310_v0 = vadd.f32 %v16805_v53, %v16804_v43  ;;  %v3311_v9 = vadd.f32 %v12445_v22, %v16806_v20  ;;  %v16813_v22 = vld [vmem:[#allocation133_spill] sm:$0xff]  ;;  %v16815_v12 = vld [vmem:[#allocation104_spill] sm:$0xff] }
 0x2bf   :  { %v3312_v17 = vadd.f32 %v12448_v39, %v16807_v4  ;;  %v3313_v1 = vadd.f32 %v12452_v54, %v16808_v14  ;;  %v12583_v52 = vadd.f32 %v12455_v10, %v16809_v28  ;;  %v12587_v45 = vadd.f32 %v12458_v61, %v16810_v42  ;;  %v16817_v61 = vld [vmem:[#allocation139_spill] sm:$0xff]  ;;  %v16820_v4 = vld [vmem:[#allocation142_spill] sm:$0xff]  ;;  %v16822_v28 = vld [vmem:[#allocation37_spill] sm:$0xff] }
 0x2c0   :  { %v12590_v6 = vadd.f32 %v3243_v41, %v16811_v23  ;;  %v12593_v63 = vadd.f32 %v3245_v62, %v16812_v7  ;;  %v3343_v39 = vadd.f32 %v12476_v13, %v16813_v22  ;;  %v3344_v54 = vadd.f32 %v12490_v2, %v16814_v50  ;;  %v16818_v41 = vld [vmem:[#allocation111_spill] sm:$0xff]  ;;  %v16819_v62 = vld [vmem:[#allocation113_spill] sm:$0xff]  ;;  %v16825_v7 = vld [vmem:[#allocation16_spill] sm:$0xff] }
 0x2c1   :  { %v3345_v10 = vadd.f32 %v12496_v29, %v16815_v12  ;;  %v3346_v47 = vadd.f32 %v12502_v8, %v16816_v49  ;;  %v3347_v43 = vadd.f32 %v12505_v59, %v16817_v61  ;;  %v3348_v53 = vadd.f32 %v12508_v15, %v16818_v41  ;;  %v16821_v14 = vld [vmem:[#allocation143_spill] sm:$0xff]  ;;  %v16824_v23 = vld [vmem:[#allocation169_spill] sm:$0xff]  ;;  %v16826_v22 = vld [vmem:[#allocation172_spill] sm:$0xff] }
 0x2c2   :  { %v3349_v20 = vadd.f32 %v12511_v51, %v16819_v62  ;;  %v3350_v13 = vadd.f32 %v12514_v37, %v16820_v4  ;;  %v3351_v2 = vadd.f32 %v12517_v35, %v16821_v14  ;;  %v3352_v29 = vadd.f32 %v12520_v32, %v16822_v28  ;;  %v16823_v42 = vld [vmem:[#allocation167_spill] sm:$0xff]  ;;  %v16827_v50 = vld [vmem:[#allocation174_spill] sm:$0xff]  ;;  %v16828_v37 = vld [vmem:[#allocation20_spill] sm:$0xff] }
 0x2c3   :  { %v3353_v8 = vadd.f32 %v12523_v33, %v16823_v42  ;;  %v3354_v59 = vadd.f32 %v12526_v18, %v16824_v23  ;;  %v3355_v15 = vadd.f32 %v12529_v38, %v16825_v7  ;;  %v3356_v51 = vadd.f32 %v3203_v55, %v16826_v22  ;;  %v16829_v61 = vld [vmem:[#allocation39_spill] sm:$0xff]  ;;  %v16830_v41 = vld [vmem:[#allocation41_spill] sm:$0xff]  ;;  %v16832_v14 = vld [vmem:[#allocation130_spill] sm:$0xff] }
 0x2c4   :  { %v3357_v12 = vadd.f32 %v3205_v40, %v16827_v50  ;;  %v3358_v49 = vadd.f32 %v3208_v46, %v16828_v37  ;;  %v3359_v35 = vadd.f32 %v3210_v48, %v16829_v61  ;;  %v3360_v62 = vadd.f32 %v3213_v11, %v16830_v41  ;;  %v16831_v32 = vld [vmem:[#allocation131_spill] sm:$0xff]  ;;  %v12631_v18 = vld [vmem:[%s14612_s2] ss:$0 sm:$0xff]  ;;  %v16835_v40 = vld [vmem:[#allocation5_spill] sm:$0xff] }
 0x2c5   :  { %v3361_v4 = vadd.f32 %v3215_v25, %v16831_v32  ;;  %v3362_v33 = vadd.f32 %v3218_v58, %v16832_v14  ;;  %v16833_v38 = vld [vmem:[#allocation74_spill] sm:$0xff]  ;;  %v16834_v55 = vld [vmem:[#allocation79_spill] sm:$0xff]  ;;  %v3365_v23 = vadd.f32 %v3225_v5, %v16835_v40  ;;  %v16836_v46 = vld [vmem:[#allocation60_spill] sm:$0xff]  ;;  %v12643_v14 = vadd.f32 %v12631_v18, %v3310_v0 }
 0x2c6   :  { %v3363_v28 = vadd.f32 %v3220_v24, %v16833_v38  ;;  %v3364_v42 = vadd.f32 %v3223_v56, %v16834_v55  ;;  %v3366_v7 = vadd.f32 %v3228_v31, %v16836_v46  ;;  %v16837_v48 = vld [vmem:[#allocation66_spill] sm:$0xff]  ;;  %v16838_v11 = vld [vmem:[#allocation103_spill] sm:$0xff]  ;;  %v16839_v25 = vld [vmem:[#allocation125_spill] sm:$0xff]  ;;  %v12646_v24 = vadd.f32 %v12631_v18, %v3311_v9 }
 0x2c7   :  { %v3367_v22 = vadd.f32 %v3230_v3, %v16837_v48  ;;  %v3368_v50 = vadd.f32 %v3233_v34, %v16838_v11  ;;  %v3369_v37 = vadd.f32 %v3235_v19, %v16839_v25  ;;  %v16840_v58 = vld [vmem:[#allocation75_spill] sm:$0xff]  ;;  %v16841_v41 = vld [vmem:[#allocation81_spill] sm:$0xff]  ;;  %16842 = vst [vmem:[#allocation86_spill] sm:$0xff] %v12643_v14  ;;  %v12649_v56 = vadd.f32 %v12631_v18, %v3312_v17  ;;  %v16850_v46 = vld [vmem:[#allocation54_spill] sm:$0xff] }
 0x2c8   :  { %v3370_v61 = vadd.f32 %v3238_v36, %v16840_v58  ;;  %v3371_v32 = vadd.f32 %v3240_v21, %v16841_v41  ;;  %16843 = vst [vmem:[#allocation87_spill] sm:$0xff] %v12646_v24  ;;  %v12652_v5 = vadd.f32 %v12631_v18, %v3313_v1  ;;  %v12655_v31 = vadd.f32 %v12631_v18, %v3343_v39  ;;  %v16849_v40 = vld [vmem:[#allocation171_spill] sm:$0xff]  ;;  %v16854_v11 = vld [vmem:[#allocation173_spill] sm:$0xff] }
 0x2c9   :  { %16844 = vst [vmem:[#allocation88_spill] sm:$0xff] %v12649_v56  ;;  %v12658_v3 = vadd.f32 %v12631_v18, %v3344_v54  ;;  %v12661_v34 = vadd.f32 %v12631_v18, %v3345_v10  ;;  %v12664_v19 = vadd.f32 %v12631_v18, %v3346_v47  ;;  %v12667_v36 = vadd.f32 %v12631_v18, %v3347_v43  ;;  %v16855_v25 = vld [vmem:[#allocation175_spill] sm:$0xff] }
 0x2ca   :  { %16845 = vst [vmem:[#allocation89_spill] sm:$0xff] %v12652_v5  ;;  %v12670_v21 = vadd.f32 %v12631_v18, %v3348_v53  ;;  %v12673_v0 = vadd.f32 %v12631_v18, %v3349_v20  ;;  %v12676_v9 = vadd.f32 %v12631_v18, %v3350_v13  ;;  %v12679_v17 = vadd.f32 %v12631_v18, %v3351_v2  ;;  %v12777_v58 = vld [vmem:[%s14610_s1 + $0x8] ss:$0 sm:$0xff] }
 0x2cb   :  { %v12682_v1 = vadd.f32 %v12631_v18, %v3352_v29  ;;  %v12685_v39 = vadd.f32 %v12631_v18, %v3353_v8  ;;  %v12688_v54 = vadd.f32 %v12631_v18, %v3354_v59  ;;  %v12691_v10 = vadd.f32 %v12631_v18, %v3355_v15 }
 0x2cc   :  { %v12694_v47 = vadd.f32 %v12631_v18, %v3356_v51  ;;  %v12697_v43 = vadd.f32 %v12631_v18, %v3357_v12  ;;  %v12700_v53 = vadd.f32 %v12631_v18, %v3358_v49  ;;  %v12703_v20 = vadd.f32 %v12631_v18, %v3359_v35 }
 0x2cd   :  { %v12706_v13 = vadd.f32 %v12631_v18, %v3360_v62  ;;  %v12709_v2 = vadd.f32 %v12631_v18, %v3361_v4  ;;  %v12712_v29 = vadd.f32 %v12631_v18, %v3362_v33  ;;  %v12715_v8 = vadd.f32 %v12631_v18, %v3363_v28 }
 0x2ce   :  { %v12718_v59 = vadd.f32 %v12631_v18, %v3364_v42  ;;  %v12721_v15 = vadd.f32 %v12631_v18, %v3365_v23  ;;  %v12724_v51 = vadd.f32 %v12631_v18, %v3366_v7  ;;  %v12727_v12 = vadd.f32 %v12631_v18, %v3367_v22 }
 0x2cf   :  { %v12730_v49 = vadd.f32 %v12631_v18, %v3368_v50  ;;  %v12733_v35 = vadd.f32 %v12631_v18, %v3369_v37  ;;  %v12736_v62 = vadd.f32 %v12631_v18, %v3370_v61  ;;  %v12739_v4 = vadd.f32 %v12631_v18, %v3371_v32  ;;  %v16856_v61 = vld [vmem:[#allocation135_spill] sm:$0xff] }
 0x2d0   :  { %v12743_v33 = vadd.f32 %v12631_v18, %v12590_v6  ;;  %v12747_v38 = vadd.f32 %v12631_v18, %v12593_v63  ;;  %v16847_v28 = vrot.slane %v16798_v60, 2  ;;  %v16848_v55 = vrot.slane %v16793_v26, 2  ;;  %v16857_v32 = vld [vmem:[#allocation55_spill] sm:$0xff] }
 0x2d1   :  { %v3109_v23 = vrot.slane %v16849_v40, 2  ;;  %v3316_v7 = vadd.f32 %v12464_v57, %v16850_v46  ;;  %v12759_v6 = vadd.f32 %v12631_v18, %v12583_v52  ;;  %v3446_v63 = vsel %vm3445_vm3, %v12643_v14, 0.0  ;;  %v5683_v40 = vld [vmem:[%s14611_s0 + $0xd8] sm:$0xff] }
 0x2d2   :  { %16846 = vst [vmem:[#allocation137_spill] sm:$0xff] %v12747_v38  ;;  %v3105_v42 = vsel %vm885_vm2, %v16848_v55, %v16847_v28  ;;  %v3447_v60 = vsel %vm3445_vm3, %v12646_v24, 0.0  ;;  %v3449_v26 = vsel %vm3445_vm3, %v12649_v56, 0.0  ;;  %v16852_v48 = vrot.slane %v12146_v16, 2  ;;  %v16866_v56 = vld [vmem:[#allocation62_spill] sm:$0xff]  ;;  %v16912_v38 = vld [vmem:[#allocation128_spill] sm:$0xff] }
 0x2d3   :  { %16851 = vst [vmem:[#allocation138_spill] sm:$0xff] %v12759_v6  ;;  %v16853_v22 = vrot.slane %v12140_v44, 2  ;;  %v3111_v50 = vrot.slane %v16854_v11, 2  ;;  %v3112_v52 = vrot.slane %v16855_v25, 2  ;;  %v3448_v37 = vadd.f32 %v3447_v60, %v3446_v63  ;;  %v16861_v25 = vld [vmem:[#allocation56_spill] sm:$0xff] }
 0x2d4   :  { %v2914_v41 = vmul.f32 %v12777_v58, %v16856_v61  ;;  %v3317_v28 = vadd.f32 %v3105_v42, %v16857_v32  ;;  %v12784_v44 = vadd.f32 %v12631_v18, %v12587_v45  ;;  %v3451_v55 = vsel %vm3445_vm3, %v12652_v5, 0.0  ;;  %v5684_v45 = vld [vmem:[%s14611_s0 + $0xe0] sm:$0xff] }
 0x2d5   :  { %v3108_v57 = vsel %vm885_vm2, %v16853_v22, %v16852_v48  ;;  %v2915_v46 = vmul.f32 %v5683_v40, %v12777_v58  ;;  %v16859_v63 = vmov %v16852_v48  ;;  %v16860_v48 = vld [vmem:[#allocation38_spill] sm:$0xff]  ;;  %v3450_v42 = vadd.f32 %v3449_v26, %v3448_v37 }
 0x2d6   :  { %16858 = vst [vmem:[#allocation106_spill] sm:$0xff] %v12784_v44  ;;  %v3110_v60 = vsel %vm885_vm2, %v16859_v63, %v3109_v23  ;;  %v3114_v22 = vrot.slane %v16860_v48, 2  ;;  %v2916_v11 = vmul.f32 %v5684_v45, %v12777_v58  ;;  %v3318_v61 = vadd.f32 %v3108_v57, %v16861_v25  ;;  %v16863_v23 = vld [vmem:[#allocation40_spill] sm:$0xff]  ;;  %v16864_v48 = vld [vmem:[#allocation46_spill] sm:$0xff] }
 0x2d7   :  { %v12802_v32 = vadd.f32 %v12631_v18, %v3316_v7  ;;  %v3453_v40 = vsel %vm3445_vm3, %v12759_v6, 0.0  ;;  %v3113_v16 = vsel %vm885_vm2, %v3111_v50, %v3112_v52  ;;  %v3116_v63 = vrot.slane %v16863_v23, 2  ;;  %v5685_v50 = vld [vmem:[%s14611_s0 + $0xf0] sm:$0xff] }
 0x2d8   :  { %v3117_v26 = vrot.slane %v16864_v48, 2  ;;  %v3452_v37 = vadd.f32 %v3451_v55, %v3450_v42  ;;  %v2917_v5 = vmul.f32 %v12777_v58, %v16865_v30  ;;  %v3319_v45 = vadd.f32 %v3110_v60, %v16866_v56  ;;  %v5686_v30 = vld [vmem:[%s14611_s0 + $0xf8] sm:$0xff] }
 0x2d9   :  { %16862 = vst [vmem:[#allocation112_spill] sm:$0xff] %v12802_v32  ;;  %v12813_v57 = vadd.f32 %v12631_v18, %v3317_v28  ;;  %v3455_v7 = vsel %vm3445_vm3, %v12784_v44, 0.0  ;;  %v2918_v25 = vmul.f32 %v5685_v50, %v12777_v58  ;;  %v3115_v23 = vsel %vm885_vm2, %v3112_v52, %v3114_v22  ;;  %v16868_v28 = vld [vmem:[#allocation65_spill] sm:$0xff]  ;;  %v16870_v22 = vld [vmem:[#allocation90_spill] sm:$0xff] }
 0x2da   :  { %v3119_v55 = vrot.slane %v2914_v41, 2  ;;  %v3454_v42 = vadd.f32 %v3453_v40, %v3452_v37  ;;  %v2919_v56 = vmul.f32 %v5686_v30, %v12777_v58  ;;  %v3320_v60 = vadd.f32 %v3113_v16, %v16868_v28  ;;  %v16871_v37 = vld [vmem:[#allocation71_spill] sm:$0xff] }
 0x2db   :  { %16867 = vst [vmem:[#allocation119_spill] sm:$0xff] %v12813_v57  ;;  %v12828_v48 = vadd.f32 %v12631_v18, %v3318_v61  ;;  %v3457_v44 = vsel %vm3445_vm3, %v12802_v32, 0.0  ;;  %v3118_v50 = vsel %vm885_vm2, %v3116_v63, %v3117_v26  ;;  %v3121_v6 = vrot.slane %v2915_v46, 2  ;;  %v5687_v16 = vld [vmem:[%s14611_s0 + $0x108] sm:$0xff] }
 0x2dc   :  { %v3122_v52 = vrot.slane %v2916_v11, 2  ;;  %v3456_v41 = vadd.f32 %v3455_v7, %v3454_v42  ;;  %v2920_v40 = vmul.f32 %v12777_v58, %v16870_v22  ;;  %v3321_v24 = vadd.f32 %v3115_v23, %v16871_v37  ;;  %v5688_v23 = vld [vmem:[%s14611_s0 + $0x110] sm:$0xff]  ;;  %v16873_v42 = vld [vmem:[#allocation107_spill] sm:$0xff] }
 0x2dd   :  { %16869 = vst [vmem:[#allocation145_spill] sm:$0xff] %v12828_v48  ;;  %v12837_v30 = vadd.f32 %v12631_v18, %v3319_v45  ;;  %v3459_v61 = vsel %vm3445_vm3, %v12813_v57, 0.0  ;;  %v2921_v63 = vmul.f32 %v5687_v16, %v12777_v58  ;;  %v3120_v46 = vsel %vm885_vm2, %v3117_v26, %v3119_v55 }
 0x2de   :  { %v3124_v11 = vrot.slane %v2917_v5, 2  ;;  %v3458_v7 = vadd.f32 %v3457_v44, %v3456_v41  ;;  %v2922_v45 = vmul.f32 %v5688_v23, %v12777_v58  ;;  %v3322_v28 = vadd.f32 %v3118_v50, %v16873_v42  ;;  %v16875_v44 = vld [vmem:[#allocation96_spill] sm:$0xff]  ;;  %v5689_v50 = vld [vmem:[%s14611_s0 + $0x120] sm:$0xff] }
 0x2df   :  { %16872 = vst [vmem:[#allocation33_spill] sm:$0xff] %v12837_v30  ;;  %v12852_v22 = vadd.f32 %v12631_v18, %v3320_v60  ;;  %v3461_v37 = vsel %vm3445_vm3, %v12828_v48, 0.0  ;;  %v3123_v16 = vsel %vm885_vm2, %v3121_v6, %v3122_v52  ;;  %v3126_v57 = vrot.slane %v2918_v25, 2  ;;  %v16876_v41 = vld [vmem:[#allocation108_spill] sm:$0xff] }
 0x2e0   :  { %v3127_v26 = vrot.slane %v2919_v56, 2  ;;  %v3460_v5 = vadd.f32 %v3459_v61, %v3458_v7  ;;  %v2923_v55 = vmul.f32 %v12777_v58, %v16875_v44  ;;  %v3323_v32 = vadd.f32 %v3120_v46, %v16876_v41  ;;  %v5690_v46 = vld [vmem:[%s14611_s0 + $0x128] sm:$0xff]  ;;  %v16878_v7 = vld [vmem:[#allocation109_spill] sm:$0xff] }
 0x2e1   :  { %16874 = vst [vmem:[#allocation92_spill] sm:$0xff] %v12852_v22  ;;  %v12861_v23 = vadd.f32 %v12631_v18, %v3321_v24  ;;  %v3463_v60 = vsel %vm3445_vm3, %v12837_v30, 0.0  ;;  %v2924_v6 = vmul.f32 %v5689_v50, %v12777_v58  ;;  %v3125_v25 = vsel %vm885_vm2, %v3122_v52, %v3124_v11  ;;  %v16880_v11 = vld [vmem:[#allocation97_spill] sm:$0xff] }
 0x2e2   :  { %v3129_v56 = vrot.slane %v2920_v40, 2  ;;  %v3462_v61 = vadd.f32 %v3461_v37, %v3460_v5  ;;  %v2925_v24 = vmul.f32 %v5690_v46, %v12777_v58  ;;  %v3324_v42 = vadd.f32 %v3123_v16, %v16878_v7  ;;  %v16881_v5 = vld [vmem:[#allocation110_spill] sm:$0xff]  ;;  %v5691_v16 = vld [vmem:[%s14611_s0 + $0x138] sm:$0xff] }
 0x2e3   :  { %16877 = vst [vmem:[#allocation19_spill] sm:$0xff] %v12861_v23  ;;  %v12876_v44 = vadd.f32 %v12631_v18, %v3322_v28  ;;  %v3465_v41 = vsel %vm3445_vm3, %v12852_v22, 0.0  ;;  %v3128_v50 = vsel %vm885_vm2, %v3126_v57, %v3127_v26  ;;  %v3131_v30 = vrot.slane %v2921_v63, 2 }
 0x2e4   :  { %v3132_v52 = vrot.slane %v2922_v45, 2  ;;  %v3464_v40 = vadd.f32 %v3463_v60, %v3462_v61  ;;  %v2926_v37 = vmul.f32 %v12777_v58, %v16880_v11  ;;  %v3325_v48 = vadd.f32 %v3125_v25, %v16881_v5  ;;  %v5692_v25 = vld [vmem:[%s14611_s0 + $0x140] sm:$0xff] }
 0x2e5   :  { %16879 = vst [vmem:[#allocation102_spill] sm:$0xff] %v12876_v44  ;;  %v12885_v46 = vadd.f32 %v12631_v18, %v3323_v32  ;;  %v3467_v28 = vsel %vm3445_vm3, %v12861_v23, 0.0  ;;  %v2927_v57 = vmul.f32 %v5691_v16, %v12777_v58  ;;  %v3130_v63 = vsel %vm885_vm2, %v3127_v26, %v3129_v56  ;;  %v16883_v61 = vld [vmem:[#allocation114_spill] sm:$0xff]  ;;  %v16885_v56 = vld [vmem:[#allocation140_spill] sm:$0xff] }
 0x2e6   :  { %v3134_v45 = vrot.slane %v2923_v55, 2  ;;  %v3466_v60 = vadd.f32 %v3465_v41, %v3464_v40  ;;  %v2928_v32 = vmul.f32 %v5692_v25, %v12777_v58  ;;  %v3326_v7 = vadd.f32 %v3128_v50, %v16883_v61  ;;  %v16886_v40 = vld [vmem:[#allocation115_spill] sm:$0xff]  ;;  %v5693_v50 = vld [vmem:[%s14611_s0 + $0x150] sm:$0xff] }
 0x2e7   :  { %16882 = vst [vmem:[#allocation100_spill] sm:$0xff] %v12885_v46  ;;  %v12900_v11 = vadd.f32 %v12631_v18, %v3324_v42  ;;  %v3469_v5 = vsel %vm3445_vm3, %v12876_v44, 0.0  ;;  %v3133_v16 = vsel %vm885_vm2, %v3131_v30, %v3132_v52  ;;  %v3136_v23 = vrot.slane %v2924_v6, 2 }
 0x2e8   :  { %v3137_v26 = vrot.slane %v2925_v24, 2  ;;  %v3468_v55 = vadd.f32 %v3467_v28, %v3466_v60  ;;  %v2929_v41 = vmul.f32 %v12777_v58, %v16885_v56  ;;  %v3327_v22 = vadd.f32 %v3130_v63, %v16886_v40  ;;  %v5694_v63 = vld [vmem:[%s14611_s0 + $0x158] sm:$0xff]  ;;  %v16888_v60 = vld [vmem:[#allocation116_spill] sm:$0xff] }
 0x2e9   :  { %16884 = vst [vmem:[#allocation36_spill] sm:$0xff] %v12900_v11  ;;  %v12909_v25 = vadd.f32 %v12631_v18, %v3325_v48  ;;  %v3471_v42 = vsel %vm3445_vm3, %v12885_v46, 0.0  ;;  %v2930_v30 = vmul.f32 %v5693_v50, %v12777_v58  ;;  %v3135_v6 = vsel %vm885_vm2, %v3132_v52, %v3134_v45  ;;  %v16890_v45 = vld [vmem:[#allocation141_spill] sm:$0xff] }
 0x2ea   :  { %v3139_v24 = vrot.slane %v2926_v37, 2  ;;  %v3470_v28 = vadd.f32 %v3469_v5, %v3468_v55  ;;  %v2931_v48 = vmul.f32 %v5694_v63, %v12777_v58  ;;  %v3328_v61 = vadd.f32 %v3133_v16, %v16888_v60  ;;  %v16891_v55 = vld [vmem:[#allocation121_spill] sm:$0xff]  ;;  %v5695_v16 = vld [vmem:[%s14611_s0 + $0x168] sm:$0xff] }
 0x2eb   :  { %16887 = vst [vmem:[#allocation43_spill] sm:$0xff] %v12909_v25  ;;  %v12924_v56 = vadd.f32 %v12631_v18, %v3326_v7  ;;  %v3473_v40 = vsel %vm3445_vm3, %v12900_v11, 0.0  ;;  %v3138_v50 = vsel %vm885_vm2, %v3136_v23, %v3137_v26  ;;  %v3141_v46 = vrot.slane %v2927_v57, 2 }
 0x2ec   :  { %v3142_v52 = vrot.slane %v2928_v32, 2  ;;  %v3472_v37 = vadd.f32 %v3471_v42, %v3470_v28  ;;  %v2932_v5 = vmul.f32 %v12777_v58, %v16890_v45  ;;  %v3329_v44 = vadd.f32 %v3135_v6, %v16891_v55  ;;  %v5696_v6 = vld [vmem:[%s14611_s0 + $0x170] sm:$0xff]  ;;  %v16893_v28 = vld [vmem:[#allocation122_spill] sm:$0xff] }
 0x2ed   :  { %16889 = vst [vmem:[#allocation45_spill] sm:$0xff] %v12924_v56  ;;  %v12933_v63 = vadd.f32 %v12631_v18, %v3327_v22  ;;  %v3475_v7 = vsel %vm3445_vm3, %v12909_v25, 0.0  ;;  %v2933_v23 = vmul.f32 %v5695_v16, %v12777_v58  ;;  %v3140_v57 = vsel %vm885_vm2, %v3137_v26, %v3139_v24  ;;  %v16895_v24 = vld [vmem:[#allocation118_spill] sm:$0xff] }
 0x2ee   :  { %v3144_v32 = vrot.slane %v2929_v41, 2  ;;  %v3474_v42 = vadd.f32 %v3473_v40, %v3472_v37  ;;  %v2934_v22 = vmul.f32 %v5696_v6, %v12777_v58  ;;  %v3330_v60 = vadd.f32 %v3138_v50, %v16893_v28  ;;  %v16896_v37 = vld [vmem:[#allocation165_spill] sm:$0xff]  ;;  %v5697_v50 = vld [vmem:[%s14611_s0 + $0x180] sm:$0xff] }
 0x2ef   :  { %16892 = vst [vmem:[#allocation51_spill] sm:$0xff] %v12933_v63  ;;  %v12948_v45 = vadd.f32 %v12631_v18, %v3328_v61  ;;  %v3477_v55 = vsel %vm3445_vm3, %v12924_v56, 0.0  ;;  %v3143_v16 = vsel %vm885_vm2, %v3141_v46, %v3142_v52  ;;  %v3146_v25 = vrot.slane %v2930_v30, 2 }
 0x2f0   :  { %v3147_v26 = vrot.slane %v2931_v48, 2  ;;  %v3476_v41 = vadd.f32 %v3475_v7, %v3474_v42  ;;  %v2935_v40 = vmul.f32 %v12777_v58, %v16895_v24  ;;  %v3331_v11 = vadd.f32 %v3140_v57, %v16896_v37  ;;  %v5698_v57 = vld [vmem:[%s14611_s0 + $0x188] sm:$0xff]  ;;  %v16898_v42 = vld [vmem:[#allocation166_spill] sm:$0xff] }
 0x2f1   :  { %16894 = vst [vmem:[#allocation53_spill] sm:$0xff] %v12948_v45  ;;  %v12957_v6 = vadd.f32 %v12631_v18, %v3329_v44  ;;  %v3479_v61 = vsel %vm3445_vm3, %v12933_v63, 0.0  ;;  %v2936_v46 = vmul.f32 %v5697_v50, %v12777_v58  ;;  %v3145_v30 = vsel %vm885_vm2, %v3142_v52, %v3144_v32  ;;  %v16900_v32 = vld [vmem:[#allocation120_spill] sm:$0xff] }
 0x2f2   :  { %v3149_v48 = vrot.slane %v2932_v5, 2  ;;  %v3478_v7 = vadd.f32 %v3477_v55, %v3476_v41  ;;  %v2937_v44 = vmul.f32 %v5698_v57, %v12777_v58  ;;  %v3332_v28 = vadd.f32 %v3143_v16, %v16898_v42  ;;  %v16901_v41 = vld [vmem:[#allocation123_spill] sm:$0xff]  ;;  %v5699_v16 = vld [vmem:[%s14611_s0 + $0x198] sm:$0xff] }
 0x2f3   :  { %16897 = vst [vmem:[#allocation127_spill] sm:$0xff] %v12957_v6  ;;  %v12972_v24 = vadd.f32 %v12631_v18, %v3330_v60  ;;  %v3481_v37 = vsel %vm3445_vm3, %v12948_v45, 0.0  ;;  %v3148_v50 = vsel %vm885_vm2, %v3146_v25, %v3147_v26  ;;  %v3151_v63 = vrot.slane %v2933_v23, 2  ;;  %v16907_v45 = vld [vmem:[#allocation170_spill] sm:$0xff] }
 0x2f4   :  { %v3152_v52 = vrot.slane %v2934_v22, 2  ;;  %v3480_v5 = vadd.f32 %v3479_v61, %v3478_v7  ;;  %v2938_v55 = vmul.f32 %v12777_v58, %v16900_v32  ;;  %v3333_v56 = vadd.f32 %v3145_v30, %v16901_v41  ;;  %v5700_v30 = vld [vmem:[%s14611_s0 + $0x1a0] sm:$0xff]  ;;  %v16903_v7 = vld [vmem:[#allocation168_spill] sm:$0xff] }
 0x2f5   :  { %16899 = vst [vmem:[#allocation22_spill] sm:$0xff] %v12972_v24  ;;  %v12981_v57 = vadd.f32 %v12631_v18, %v3331_v11  ;;  %v3483_v60 = vsel %vm3445_vm3, %v12957_v6, 0.0  ;;  %v2939_v25 = vmul.f32 %v5699_v16, %v12777_v58  ;;  %v3150_v23 = vsel %vm885_vm2, %v3147_v26, %v3149_v48  ;;  %v16905_v48 = vld [vmem:[#allocation14_spill] sm:$0xff] }
 0x2f6   :  { %v3154_v22 = vrot.slane %v2935_v40, 2  ;;  %v3482_v61 = vadd.f32 %v3481_v37, %v3480_v5  ;;  %v2940_v11 = vmul.f32 %v5700_v30, %v12777_v58  ;;  %v3334_v42 = vadd.f32 %v3148_v50, %v16903_v7  ;;  %v16906_v37 = vld [vmem:[#allocation99_spill] sm:$0xff]  ;;  %v16909_v50 = vld [vmem:[#allocation105_spill] sm:$0xff] }
 0x2f7   :  { %16902 = vst [vmem:[#allocation153_spill] sm:$0xff] %v12981_v57  ;;  %v12996_v32 = vadd.f32 %v12631_v18, %v3332_v28  ;;  %v3485_v41 = vsel %vm3445_vm3, %v12972_v24, 0.0  ;;  %v3153_v16 = vsel %vm885_vm2, %v3151_v63, %v3152_v52  ;;  %v3156_v6 = vrot.slane %v2936_v46, 2 }
 0x2f8   :  { %v3157_v26 = vrot.slane %v2937_v44, 2  ;;  %v3484_v40 = vadd.f32 %v3483_v60, %v3482_v61  ;;  %v2854_v5 = vadd.f32 %v16906_v37, %v16905_v48  ;;  %v3335_v14 = vadd.f32 %v3150_v23, %v16907_v45  ;;  %v16910_v44 = vld [vmem:[#allocation67_spill] sm:$0xff]  ;;  %v16911_v61 = vld [vmem:[#allocation124_spill] sm:$0xff] }
 0x2f9   :  { %16904 = vst [vmem:[#allocation154_spill] sm:$0xff] %v12996_v32  ;;  %v13005_v30 = vadd.f32 %v12631_v18, %v3333_v56  ;;  %v3487_v28 = vsel %vm3445_vm3, %v12981_v57, 0.0  ;;  %v2941_v7 = vmul.f32 %v12777_v58, %v16909_v50  ;;  %v3155_v24 = vsel %vm885_vm2, %v3152_v52, %v3154_v22  ;;  %v16913_v52 = vld [vmem:[#allocation26_spill] sm:$0xff]  ;;  %v16914_v22 = vld [vmem:[#allocation117_spill] sm:$0xff] }
 0x2fa   :  { %v3159_v63 = vrot.slane %v2938_v55, 2  ;;  %v3486_v46 = vadd.f32 %v3485_v41, %v3484_v40  ;;  %v2942_v60 = vmul.f32 %v12777_v58, %v16910_v44  ;;  %v3336_v48 = vadd.f32 %v3153_v16, %v16911_v61  ;;  %v16915_v16 = vld [vmem:[#allocation68_spill] sm:$0xff] }
 0x2fb   :  { %16908 = vst [vmem:[#allocation129_spill] sm:$0xff] %v13005_v30  ;;  %v13016_v45 = vadd.f32 %v12631_v18, %v3334_v42  ;;  %v3489_v56 = vsel %vm3445_vm3, %v12996_v32, 0.0  ;;  %v3158_v23 = vsel %vm885_vm2, %v3156_v6, %v3157_v26  ;;  %v3161_v37 = vrot.slane %v2939_v25, 2  ;;  %v16917_v44 = vld [vmem:[#allocation144_spill] sm:$0xff]  ;;  %v16923_v32 = vld [vmem:[#allocation21_spill] sm:$0xff] }
 0x2fc   :  { %v3162_v57 = vrot.slane %v2940_v11, 2  ;;  %v3488_v50 = vadd.f32 %v3487_v28, %v3486_v46  ;;  %v2855_v55 = vadd.f32 %v16913_v52, %v16912_v38  ;;  %v3337_v41 = vadd.f32 %v3155_v24, %v16914_v22  ;;  %v16919_v46 = vld [vmem:[#allocation11_spill] sm:$0xff] }
 0x2fd   :  { %v13025_v58 = vadd.f32 %v12631_v18, %v3335_v14  ;;  %v3491_v42 = vsel %vm3445_vm3, %v13005_v30, 0.0  ;;  %v16916_v40 = vrot.slane %v16915_v16, 1  ;;  %v16918_v61 = vrot.slane %v16917_v44, 1  ;;  %v16920_v38 = vld [vmem:[#allocation27_spill] sm:$0xff] }
 0x2fe   :  { %v3160_v25 = vsel %vm885_vm2, %v3157_v26, %v3159_v63  ;;  %v3164_v11 = vrot.slane %v2941_v7, 2  ;;  %v3490_v28 = vadd.f32 %v3489_v56, %v3488_v50  ;;  %v2856_v52 = vadd.f32 %v16920_v38, %v16919_v46  ;;  %v16921_v30 = vld [vmem:[#allocation155_spill] sm:$0xff]  ;;  %v16926_v46 = vld [vmem:[#allocation152_spill] sm:$0xff] }
 0x2ff   :  { %v2681_v6 = vsel %vm400_vm1, %v16918_v61, %v16916_v40  ;;  %v3338_v24 = vadd.f32 %v3158_v23, %v2854_v5  ;;  %v13038_v14 = vadd.f32 %v12631_v18, %v3336_v48  ;;  %v3493_v22 = vsel %vm3445_vm3, %v13016_v45, 0.0  ;;  %v16925_v56 = vld [vmem:[#allocation15_spill] sm:$0xff] }
 0x300   :  { %v16922_v16 = vrot.slane %v16921_v30, 1  ;;  %v16924_v44 = vrot.slane %v16923_v32, 1  ;;  %v3163_v26 = vsel %vm885_vm2, %v3161_v37, %v3162_v57  ;;  %v3166_v7 = vrot.slane %v2942_v60, 2 }
 0x301   :  { %v3492_v63 = vadd.f32 %v3491_v42, %v3490_v28  ;;  %v2857_v50 = vadd.f32 %v2681_v6, %v16925_v56  ;;  %v3339_v61 = vadd.f32 %v3160_v25, %v2855_v55  ;;  %v13050_v5 = vadd.f32 %v12631_v18, %v3337_v41 }
 0x302   :  { %v2684_v40 = vsel %vm400_vm1, %v16924_v44, %v16922_v16  ;;  %v3495_v48 = vsel %vm3445_vm3, %v13025_v58, 0.0  ;;  %v3165_v23 = vsel %vm885_vm2, %v3162_v57, %v3164_v11  ;;  %v3340_v38 = vadd.f32 %v3163_v26, %v2856_v52 }
 0x303   :  { %v3494_v30 = vadd.f32 %v3493_v22, %v3492_v63  ;;  %v2858_v32 = vadd.f32 %v2684_v40, %v16926_v46  ;;  %v13057_v16 = vadd.f32 %v12631_v18, %v3338_v24  ;;  %v3497_v60 = vsel %vm3445_vm3, %v13038_v14, 0.0 }
 0x304   :  { %v16927_v37 = vrot.slane %v12184_v27, 2  ;;  %v3341_v42 = vadd.f32 %v3165_v23, %v2857_v50  ;;  %v13065_v6 = vadd.f32 %v12631_v18, %v3339_v61  ;;  %v3499_v57 = vsel %vm3445_vm3, %v13050_v5, 0.0 }
 0x305   :  { %v3496_v41 = vadd.f32 %v3495_v48, %v3494_v30  ;;  %v13070_v28 = vadd.f32 %v12631_v18, %v3340_v38  ;;  %v3501_v52 = vsel %vm3445_vm3, %v13057_v16, 0.0  ;;  %v3511_v48 = vsel %vm3445_vm3, %v12655_v31, 0.0 }
 0x306   :  { %v3168_v55 = vsel %vm885_vm2, %v3166_v7, %v16927_v37  ;;  %v13075_v27 = vadd.f32 %v12631_v18, %v3341_v42  ;;  %v3503_v22 = vsel %vm3445_vm3, %v13065_v6, 0.0  ;;  %v3515_v46 = vsel %vm3445_vm3, %v12661_v34, 0.0 }
 0x307   :  { %v3498_v25 = vadd.f32 %v3497_v60, %v3496_v41  ;;  %v3342_v11 = vadd.f32 %v3168_v55, %v2858_v32  ;;  %v3505_v26 = vsel %vm3445_vm3, %v13070_v28, 0.0  ;;  %v3517_v38 = vsel %vm3445_vm3, %v12664_v19, 0.0 }
 0x308   :  { %v3507_v63 = vsel %vm3445_vm3, %v13075_v27, 0.0  ;;  %v3519_v37 = vsel %vm3445_vm3, %v12667_v36, 0.0  ;;  %v3521_v41 = vsel %vm3445_vm3, %v12670_v21, 0.0 }
 0x309   :  { %v3500_v24 = vadd.f32 %v3499_v57, %v3498_v25  ;;  %v13080_v40 = vadd.f32 %v12631_v18, %v3342_v11  ;;  %v3513_v18 = vsel %vm3445_vm3, %v12658_v3, 0.0  ;;  %v3523_v57 = vsel %vm3445_vm3, %v12673_v0, 0.0 }
 0x30a   :  { %v3525_v11 = vsel %vm3445_vm3, %v12676_v9, 0.0 }
 0x30b   :  { %v3502_v44 = vadd.f32 %v3501_v52, %v3500_v24  ;;  %v3509_v50 = vsel %vm3445_vm3, %v13080_v40, 0.0  ;;  %v3527_v24 = vsel %vm3445_vm3, %v12679_v17, 0.0 }
 0x30d   :  { %v3504_v7 = vadd.f32 %v3503_v22, %v3502_v44  ;;  %v3529_v44 = vsel %vm3445_vm3, %v12682_v1, 0.0 }
 0x30f   :  { %v3506_v56 = vadd.f32 %v3505_v26, %v3504_v7  ;;  %v3531_v7 = vsel %vm3445_vm3, %v12685_v39, 0.0 }
 0x311   :  { %v3508_v61 = vadd.f32 %v3507_v63, %v3506_v56  ;;  %v3533_v56 = vsel %vm3445_vm3, %v12688_v54, 0.0 }
 0x313   :  { %v3510_v23 = vadd.f32 %v3509_v50, %v3508_v61  ;;  %v3535_v61 = vsel %vm3445_vm3, %v12691_v10, 0.0 }
 0x315   :  { %v3512_v30 = vadd.f32 %v3511_v48, %v3510_v23  ;;  %v3537_v23 = vsel %vm3445_vm3, %v12694_v47, 0.0 }
 0x317   :  { %v3514_v32 = vadd.f32 %v3513_v18, %v3512_v30  ;;  %v3539_v30 = vsel %vm3445_vm3, %v12697_v43, 0.0 }
 0x319   :  { %v3516_v60 = vadd.f32 %v3515_v46, %v3514_v32  ;;  %v3541_v32 = vsel %vm3445_vm3, %v12700_v53, 0.0 }
 0x31b   :  { %v3518_v55 = vadd.f32 %v3517_v38, %v3516_v60  ;;  %v3543_v60 = vsel %vm3445_vm3, %v12703_v20, 0.0 }
 0x31d   :  { %v3520_v42 = vadd.f32 %v3519_v37, %v3518_v55  ;;  %v3545_v55 = vsel %vm3445_vm3, %v12706_v13, 0.0 }
 0x31f   :  { %v3522_v25 = vadd.f32 %v3521_v41, %v3520_v42  ;;  %v3547_v42 = vsel %vm3445_vm3, %v12709_v2, 0.0 }
 0x321   :  { %v3524_v52 = vadd.f32 %v3523_v57, %v3522_v25  ;;  %v3549_v25 = vsel %vm3445_vm3, %v12712_v29, 0.0 }
 0x323   :  { %v3526_v22 = vadd.f32 %v3525_v11, %v3524_v52  ;;  %v3551_v52 = vsel %vm3445_vm3, %v12715_v8, 0.0 }
 0x325   :  { %v3528_v26 = vadd.f32 %v3527_v24, %v3526_v22  ;;  %v3553_v22 = vsel %vm3445_vm3, %v12718_v59, 0.0 }
 0x327   :  { %v3530_v63 = vadd.f32 %v3529_v44, %v3528_v26  ;;  %v3555_v26 = vsel %vm3445_vm3, %v12721_v15, 0.0 }
 0x329   :  { %v3532_v50 = vadd.f32 %v3531_v7, %v3530_v63  ;;  %v3557_v63 = vsel %vm3445_vm3, %v12724_v51, 0.0 }
 0x32b   :  { %v3534_v48 = vadd.f32 %v3533_v56, %v3532_v50  ;;  %v3559_v50 = vsel %vm3445_vm3, %v12727_v12, 0.0 }
 0x32d   :  { %v3536_v18 = vadd.f32 %v3535_v61, %v3534_v48  ;;  %v3561_v48 = vsel %vm3445_vm3, %v12730_v49, 0.0 }
 0x32f   :  { %v3538_v46 = vadd.f32 %v3537_v23, %v3536_v18  ;;  %v3563_v18 = vsel %vm3445_vm3, %v12733_v35, 0.0 }
 0x331   :  { %v3540_v38 = vadd.f32 %v3539_v30, %v3538_v46 }
 0x333   :  { %v3542_v37 = vadd.f32 %v3541_v32, %v3540_v38  ;;  %v3565_v32 = vsel %vm3445_vm3, %v12736_v62, 0.0 }
 0x335   :  { %v3544_v41 = vadd.f32 %v3543_v60, %v3542_v37  ;;  %v3567_v60 = vsel %vm3445_vm3, %v12739_v4, 0.0 }
 0x337   :  { %v3546_v57 = vadd.f32 %v3545_v55, %v3544_v41  ;;  %v3569_v55 = vsel %vm3445_vm3, %v12743_v33, 0.0 }
 0x339   :  { %v3548_v11 = vadd.f32 %v3547_v42, %v3546_v57  ;;  %v16928_v42 = vld [vmem:[#allocation137_spill] sm:$0xff] }
 0x33a   :  { %v3571_v57 = vsel %vm3445_vm3, %v16928_v42, 0.0 }
 0x33b   :  { %v3550_v24 = vadd.f32 %v3549_v25, %v3548_v11 }
 0x33d   :  { %v3552_v44 = vadd.f32 %v3551_v52, %v3550_v24 }
 0x33f   :  { %v3554_v7 = vadd.f32 %v3553_v22, %v3552_v44 }
 0x341   :  { %v3556_v56 = vadd.f32 %v3555_v26, %v3554_v7 }
 0x343   :  { %v3558_v61 = vadd.f32 %v3557_v63, %v3556_v56  ;;  %v16929_v63 = vld [vmem:[#allocation86_spill] sm:$0xff] }
 0x345   :  { %v3560_v23 = vadd.f32 %v3559_v50, %v3558_v61  ;;  %v16930_v50 = vld [vmem:[#allocation87_spill] sm:$0xff] }
 0x347   :  { %v3562_v30 = vadd.f32 %v3561_v48, %v3560_v23  ;;  %v16931_v48 = vld [vmem:[#allocation88_spill] sm:$0xff] }
 0x349   :  { %v3564_v46 = vadd.f32 %v3563_v18, %v3562_v30  ;;  %v16932_v18 = vld [vmem:[#allocation89_spill] sm:$0xff] }
 0x34b   :  { %v3566_v38 = vadd.f32 %v3565_v32, %v3564_v46  ;;  %v16933_v46 = vld [vmem:[#allocation138_spill] sm:$0xff] }
 0x34d   :  { %v3568_v37 = vadd.f32 %v3567_v60, %v3566_v38 }
 0x34f   :  { %v3570_v41 = vadd.f32 %v3569_v55, %v3568_v37  ;;  %v16934_v55 = vld [vmem:[#allocation106_spill] sm:$0xff] }
 0x351   :  { %v3572_v25 = vadd.f32 %v3571_v57, %v3570_v41 }
 0x353   :  { %v3573_v11 = vrot.slane %v3572_v25, 4 }
 0x355   :  { %v3574_v52 = vadd.f32 %v3573_v11, %v3572_v25  ;;  %v16935_v25 = vld [vmem:[#allocation112_spill] sm:$0xff] }
 0x357   :  { %v3575_v24 = vrot.slane %v3574_v52, 2 }
 0x359   :  { %v3576_v22 = vadd.f32 %v3575_v24, %v3574_v52 }
 0x35b   :  { %v3577_v44 = vrot.slane %v3576_v22, 1 }
 0x35d   :  { %v3578_v26 = vadd.f32 %v3577_v44, %v3576_v22 }
 0x35f   :  { %v13150_v7 = vmul.f32 0.001953125, %v3578_v26 }
 0x361   :  { %v13154_v56 = vsub.f32 %v16929_v63, %v13150_v7  ;;  %v13158_v61 = vsub.f32 %v16930_v50, %v13150_v7  ;;  %v13162_v23 = vsub.f32 %v16931_v48, %v13150_v7  ;;  %v13166_v30 = vsub.f32 %v16932_v18, %v13150_v7  ;;  %v16937_v63 = vld [vmem:[#allocation119_spill] sm:$0xff] }
 0x362   :  { %v13170_v32 = vsub.f32 %v16933_v46, %v13150_v7  ;;  %v13180_v41 = vsub.f32 %v16934_v55, %v13150_v7  ;;  %v13186_v11 = vsub.f32 %v16935_v25, %v13150_v7  ;;  %v13195_v50 = vsub.f32 %v16937_v63, %v13150_v7  ;;  %v16939_v55 = vld [vmem:[#allocation145_spill] sm:$0xff] }
 0x363   :  { %v3644_v38 = vmul.f32 %v13154_v56, %v13154_v56  ;;  %v3645_v60 = vmul.f32 %v13158_v61, %v13158_v61  ;;  %v3646_v37 = vmul.f32 %v13162_v23, %v13162_v23  ;;  %v3647_v57 = vmul.f32 %v13166_v30, %v13166_v30 }
 0x364   :  { %16936 = vst [vmem:[#allocation23_spill] sm:$0xff] %v13186_v11  ;;  %v3648_v52 = vmul.f32 %v13170_v32, %v13170_v32  ;;  %16938 = vst [vmem:[#allocation147_spill] sm:$0xff] %v13195_v50  ;;  %v3649_v48 = vmul.f32 %v13180_v41, %v13180_v41  ;;  %v13202_v25 = vsub.f32 %v16939_v55, %v13150_v7 }
 0x365   :  { %v3708_v24 = vsel %vm3445_vm3, %v3644_v38, 0.0  ;;  %v3709_v22 = vsel %vm3445_vm3, %v3645_v60, 0.0  ;;  %v3711_v44 = vsel %vm3445_vm3, %v3646_v37, 0.0  ;;  %v3713_v18 = vsel %vm3445_vm3, %v3647_v57, 0.0 }
 0x366   :  { %v3710_v26 = vadd.f32 %v3709_v22, %v3708_v24  ;;  %16940 = vst [vmem:[#allocation24_spill] sm:$0xff] %v13202_v25  ;;  %v3650_v38 = vmul.f32 %v13186_v11, %v13186_v11  ;;  %v3715_v60 = vsel %vm3445_vm3, %v3648_v52, 0.0  ;;  %v16941_v24 = vld [vmem:[#allocation33_spill] sm:$0xff]  ;;  %v3651_v63 = vmul.f32 %v13195_v50, %v13195_v50 }
 0x367   :  { %v13209_v22 = vsub.f32 %v16941_v24, %v13150_v7  ;;  %v3717_v57 = vsel %vm3445_vm3, %v3649_v48, 0.0  ;;  %v3652_v11 = vmul.f32 %v13202_v25, %v13202_v25 }
 0x368   :  { %v3712_v46 = vadd.f32 %v3711_v44, %v3710_v26  ;;  %v16943_v26 = vld [vmem:[#allocation92_spill] sm:$0xff]  ;;  %v3719_v52 = vsel %vm3445_vm3, %v3650_v38, 0.0  ;;  %v3721_v48 = vsel %vm3445_vm3, %v3651_v63, 0.0 }
 0x369   :  { %16942 = vst [vmem:[#allocation148_spill] sm:$0xff] %v13209_v22  ;;  %v13216_v55 = vsub.f32 %v16943_v26, %v13150_v7  ;;  %v3653_v50 = vmul.f32 %v13209_v22, %v13209_v22  ;;  %v3723_v38 = vsel %vm3445_vm3, %v3652_v11, 0.0 }
 0x36a   :  { %v3714_v37 = vadd.f32 %v3713_v18, %v3712_v46  ;;  %v16945_v46 = vld [vmem:[#allocation19_spill] sm:$0xff] }
 0x36b   :  { %16944 = vst [vmem:[#allocation30_spill] sm:$0xff] %v13216_v55  ;;  %v13223_v24 = vsub.f32 %v16945_v46, %v13150_v7  ;;  %v3654_v25 = vmul.f32 %v13216_v55, %v13216_v55  ;;  %v3725_v63 = vsel %vm3445_vm3, %v3653_v50, 0.0 }
 0x36c   :  { %v3716_v44 = vadd.f32 %v3715_v60, %v3714_v37  ;;  %v16947_v37 = vld [vmem:[#allocation102_spill] sm:$0xff] }
 0x36d   :  { %16946 = vst [vmem:[#allocation149_spill] sm:$0xff] %v13223_v24  ;;  %v13230_v26 = vsub.f32 %v16947_v37, %v13150_v7  ;;  %v3655_v22 = vmul.f32 %v13223_v24, %v13223_v24  ;;  %v3727_v11 = vsel %vm3445_vm3, %v3654_v25, 0.0 }
 0x36e   :  { %v3718_v18 = vadd.f32 %v3717_v57, %v3716_v44  ;;  %v16949_v44 = vld [vmem:[#allocation100_spill] sm:$0xff] }
 0x36f   :  { %16948 = vst [vmem:[#allocation31_spill] sm:$0xff] %v13230_v26  ;;  %v13237_v46 = vsub.f32 %v16949_v44, %v13150_v7  ;;  %v3656_v55 = vmul.f32 %v13230_v26, %v13230_v26  ;;  %v3729_v50 = vsel %vm3445_vm3, %v3655_v22, 0.0 }
 0x370   :  { %v3720_v60 = vadd.f32 %v3719_v52, %v3718_v18  ;;  %v16951_v18 = vld [vmem:[#allocation36_spill] sm:$0xff] }
 0x371   :  { %16950 = vst [vmem:[#allocation150_spill] sm:$0xff] %v13237_v46  ;;  %v13244_v37 = vsub.f32 %v16951_v18, %v13150_v7  ;;  %v3657_v24 = vmul.f32 %v13237_v46, %v13237_v46  ;;  %v3731_v25 = vsel %vm3445_vm3, %v3656_v55, 0.0 }
 0x372   :  { %v3722_v57 = vadd.f32 %v3721_v48, %v3720_v60  ;;  %v16953_v60 = vld [vmem:[#allocation43_spill] sm:$0xff] }
 0x373   :  { %16952 = vst [vmem:[#allocation32_spill] sm:$0xff] %v13244_v37  ;;  %v13251_v44 = vsub.f32 %v16953_v60, %v13150_v7  ;;  %v3658_v26 = vmul.f32 %v13244_v37, %v13244_v37  ;;  %v3733_v22 = vsel %vm3445_vm3, %v3657_v24, 0.0 }
 0x374   :  { %v3724_v52 = vadd.f32 %v3723_v38, %v3722_v57  ;;  %v16955_v57 = vld [vmem:[#allocation45_spill] sm:$0xff] }
 0x375   :  { %16954 = vst [vmem:[#allocation151_spill] sm:$0xff] %v13251_v44  ;;  %v13258_v18 = vsub.f32 %v16955_v57, %v13150_v7  ;;  %v3659_v46 = vmul.f32 %v13251_v44, %v13251_v44  ;;  %v3735_v55 = vsel %vm3445_vm3, %v3658_v26, 0.0 }
 0x376   :  { %v3726_v48 = vadd.f32 %v3725_v63, %v3724_v52  ;;  %v16957_v52 = vld [vmem:[#allocation51_spill] sm:$0xff] }
 0x377   :  { %16956 = vst [vmem:[#allocation101_spill] sm:$0xff] %v13258_v18  ;;  %v13265_v60 = vsub.f32 %v16957_v52, %v13150_v7  ;;  %v3660_v37 = vmul.f32 %v13258_v18, %v13258_v18  ;;  %v3737_v24 = vsel %vm3445_vm3, %v3659_v46, 0.0 }
 0x378   :  { %v3728_v38 = vadd.f32 %v3727_v11, %v3726_v48  ;;  %v16959_v48 = vld [vmem:[#allocation53_spill] sm:$0xff] }
 0x379   :  { %16958 = vst [vmem:[#allocation6_spill] sm:$0xff] %v13265_v60  ;;  %v13272_v57 = vsub.f32 %v16959_v48, %v13150_v7  ;;  %v3661_v44 = vmul.f32 %v13265_v60, %v13265_v60  ;;  %v3739_v26 = vsel %vm3445_vm3, %v3660_v37, 0.0 }
 0x37a   :  { %v3730_v63 = vadd.f32 %v3729_v50, %v3728_v38  ;;  %v16961_v38 = vld [vmem:[#allocation127_spill] sm:$0xff] }
 0x37b   :  { %16960 = vst [vmem:[#allocation64_spill] sm:$0xff] %v13272_v57  ;;  %v13279_v52 = vsub.f32 %v16961_v38, %v13150_v7  ;;  %v3662_v18 = vmul.f32 %v13272_v57, %v13272_v57  ;;  %v3741_v46 = vsel %vm3445_vm3, %v3661_v44, 0.0 }
 0x37c   :  { %v3732_v11 = vadd.f32 %v3731_v25, %v3730_v63  ;;  %v16963_v63 = vld [vmem:[#allocation22_spill] sm:$0xff] }
 0x37d   :  { %16962 = vst [vmem:[#allocation4_spill] sm:$0xff] %v13279_v52  ;;  %v13286_v48 = vsub.f32 %v16963_v63, %v13150_v7  ;;  %v3663_v60 = vmul.f32 %v13279_v52, %v13279_v52  ;;  %v3743_v37 = vsel %vm3445_vm3, %v3662_v18, 0.0 }
 0x37e   :  { %v3734_v50 = vadd.f32 %v3733_v22, %v3732_v11  ;;  %v16964_v11 = vld [vmem:[#allocation153_spill] sm:$0xff] }
 0x37f   :  { %v13293_v38 = vsub.f32 %v16964_v11, %v13150_v7  ;;  %v3664_v57 = vmul.f32 %v13286_v48, %v13286_v48  ;;  %v3745_v44 = vsel %vm3445_vm3, %v3663_v60, 0.0 }
 0x380   :  { %v3736_v25 = vadd.f32 %v3735_v55, %v3734_v50  ;;  %v16965_v50 = vld [vmem:[#allocation154_spill] sm:$0xff] }
 0x381   :  { %v13300_v63 = vsub.f32 %v16965_v50, %v13150_v7  ;;  %v3665_v52 = vmul.f32 %v13293_v38, %v13293_v38  ;;  %v3747_v18 = vsel %vm3445_vm3, %v3664_v57, 0.0 }
 0x382   :  { %v3738_v22 = vadd.f32 %v3737_v24, %v3736_v25  ;;  %v16966_v25 = vld [vmem:[#allocation129_spill] sm:$0xff] }
 0x383   :  { %v13307_v11 = vsub.f32 %v16966_v25, %v13150_v7  ;;  %v3666_v50 = vmul.f32 %v13300_v63, %v13300_v63  ;;  %v3749_v60 = vsel %vm3445_vm3, %v3665_v52, 0.0 }
 0x384   :  { %v3740_v55 = vadd.f32 %v3739_v26, %v3738_v22  ;;  %v13314_v22 = vsub.f32 %v13016_v45, %v13150_v7  ;;  %v13328_v45 = vsub.f32 %v13038_v14, %v13150_v7  ;;  %v13342_v14 = vsub.f32 %v13057_v16, %v13150_v7 }
 0x385   :  { %v3667_v25 = vmul.f32 %v13307_v11, %v13307_v11  ;;  %v3751_v57 = vsel %vm3445_vm3, %v3666_v50, 0.0  ;;  %v13356_v16 = vsub.f32 %v13070_v28, %v13150_v7  ;;  %v13370_v28 = vsub.f32 %v13080_v40, %v13150_v7 }
 0x386   :  { %v3742_v24 = vadd.f32 %v3741_v46, %v3740_v55  ;;  %v13321_v55 = vsub.f32 %v13025_v58, %v13150_v7  ;;  %v13335_v58 = vsub.f32 %v13050_v5, %v13150_v7  ;;  %v13349_v5 = vsub.f32 %v13065_v6, %v13150_v7 }
 0x387   :  { %v3753_v52 = vsel %vm3445_vm3, %v3667_v25, 0.0  ;;  %16968 = vst [vmem:[#allocation7_spill] sm:$0xff] %v13356_v16  ;;  %v13363_v6 = vsub.f32 %v13075_v27, %v13150_v7  ;;  %v13377_v27 = vsub.f32 %v12655_v31, %v13150_v7  ;;  %v13384_v40 = vsub.f32 %v12658_v3, %v13150_v7 }
 0x388   :  { %v3744_v26 = vadd.f32 %v3743_v37, %v3742_v24  ;;  %v3668_v24 = vmul.f32 %v13314_v22, %v13314_v22  ;;  %16967 = vst [vmem:[#allocation72_spill] sm:$0xff] %v13349_v5  ;;  %v13391_v31 = vsub.f32 %v12661_v34, %v13150_v7  ;;  %v13398_v3 = vsub.f32 %v12664_v19, %v13150_v7 }
 0x389   :  { %16969 = vst [vmem:[#allocation70_spill] sm:$0xff] %v13363_v6  ;;  %v13405_v34 = vsub.f32 %v12667_v36, %v13150_v7  ;;  %v13412_v19 = vsub.f32 %v12670_v21, %v13150_v7  ;;  %v13419_v36 = vsub.f32 %v12673_v0, %v13150_v7  ;;  %v13426_v21 = vsub.f32 %v12676_v9, %v13150_v7 }
 0x38a   :  { %v3746_v46 = vadd.f32 %v3745_v44, %v3744_v26  ;;  %v3669_v26 = vmul.f32 %v13321_v55, %v13321_v55  ;;  %v3755_v50 = vsel %vm3445_vm3, %v3668_v24, 0.0  ;;  %v13433_v0 = vsub.f32 %v12679_v17, %v13150_v7 }
 0x38b   :  { %v13440_v9 = vsub.f32 %v12682_v1, %v13150_v7  ;;  %v13447_v17 = vsub.f32 %v12685_v39, %v13150_v7  ;;  %v13454_v1 = vsub.f32 %v12688_v54, %v13150_v7  ;;  %v13461_v39 = vsub.f32 %v12691_v10, %v13150_v7 }
 0x38c   :  { %v3748_v37 = vadd.f32 %v3747_v18, %v3746_v46  ;;  %v3670_v46 = vmul.f32 %v13328_v45, %v13328_v45  ;;  %v3757_v25 = vsel %vm3445_vm3, %v3669_v26, 0.0  ;;  %v13468_v54 = vsub.f32 %v12694_v47, %v13150_v7 }
 0x38d   :  { %v13475_v10 = vsub.f32 %v12697_v43, %v13150_v7  ;;  %v13482_v47 = vsub.f32 %v12700_v53, %v13150_v7  ;;  %v13489_v43 = vsub.f32 %v12703_v20, %v13150_v7  ;;  %v13496_v53 = vsub.f32 %v12706_v13, %v13150_v7 }
 0x38e   :  { %v3750_v44 = vadd.f32 %v3749_v60, %v3748_v37  ;;  %v3671_v37 = vmul.f32 %v13335_v58, %v13335_v58  ;;  %v3759_v24 = vsel %vm3445_vm3, %v3670_v46, 0.0  ;;  %v13503_v20 = vsub.f32 %v12709_v2, %v13150_v7 }
 0x38f   :  { %v13510_v13 = vsub.f32 %v12712_v29, %v13150_v7  ;;  %v13517_v2 = vsub.f32 %v12715_v8, %v13150_v7  ;;  %v13524_v29 = vsub.f32 %v12718_v59, %v13150_v7  ;;  %v13531_v8 = vsub.f32 %v12721_v15, %v13150_v7 }
 0x390   :  { %v3752_v18 = vadd.f32 %v3751_v57, %v3750_v44  ;;  %v3672_v44 = vmul.f32 %v13342_v14, %v13342_v14  ;;  %v3761_v26 = vsel %vm3445_vm3, %v3671_v37, 0.0  ;;  %v13538_v59 = vsub.f32 %v12724_v51, %v13150_v7 }
 0x391   :  { %v13545_v15 = vsub.f32 %v12727_v12, %v13150_v7  ;;  %v13552_v51 = vsub.f32 %v12730_v49, %v13150_v7  ;;  %v13559_v12 = vsub.f32 %v12733_v35, %v13150_v7  ;;  %v13566_v49 = vsub.f32 %v12736_v62, %v13150_v7 }
 0x392   :  { %v3754_v60 = vadd.f32 %v3753_v52, %v3752_v18  ;;  %v3673_v18 = vmul.f32 %v13349_v5, %v13349_v5  ;;  %v3763_v46 = vsel %vm3445_vm3, %v3672_v44, 0.0  ;;  %v13573_v35 = vsub.f32 %v12739_v4, %v13150_v7 }
 0x393   :  { %16970 = vst [vmem:[#allocation8_spill] sm:$0xff] %v13566_v49  ;;  %v13580_v62 = vsub.f32 %v12743_v33, %v13150_v7  ;;  %v13587_v4 = vsub.f32 %v16928_v42, %v13150_v7 }
 0x394   :  { %v3756_v57 = vadd.f32 %v3755_v50, %v3754_v60  ;;  %v3674_v60 = vmul.f32 %v13356_v16, %v13356_v16  ;;  %v3765_v37 = vsel %vm3445_vm3, %v3673_v18, 0.0  ;;  %16971 = vst [vmem:[#allocation73_spill] sm:$0xff] %v13573_v35 }
 0x395   :  { %16972 = vst [vmem:[#allocation9_spill] sm:$0xff] %v13580_v62  ;;  %16973 = vst [vmem:[#allocation80_spill] sm:$0xff] %v13587_v4  ;;  %v3706_v33 = vmul.f32 %v13580_v62, %v13580_v62 }
 0x396   :  { %v3758_v52 = vadd.f32 %v3757_v25, %v3756_v57  ;;  %v3675_v57 = vmul.f32 %v13363_v6, %v13363_v6  ;;  %v3767_v44 = vsel %vm3445_vm3, %v3674_v60, 0.0 }
 0x397   :  { %v3831_v42 = vsel %vm3445_vm3, %v3706_v33, 0.0 }
 0x398   :  { %v3760_v50 = vadd.f32 %v3759_v24, %v3758_v52  ;;  %v3676_v52 = vmul.f32 %v13370_v28, %v13370_v28  ;;  %v3769_v18 = vsel %vm3445_vm3, %v3675_v57, 0.0 }
 0x39a   :  { %v3762_v25 = vadd.f32 %v3761_v26, %v3760_v50  ;;  %v3677_v50 = vmul.f32 %v13377_v27, %v13377_v27  ;;  %v3771_v60 = vsel %vm3445_vm3, %v3676_v52, 0.0 }
 0x39c   :  { %v3764_v24 = vadd.f32 %v3763_v46, %v3762_v25  ;;  %v3678_v25 = vmul.f32 %v13384_v40, %v13384_v40  ;;  %v3773_v57 = vsel %vm3445_vm3, %v3677_v50, 0.0 }
 0x39e   :  { %v3766_v26 = vadd.f32 %v3765_v37, %v3764_v24  ;;  %v3679_v24 = vmul.f32 %v13391_v31, %v13391_v31  ;;  %v3775_v52 = vsel %vm3445_vm3, %v3678_v25, 0.0 }
 0x3a0   :  { %v3768_v46 = vadd.f32 %v3767_v44, %v3766_v26  ;;  %v3680_v26 = vmul.f32 %v13398_v3, %v13398_v3  ;;  %v3777_v50 = vsel %vm3445_vm3, %v3679_v24, 0.0 }
 0x3a2   :  { %v3770_v37 = vadd.f32 %v3769_v18, %v3768_v46  ;;  %v3681_v46 = vmul.f32 %v13405_v34, %v13405_v34  ;;  %v3779_v25 = vsel %vm3445_vm3, %v3680_v26, 0.0 }
 0x3a4   :  { %v3772_v44 = vadd.f32 %v3771_v60, %v3770_v37  ;;  %v3682_v37 = vmul.f32 %v13412_v19, %v13412_v19  ;;  %v3781_v24 = vsel %vm3445_vm3, %v3681_v46, 0.0 }
 0x3a6   :  { %v3774_v18 = vadd.f32 %v3773_v57, %v3772_v44  ;;  %v3683_v44 = vmul.f32 %v13419_v36, %v13419_v36  ;;  %v3783_v26 = vsel %vm3445_vm3, %v3682_v37, 0.0 }
 0x3a8   :  { %v3776_v60 = vadd.f32 %v3775_v52, %v3774_v18  ;;  %v3684_v18 = vmul.f32 %v13426_v21, %v13426_v21  ;;  %v3785_v46 = vsel %vm3445_vm3, %v3683_v44, 0.0 }
 0x3aa   :  { %v3778_v57 = vadd.f32 %v3777_v50, %v3776_v60  ;;  %v3685_v60 = vmul.f32 %v13433_v0, %v13433_v0  ;;  %v3787_v37 = vsel %vm3445_vm3, %v3684_v18, 0.0 }
 0x3ac   :  { %v3780_v52 = vadd.f32 %v3779_v25, %v3778_v57  ;;  %v3686_v57 = vmul.f32 %v13440_v9, %v13440_v9  ;;  %v3789_v44 = vsel %vm3445_vm3, %v3685_v60, 0.0 }
 0x3ae   :  { %v3782_v50 = vadd.f32 %v3781_v24, %v3780_v52  ;;  %v3687_v52 = vmul.f32 %v13447_v17, %v13447_v17  ;;  %v3791_v18 = vsel %vm3445_vm3, %v3686_v57, 0.0 }
 0x3b0   :  { %v3784_v25 = vadd.f32 %v3783_v26, %v3782_v50  ;;  %v3688_v50 = vmul.f32 %v13454_v1, %v13454_v1  ;;  %v3793_v60 = vsel %vm3445_vm3, %v3687_v52, 0.0 }
 0x3b2   :  { %v3786_v24 = vadd.f32 %v3785_v46, %v3784_v25  ;;  %v3689_v25 = vmul.f32 %v13461_v39, %v13461_v39  ;;  %v3795_v57 = vsel %vm3445_vm3, %v3688_v50, 0.0 }
 0x3b4   :  { %v3788_v26 = vadd.f32 %v3787_v37, %v3786_v24  ;;  %v3690_v24 = vmul.f32 %v13468_v54, %v13468_v54  ;;  %v3797_v52 = vsel %vm3445_vm3, %v3689_v25, 0.0 }
 0x3b6   :  { %v3790_v46 = vadd.f32 %v3789_v44, %v3788_v26  ;;  %v3691_v26 = vmul.f32 %v13475_v10, %v13475_v10  ;;  %v3799_v50 = vsel %vm3445_vm3, %v3690_v24, 0.0 }
 0x3b8   :  { %v3792_v37 = vadd.f32 %v3791_v18, %v3790_v46  ;;  %v3692_v46 = vmul.f32 %v13482_v47, %v13482_v47  ;;  %v3801_v25 = vsel %vm3445_vm3, %v3691_v26, 0.0 }
 0x3ba   :  { %v3794_v44 = vadd.f32 %v3793_v60, %v3792_v37  ;;  %v3693_v37 = vmul.f32 %v13489_v43, %v13489_v43  ;;  %v3803_v24 = vsel %vm3445_vm3, %v3692_v46, 0.0 }
 0x3bc   :  { %v3796_v18 = vadd.f32 %v3795_v57, %v3794_v44  ;;  %v3694_v44 = vmul.f32 %v13496_v53, %v13496_v53  ;;  %v3805_v26 = vsel %vm3445_vm3, %v3693_v37, 0.0 }
 0x3be   :  { %v3798_v60 = vadd.f32 %v3797_v52, %v3796_v18  ;;  %v3695_v18 = vmul.f32 %v13503_v20, %v13503_v20  ;;  %v3807_v46 = vsel %vm3445_vm3, %v3694_v44, 0.0 }
 0x3c0   :  { %v3800_v57 = vadd.f32 %v3799_v50, %v3798_v60  ;;  %v3696_v60 = vmul.f32 %v13510_v13, %v13510_v13  ;;  %v3809_v37 = vsel %vm3445_vm3, %v3695_v18, 0.0 }
 0x3c2   :  { %v3802_v52 = vadd.f32 %v3801_v25, %v3800_v57  ;;  %v3697_v57 = vmul.f32 %v13517_v2, %v13517_v2  ;;  %v3811_v44 = vsel %vm3445_vm3, %v3696_v60, 0.0 }
 0x3c4   :  { %v3804_v50 = vadd.f32 %v3803_v24, %v3802_v52  ;;  %v3698_v52 = vmul.f32 %v13524_v29, %v13524_v29  ;;  %v3813_v18 = vsel %vm3445_vm3, %v3697_v57, 0.0 }
 0x3c6   :  { %v3806_v25 = vadd.f32 %v3805_v26, %v3804_v50  ;;  %v3699_v50 = vmul.f32 %v13531_v8, %v13531_v8  ;;  %v3815_v60 = vsel %vm3445_vm3, %v3698_v52, 0.0 }
 0x3c8   :  { %v3808_v24 = vadd.f32 %v3807_v46, %v3806_v25  ;;  %v3700_v25 = vmul.f32 %v13538_v59, %v13538_v59  ;;  %v3817_v57 = vsel %vm3445_vm3, %v3699_v50, 0.0 }
 0x3ca   :  { %v3810_v26 = vadd.f32 %v3809_v37, %v3808_v24  ;;  %v3701_v24 = vmul.f32 %v13545_v15, %v13545_v15  ;;  %v3819_v52 = vsel %vm3445_vm3, %v3700_v25, 0.0 }
 0x3cc   :  { %v3812_v46 = vadd.f32 %v3811_v44, %v3810_v26  ;;  %v3702_v26 = vmul.f32 %v13552_v51, %v13552_v51  ;;  %v3821_v50 = vsel %vm3445_vm3, %v3701_v24, 0.0 }
 0x3ce   :  { %v3814_v37 = vadd.f32 %v3813_v18, %v3812_v46  ;;  %v3703_v46 = vmul.f32 %v13559_v12, %v13559_v12  ;;  %v3823_v25 = vsel %vm3445_vm3, %v3702_v26, 0.0  ;;  %v3707_v26 = vmul.f32 %v13587_v4, %v13587_v4 }
 0x3d0   :  { %v3816_v44 = vadd.f32 %v3815_v60, %v3814_v37  ;;  %v3704_v37 = vmul.f32 %v13566_v49, %v13566_v49  ;;  %v3825_v24 = vsel %vm3445_vm3, %v3703_v46, 0.0  ;;  %v3833_v16 = vsel %vm3445_vm3, %v3707_v26, 0.0 }
 0x3d2   :  { %v3818_v18 = vadd.f32 %v3817_v57, %v3816_v44  ;;  %v3705_v44 = vmul.f32 %v13573_v35, %v13573_v35 }
 0x3d4   :  { %v3820_v60 = vadd.f32 %v3819_v52, %v3818_v18  ;;  %v3827_v18 = vsel %vm3445_vm3, %v3704_v37, 0.0 }
 0x3d6   :  { %v3822_v57 = vadd.f32 %v3821_v50, %v3820_v60  ;;  %v3829_v50 = vsel %vm3445_vm3, %v3705_v44, 0.0 }
 0x3d8   :  { %v3824_v52 = vadd.f32 %v3823_v25, %v3822_v57 }
 0x3da   :  { %v3826_v6 = vadd.f32 %v3825_v24, %v3824_v52 }
 0x3dc   :  { %v3828_v60 = vadd.f32 %v3827_v18, %v3826_v6  ;;  %v13605_v6 = vld [vmem:[%s14613_s3] ss:$0 sm:$0xff] }
 0x3de   :  { %v3830_v7 = vadd.f32 %v3829_v50, %v3828_v60 }
 0x3e0   :  { %v3832_v35 = vadd.f32 %v3831_v42, %v3830_v7 }
 0x3e2   :  { %v3834_v46 = vadd.f32 %v3833_v16, %v3832_v35  ;;  %v13618_v35 = vld [vmem:[%s14614_s4] ss:$0 sm:$0xff] }
 0x3e4   :  { %v3835_v25 = vrot.slane %v3834_v46, 4 }
 0x3e6   :  { %v3836_v57 = vadd.f32 %v3835_v25, %v3834_v46 }
 0x3e8   :  { %v3837_v5 = vrot.slane %v3836_v57, 2 }
 0x3ea   :  { %v3838_v62 = vadd.f32 %v3837_v5, %v3836_v57 }
 0x3ec   :  { %v3839_v49 = vrot.slane %v3838_v62, 1 }
 0x3ee   :  { %v3840_v37 = vadd.f32 %v3839_v49, %v3838_v62 }
 0x3f0   :  { %v3841_v24 = vmul.f32 0.001953125, %v3840_v37 }
 0x3f2   :  { %v3842_v52 = vadd.f32 1e-05, %v3841_v24 }
 0x3f4   :  { %5454 = vrsqrt.f32 %v3842_v52 }
 0x3fe   :  { %v13600_v4 = vpop.eup %5454 }
 0x3ff   :  { %v3844_v44 = vmul.f32 %v13600_v4, %v13154_v56  ;;  %v3876_v16 = vmul.f32 %v13600_v4, %v13370_v28  ;;  %v3845_v5 = vmul.f32 %v13600_v4, %v13158_v61  ;;  %v3877_v49 = vmul.f32 %v13600_v4, %v13377_v27 }
 0x400   :  { %v3846_v62 = vmul.f32 %v13600_v4, %v13162_v23  ;;  %v3878_v56 = vmul.f32 %v13600_v4, %v13384_v40  ;;  %v3847_v28 = vmul.f32 %v13600_v4, %v13166_v30  ;;  %v3879_v61 = vmul.f32 %v13600_v4, %v13391_v31 }
 0x401   :  { %v3915_v33 = vmul.f32 %v13605_v6, %v3844_v44  ;;  %v3947_v27 = vmul.f32 %v13605_v6, %v3876_v16  ;;  %v3916_v18 = vmul.f32 %v13605_v6, %v3845_v5  ;;  %v3948_v26 = vmul.f32 %v13605_v6, %v3877_v49 }
 0x402   :  { %v3917_v50 = vmul.f32 %v13605_v6, %v3846_v62  ;;  %v3949_v23 = vmul.f32 %v13605_v6, %v3878_v56  ;;  %v3918_v40 = vmul.f32 %v13605_v6, %v3847_v28  ;;  %v3950_v60 = vmul.f32 %v13605_v6, %v3879_v61 }
 0x403   :  { %v3986_v30 = vadd.f32 %v13618_v35, %v3915_v33  ;;  %v4018_v31 = vadd.f32 %v13618_v35, %v3947_v27  ;;  %v3987_v42 = vadd.f32 %v13618_v35, %v3916_v18  ;;  %v4019_v7 = vadd.f32 %v13618_v35, %v3948_v26 }
 0x404   :  { %v3988_v46 = vadd.f32 %v13618_v35, %v3917_v50  ;;  %v4020_v25 = vadd.f32 %v13618_v35, %v3949_v23  ;;  %v3989_v57 = vadd.f32 %v13618_v35, %v3918_v40  ;;  %v4021_v37 = vadd.f32 %v13618_v35, %v3950_v60 }
 0x405   :  { %v4050_v24 = vmax.f32 %v3986_v30, 0.0  ;;  %v4082_v52 = vmax.f32 %v4018_v31, 0.0  ;;  %v4051_v44 = vmax.f32 %v3987_v42, 0.0  ;;  %v4083_v16 = vmax.f32 %v4019_v7, 0.0  ;;  %v16974_v42 = vld [vmem:[#allocation23_spill] sm:$0xff] }
 0x406   :  { %v4052_v5 = vmax.f32 %v3988_v46, 0.0  ;;  %v4084_v49 = vmax.f32 %v4020_v25, 0.0  ;;  %v4053_v62 = vmax.f32 %v3989_v57, 0.0  ;;  %v4085_v56 = vmax.f32 %v4021_v37, 0.0  ;;  %v16975_v37 = vld [vmem:[#allocation147_spill] sm:$0xff] }
 0x407   :  { %v4114_v28 = vmin.f32 %v4050_v24, 6.0  ;;  %v4146_v61 = vmin.f32 %v4082_v52, 6.0  ;;  %v4115_v33 = vmin.f32 %v4051_v44, 6.0  ;;  %v4147_v27 = vmin.f32 %v4083_v16, 6.0 }
 0x408   :  { %v4116_v18 = vmin.f32 %v4052_v5, 6.0  ;;  %v4148_v26 = vmin.f32 %v4084_v49, 6.0  ;;  %v4117_v50 = vmin.f32 %v4053_v62, 6.0  ;;  %v3848_v23 = vmul.f32 %v13600_v4, %v13170_v32 }
 0x409   :  { %5356 = vmatprep.mubr.msk.f32.mxu0 %vm3445_vm3, %v4114_v28  ;;  %5404 = vmatprep.mubr.msk.f32.mxu1 %vm3445_vm3, %v4146_v61  ;;  %v3880_v40 = vmul.f32 %v13600_v4, %v13398_v3  ;;  %v3849_v60 = vmul.f32 %v13600_v4, %v13180_v41  ;;  %v4149_v30 = vmin.f32 %v4085_v56, 6.0  ;;  %v3881_v31 = vmul.f32 %v13600_v4, %v13405_v34 }
 0x40a   :  { %5357 = vmatmul.mubr.msk.f32.vlgmr.msra.gmra.mrb[0].mxu0 %vm3445_vm3, %v4115_v33  ;;  %5405 = vmatmul.mubr.msk.f32.vlgmr.msra.gmra.mrb[0].mxu1 %vm3445_vm3, %v4147_v27  ;;  %v3850_v7 = vmul.f32 %v13600_v4, %v16974_v42  ;;  %v3882_v32 = vmul.f32 %v13600_v4, %v13412_v19  ;;  %v3919_v41 = vmul.f32 %v13605_v6, %v3848_v23 }
 0x40b   :  { %5359 = vmatprep.mubr.msk.f32.mxu0 %vm3445_vm3, %v4116_v18  ;;  %5407 = vmatprep.mubr.msk.f32.mxu1 %vm3445_vm3, %v4148_v26  ;;  %v3951_v3 = vmul.f32 %v13605_v6, %v3880_v40  ;;  %v3920_v46 = vmul.f32 %v13605_v6, %v3849_v60  ;;  %v3952_v25 = vmul.f32 %v13605_v6, %v3881_v31 }
 0x40c   :  { %v3921_v34 = vmul.f32 %v13605_v6, %v3850_v7  ;;  %v3953_v57 = vmul.f32 %v13605_v6, %v3882_v32  ;;  %v3851_v24 = vmul.f32 %v13600_v4, %v16975_v37  ;;  %v3990_v19 = vadd.f32 %v13618_v35, %v3919_v41  ;;  %v16976_v41 = vld [vmem:[#allocation24_spill] sm:$0xff] }
 0x40d   :  { %v4022_v52 = vadd.f32 %v13618_v35, %v3951_v3  ;;  %v3991_v44 = vadd.f32 %v13618_v35, %v3920_v46  ;;  %v3883_v16 = vmul.f32 %v13600_v4, %v13419_v36  ;;  %v4023_v5 = vadd.f32 %v13618_v35, %v3952_v25  ;;  %v16977_v25 = vld [vmem:[#allocation148_spill] sm:$0xff] }
 0x40e   :  { %5360 = vmatmul.mubr.msk.f32.gmra.mrb[2].mxu0 %vm3445_vm3, %v4117_v50  ;;  %5408 = vmatmul.mubr.msk.f32.gmra.mrb[2].mxu1 %vm3445_vm3, %v4149_v30  ;;  %v3992_v49 = vadd.f32 %v13618_v35, %v3921_v34  ;;  %v4024_v62 = vadd.f32 %v13618_v35, %v3953_v57  ;;  %v4054_v56 = vmax.f32 %v3990_v19, 0.0  ;;  %v3922_v33 = vmul.f32 %v13605_v6, %v3851_v24  ;;  %v16978_v24 = vld [vmem:[#allocation30_spill] sm:$0xff] }
 0x40f   :  { %v4086_v28 = vmax.f32 %v4022_v52, 0.0  ;;  %v4055_v61 = vmax.f32 %v3991_v44, 0.0  ;;  %v4087_v27 = vmax.f32 %v4023_v5, 0.0  ;;  %v3954_v36 = vmul.f32 %v13605_v6, %v3883_v16 }
 0x410   :  { %v4056_v18 = vmax.f32 %v3992_v49, 0.0  ;;  %v4088_v26 = vmax.f32 %v4024_v62, 0.0  ;;  %v4118_v23 = vmin.f32 %v4054_v56, 6.0  ;;  %v3993_v60 = vadd.f32 %v13618_v35, %v3922_v33  ;;  %v16979_v33 = vld [vmem:[#allocation149_spill] sm:$0xff] }
 0x411   :  { %v4150_v50 = vmin.f32 %v4086_v28, 6.0  ;;  %v4119_v40 = vmin.f32 %v4055_v61, 6.0  ;;  %v4151_v30 = vmin.f32 %v4087_v27, 6.0  ;;  %v4025_v7 = vadd.f32 %v13618_v35, %v3954_v36 }
 0x412   :  { %v4120_v31 = vmin.f32 %v4056_v18, 6.0  ;;  %v4152_v42 = vmin.f32 %v4088_v26, 6.0  ;;  %5362 = vmatprep.mubr.msk.f32.mxu0 %vm3445_vm3, %v4118_v23  ;;  %v4057_v32 = vmax.f32 %v3993_v60, 0.0  ;;  %v3852_v3 = vmul.f32 %v13600_v4, %v16976_v41 }
 0x413   :  { %5410 = vmatprep.mubr.msk.f32.mxu1 %vm3445_vm3, %v4150_v50  ;;  %v3884_v46 = vmul.f32 %v13600_v4, %v13426_v21  ;;  %v3853_v34 = vmul.f32 %v13600_v4, %v16977_v25  ;;  %5363 = vmatmul.mubr.msk.f32.gmra.mrb[4].mxu0 %vm3445_vm3, %v4119_v40  ;;  %v4089_v57 = vmax.f32 %v4025_v7, 0.0  ;;  %v3885_v37 = vmul.f32 %v13600_v4, %v13433_v0 }
 0x414   :  { %5411 = vmatmul.mubr.msk.f32.gmra.mrb[4].mxu1 %vm3445_vm3, %v4151_v30  ;;  %v3854_v19 = vmul.f32 %v13600_v4, %v16978_v24  ;;  %v3886_v52 = vmul.f32 %v13600_v4, %v13440_v9  ;;  %5365 = vmatprep.mubr.msk.f32.mxu0 %vm3445_vm3, %v4120_v31  ;;  %v4121_v21 = vmin.f32 %v4057_v32, 6.0  ;;  %v3923_v44 = vmul.f32 %v13605_v6, %v3852_v3 }
 0x415   :  { %5413 = vmatprep.mubr.msk.f32.mxu1 %vm3445_vm3, %v4152_v42  ;;  %v3955_v16 = vmul.f32 %v13605_v6, %v3884_v46  ;;  %v3924_v5 = vmul.f32 %v13605_v6, %v3853_v34  ;;  %v4153_v49 = vmin.f32 %v4089_v57, 6.0  ;;  %v3956_v0 = vmul.f32 %v13605_v6, %v3885_v37 }
 0x416   :  { %v3925_v62 = vmul.f32 %v13605_v6, %v3854_v19  ;;  %v3957_v56 = vmul.f32 %v13605_v6, %v3886_v52  ;;  %v3994_v9 = vadd.f32 %v13618_v35, %v3923_v44  ;;  %v3855_v27 = vmul.f32 %v13600_v4, %v16979_v33  ;;  %v16980_v19 = vld [vmem:[#allocation31_spill] sm:$0xff] }
 0x417   :  { %v4026_v28 = vadd.f32 %v13618_v35, %v3955_v16  ;;  %v3995_v61 = vadd.f32 %v13618_v35, %v3924_v5  ;;  %5366 = vmatmul.mubr.msk.f32.gmra.mrb[6].mxu0 %vm3445_vm3, %v4121_v21  ;;  %v4027_v18 = vadd.f32 %v13618_v35, %v3956_v0  ;;  %v3887_v7 = vmul.f32 %v13600_v4, %v13447_v17  ;;  %v16981_v21 = vld [vmem:[#allocation150_spill] sm:$0xff] }
 0x418   :  { %5414 = vmatmul.mubr.msk.f32.gmra.mrb[6].mxu1 %vm3445_vm3, %v4153_v49  ;;  %v3996_v26 = vadd.f32 %v13618_v35, %v3925_v62  ;;  %v4028_v36 = vadd.f32 %v13618_v35, %v3957_v56  ;;  %v4058_v23 = vmax.f32 %v3994_v9, 0.0  ;;  %v3926_v60 = vmul.f32 %v13605_v6, %v3855_v27  ;;  %v16982_v49 = vld [vmem:[#allocation32_spill] sm:$0xff] }
 0x419   :  { %v4090_v50 = vmax.f32 %v4026_v28, 0.0  ;;  %v4059_v40 = vmax.f32 %v3995_v61, 0.0  ;;  %v4091_v30 = vmax.f32 %v4027_v18, 0.0  ;;  %v3958_v37 = vmul.f32 %v13605_v6, %v3887_v7 }
 0x41a   :  { %v4060_v31 = vmax.f32 %v3996_v26, 0.0  ;;  %v4092_v42 = vmax.f32 %v4028_v36, 0.0  ;;  %v4122_v32 = vmin.f32 %v4058_v23, 6.0  ;;  %v3997_v46 = vadd.f32 %v13618_v35, %v3926_v60  ;;  %v16983_v36 = vld [vmem:[#allocation151_spill] sm:$0xff] }
 0x41b   :  { %v4154_v41 = vmin.f32 %v4090_v50, 6.0  ;;  %v4123_v3 = vmin.f32 %v4059_v40, 6.0  ;;  %v4155_v25 = vmin.f32 %v4091_v30, 6.0  ;;  %v3856_v52 = vmul.f32 %v13600_v4, %v16980_v19 }
 0x41c   :  { %v4124_v34 = vmin.f32 %v4060_v31, 6.0  ;;  %v4156_v57 = vmin.f32 %v4092_v42, 6.0  ;;  %5368 = vmatprep.mubr.msk.f32.mxu0 %vm3445_vm3, %v4122_v32  ;;  %v4061_v24 = vmax.f32 %v3997_v46, 0.0  ;;  %v3888_v17 = vmul.f32 %v13600_v4, %v13454_v1 }
 0x41d   :  { %5416 = vmatprep.mubr.msk.f32.mxu1 %vm3445_vm3, %v4154_v41  ;;  %v3857_v44 = vmul.f32 %v13600_v4, %v16981_v21  ;;  %5369 = vmatmul.mubr.msk.f32.gmra.mrb[8].mxu0 %vm3445_vm3, %v4123_v3  ;;  %v4029_v16 = vadd.f32 %v13618_v35, %v3958_v37  ;;  %v3889_v5 = vmul.f32 %v13600_v4, %v13461_v39 }
 0x41e   :  { %5417 = vmatmul.mubr.msk.f32.gmra.mrb[8].mxu1 %vm3445_vm3, %v4155_v25  ;;  %v3858_v0 = vmul.f32 %v13600_v4, %v16982_v49  ;;  %5371 = vmatprep.mubr.msk.f32.mxu0 %vm3445_vm3, %v4124_v34  ;;  %v4125_v1 = vmin.f32 %v4061_v24, 6.0  ;;  %v3927_v62 = vmul.f32 %v13605_v6, %v3856_v52  ;;  %v3959_v56 = vmul.f32 %v13605_v6, %v3888_v17 }
 0x41f   :  { %5419 = vmatprep.mubr.msk.f32.mxu1 %vm3445_vm3, %v4156_v57  ;;  %v3928_v9 = vmul.f32 %v13605_v6, %v3857_v44  ;;  %v4093_v28 = vmax.f32 %v4029_v16, 0.0  ;;  %v3960_v61 = vmul.f32 %v13605_v6, %v3889_v5  ;;  %v3890_v39 = vmul.f32 %v13600_v4, %v13468_v54  ;;  %v16984_v44 = vld [vmem:[#allocation101_spill] sm:$0xff]  ;;  %v16985_v5 = vld [vmem:[#allocation6_spill] sm:$0xff] }
 0x420   :  { %v3929_v33 = vmul.f32 %v13605_v6, %v3858_v0  ;;  %v3998_v27 = vadd.f32 %v13618_v35, %v3927_v62  ;;  %v4030_v18 = vadd.f32 %v13618_v35, %v3959_v56  ;;  %v3859_v23 = vmul.f32 %v13600_v4, %v16983_v36  ;;  %v16986_v56 = vld [vmem:[#allocation64_spill] sm:$0xff] }
 0x421   :  { %v3999_v26 = vadd.f32 %v13618_v35, %v3928_v9  ;;  %5372 = vmatmul.mubr.msk.f32.gmra.mrb[10].mxu0 %vm3445_vm3, %v4125_v1  ;;  %v4157_v50 = vmin.f32 %v4093_v28, 6.0  ;;  %v4031_v40 = vadd.f32 %v13618_v35, %v3960_v61  ;;  %v3961_v30 = vmul.f32 %v13605_v6, %v3890_v39 }
 0x422   :  { %v4000_v60 = vadd.f32 %v13618_v35, %v3929_v33  ;;  %v4062_v31 = vmax.f32 %v3998_v27, 0.0  ;;  %v4094_v54 = vmax.f32 %v4030_v18, 0.0  ;;  %v3930_v7 = vmul.f32 %v13605_v6, %v3859_v23 }
 0x423   :  { %v4063_v42 = vmax.f32 %v3999_v26, 0.0  ;;  %5420 = vmatmul.mubr.msk.f32.gmra.mrb[10].mxu1 %vm3445_vm3, %v4157_v50  ;;  %v4095_v32 = vmax.f32 %v4031_v40, 0.0  ;;  %v4032_v3 = vadd.f32 %v13618_v35, %v3961_v30  ;;  %v3891_v46 = vmul.f32 %v13600_v4, %v13475_v10  ;;  %v16987_v50 = vld [vmem:[#allocation4_spill] sm:$0xff] }
 0x424   :  { %v4064_v41 = vmax.f32 %v4000_v60, 0.0  ;;  %v4126_v25 = vmin.f32 %v4062_v31, 6.0  ;;  %v4158_v34 = vmin.f32 %v4094_v54, 6.0  ;;  %v4001_v37 = vadd.f32 %v13618_v35, %v3930_v7 }
 0x425   :  { %v4127_v57 = vmin.f32 %v4063_v42, 6.0  ;;  %v4159_v24 = vmin.f32 %v4095_v32, 6.0  ;;  %v4096_v52 = vmax.f32 %v4032_v3, 0.0  ;;  %v3962_v17 = vmul.f32 %v13605_v6, %v3891_v46 }
 0x426   :  { %v4128_v19 = vmin.f32 %v4064_v41, 6.0  ;;  %5374 = vmatprep.mubr.msk.f32.mxu0 %vm3445_vm3, %v4126_v25  ;;  %5422 = vmatprep.mubr.msk.f32.mxu1 %vm3445_vm3, %v4158_v34  ;;  %v4065_v21 = vmax.f32 %v4001_v37, 0.0  ;;  %v3860_v16 = vmul.f32 %v13600_v4, %v16984_v44  ;;  %v3892_v10 = vmul.f32 %v13600_v4, %v13482_v47 }
 0x427   :  { %v3861_v49 = vmul.f32 %v13600_v4, %v16985_v5  ;;  %5375 = vmatmul.mubr.msk.f32.gmra.mrb[12].mxu0 %vm3445_vm3, %v4127_v57  ;;  %5423 = vmatmul.mubr.msk.f32.gmra.mrb[12].mxu1 %vm3445_vm3, %v4159_v24  ;;  %v4160_v0 = vmin.f32 %v4096_v52, 6.0  ;;  %v4033_v1 = vadd.f32 %v13618_v35, %v3962_v17  ;;  %v3893_v62 = vmul.f32 %v13600_v4, %v13489_v43 }
 0x428   :  { %v3862_v9 = vmul.f32 %v13600_v4, %v16986_v56  ;;  %5377 = vmatprep.mubr.msk.f32.mxu0 %vm3445_vm3, %v4128_v19  ;;  %v4129_v28 = vmin.f32 %v4065_v21, 6.0  ;;  %v3931_v47 = vmul.f32 %v13605_v6, %v3860_v16  ;;  %v3963_v61 = vmul.f32 %v13605_v6, %v3892_v10 }
 0x429   :  { %v3932_v33 = vmul.f32 %v13605_v6, %v3861_v49  ;;  %5425 = vmatprep.mubr.msk.f32.mxu1 %vm3445_vm3, %v4160_v0  ;;  %v4097_v39 = vmax.f32 %v4033_v1, 0.0  ;;  %v3964_v27 = vmul.f32 %v13605_v6, %v3893_v62  ;;  %v3894_v43 = vmul.f32 %v13600_v4, %v13496_v53 }
 0x42a   :  { %v3933_v18 = vmul.f32 %v13605_v6, %v3862_v9  ;;  %v4002_v26 = vadd.f32 %v13618_v35, %v3931_v47  ;;  %v4034_v36 = vadd.f32 %v13618_v35, %v3963_v61  ;;  %v3863_v40 = vmul.f32 %v13600_v4, %v16987_v50 }
 0x42b   :  { %v4003_v23 = vadd.f32 %v13618_v35, %v3932_v33  ;;  %5378 = vmatmul.mubr.msk.f32.gmra.mrb[14].mxu0 %vm3445_vm3, %v4129_v28  ;;  %v4161_v60 = vmin.f32 %v4097_v39, 6.0  ;;  %v4035_v30 = vadd.f32 %v13618_v35, %v3964_v27  ;;  %v3965_v54 = vmul.f32 %v13605_v6, %v3894_v43 }
 0x42c   :  { %v4004_v31 = vadd.f32 %v13618_v35, %v3933_v18  ;;  %v4066_v42 = vmax.f32 %v4002_v26, 0.0  ;;  %v4098_v53 = vmax.f32 %v4034_v36, 0.0  ;;  %v3934_v32 = vmul.f32 %v13605_v6, %v3863_v40 }
 0x42d   :  { %v4067_v7 = vmax.f32 %v4003_v23, 0.0  ;;  %5426 = vmatmul.mubr.msk.f32.gmra.mrb[14].mxu1 %vm3445_vm3, %v4161_v60  ;;  %v4099_v41 = vmax.f32 %v4035_v30, 0.0  ;;  %v4036_v46 = vadd.f32 %v13618_v35, %v3965_v54  ;;  %v3895_v25 = vmul.f32 %v13600_v4, %v13503_v20 }
 0x42e   :  { %v4068_v3 = vmax.f32 %v4004_v31, 0.0  ;;  %v4130_v34 = vmin.f32 %v4066_v42, 6.0  ;;  %v4162_v57 = vmin.f32 %v4098_v53, 6.0  ;;  %v4005_v24 = vadd.f32 %v13618_v35, %v3934_v32 }
 0x42f   :  { %v4131_v37 = vmin.f32 %v4067_v7, 6.0  ;;  %v4163_v19 = vmin.f32 %v4099_v41, 6.0  ;;  %v4100_v17 = vmax.f32 %v4036_v46, 0.0  ;;  %v3966_v21 = vmul.f32 %v13605_v6, %v3895_v25 }
 0x430   :  { %v4132_v52 = vmin.f32 %v4068_v3, 6.0  ;;  %5380 = vmatprep.mubr.msk.f32.mxu0 %vm3445_vm3, %v4130_v34  ;;  %5428 = vmatprep.mubr.msk.f32.mxu1 %vm3445_vm3, %v4162_v57  ;;  %v4069_v44 = vmax.f32 %v4005_v24, 0.0  ;;  %v3864_v16 = vmul.f32 %v13600_v4, %v13286_v48  ;;  %v3896_v20 = vmul.f32 %v13600_v4, %v13510_v13 }
 0x431   :  { %v3865_v10 = vmul.f32 %v13600_v4, %v13293_v38  ;;  %5381 = vmatmul.mubr.msk.f32.gmra.mrb[16].mxu0 %vm3445_vm3, %v4131_v37  ;;  %5429 = vmatmul.mubr.msk.f32.gmra.mrb[16].mxu1 %vm3445_vm3, %v4163_v19  ;;  %v4164_v5 = vmin.f32 %v4100_v17, 6.0  ;;  %v4037_v49 = vadd.f32 %v13618_v35, %v3966_v21  ;;  %v3897_v0 = vmul.f32 %v13600_v4, %v13517_v2 }
 0x432   :  { %v3866_v1 = vmul.f32 %v13600_v4, %v13300_v63  ;;  %5383 = vmatprep.mubr.msk.f32.mxu0 %vm3445_vm3, %v4132_v52  ;;  %v4133_v48 = vmin.f32 %v4069_v44, 6.0  ;;  %v3935_v13 = vmul.f32 %v13605_v6, %v3864_v16  ;;  %v3967_v38 = vmul.f32 %v13605_v6, %v3896_v20 }
 0x433   :  { %v3936_v62 = vmul.f32 %v13605_v6, %v3865_v10  ;;  %5431 = vmatprep.mubr.msk.f32.mxu1 %vm3445_vm3, %v4164_v5  ;;  %v4101_v56 = vmax.f32 %v4037_v49, 0.0  ;;  %v3968_v9 = vmul.f32 %v13605_v6, %v3897_v0  ;;  %v3898_v2 = vmul.f32 %v13600_v4, %v13524_v29 }
 0x434   :  { %v3937_v28 = vmul.f32 %v13605_v6, %v3866_v1  ;;  %v4006_v63 = vadd.f32 %v13618_v35, %v3935_v13  ;;  %v4038_v47 = vadd.f32 %v13618_v35, %v3967_v38  ;;  %v3867_v33 = vmul.f32 %v13600_v4, %v13307_v11 }
 0x435   :  { %v4007_v61 = vadd.f32 %v13618_v35, %v3936_v62  ;;  %5384 = vmatmul.mubr.msk.f32.gmra.mrb[18].mxu0 %vm3445_vm3, %v4133_v48  ;;  %v4165_v39 = vmin.f32 %v4101_v56, 6.0  ;;  %v4039_v27 = vadd.f32 %v13618_v35, %v3968_v9  ;;  %v3969_v43 = vmul.f32 %v13605_v6, %v3898_v2 }
 0x436   :  { %v4008_v18 = vadd.f32 %v13618_v35, %v3937_v28  ;;  %v4070_v26 = vmax.f32 %v4006_v63, 0.0  ;;  %v4102_v29 = vmax.f32 %v4038_v47, 0.0  ;;  %v3938_v23 = vmul.f32 %v13605_v6, %v3867_v33 }
 0x437   :  { %v4071_v36 = vmax.f32 %v4007_v61, 0.0  ;;  %5432 = vmatmul.mubr.msk.f32.gmra.mrb[18].mxu1 %vm3445_vm3, %v4165_v39  ;;  %v4103_v50 = vmax.f32 %v4039_v27, 0.0  ;;  %v4040_v11 = vadd.f32 %v13618_v35, %v3969_v43  ;;  %v3899_v60 = vmul.f32 %v13600_v4, %v13531_v8  ;;  %v16988_v43 = vld [vmem:[#allocation8_spill] sm:$0xff] }
 0x438   :  { %v4072_v40 = vmax.f32 %v4008_v18, 0.0  ;;  %v4134_v30 = vmin.f32 %v4070_v26, 6.0  ;;  %v4166_v31 = vmin.f32 %v4102_v29, 6.0  ;;  %v4009_v42 = vadd.f32 %v13618_v35, %v3938_v23  ;;  %v16989_v26 = vld [vmem:[#allocation72_spill] sm:$0xff] }
 0x439   :  { %v4135_v54 = vmin.f32 %v4071_v36, 6.0  ;;  %v4167_v53 = vmin.f32 %v4103_v50, 6.0  ;;  %v4104_v32 = vmax.f32 %v4040_v11, 0.0  ;;  %v3970_v41 = vmul.f32 %v13605_v6, %v3899_v60  ;;  %v16990_v50 = vld [vmem:[#allocation73_spill] sm:$0xff]  ;;  %v16991_v11 = vld [vmem:[#allocation7_spill] sm:$0xff] }
 0x43a   :  { %v4136_v7 = vmin.f32 %v4072_v40, 6.0  ;;  %5386 = vmatprep.mubr.msk.f32.mxu0 %vm3445_vm3, %v4134_v30  ;;  %5434 = vmatprep.mubr.msk.f32.mxu1 %vm3445_vm3, %v4166_v31  ;;  %v4073_v3 = vmax.f32 %v4009_v42, 0.0  ;;  %v3868_v46 = vmul.f32 %v13600_v4, %v13314_v22  ;;  %v3900_v8 = vmul.f32 %v13600_v4, %v13538_v59 }
 0x43b   :  { %v3869_v25 = vmul.f32 %v13600_v4, %v13321_v55  ;;  %5387 = vmatmul.mubr.msk.f32.gmra.mrb[20].mxu0 %vm3445_vm3, %v4135_v54  ;;  %5435 = vmatmul.mubr.msk.f32.gmra.mrb[20].mxu1 %vm3445_vm3, %v4167_v53  ;;  %v4168_v34 = vmin.f32 %v4104_v32, 6.0  ;;  %v4041_v57 = vadd.f32 %v13618_v35, %v3970_v41  ;;  %v3901_v37 = vmul.f32 %v13600_v4, %v13545_v15  ;;  %v16992_v32 = vld [vmem:[#allocation9_spill] sm:$0xff] }
 0x43c   :  { %v3870_v24 = vmul.f32 %v13600_v4, %v13328_v45  ;;  %5389 = vmatprep.mubr.msk.f32.mxu0 %vm3445_vm3, %v4136_v7  ;;  %v4137_v22 = vmin.f32 %v4073_v3, 6.0  ;;  %v3939_v59 = vmul.f32 %v13605_v6, %v3868_v46  ;;  %v3971_v55 = vmul.f32 %v13605_v6, %v3900_v8 }
 0x43d   :  { %v3940_v19 = vmul.f32 %v13605_v6, %v3869_v25  ;;  %5437 = vmatprep.mubr.msk.f32.mxu1 %vm3445_vm3, %v4168_v34  ;;  %v4105_v52 = vmax.f32 %v4041_v57, 0.0  ;;  %v3972_v17 = vmul.f32 %v13605_v6, %v3901_v37  ;;  %v3902_v15 = vmul.f32 %v13600_v4, %v13552_v51  ;;  %v16993_v25 = vld [vmem:[#allocation70_spill] sm:$0xff] }
 0x43e   :  { %v3941_v21 = vmul.f32 %v13605_v6, %v3870_v24  ;;  %v4010_v45 = vadd.f32 %v13618_v35, %v3939_v59  ;;  %v4042_v44 = vadd.f32 %v13618_v35, %v3971_v55  ;;  %v3871_v20 = vmul.f32 %v13600_v4, %v13335_v58 }
 0x43f   :  { %v4011_v16 = vadd.f32 %v13618_v35, %v3940_v19  ;;  %5390 = vmatmul.mubr.msk.f32.gmra.mrb[22].mxu0 %vm3445_vm3, %v4137_v22  ;;  %v4169_v10 = vmin.f32 %v4105_v52, 6.0  ;;  %v4043_v5 = vadd.f32 %v13618_v35, %v3972_v17  ;;  %v3973_v0 = vmul.f32 %v13605_v6, %v3902_v15 }
 0x440   :  { %v4012_v49 = vadd.f32 %v13618_v35, %v3941_v21  ;;  %v4074_v1 = vmax.f32 %v4010_v45, 0.0  ;;  %v4106_v51 = vmax.f32 %v4042_v44, 0.0  ;;  %v3942_v13 = vmul.f32 %v13605_v6, %v3871_v20  ;;  %v16994_v45 = vld [vmem:[#allocation80_spill] sm:$0xff] }
 0x441   :  { %v4075_v48 = vmax.f32 %v4011_v16, 0.0  ;;  %5438 = vmatmul.mubr.msk.f32.gmra.mrb[22].mxu1 %vm3445_vm3, %v4169_v10  ;;  %v4107_v38 = vmax.f32 %v4043_v5, 0.0  ;;  %v4044_v58 = vadd.f32 %v13618_v35, %v3973_v0  ;;  %v3903_v56 = vmul.f32 %v13600_v4, %v13559_v12 }
 0x442   :  { %v4076_v62 = vmax.f32 %v4012_v49, 0.0  ;;  %v4138_v9 = vmin.f32 %v4074_v1, 6.0  ;;  %v4170_v28 = vmin.f32 %v4106_v51, 6.0  ;;  %v4013_v63 = vadd.f32 %v13618_v35, %v3942_v13 }
 0x443   :  { %v4139_v2 = vmin.f32 %v4075_v48, 6.0  ;;  %v4171_v47 = vmin.f32 %v4107_v38, 6.0  ;;  %v4108_v33 = vmax.f32 %v4044_v58, 0.0  ;;  %v3974_v39 = vmul.f32 %v13605_v6, %v3903_v56  ;;  %v5701_v58 = vld [vmem:[%s14611_s0 + $0x20] sm:$0xff] }
 0x444   :  { %v4140_v61 = vmin.f32 %v4076_v62, 6.0  ;;  %5392 = vmatprep.mubr.msk.f32.mxu0 %vm3445_vm3, %v4138_v9  ;;  %5440 = vmatprep.mubr.msk.f32.mxu1 %vm3445_vm3, %v4170_v28  ;;  %v4077_v27 = vmax.f32 %v4013_v63, 0.0  ;;  %v3872_v18 = vmul.f32 %v13600_v4, %v13342_v14  ;;  %v3904_v12 = vmul.f32 %v13600_v4, %v16988_v43  ;;  %v5703_v28 = vld [vmem:[%s14611_s0 + $0x1d0] sm:$0xff]  ;;  %v5704_v63 = vld [vmem:[%s14611_s0 + $0x1d8] sm:$0x3] }
 0x445   :  { %v3873_v29 = vmul.f32 %v13600_v4, %v16989_v26  ;;  %5393 = vmatmul.mubr.msk.f32.gmra.mrb[24].mxu0 %vm3445_vm3, %v4139_v2  ;;  %5441 = vmatmul.mubr.msk.f32.gmra.mrb[24].mxu1 %vm3445_vm3, %v4171_v47  ;;  %v4172_v36 = vmin.f32 %v4108_v33, 6.0  ;;  %v4045_v23 = vadd.f32 %v13618_v35, %v3974_v39  ;;  %v3905_v40 = vmul.f32 %v13600_v4, %v16990_v50  ;;  %v5706_v39 = vld [vmem:[%s14611_s0 + $0x1c8] sm:$0xff]  ;;  %v5707_v43 = vld [vmem:[%s14611_s0 + $0x38] sm:$0xff]  ;;  %v5708_v26 = vld [vmem:[%s14611_s0 + $0x40] sm:$0x3] }
 0x446   :  { %v3874_v60 = vmul.f32 %v13600_v4, %v16991_v11  ;;  %5395 = vmatprep.mubr.msk.f32.mxu0 %vm3445_vm3, %v4140_v61  ;;  %v4141_v14 = vmin.f32 %v4077_v27, 6.0  ;;  %v3943_v30 = vmul.f32 %v13605_v6, %v3872_v18  ;;  %v3975_v31 = vmul.f32 %v13605_v6, %v3904_v12  ;;  %v5705_v61 = vld [vmem:[%s14611_s0 + $0x18] sm:$0xff]  ;;  %v13953_v18 = vld [vmem:[%s14615_s6] ss:$0 sm:$0xff]  ;;  %v5710_v50 = vld [vmem:[%s14611_s0 + $0x1f0] sm:$0x3] }
 0x447   :  { %v3944_v54 = vmul.f32 %v13605_v6, %v3873_v29  ;;  %5443 = vmatprep.mubr.msk.f32.mxu1 %vm3445_vm3, %v4172_v36  ;;  %v4109_v42 = vmax.f32 %v4045_v23, 0.0  ;;  %v3976_v53 = vmul.f32 %v13605_v6, %v3905_v40  ;;  %v3906_v41 = vmul.f32 %v13600_v4, %v16992_v32  ;;  %v5709_v36 = vld [vmem:[%s14611_s0 + $0x1e8] sm:$0xff] }
 0x448   :  { %v3945_v7 = vmul.f32 %v13605_v6, %v3874_v60  ;;  %v4014_v3 = vadd.f32 %v13618_v35, %v3943_v30  ;;  %v4046_v46 = vadd.f32 %v13618_v35, %v3975_v31  ;;  %v3875_v34 = vmul.f32 %v13600_v4, %v16993_v25  ;;  %v5711_v31 = vld [vmem:[%s14611_s0 + $0x30] sm:$0xff] }
 0x449   :  { %v4015_v8 = vadd.f32 %v13618_v35, %v3944_v54  ;;  %5396 = vmatmul.mubr.msk.f32.gmra.mrb[26].mxu0 %vm3445_vm3, %v4141_v14  ;;  %v4173_v57 = vmin.f32 %v4109_v42, 6.0  ;;  %v4047_v37 = vadd.f32 %v13618_v35, %v3976_v53  ;;  %v3977_v22 = vmul.f32 %v13605_v6, %v3906_v41  ;;  %v5712_v42 = vld [vmem:[%s14611_s0 + $0x1e0] sm:$0xff] }
 0x44a   :  { %v4016_v24 = vadd.f32 %v13618_v35, %v3945_v7  ;;  %v4078_v59 = vmax.f32 %v4014_v3, 0.0  ;;  %v4110_v55 = vmax.f32 %v4046_v46, 0.0  ;;  %v3946_v52 = vmul.f32 %v13605_v6, %v3875_v34 }
 0x44b   :  { %v4079_v19 = vmax.f32 %v4015_v8, 0.0  ;;  %5444 = vmatmul.mubr.msk.f32.gmra.mrb[26].mxu1 %vm3445_vm3, %v4173_v57  ;;  %v4111_v17 = vmax.f32 %v4047_v37, 0.0  ;;  %v4048_v15 = vadd.f32 %v13618_v35, %v3977_v22  ;;  %v3907_v44 = vmul.f32 %v13600_v4, %v16994_v45  ;;  %v5713_v37 = vld [vmem:[%s14611_s0 + $0x50] sm:$0xff] }
 0x44c   :  { %v4080_v21 = vmax.f32 %v4016_v24, 0.0  ;;  %v4142_v16 = vmin.f32 %v4078_v59, 6.0  ;;  %v4174_v20 = vmin.f32 %v4110_v55, 6.0  ;;  %v4017_v5 = vadd.f32 %v13618_v35, %v3946_v52 }
 0x44d   :  { %v4143_v10 = vmin.f32 %v4079_v19, 6.0  ;;  %v4175_v49 = vmin.f32 %v4111_v17, 6.0  ;;  %v4112_v1 = vmax.f32 %v4048_v15, 0.0  ;;  %v3978_v51 = vmul.f32 %v13605_v6, %v3907_v44  ;;  %v5714_v19 = vld [vmem:[%s14611_s0 + $0x58] sm:$0x3] }
 0x44e   :  { %v4144_v0 = vmin.f32 %v4080_v21, 6.0  ;;  %5398 = vmatprep.mubr.msk.f32.mxu0 %vm3445_vm3, %v4142_v16  ;;  %5446 = vmatprep.mubr.msk.f32.mxu1 %vm3445_vm3, %v4174_v20  ;;  %v4081_v48 = vmax.f32 %v4017_v5, 0.0  ;;  %v4275_v56 = vrot.slane %v5701_v58, 1  ;;  %v4355_v2 = vrot.slane %v5703_v28, 1 }
 0x44f   :  { %5399 = vmatmul.mubr.msk.f32.gmra.mrb[28].mxu0 %vm3445_vm3, %v4143_v10  ;;  %5447 = vmatmul.mubr.msk.f32.gmra.mrb[28].mxu1 %vm3445_vm3, %v4175_v49  ;;  %v4176_v4 = vmin.f32 %v4112_v1, 6.0  ;;  %v4049_v13 = vadd.f32 %v13618_v35, %v3978_v51  ;;  %v5702_v35 = vld [vmem:[%s14611_s0 + $0x28] sm:$0x3]  ;;  %v4357_v47 = vrot.slane %v5704_v63, 1  ;;  %v4274_v33 = vrot.slane %v5705_v61, 1 }
 0x450   :  { %5401 = vmatprep.mubr.msk.f32.mxu0 %vm3445_vm3, %v4144_v0  ;;  %v4145_v38 = vmin.f32 %v4081_v48, 6.0  ;;  %v4277_v9 = vrot.slane %v5702_v35, 1  ;;  %v4354_v27 = vrot.slane %v5706_v39, 1  ;;  %v4280_v12 = vrot.slane %v5707_v43, 1  ;;  %v5715_v0 = vld [vmem:[%s14611_s0 + $0x200] sm:$0xff] }
 0x451   :  { %5449 = vmatprep.mubr.msk.f32.mxu1 %vm3445_vm3, %v4176_v4  ;;  %v4113_v62 = vmax.f32 %v4049_v13, 0.0  ;;  %v4282_v29 = vrot.slane %v5708_v26, 1  ;;  %v4360_v23 = vrot.slane %v5709_v36, 1  ;;  %v4362_v40 = vrot.slane %v5710_v50, 1  ;;  %v5716_v51 = vld [vmem:[%s14611_s0 + $0x208] sm:$0x3] }
 0x452   :  { %v4278_v11 = vsel %vm400_vm1, %v4275_v56, %v4277_v9  ;;  %v4358_v14 = vsel %vm400_vm1, %v4355_v2, %v4357_v47  ;;  %v4279_v54 = vrot.slane %v5711_v31, 1  ;;  %v4359_v53 = vrot.slane %v5712_v42, 1  ;;  %v5720_v47 = vld [vmem:[%s14611_s0 + $0x70] sm:$0x3]  ;;  %v5721_v26 = vld [vmem:[%s14611_s0 + $0x218] sm:$0xff]  ;;  %v5723_v50 = vld [vmem:[%s14611_s0 + $0x60] sm:$0xff] }
 0x453   :  { %5402 = vmatmul.mubr.msk.f32.gmra.mrb[30].mxu0 %vm3445_vm3, %v4145_v38  ;;  %v4177_v6 = vmin.f32 %v4113_v62, 6.0  ;;  %v4276_v41 = vsel %vm400_vm1, %v4274_v33, %v4275_v56  ;;  %v4356_v46 = vsel %vm400_vm1, %v4354_v27, %v4355_v2  ;;  %v4283_v57 = vsel %vm400_vm1, %v4280_v12, %v4282_v29  ;;  %v5717_v38 = vld [vmem:[%s14611_s0 + $0x48] sm:$0xff]  ;;  %v5718_v56 = vld [vmem:[%s14611_s0 + $0x1f8] sm:$0xff]  ;;  %v5722_v36 = vld [vmem:[%s14611_s0 + $0x220] sm:$0x3] }
 0x454   :  { %v4285_v24 = vrot.slane %v5713_v37, 1  ;;  %v4363_v55 = vsel %vm400_vm1, %v4360_v23, %v4362_v40  ;;  %v4287_v52 = vrot.slane %v5714_v19, 1  ;;  %v4281_v44 = vsel %vm400_vm1, %v4279_v54, %v4280_v12  ;;  %v5719_v2 = vld [vmem:[%s14611_s0 + $0x68] sm:$0xff]  ;;  %v5724_v54 = vld [vmem:[%s14611_s0 + $0x210] sm:$0xff] }
 0x455   :  { %5450 = vmatmul.mubr.msk.f32.gmra.mrb[30].mxu1 %vm3445_vm3, %v4177_v6  ;;  %v4361_v16 = vsel %vm400_vm1, %v4359_v53, %v4360_v23  ;;  %v4365_v1 = vrot.slane %v5715_v0, 1  ;;  %v4367_v48 = vrot.slane %v5716_v51, 1  ;;  %v4284_v62 = vrot.slane %v5717_v38, 1 }
 0x456   :  { %v4364_v35 = vrot.slane %v5718_v56, 1  ;;  %v4290_v63 = vrot.slane %v5719_v2, 1  ;;  %v4292_v61 = vrot.slane %v5720_v47, 1  ;;  %v4288_v33 = vsel %vm400_vm1, %v4285_v24, %v4287_v52 }
 0x457   :  { %v4368_v39 = vsel %vm400_vm1, %v4365_v1, %v4367_v48  ;;  %v4286_v12 = vsel %vm400_vm1, %v4284_v62, %v4285_v24  ;;  %v4370_v29 = vrot.slane %v5721_v26, 1  ;;  %v4372_v23 = vrot.slane %v5722_v36, 1  ;;  %v5730_v48 = vld [vmem:[%s14611_s0 + $0x228] sm:$0xff]  ;;  %v5731_v62 = vld [vmem:[%s14611_s0 + $0x98] sm:$0xff] }
 0x458   :  { %v4289_v40 = vrot.slane %v5723_v50, 1  ;;  %v4369_v42 = vrot.slane %v5724_v54, 1  ;;  %v5734_v36 = vld [vmem:[%s14611_s0 + $0x248] sm:$0xff]  ;;  %v5735_v50 = vld [vmem:[%s14611_s0 + $0x250] sm:$0x3] }
 0x4dd   :  { %v5358_v60 = vpop.f32.mrb[0].mxu0  ;;  %v5406_v30 = vpop.f32.mrb[0].mxu1 }
 0x4de   :  { %v4774_v7 = vadd.f32 %v5358_v60, %v13953_v18  ;;  %v4934_v32 = vadd.f32 %v5406_v30, %v13953_v18  ;;  %v4768_v3 = vpop.f32.mrb[1].mxu0  ;;  %v4928_v8 = vpop.f32.mrb[1].mxu1  ;;  %v4366_v30 = vsel %vm400_vm1, %v4364_v35, %v4365_v1 }
 0x4df   :  { %v4769_v25 = vadd.f32 %v13953_v18, %v4768_v3  ;;  %v4929_v34 = vadd.f32 %v13953_v18, %v4928_v8 }
 0x4e0   :  { %v5088_v22 = vadd.f32 %v4774_v7, %v4278_v11  ;;  %v5120_v59 = vadd.f32 %v4934_v32, %v4358_v14  ;;  %v4293_v32 = vsel %vm400_vm1, %v4290_v63, %v4292_v61 }
 0x4e1   :  { %v5087_v17 = vadd.f32 %v4769_v25, %v4276_v41  ;;  %v5119_v21 = vadd.f32 %v4929_v34, %v4356_v46  ;;  %v5361_v15 = vpop.f32.mrb[2].mxu0  ;;  %v5409_v45 = vpop.f32.mrb[2].mxu1  ;;  %v5725_v46 = vld [vmem:[%s14611_s0 + $0x80] sm:$0xff]  ;;  %v5726_v25 = vld [vmem:[%s14611_s0 + $0x88] sm:$0x3] }
 0x4e2   :  { %5152 = vst.msk [vmem:[%s14616_s7 + $0x8] sm:$0xff] %vm3445_vm3, %v5088_v22  ;;  %5184 = vst.msk [vmem:[%s14616_s7 + $0x108] sm:$0xff] %vm3445_vm3, %v5120_v59  ;;  %v4784_v20 = vadd.f32 %v5361_v15, %v13953_v18  ;;  %v4944_v10 = vadd.f32 %v5409_v45, %v13953_v18  ;;  %v4778_v5 = vpop.f32.mrb[3].mxu0  ;;  %v4938_v49 = vpop.f32.mrb[3].mxu1  ;;  %v4295_v8 = vrot.slane %v5725_v46, 1  ;;  %v4297_v34 = vrot.slane %v5726_v25, 1 }
 0x4e3   :  { %5151 = vst.msk [vmem:[%s14616_s7] sm:$0xff] %vm3445_vm3, %v5087_v17  ;;  %5183 = vst.msk [vmem:[%s14616_s7 + $0x100] sm:$0xff] %vm3445_vm3, %v5119_v21  ;;  %v4779_v4 = vadd.f32 %v13953_v18, %v4778_v5  ;;  %v4939_v13 = vadd.f32 %v13953_v18, %v4938_v49  ;;  %v4373_v22 = vsel %vm400_vm1, %v4370_v29, %v4372_v23  ;;  %v5727_v45 = vld [vmem:[%s14611_s0 + $0x230] sm:$0xff]  ;;  %v5729_v49 = vld [vmem:[%s14611_s0 + $0x78] sm:$0xff]  ;;  %v4380_v23 = vrot.slane %v5734_v36, 1 }
 0x4e4   :  { %v5090_v6 = vadd.f32 %v4784_v20, %v4283_v57  ;;  %v5122_v58 = vadd.f32 %v4944_v10, %v4363_v55  ;;  %v4291_v55 = vsel %vm400_vm1, %v4289_v40, %v4290_v63  ;;  %v4371_v21 = vsel %vm400_vm1, %v4369_v42, %v4370_v29  ;;  %v5728_v10 = vld [vmem:[%s14611_s0 + $0x238] sm:$0x3] }
 0x4e5   :  { %v5089_v9 = vadd.f32 %v4779_v4, %v4281_v44  ;;  %v5121_v28 = vadd.f32 %v4939_v13, %v4361_v16  ;;  %v4375_v44 = vrot.slane %v5727_v45, 1  ;;  %v4377_v5 = vrot.slane %v5728_v10, 1 }
 0x4e6   :  { %5154 = vst.msk [vmem:[%s14616_s7 + $0x18] sm:$0xff] %vm3445_vm3, %v5090_v6  ;;  %5186 = vst.msk [vmem:[%s14616_s7 + $0x118] sm:$0xff] %vm3445_vm3, %v5122_v58  ;;  %v5364_v27 = vpop.f32.mrb[4].mxu0  ;;  %v4294_v0 = vrot.slane %v5729_v49, 1  ;;  %v4374_v4 = vrot.slane %v5730_v48, 1  ;;  %v4300_v6 = vrot.slane %v5731_v62, 1  ;;  %v4298_v35 = vsel %vm400_vm1, %v4295_v8, %v4297_v34 }
 0x4e7   :  { %5153 = vst.msk [vmem:[%s14616_s7 + $0x10] sm:$0xff] %vm3445_vm3, %v5089_v9  ;;  %5185 = vst.msk [vmem:[%s14616_s7 + $0x110] sm:$0xff] %vm3445_vm3, %v5121_v28  ;;  %v5412_v43 = vpop.f32.mrb[4].mxu1  ;;  %v4794_v11 = vadd.f32 %v5364_v27, %v13953_v18  ;;  %v4788_v14 = vpop.f32.mrb[5].mxu0  ;;  %v5732_v58 = vld [vmem:[%s14611_s0 + $0xa0] sm:$0x3]  ;;  %v4378_v28 = vsel %vm400_vm1, %v4375_v44, %v4377_v5 }
 0x4e8   :  { %v4954_v60 = vadd.f32 %v5412_v43, %v13953_v18  ;;  %v4948_v31 = vpop.f32.mrb[5].mxu1  ;;  %v4789_v53 = vadd.f32 %v13953_v18, %v4788_v14  ;;  %v4302_v56 = vrot.slane %v5732_v58, 1  ;;  %v4296_v63 = vsel %vm400_vm1, %v4294_v0, %v4295_v8  ;;  %v5733_v43 = vld [vmem:[%s14611_s0 + $0x90] sm:$0xff]  ;;  %v5739_v34 = vld [vmem:[%s14611_s0 + $0x260] sm:$0xff]  ;;  %v5745_v58 = vld [vmem:[%s14611_s0 + $0x278] sm:$0xff] }
 0x4e9   :  { %v4949_v7 = vadd.f32 %v13953_v18, %v4948_v31  ;;  %v5092_v41 = vadd.f32 %v4794_v11, %v4288_v33  ;;  %v4382_v40 = vrot.slane %v5735_v50, 1  ;;  %v5744_v48 = vld [vmem:[%s14611_s0 + $0xd0] sm:$0x3] }
 0x4ea   :  { %v5124_v3 = vadd.f32 %v4954_v60, %v4368_v39  ;;  %v5091_v57 = vadd.f32 %v4789_v53, %v4286_v12  ;;  %v5367_v24 = vpop.f32.mrb[6].mxu0  ;;  %v4376_v39 = vsel %vm400_vm1, %v4374_v4, %v4375_v44  ;;  %v4299_v12 = vrot.slane %v5733_v43, 1  ;;  %v5742_v44 = vld [vmem:[%s14611_s0 + $0x258] sm:$0xff] }
 0x4eb   :  { %v5123_v37 = vadd.f32 %v4949_v7, %v4366_v30  ;;  %v5415_v59 = vpop.f32.mrb[6].mxu1  ;;  %5156 = vst.msk [vmem:[%s14616_s7 + $0x28] sm:$0xff] %vm3445_vm3, %v5092_v41  ;;  %v4804_v19 = vadd.f32 %v5367_v24, %v13953_v18  ;;  %v4798_v17 = vpop.f32.mrb[7].mxu0  ;;  %v4303_v14 = vsel %vm400_vm1, %v4300_v6, %v4302_v56  ;;  %v5736_v30 = vld [vmem:[%s14611_s0 + $0x240] sm:$0xff]  ;;  %v5737_v7 = vld [vmem:[%s14611_s0 + $0xb0] sm:$0xff]  ;;  %v4312_v4 = vrot.slane %v5744_v48, 1 }
 0x4ec   :  { %5188 = vst.msk [vmem:[%s14616_s7 + $0x128] sm:$0xff] %vm3445_vm3, %v5124_v3  ;;  %v4964_v52 = vadd.f32 %v5415_v59, %v13953_v18  ;;  %v4958_v15 = vpop.f32.mrb[7].mxu1  ;;  %5155 = vst.msk [vmem:[%s14616_s7 + $0x20] sm:$0xff] %vm3445_vm3, %v5091_v57  ;;  %v4799_v16 = vadd.f32 %v13953_v18, %v4798_v17  ;;  %v4379_v31 = vrot.slane %v5736_v30, 1  ;;  %v5738_v41 = vld [vmem:[%s14611_s0 + $0xb8] sm:$0x3]  ;;  %v4301_v8 = vsel %vm400_vm1, %v4299_v12, %v4300_v6 }
 0x4ed   :  { %5187 = vst.msk [vmem:[%s14616_s7 + $0x120] sm:$0xff] %vm3445_vm3, %v5123_v37  ;;  %v4959_v20 = vadd.f32 %v13953_v18, %v4958_v15  ;;  %v5094_v1 = vadd.f32 %v4804_v19, %v4293_v32  ;;  %v4305_v32 = vrot.slane %v5737_v7, 1  ;;  %v4307_v3 = vrot.slane %v5738_v41, 1  ;;  %v5740_v37 = vld [vmem:[%s14611_s0 + $0x268] sm:$0x3] }
 0x4ee   :  { %v5126_v51 = vadd.f32 %v4964_v52, %v4373_v22  ;;  %v5093_v13 = vadd.f32 %v4799_v16, %v4291_v55  ;;  %v4385_v57 = vrot.slane %v5739_v34, 1  ;;  %v4387_v24 = vrot.slane %v5740_v37, 1  ;;  %v5741_v19 = vld [vmem:[%s14611_s0 + $0xa8] sm:$0xff]  ;;  %v5753_v34 = vld [vmem:[%s14611_s0 + $0xd8] sm:$0xff] }
 0x4ef   :  { %v5125_v38 = vadd.f32 %v4959_v20, %v4371_v21  ;;  %5158 = vst.msk [vmem:[%s14616_s7 + $0x38] sm:$0xff] %vm3445_vm3, %v5094_v1  ;;  %v4383_v22 = vsel %vm400_vm1, %v4380_v23, %v4382_v40  ;;  %v4304_v52 = vrot.slane %v5741_v19, 1  ;;  %v4381_v15 = vsel %vm400_vm1, %v4379_v31, %v4380_v23  ;;  %v5743_v1 = vld [vmem:[%s14611_s0 + $0xc8] sm:$0xff] }
 0x4f0   :  { %5190 = vst.msk [vmem:[%s14616_s7 + $0x138] sm:$0xff] %vm3445_vm3, %v5126_v51  ;;  %5157 = vst.msk [vmem:[%s14616_s7 + $0x30] sm:$0xff] %vm3445_vm3, %v5093_v13  ;;  %v5370_v9 = vpop.f32.mrb[8].mxu0  ;;  %v4384_v16 = vrot.slane %v5742_v44, 1  ;;  %v4308_v5 = vsel %vm400_vm1, %v4305_v32, %v4307_v3  ;;  %v4388_v0 = vsel %vm400_vm1, %v4385_v57, %v4387_v24  ;;  %v4310_v51 = vrot.slane %v5743_v1, 1  ;;  %v5751_v3 = vld [vmem:[%s14611_s0 + $0x290] sm:$0xff] }
 0x4f1   :  { %5189 = vst.msk [vmem:[%s14616_s7 + $0x130] sm:$0xff] %vm3445_vm3, %v5125_v38  ;;  %v5418_v2 = vpop.f32.mrb[8].mxu1  ;;  %v4814_v47 = vadd.f32 %v5370_v9, %v13953_v18  ;;  %v4808_v33 = vpop.f32.mrb[9].mxu0  ;;  %v4306_v6 = vsel %vm400_vm1, %v4304_v52, %v4305_v32  ;;  %v4390_v56 = vrot.slane %v5745_v58, 1  ;;  %v5756_v44 = vld [vmem:[%s14611_s0 + $0x100] sm:$0x3] }
 0x4f2   :  { %v4974_v61 = vadd.f32 %v5418_v2, %v13953_v18  ;;  %v4968_v27 = vpop.f32.mrb[9].mxu1  ;;  %v4809_v26 = vadd.f32 %v13953_v18, %v4808_v33  ;;  %v5747_v33 = vld [vmem:[%s14611_s0 + $0xc0] sm:$0xff]  ;;  %v4313_v40 = vsel %vm400_vm1, %v4310_v51, %v4312_v4 }
 0x4f3   :  { %v4969_v29 = vadd.f32 %v13953_v18, %v4968_v27  ;;  %v5096_v11 = vadd.f32 %v4814_v47, %v4298_v35  ;;  %v5746_v35 = vld [vmem:[%s14611_s0 + $0x280] sm:$0x3]  ;;  %v4386_v47 = vsel %vm400_vm1, %v4384_v16, %v4385_v57  ;;  %v4314_v57 = vrot.slane %v5753_v34, 1 }
 0x4f4   :  { %v5128_v60 = vadd.f32 %v4974_v61, %v4378_v28  ;;  %v5095_v54 = vadd.f32 %v4809_v26, %v4296_v63  ;;  %v5373_v53 = vpop.f32.mrb[10].mxu0  ;;  %v4392_v9 = vrot.slane %v5746_v35, 1  ;;  %v4322_v16 = vrot.slane %v5756_v44, 1  ;;  %v5758_v35 = vld [vmem:[%s14611_s0 + $0x2a8] sm:$0xff] }
 0x4f5   :  { %v5127_v42 = vadd.f32 %v4969_v29, %v4376_v39  ;;  %5160 = vst.msk [vmem:[%s14616_s7 + $0x48] sm:$0xff] %vm3445_vm3, %v5096_v11  ;;  %v4824_v46 = vadd.f32 %v5373_v53, %v13953_v18  ;;  %v4818_v25 = vpop.f32.mrb[11].mxu0  ;;  %v4309_v39 = vrot.slane %v5747_v33, 1  ;;  %v5748_v29 = vld [vmem:[%s14611_s0 + $0x270] sm:$0xff]  ;;  %v5750_v53 = vld [vmem:[%s14611_s0 + $0xe8] sm:$0x3] }
 0x4f6   :  { %5192 = vst.msk [vmem:[%s14616_s7 + $0x148] sm:$0xff] %vm3445_vm3, %v5128_v60  ;;  %5159 = vst.msk [vmem:[%s14616_s7 + $0x40] sm:$0xff] %vm3445_vm3, %v5095_v54  ;;  %v5421_v59 = vpop.f32.mrb[10].mxu1  ;;  %v4819_v55 = vadd.f32 %v13953_v18, %v4818_v25  ;;  %v4389_v36 = vrot.slane %v5748_v29, 1  ;;  %v4393_v60 = vsel %vm400_vm1, %v4390_v56, %v4392_v9  ;;  %v5749_v54 = vld [vmem:[%s14611_s0 + $0xe0] sm:$0xff]  ;;  %v4317_v7 = vrot.slane %v5750_v53, 1 }
 0x4f7   :  { %5191 = vst.msk [vmem:[%s14616_s7 + $0x140] sm:$0xff] %vm3445_vm3, %v5127_v42  ;;  %v5098_v17 = vadd.f32 %v4824_v46, %v4303_v14  ;;  %v4984_v21 = vadd.f32 %v5421_v59, %v13953_v18  ;;  %v4978_v45 = vpop.f32.mrb[11].mxu1  ;;  %v4311_v30 = vsel %vm400_vm1, %v4309_v39, %v4310_v51  ;;  %v4315_v42 = vrot.slane %v5749_v54, 1  ;;  %v5760_v33 = vld [vmem:[%s14611_s0 + $0x2a0] sm:$0xff] }
 0x4f8   :  { %v5097_v20 = vadd.f32 %v4819_v55, %v4301_v8  ;;  %v4979_v10 = vadd.f32 %v13953_v18, %v4978_v45  ;;  %v4395_v46 = vrot.slane %v5751_v3, 1  ;;  %v5752_v8 = vld [vmem:[%s14611_s0 + $0x298] sm:$0x3]  ;;  %v5754_v55 = vld [vmem:[%s14611_s0 + $0x288] sm:$0xff]  ;;  %v4400_v9 = vrot.slane %v5758_v35, 1 }
 0x4f9   :  { %5162 = vst.msk [vmem:[%s14616_s7 + $0x58] sm:$0xff] %vm3445_vm3, %v5098_v17  ;;  %v5130_v49 = vadd.f32 %v4984_v21, %v4383_v22  ;;  %v4397_v25 = vrot.slane %v5752_v8, 1  ;;  %v4391_v22 = vsel %vm400_vm1, %v4389_v36, %v4390_v56  ;;  %v4394_v19 = vrot.slane %v5754_v55, 1  ;;  %v5762_v36 = vld [vmem:[%s14611_s0 + $0x118] sm:$0x3]  ;;  %v5767_v55 = vld [vmem:[%s14611_s0 + $0x128] sm:$0xff] }
 0x4fa   :  { %5161 = vst.msk [vmem:[%s14616_s7 + $0x50] sm:$0xff] %vm3445_vm3, %v5097_v20  ;;  %v5129_v13 = vadd.f32 %v4979_v10, %v4381_v15  ;;  %v5376_v38 = vpop.f32.mrb[12].mxu0  ;;  %v5424_v62 = vpop.f32.mrb[12].mxu1  ;;  %v5755_v15 = vld [vmem:[%s14611_s0 + $0xf8] sm:$0xff]  ;;  %v4318_v10 = vsel %vm400_vm1, %v4315_v42, %v4317_v7  ;;  %v4316_v1 = vsel %vm400_vm1, %v4314_v57, %v4315_v42  ;;  %v4399_v39 = vrot.slane %v5760_v33, 1  ;;  %v5765_v7 = vld [vmem:[%s14611_s0 + $0x108] sm:$0xff] }
 0x4fb   :  { %5194 = vst.msk [vmem:[%s14616_s7 + $0x158] sm:$0xff] %vm3445_vm3, %v5130_v49  ;;  %v4834_v28 = vadd.f32 %v5376_v38, %v13953_v18  ;;  %v4994_v2 = vadd.f32 %v5424_v62, %v13953_v18  ;;  %v4828_v63 = vpop.f32.mrb[13].mxu0  ;;  %v4988_v61 = vpop.f32.mrb[13].mxu1  ;;  %v4320_v45 = vrot.slane %v5755_v15, 1  ;;  %v4398_v49 = vsel %vm400_vm1, %v4395_v46, %v4397_v25  ;;  %v5757_v62 = vld [vmem:[%s14611_s0 + $0xf0] sm:$0xff]  ;;  %v5766_v25 = vld [vmem:[%s14611_s0 + $0x2b8] sm:$0xff] }
 0x4fc   :  { %5193 = vst.msk [vmem:[%s14616_s7 + $0x150] sm:$0xff] %vm3445_vm3, %v5129_v13  ;;  %v4829_v27 = vadd.f32 %v13953_v18, %v4828_v63  ;;  %v4989_v43 = vadd.f32 %v13953_v18, %v4988_v61  ;;  %v4396_v13 = vsel %vm400_vm1, %v4394_v19, %v4395_v46  ;;  %v4401_v46 = vsel %vm400_vm1, %v4399_v39, %v4400_v9 }
 0x4fd   :  { %v5100_v12 = vadd.f32 %v4834_v28, %v4308_v5  ;;  %v5132_v26 = vadd.f32 %v4994_v2, %v4388_v0  ;;  %v5759_v28 = vld [vmem:[%s14611_s0 + $0x2b0] sm:$0x3]  ;;  %v4323_v61 = vsel %vm400_vm1, %v4320_v45, %v4322_v16  ;;  %v4404_v34 = vrot.slane %v5766_v25, 1  ;;  %v5769_v16 = vld [vmem:[%s14611_s0 + $0x2d8] sm:$0xff]  ;;  %v5780_v25 = vld [vmem:[%s14611_s0 + $0x160] sm:$0x3] }
 0x4fe   :  { %v5099_v23 = vadd.f32 %v4829_v27, %v4306_v6  ;;  %v5131_v50 = vadd.f32 %v4989_v43, %v4386_v47  ;;  %v5379_v11 = vpop.f32.mrb[14].mxu0  ;;  %v4319_v6 = vrot.slane %v5757_v62, 1  ;;  %v4402_v2 = vrot.slane %v5759_v28, 1 }
 0x4ff   :  { %5164 = vst.msk [vmem:[%s14616_s7 + $0x68] sm:$0xff] %vm3445_vm3, %v5100_v12  ;;  %5196 = vst.msk [vmem:[%s14616_s7 + $0x168] sm:$0xff] %vm3445_vm3, %v5132_v26  ;;  %v4844_v14 = vadd.f32 %v5379_v11, %v13953_v18  ;;  %v4838_v31 = vpop.f32.mrb[15].mxu0  ;;  %v5761_v26 = vld [vmem:[%s14611_s0 + $0x110] sm:$0xff]  ;;  %v4330_v19 = vrot.slane %v5767_v55, 1 }
 0x500   :  { %5163 = vst.msk [vmem:[%s14616_s7 + $0x60] sm:$0xff] %vm3445_vm3, %v5099_v23  ;;  %5195 = vst.msk [vmem:[%s14616_s7 + $0x160] sm:$0xff] %vm3445_vm3, %v5131_v50  ;;  %v5427_v32 = vpop.f32.mrb[14].mxu1  ;;  %v4839_v41 = vadd.f32 %v13953_v18, %v4838_v31  ;;  %v4325_v29 = vrot.slane %v5761_v26, 1  ;;  %v4327_v23 = vrot.slane %v5762_v36, 1  ;;  %v4403_v54 = vsel %vm400_vm1, %v4400_v9, %v4402_v2  ;;  %v5781_v55 = vld [vmem:[%s14611_s0 + $0x150] sm:$0xff] }
 0x501   :  { %v5102_v37 = vadd.f32 %v4844_v14, %v4313_v40  ;;  %v5004_v24 = vadd.f32 %v5427_v32, %v13953_v18  ;;  %v4998_v59 = vpop.f32.mrb[15].mxu1  ;;  %v4321_v40 = vsel %vm400_vm1, %v4319_v6, %v4320_v45  ;;  %v4324_v32 = vrot.slane %v5765_v7, 1  ;;  %v5772_v6 = vld [vmem:[%s14611_s0 + $0x2d0] sm:$0xff] }
 0x502   :  { %v5101_v52 = vadd.f32 %v4839_v41, %v4311_v30  ;;  %v4999_v17 = vadd.f32 %v13953_v18, %v4998_v59  ;;  %v5764_v30 = vld [vmem:[%s14611_s0 + $0x2c8] sm:$0x3] }
 0x503   :  { %5166 = vst.msk [vmem:[%s14616_s7 + $0x78] sm:$0xff] %vm3445_vm3, %v5102_v37  ;;  %v5134_v21 = vadd.f32 %v5004_v24, %v4393_v60  ;;  %v5763_v60 = vld [vmem:[%s14611_s0 + $0x2c0] sm:$0xff]  ;;  %v4407_v31 = vrot.slane %v5764_v30, 1  ;;  %v4328_v24 = vsel %vm400_vm1, %v4325_v29, %v4327_v23  ;;  %v4326_v44 = vsel %vm400_vm1, %v4324_v32, %v4325_v29 }
 0x504   :  { %5165 = vst.msk [vmem:[%s14616_s7 + $0x70] sm:$0xff] %vm3445_vm3, %v5101_v52  ;;  %v5133_v20 = vadd.f32 %v4999_v17, %v4391_v22  ;;  %v5382_v5 = vpop.f32.mrb[16].mxu0  ;;  %v5430_v0 = vpop.f32.mrb[16].mxu1  ;;  %v4405_v14 = vrot.slane %v5763_v60, 1  ;;  %v5768_v52 = vld [vmem:[%s14611_s0 + $0x130] sm:$0x3] }
 0x505   :  { %5198 = vst.msk [vmem:[%s14616_s7 + $0x178] sm:$0xff] %vm3445_vm3, %v5134_v21  ;;  %v4854_v51 = vadd.f32 %v5382_v5, %v13953_v18  ;;  %v5014_v48 = vadd.f32 %v5430_v0, %v13953_v18  ;;  %v4848_v4 = vpop.f32.mrb[17].mxu0  ;;  %v5008_v38 = vpop.f32.mrb[17].mxu1  ;;  %v4332_v17 = vrot.slane %v5768_v52, 1 }
 0x506   :  { %5197 = vst.msk [vmem:[%s14616_s7 + $0x170] sm:$0xff] %vm3445_vm3, %v5133_v20  ;;  %v4849_v58 = vadd.f32 %v13953_v18, %v4848_v4  ;;  %v5009_v56 = vadd.f32 %v13953_v18, %v5008_v38  ;;  %v4408_v59 = vsel %vm400_vm1, %v4405_v14, %v4407_v31  ;;  %v4410_v20 = vrot.slane %v5769_v16, 1  ;;  %v5771_v4 = vld [vmem:[%s14611_s0 + $0x120] sm:$0xff] }
 0x507   :  { %v5104_v63 = vadd.f32 %v4854_v51, %v4318_v10  ;;  %v5136_v47 = vadd.f32 %v5014_v48, %v4398_v49  ;;  %v5770_v10 = vld [vmem:[%s14611_s0 + $0x2e0] sm:$0x3]  ;;  %v4406_v51 = vsel %vm400_vm1, %v4404_v34, %v4405_v14  ;;  %v4333_v2 = vsel %vm400_vm1, %v4330_v19, %v4332_v17 }
 0x508   :  { %v5103_v27 = vadd.f32 %v4849_v58, %v4316_v1  ;;  %v5135_v43 = vadd.f32 %v5009_v56, %v4396_v13  ;;  %v5385_v12 = vpop.f32.mrb[18].mxu0  ;;  %v4412_v5 = vrot.slane %v5770_v10, 1  ;;  %v4329_v13 = vrot.slane %v5771_v4, 1  ;;  %v5782_v10 = vld [vmem:[%s14611_s0 + $0x308] sm:$0xff]  ;;  %v5784_v4 = vld [vmem:[%s14611_s0 + $0x300] sm:$0xff] }
 0x509   :  { %5168 = vst.msk [vmem:[%s14616_s7 + $0x88] sm:$0xff] %vm3445_vm3, %v5104_v63  ;;  %5200 = vst.msk [vmem:[%s14616_s7 + $0x188] sm:$0xff] %vm3445_vm3, %v5136_v47  ;;  %v4864_v50 = vadd.f32 %v5385_v12, %v13953_v18  ;;  %v4858_v11 = vpop.f32.mrb[19].mxu0  ;;  %v4409_v58 = vrot.slane %v5772_v6, 1  ;;  %v5774_v12 = vld [vmem:[%s14611_s0 + $0x148] sm:$0x3] }
 0x50a   :  { %5167 = vst.msk [vmem:[%s14616_s7 + $0x80] sm:$0xff] %vm3445_vm3, %v5103_v27  ;;  %5199 = vst.msk [vmem:[%s14616_s7 + $0x180] sm:$0xff] %vm3445_vm3, %v5135_v43  ;;  %v5433_v42 = vpop.f32.mrb[18].mxu1  ;;  %v4859_v53 = vadd.f32 %v13953_v18, %v4858_v11  ;;  %v4413_v47 = vsel %vm400_vm1, %v4410_v20, %v4412_v5  ;;  %v4331_v33 = vsel %vm400_vm1, %v4329_v13, %v4330_v19  ;;  %v5773_v27 = vld [vmem:[%s14611_s0 + $0x140] sm:$0xff]  ;;  %v4337_v26 = vrot.slane %v5774_v12, 1 }
 0x50b   :  { %v5106_v41 = vadd.f32 %v4864_v50, %v4323_v61  ;;  %v5024_v3 = vadd.f32 %v5433_v42, %v13953_v18  ;;  %v5018_v8 = vpop.f32.mrb[19].mxu1  ;;  %v4335_v43 = vrot.slane %v5773_v27, 1  ;;  %v4411_v23 = vsel %vm400_vm1, %v4409_v58, %v4410_v20  ;;  %v5775_v50 = vld [vmem:[%s14611_s0 + $0x2f0] sm:$0xff]  ;;  %v5776_v11 = vld [vmem:[%s14611_s0 + $0x2f8] sm:$0x3] }
 0x50c   :  { %v5105_v57 = vadd.f32 %v4859_v53, %v4321_v40  ;;  %v5019_v37 = vadd.f32 %v13953_v18, %v5018_v8  ;;  %v4415_v40 = vrot.slane %v5775_v50, 1  ;;  %v4417_v60 = vrot.slane %v5776_v11, 1  ;;  %v5778_v53 = vld [vmem:[%s14611_s0 + $0x2e8] sm:$0xff]  ;;  %v5790_v11 = vld [vmem:[%s14611_s0 + $0x318] sm:$0xff] }
 0x50d   :  { %5170 = vst.msk [vmem:[%s14616_s7 + $0x98] sm:$0xff] %vm3445_vm3, %v5106_v41  ;;  %v5138_v22 = vadd.f32 %v5024_v3, %v4403_v54  ;;  %v5777_v54 = vld [vmem:[%s14611_s0 + $0x138] sm:$0xff]  ;;  %v4414_v7 = vrot.slane %v5778_v53, 1  ;;  %v4342_v34 = vrot.slane %v5780_v25, 1  ;;  %v4339_v19 = vrot.slane %v5781_v55, 1 }
 0x50e   :  { %5169 = vst.msk [vmem:[%s14616_s7 + $0x90] sm:$0xff] %vm3445_vm3, %v5105_v57  ;;  %v5137_v21 = vadd.f32 %v5019_v37, %v4401_v46  ;;  %v5388_v15 = vpop.f32.mrb[20].mxu0  ;;  %v5436_v45 = vpop.f32.mrb[20].mxu1  ;;  %v4334_v42 = vrot.slane %v5777_v54, 1  ;;  %v5779_v46 = vld [vmem:[%s14611_s0 + $0x158] sm:$0xff]  ;;  %v4338_v37 = vsel %vm400_vm1, %v4335_v43, %v4337_v26  ;;  %v4420_v5 = vrot.slane %v5782_v10, 1 }
 0x50f   :  { %5202 = vst.msk [vmem:[%s14616_s7 + $0x198] sm:$0xff] %vm3445_vm3, %v5138_v22  ;;  %v4874_v49 = vadd.f32 %v5388_v15, %v13953_v18  ;;  %v5034_v0 = vadd.f32 %v5436_v45, %v13953_v18  ;;  %v4868_v1 = vpop.f32.mrb[21].mxu0  ;;  %v5028_v48 = vpop.f32.mrb[21].mxu1  ;;  %v4340_v8 = vrot.slane %v5779_v46, 1  ;;  %v4418_v22 = vsel %vm400_vm1, %v4415_v40, %v4417_v60  ;;  %v5789_v26 = vld [vmem:[%s14611_s0 + $0x168] sm:$0xff] }
 0x510   :  { %5201 = vst.msk [vmem:[%s14616_s7 + $0x190] sm:$0xff] %vm3445_vm3, %v5137_v21  ;;  %v4869_v38 = vadd.f32 %v13953_v18, %v4868_v1  ;;  %v5029_v62 = vadd.f32 %v13953_v18, %v5028_v48  ;;  %v4336_v21 = vsel %vm400_vm1, %v4334_v42, %v4335_v43  ;;  %v4416_v45 = vsel %vm400_vm1, %v4414_v7, %v4415_v40 }
 0x511   :  { %v5108_v56 = vadd.f32 %v4874_v49, %v4328_v24  ;;  %v5140_v35 = vadd.f32 %v5034_v0, %v4408_v59  ;;  %v5783_v49 = vld [vmem:[%s14611_s0 + $0x310] sm:$0x3]  ;;  %v4343_v48 = vsel %vm400_vm1, %v4340_v8, %v4342_v34  ;;  %v4419_v13 = vrot.slane %v5784_v4, 1 }
 0x512   :  { %v5107_v9 = vadd.f32 %v4869_v38, %v4326_v44  ;;  %v5139_v28 = vadd.f32 %v5029_v62, %v4406_v51  ;;  %v5391_v63 = vpop.f32.mrb[22].mxu0  ;;  %v4422_v0 = vrot.slane %v5783_v49, 1  ;;  %v4341_v58 = vsel %vm400_vm1, %v4339_v19, %v4340_v8  ;;  %v5792_v8 = vld [vmem:[%s14611_s0 + $0x190] sm:$0x3] }
 0x513   :  { %5172 = vst.msk [vmem:[%s14616_s7 + $0xa8] sm:$0xff] %vm3445_vm3, %v5108_v56  ;;  %5204 = vst.msk [vmem:[%s14616_s7 + $0x1a8] sm:$0xff] %vm3445_vm3, %v5140_v35  ;;  %v4884_v61 = vadd.f32 %v5391_v63, %v13953_v18  ;;  %v4878_v39 = vpop.f32.mrb[23].mxu0  ;;  %v5785_v56 = vld [vmem:[%s14611_s0 + $0x170] sm:$0xff]  ;;  %v4421_v50 = vsel %vm400_vm1, %v4419_v13, %v4420_v5  ;;  %v4424_v60 = vrot.slane %v5790_v11, 1  ;;  %v4352_v25 = vrot.slane %v5792_v8, 1 }
 0x514   :  { %5171 = vst.msk [vmem:[%s14616_s7 + $0xa0] sm:$0xff] %vm3445_vm3, %v5107_v9  ;;  %5203 = vst.msk [vmem:[%s14616_s7 + $0x1a0] sm:$0xff] %vm3445_vm3, %v5139_v28  ;;  %v5439_v29 = vpop.f32.mrb[22].mxu1  ;;  %v4879_v36 = vadd.f32 %v13953_v18, %v4878_v39  ;;  %v4345_v35 = vrot.slane %v5785_v56, 1  ;;  %v4423_v27 = vsel %vm400_vm1, %v4420_v5, %v4422_v0 }
 0x515   :  { %v5110_v14 = vadd.f32 %v4884_v61, %v4333_v2  ;;  %v5044_v30 = vadd.f32 %v5439_v29, %v13953_v18  ;;  %v5038_v31 = vpop.f32.mrb[23].mxu1  ;;  %v5786_v2 = vld [vmem:[%s14611_s0 + $0x178] sm:$0x3]  ;;  %v4344_v29 = vrot.slane %v5789_v26, 1 }
 0x516   :  { %v5109_v32 = vadd.f32 %v4879_v36, %v4331_v33  ;;  %v5039_v41 = vadd.f32 %v13953_v18, %v5038_v31  ;;  %v4347_v63 = vrot.slane %v5786_v2, 1  ;;  %v5788_v33 = vld [vmem:[%s14611_s0 + $0x328] sm:$0x3] }
 0x517   :  { %5174 = vst.msk [vmem:[%s14616_s7 + $0xb8] sm:$0xff] %vm3445_vm3, %v5110_v14  ;;  %v5142_v3 = vadd.f32 %v5044_v30, %v4413_v47  ;;  %v5787_v47 = vld [vmem:[%s14611_s0 + $0x320] sm:$0xff]  ;;  %v4427_v39 = vrot.slane %v5788_v33, 1 }
 0x518   :  { %5173 = vst.msk [vmem:[%s14616_s7 + $0xb0] sm:$0xff] %vm3445_vm3, %v5109_v32  ;;  %v5141_v57 = vadd.f32 %v5039_v41, %v4411_v23  ;;  %v5394_v24 = vpop.f32.mrb[24].mxu0  ;;  %v5442_v59 = vpop.f32.mrb[24].mxu1  ;;  %v4425_v61 = vrot.slane %v5787_v47, 1  ;;  %v4348_v54 = vsel %vm400_vm1, %v4345_v35, %v4347_v63  ;;  %v4346_v41 = vsel %vm400_vm1, %v4344_v29, %v4345_v35 }
 0x519   :  { %5206 = vst.msk [vmem:[%s14616_s7 + $0x1b8] sm:$0xff] %vm3445_vm3, %v5142_v3  ;;  %v4894_v52 = vadd.f32 %v5394_v24, %v13953_v18  ;;  %v5054_v17 = vadd.f32 %v5442_v59, %v13953_v18  ;;  %v4888_v15 = vpop.f32.mrb[25].mxu0  ;;  %v5048_v44 = vpop.f32.mrb[25].mxu1  ;;  %v5791_v3 = vld [vmem:[%s14611_s0 + $0x188] sm:$0xff]  ;;  %v5793_v59 = vld [vmem:[%s14611_s0 + $0x180] sm:$0xff] }
 0x51a   :  { %5205 = vst.msk [vmem:[%s14616_s7 + $0x1b0] sm:$0xff] %vm3445_vm3, %v5141_v57  ;;  %v4889_v16 = vadd.f32 %v13953_v18, %v4888_v15  ;;  %v5049_v20 = vadd.f32 %v13953_v18, %v5048_v44  ;;  %v4428_v42 = vsel %vm400_vm1, %v4425_v61, %v4427_v39  ;;  %v4350_v46 = vrot.slane %v5791_v3, 1  ;;  %v5795_v15 = vld [vmem:[%s14611_s0 + $0x340] sm:$0x3] }
 0x51b   :  { %v5112_v1 = vadd.f32 %v4894_v52, %v4338_v37  ;;  %v5144_v51 = vadd.f32 %v5054_v17, %v4418_v22  ;;  %v4426_v24 = vsel %vm400_vm1, %v4424_v60, %v4425_v61  ;;  %v4349_v55 = vrot.slane %v5793_v59, 1  ;;  %v5794_v17 = vld [vmem:[%s14611_s0 + $0x338] sm:$0xff] }
 0x51c   :  { %v5111_v38 = vadd.f32 %v4889_v16, %v4336_v21  ;;  %v5143_v62 = vadd.f32 %v5049_v20, %v4416_v45  ;;  %v5397_v6 = vpop.f32.mrb[26].mxu0  ;;  %v4430_v21 = vrot.slane %v5794_v17, 1  ;;  %v4432_v45 = vrot.slane %v5795_v15, 1  ;;  %v5796_v20 = vld [vmem:[%s14611_s0 + $0x330] sm:$0xff] }
 0x51d   :  { %5176 = vst.msk [vmem:[%s14616_s7 + $0xc8] sm:$0xff] %vm3445_vm3, %v5112_v1  ;;  %5208 = vst.msk [vmem:[%s14616_s7 + $0x1c8] sm:$0xff] %vm3445_vm3, %v5144_v51  ;;  %v4904_v9 = vadd.f32 %v5397_v6, %v13953_v18  ;;  %v4898_v28 = vpop.f32.mrb[27].mxu0  ;;  %v4429_v10 = vrot.slane %v5796_v20, 1  ;;  %v4353_v0 = vsel %vm400_vm1, %v4350_v46, %v4352_v25 }
 0x51e   :  { %5175 = vst.msk [vmem:[%s14616_s7 + $0xc0] sm:$0xff] %vm3445_vm3, %v5111_v38  ;;  %5207 = vst.msk [vmem:[%s14616_s7 + $0x1c0] sm:$0xff] %vm3445_vm3, %v5143_v62  ;;  %v5445_v43 = vpop.f32.mrb[26].mxu1  ;;  %v4899_v12 = vadd.f32 %v13953_v18, %v4898_v28  ;;  %v4433_v13 = vsel %vm400_vm1, %v4430_v21, %v4432_v45 }
 0x51f   :  { %v5114_v36 = vadd.f32 %v4904_v9, %v4343_v48  ;;  %v5064_v23 = vadd.f32 %v5445_v43, %v13953_v18  ;;  %v5058_v40 = vpop.f32.mrb[27].mxu1  ;;  %v4351_v48 = vsel %vm400_vm1, %v4349_v55, %v4350_v46  ;;  %v4431_v56 = vsel %vm400_vm1, %v4429_v10, %v4430_v21 }
 0x520   :  { %v5113_v14 = vadd.f32 %v4899_v12, %v4341_v58  ;;  %v5059_v30 = vadd.f32 %v13953_v18, %v5058_v40 }
 0x521   :  { %5178 = vst.msk [vmem:[%s14616_s7 + $0xd8] sm:$0xff] %vm3445_vm3, %v5114_v36  ;;  %v5146_v31 = vadd.f32 %v5064_v23, %v4423_v27 }
 0x522   :  { %5177 = vst.msk [vmem:[%s14616_s7 + $0xd0] sm:$0xff] %vm3445_vm3, %v5113_v14  ;;  %v5145_v53 = vadd.f32 %v5059_v30, %v4421_v50  ;;  %v5400_v7 = vpop.f32.mrb[28].mxu0  ;;  %v5448_v32 = vpop.f32.mrb[28].mxu1 }
 0x523   :  { %5210 = vst.msk [vmem:[%s14616_s7 + $0x1d8] sm:$0xff] %vm3445_vm3, %v5146_v31  ;;  %v4914_v34 = vadd.f32 %v5400_v7, %v13953_v18  ;;  %v5074_v57 = vadd.f32 %v5448_v32, %v13953_v18  ;;  %v4908_v37 = vpop.f32.mrb[29].mxu0  ;;  %v5068_v22 = vpop.f32.mrb[29].mxu1 }
 0x524   :  { %5209 = vst.msk [vmem:[%s14616_s7 + $0x1d0] sm:$0xff] %vm3445_vm3, %v5145_v53  ;;  %v4909_v19 = vadd.f32 %v13953_v18, %v4908_v37  ;;  %v5069_v52 = vadd.f32 %v13953_v18, %v5068_v22 }
 0x525   :  { %v5116_v44 = vadd.f32 %v4914_v34, %v4348_v54  ;;  %v5148_v16 = vadd.f32 %v5074_v57, %v4428_v42 }
 0x526   :  { %v5115_v5 = vadd.f32 %v4909_v19, %v4346_v41  ;;  %v5147_v49 = vadd.f32 %v5069_v52, %v4426_v24  ;;  %v5403_v1 = vpop.f32.mrb[30].mxu0 }
 0x527   :  { %5180 = vst.msk [vmem:[%s14616_s7 + $0xe8] sm:$0xff] %vm3445_vm3, %v5116_v44  ;;  %5212 = vst.msk [vmem:[%s14616_s7 + $0x1e8] sm:$0xff] %vm3445_vm3, %v5148_v16  ;;  %v4924_v51 = vadd.f32 %v5403_v1, %v13953_v18  ;;  %v4918_v4 = vpop.f32.mrb[31].mxu0 }
 0x528   :  { %5179 = vst.msk [vmem:[%s14616_s7 + $0xe0] sm:$0xff] %vm3445_vm3, %v5115_v5  ;;  %5211 = vst.msk [vmem:[%s14616_s7 + $0x1e0] sm:$0xff] %vm3445_vm3, %v5147_v49  ;;  %v5451_v38 = vpop.f32.mrb[30].mxu1  ;;  %v4919_v62 = vadd.f32 %v13953_v18, %v4918_v4 }
 0x529   :  { %v5118_v6 = vadd.f32 %v4924_v51, %v4353_v0  ;;  %v5084_v58 = vadd.f32 %v5451_v38, %v13953_v18  ;;  %v5078_v35 = vpop.f32.mrb[31].mxu1 }
 0x52a   :  { %v5117_v9 = vadd.f32 %v4919_v62, %v4351_v48  ;;  %v5079_v28 = vadd.f32 %v13953_v18, %v5078_v35 }
 0x52b   :  { %5182 = vst.msk [vmem:[%s14616_s7 + $0xf8] sm:$0xff] %vm3445_vm3, %v5118_v6  ;;  %v5150_v2 = vadd.f32 %v5084_v58, %v4433_v13 }
 0x52c   :  { %5181 = vst.msk [vmem:[%s14616_s7 + $0xf0] sm:$0xff] %vm3445_vm3, %v5117_v9  ;;  %v5149_v63 = vadd.f32 %v5079_v28, %v4431_v56 }
 0x52d   :  { %5214 = vst.msk [vmem:[%s14616_s7 + $0x1f8] sm:$0xff] %vm3445_vm3, %v5150_v2 }
 0x52e   :  { %5213 = vst.msk [vmem:[%s14616_s7 + $0x1f0] sm:$0xff] %vm3445_vm3, %v5149_v63 }

</bundles_post_ra>
